<compile_context>
chip_gen: v7x
topology: tpu7x:2x2x1
jax: 0.10.0
libtpu: 0.0.40
codegen_flags: <defaults>
</compile_context>

<pallas_src>
import jax
import jax.numpy as jnp
from jax.experimental import pallas as pl
from jax.experimental.pallas import tpu as pltpu

H1 = 1024   # first hidden size  (nn.Linear(input_size, 1024))
H2 = 4096   # second hidden size (nn.Linear(1024, 4096))


def labelnet_kernel(
    x_ref, w1_ref, b1_ref, w2_ref, b2_ref, wh_ref, b3_ref, bc_ref,
    label_pre_ref, hash_ref, label_predict_ref,
):
    """Whole forward pass in one invocation (all operands resident in VMEM)."""
    # h1 = relu(x @ W1 + b1)                                      [B, 1024]
    h1 = jnp.dot(
        x_ref[...].astype(jnp.bfloat16), w1_ref[...],
        preferred_element_type=jnp.float32,
    )
    h1 = jnp.maximum(h1 + b1_ref[...], 0.0)

    # features = relu(h1 @ W2 + b2)                               [B, 4096] f32
    feat = jnp.dot(
        h1.astype(jnp.bfloat16), w2_ref[...],
        preferred_element_type=jnp.float32,
    )
    feat = jnp.maximum(feat + b2_ref[...], 0.0)

    # merged head: columns [0:code_length] = hash head, [code_length:] = classifier.
    # feat kept in f32 and wh upcast: the head matmul is tiny, exact math is free.
    head = jnp.dot(
        feat, wh_ref[...].astype(jnp.float32),
        preferred_element_type=jnp.float32,
    )

    code_length = hash_ref.shape[1]
    label_size = label_pre_ref.shape[1]

    # hash head: tanh(features @ W3 + b3)
    hash_ref[...] = jnp.tanh(head[:, :code_length] + b3_ref[...]).astype(hash_ref.dtype)

    # classifier head: logits + softmax over dim=1 (exact normalization)
    lp = head[:, code_length:code_length + label_size] + bc_ref[...]
    label_pre_ref[...] = lp.astype(label_pre_ref.dtype)
    m = jnp.max(lp, axis=1, keepdims=True)
    e = jnp.exp(lp - m)
    label_predict_ref[...] = (
        e / jnp.sum(e, axis=1, keepdims=True)
    ).astype(label_predict_ref.dtype)


@jax.jit
def labelnet_forward(x, kparams):
    """x: [B, input_size] f32; kparams: output of prepare_params (bf16 weights)."""
    w1, b1, w2, b2, wh, b3, bc = kparams
    B = x.shape[0]
    code_length = b3.shape[1]
    label_size = bc.shape[1]
    assert wh.shape[1] == code_length + label_size

    out_shape = (
        jax.ShapeDtypeStruct((B, label_size), x.dtype),   # label_pre
        jax.ShapeDtypeStruct((B, code_length), x.dtype),  # hash_code
        jax.ShapeDtypeStruct((B, label_size), x.dtype),   # label_predict
    )

    vmem = pl.BlockSpec(memory_space=pltpu.MemorySpace.VMEM)
    return pl.pallas_call(
        labelnet_kernel,
        out_shape=out_shape,
        in_specs=[vmem] * 8,                 # whole operands resident in VMEM
        out_specs=(vmem, vmem, vmem),
        compiler_params=pltpu.CompilerParams(
            # actual use ~12 MiB; 20 MiB covers compiler scratch while staying
            # far below v7x's 64 MiB physical VMEM (and above v5e's 16 MiB
            # scoped default so it cannot block the 8 MiB W2 buffer).
            vmem_limit_bytes=20 * 1024 * 1024,
        ),
    )(x, w1, b1, w2, b2, wh, b3, bc)


def init_params(key, input_size, code_length, label_size, dtype=jnp.float32):
    """Deterministic f32 init mirroring nn.Linear's U(-1/sqrt(fan_in), +).

    Weights stored as [in_features, out_features] (transposed vs PyTorch's
    [out, in]) so the kernel computes y = x @ W + b directly."""
    def linear(k, fan_in, fan_out):
        kw, kb = jax.random.split(k)
        bound = 1.0 / jnp.sqrt(fan_in)
        w = jax.random.uniform(kw, (fan_in, fan_out), dtype, -bound, bound)
        b = jax.random.uniform(kb, (1, fan_out), dtype, -bound, bound)
        return w, b

    k1, k2, k3, k4 = jax.random.split(key, 4)
    w1, b1 = linear(k1, input_size, H1)
    w2, b2 = linear(k2, H1, H2)
    w3, b3 = linear(k3, H2, code_length)   # hash head
    wc, bc = linear(k4, H2, label_size)    # classifier head
    return (w1, b1, w2, b2, w3, b3, wc, bc)


def prepare_params(params):
    """One-time weight prep: bf16 weight streams + merged [H2, code+label] head."""
    w1, b1, w2, b2, w3, b3, wc, bc = params
    wh = jnp.concatenate([w3, wc], axis=1)
    # TODO(synk): device-specific win — quantize w2 (and wh) to int8 (v5e/v6e)
    # or fp8 (v7x) here with per-column scales folded into b2 for ~2x fewer bytes.
    return (
        w1.astype(jnp.bfloat16), b1.astype(jnp.float32),
        w2.astype(jnp.bfloat16), b2.astype(jnp.float32),
        wh.astype(jnp.bfloat16), b3.astype(jnp.float32), bc.astype(jnp.float32),
    )


def labelnet_reference(x, params):
    """Pure-JAX f32 reference of the PyTorch forward pass (for sanity check)."""
    w1, b1, w2, b2, w3, b3, wc, bc = params
    h1 = jnp.maximum(x @ w1 + b1, 0.0)
    feats = jnp.maximum(h1 @ w2 + b2, 0.0)
    hash_code = jnp.tanh(feats @ w3 + b3)
    label_pre = feats @ wc + bc
    label_predict = jax.nn.softmax(label_pre, axis=1)
    return label_pre, hash_code, label_predict


if __name__ == "__main__":
    key = jax.random.PRNGKey(0)
    B, input_size, code_length, label_size = 8, 24, 32, 24

    kx, kp = jax.random.split(key)
    x = jax.random.normal(kx, (B, input_size), jnp.float32)
    params = init_params(kp, input_size, code_length, label_size)
    kparams = prepare_params(params)

    label_pre, hash_code, label_predict = labelnet_forward(x, kparams)
    jax.block_until_ready((label_pre, hash_code, label_predict))

    # sanity check against the pure-f32 reference (kernel streams bf16 weights
    # and feeds bf16 activations to the first two MXU matmuls, hence the
    # slightly loosened tolerances; head matmul + softmax are exact f32)
    ref_pre, ref_hash, ref_pred = labelnet_reference(x, params)
    assert jnp.allclose(label_pre, ref_pre, atol=5e-3, rtol=2e-2)
    assert jnp.allclose(hash_code, ref_hash, atol=5e-3, rtol=2e-2)
    assert jnp.allclose(label_predict, ref_pred, atol=2e-3, rtol=2e-2)

    print("KERNEL_OK")
</pallas_src>

<mosaic_0001>
module attributes {stable_mosaic.version = 11 : i64} {
  func.func @labelnet_kernel(%arg0: memref<8x24xf32, #tpu.memory_space<vmem>>, %arg1: memref<24x1024xbf16, #tpu.memory_space<vmem>>, %arg2: memref<1x1024xf32, #tpu.memory_space<vmem>>, %arg3: memref<1024x4096xbf16, #tpu.memory_space<vmem>>, %arg4: memref<1x4096xf32, #tpu.memory_space<vmem>>, %arg5: memref<4096x56xbf16, #tpu.memory_space<vmem>>, %arg6: memref<1x32xf32, #tpu.memory_space<vmem>>, %arg7: memref<1x24xf32, #tpu.memory_space<vmem>>, %arg8: memref<8x24xf32, #tpu.memory_space<vmem>>, %arg9: memref<8x32xf32, #tpu.memory_space<vmem>>, %arg10: memref<8x24xf32, #tpu.memory_space<vmem>>) attributes {dimension_semantics = [], scalar_prefetch = 0 : i64, scratch_operands = 0 : i64, tpu.core_type = #tpu.core_type<tc>} {
    %c0 = arith.constant 0 : index
    %c0_0 = arith.constant 0 : index
    %0 = vector.load %arg0[%c0, %c0_0] : memref<8x24xf32, #tpu.memory_space<vmem>>, vector<8x24xf32>
    %1 = arith.truncf %0 : vector<8x24xf32> to vector<8x24xbf16>
    %c0_1 = arith.constant 0 : index
    %c0_2 = arith.constant 0 : index
    %2 = vector.load %arg1[%c0_1, %c0_2] : memref<24x1024xbf16, #tpu.memory_space<vmem>>, vector<24x1024xbf16>
    %cst = arith.constant dense<0.000000e+00> : vector<8x1024xf32>
    %3 = tpu.matmul %1, %2, %cst {dimension_numbers = #tpu.dot_dimension_numbers<[1], [0], [0], [1], [0, 0, 1, 1], [], []>} : vector<8x24xbf16>, vector<24x1024xbf16>, vector<8x1024xf32> -> vector<8x1024xf32>
    %c0_3 = arith.constant 0 : index
    %c0_4 = arith.constant 0 : index
    %4 = vector.load %arg2[%c0_3, %c0_4] : memref<1x1024xf32, #tpu.memory_space<vmem>>, vector<1x1024xf32>
    %5 = vector.broadcast %4 : vector<1x1024xf32> to vector<8x1024xf32>
    %6 = arith.addf %3, %5 : vector<8x1024xf32>
    %cst_5 = arith.constant 0.000000e+00 : f32
    %7 = vector.broadcast %cst_5 : f32 to vector<8x1024xf32>
    %8 = arith.maximumf %6, %7 : vector<8x1024xf32>
    %9 = arith.truncf %8 : vector<8x1024xf32> to vector<8x1024xbf16>
    %c0_6 = arith.constant 0 : index
    %c0_7 = arith.constant 0 : index
    %10 = vector.load %arg3[%c0_6, %c0_7] : memref<1024x4096xbf16, #tpu.memory_space<vmem>>, vector<1024x4096xbf16>
    %cst_8 = arith.constant dense<0.000000e+00> : vector<8x4096xf32>
    %11 = tpu.matmul %9, %10, %cst_8 {dimension_numbers = #tpu.dot_dimension_numbers<[1], [0], [0], [1], [0, 0, 1, 1], [], []>} : vector<8x1024xbf16>, vector<1024x4096xbf16>, vector<8x4096xf32> -> vector<8x4096xf32>
    %c0_9 = arith.constant 0 : index
    %c0_10 = arith.constant 0 : index
    %12 = vector.load %arg4[%c0_9, %c0_10] : memref<1x4096xf32, #tpu.memory_space<vmem>>, vector<1x4096xf32>
    %13 = vector.broadcast %12 : vector<1x4096xf32> to vector<8x4096xf32>
    %14 = arith.addf %11, %13 : vector<8x4096xf32>
    %cst_11 = arith.constant 0.000000e+00 : f32
    %15 = vector.broadcast %cst_11 : f32 to vector<8x4096xf32>
    %16 = arith.maximumf %14, %15 : vector<8x4096xf32>
    %c0_12 = arith.constant 0 : index
    %c0_13 = arith.constant 0 : index
    %17 = vector.load %arg5[%c0_12, %c0_13] : memref<4096x56xbf16, #tpu.memory_space<vmem>>, vector<4096x56xbf16>
    %18 = arith.extf %17 : vector<4096x56xbf16> to vector<4096x56xf32>
    %cst_14 = arith.constant dense<0.000000e+00> : vector<8x56xf32>
    %19 = tpu.matmul %16, %18, %cst_14 {dimension_numbers = #tpu.dot_dimension_numbers<[1], [0], [0], [1], [0, 0, 1, 1], [], []>} : vector<8x4096xf32>, vector<4096x56xf32>, vector<8x56xf32> -> vector<8x56xf32>
    %20 = vector.extract_strided_slice %19 {offsets = [0, 0], sizes = [8, 32], strides = [1, 1]} : vector<8x56xf32> to vector<8x32xf32>
    %c0_15 = arith.constant 0 : index
    %c0_16 = arith.constant 0 : index
    %21 = vector.load %arg6[%c0_15, %c0_16] : memref<1x32xf32, #tpu.memory_space<vmem>>, vector<1x32xf32>
    %22 = vector.broadcast %21 : vector<1x32xf32> to vector<8x32xf32>
    %23 = arith.addf %20, %22 : vector<8x32xf32>
    %24 = math.tanh %23 : vector<8x32xf32>
    %c0_17 = arith.constant 0 : index
    %c0_18 = arith.constant 0 : index
    %25 = vector.load %arg9[%c0_17, %c0_18] : memref<8x32xf32, #tpu.memory_space<vmem>>, vector<8x32xf32>
    tpu.vector_store %arg9[%c0_17, %c0_18], %24 {strides = array<i32>} : memref<8x32xf32, #tpu.memory_space<vmem>>, vector<8x32xf32>,
    %26 = vector.extract_strided_slice %19 {offsets = [0, 32], sizes = [8, 24], strides = [1, 1]} : vector<8x56xf32> to vector<8x24xf32>
    %c0_19 = arith.constant 0 : index
    %c0_20 = arith.constant 0 : index
    %27 = vector.load %arg7[%c0_19, %c0_20] : memref<1x24xf32, #tpu.memory_space<vmem>>, vector<1x24xf32>
    %28 = vector.broadcast %27 : vector<1x24xf32> to vector<8x24xf32>
    %29 = arith.addf %26, %28 : vector<8x24xf32>
    %c0_21 = arith.constant 0 : index
    %c0_22 = arith.constant 0 : index
    %30 = vector.load %arg8[%c0_21, %c0_22] : memref<8x24xf32, #tpu.memory_space<vmem>>, vector<8x24xf32>
    tpu.vector_store %arg8[%c0_21, %c0_22], %29 {strides = array<i32>} : memref<8x24xf32, #tpu.memory_space<vmem>>, vector<8x24xf32>,
    %cst_23 = arith.constant dense<0xFF800000> : vector<8xf32>
    %31 = vector.multi_reduction <maximumf>, %29, %cst_23 [1] : vector<8x24xf32> to vector<8xf32>
    %32 = vector.shape_cast %31 : vector<8xf32> to vector<8x1xf32>
    %33 = vector.broadcast %32 : vector<8x1xf32> to vector<8x24xf32>
    %34 = arith.subf %29, %33 : vector<8x24xf32>
    %35 = math.exp %34 : vector<8x24xf32>
    %cst_24 = arith.constant dense<0.000000e+00> : vector<8xf32>
    %36 = vector.multi_reduction <add>, %35, %cst_24 [1] : vector<8x24xf32> to vector<8xf32>
    %37 = vector.shape_cast %36 : vector<8xf32> to vector<8x1xf32>
    %38 = vector.broadcast %37 : vector<8x1xf32> to vector<8x24xf32>
    %39 = arith.divf %35, %38 : vector<8x24xf32>
    %c0_25 = arith.constant 0 : index
    %c0_26 = arith.constant 0 : index
    %40 = vector.load %arg10[%c0_25, %c0_26] : memref<8x24xf32, #tpu.memory_space<vmem>>, vector<8x24xf32>
    tpu.vector_store %arg10[%c0_25, %c0_26], %39 {strides = array<i32>} : memref<8x24xf32, #tpu.memory_space<vmem>>, vector<8x24xf32>,
    return
  }
}

</mosaic_0001>

<bundles_post_ra>
// kernel: labelnet_forward.1
= control target key start
LH: loop header
LB: loop body
LE: loop exit
PB: predicated region body
PF: predicated region fallthrough
CT: control target
= control target key end

     0   :  { %16 = vsyncpa [#allocation3], 0  ;;  %s24048_s0 = inlined_call_operand.hbm [shape: f32[8,24], index: 0, kind: input, shape index: {}]   ;;  %s24049_s1 = inlined_call_operand.hbm [shape: bf16[24,1024], index: 1, kind: input, shape index: {}]   ;;  %s24050_s2 = inlined_call_operand.hbm [shape: f32[1,1024], index: 2, kind: input, shape index: {}]   ;;  %s24051_s3 = inlined_call_operand.hbm [shape: bf16[1024,4096], index: 3, kind: input, shape index: {}]   ;;  %s24052_s4 = inlined_call_operand.hbm [shape: f32[1,4096], index: 4, kind: input, shape index: {}]   ;;  %s24053_s5 = inlined_call_operand.vmem [shape: bf16[4096,56], index: 5, kind: input, shape index: {}]   ;;  %s24054_s6 = inlined_call_operand.hbm [shape: f32[1,32], index: 6, kind: input, shape index: {}]   ;;  %s24055_s7 = inlined_call_operand.hbm [shape: f32[1,24], index: 7, kind: input, shape index: {}]   ;;  %s24056_s8 = inlined_call_operand.hbm [shape: f32[8,24], index: 8, kind: output, shape index: {0}]   ;;  %s24057_s9 = inlined_call_operand.hbm [shape: f32[8,32], index: 9, kind: output, shape index: {1}]   ;;  %s24058_s10 = inlined_call_operand.hbm [shape: f32[8,24], index: 10, kind: output, shape index: {2}]  }
   0x1   :  { %17 = vsyncpa [#allocation6], 0 }
   0x2   :  { %18 = vsyncpa [#allocation9], 0 }
   0x3   :  { %19 = vsyncpa [#allocation12], 0 }
   0x4   :  { %20 = vsyncpa [#allocation4], 0 }
   0x5   :  { %21 = vsyncpa [#allocation16], 0  ;;  %s22705_s13 = smov [#allocation5]   ;;  %s22473_s17 = scalar_lea.hbm %s24049_s1, 1536 }
   0x6   :  { %s37_s14 = sshll.u32 %s22705_s13, 4  ;;  %p22474_p0 = scmp.ne.s32.totalorder %s24049_s1, %s22473_s17  ;;  %s38_s14 = int_to_ptr.vmem [resolvable:$true] %s37_s14 }
   0x7   :  { %p22477_p1 = scmp.lt.u32.totalorder %s22473_s17, %s24049_s1 }
   0x9   :  { %p22479_p2 = pnand %p22477_p1, %p22474_p0 }
   0xb   :  { %22482 = shalt.err (!%p22479_p2)
}
   0xc   :  { %s22483_s22 = scalar_lea.vmem %s38_s14, 1536  ;;  %p22488_p4 = scmp.lt.s32.totalorder %s38_s14, %s38_s14 }
   0xd   :  { %p22484_p3 = scmp.ne.s32.totalorder %s38_s14, %s22483_s22  ;;  %p22489_p5 = scmp.lt.s32.totalorder %s22483_s22, %s22483_s22 }
   0xf   :  { %p22490_p6 = por %p22489_p5, %p22488_p4 }
  0x11   :  { %p22491_p7 = pnand %p22490_p6, %p22484_p3 }
  0x13   :  { %22494 = shalt.err (!%p22491_p7)
}
  0x14   :  { %s22706_s23 = smov 512   ;;  %s22707_s24 = smov 32  }
  0x15   :  { %43 = dma.hbm_to_vmem [thread:$0]  %s24049_s1, 1536, %s38_s14, [#allocation6], %s22706_s23, %s22706_s23, %s22707_s24  }
  0x16   :  { %s22708_s27 = smov [#allocation8]   ;;  %s22495_s11 = scalar_lea.hbm %s24051_s3, 262144 }
  0x17   :  { %s59_s28 = sshll.u32 %s22708_s27, 4  ;;  %p22496_p8 = scmp.ne.s32.totalorder %s24051_s3, %s22495_s11  ;;  %s60_s28 = int_to_ptr.vmem [resolvable:$true] %s59_s28 }
  0x18   :  { %p22499_p9 = scmp.lt.u32.totalorder %s22495_s11, %s24051_s3 }
  0x1a   :  { %p22501_p10 = pnand %p22499_p9, %p22496_p8 }
  0x1c   :  { %22504 = shalt.err (!%p22501_p10)
}
  0x1d   :  { %s22505_s17 = scalar_lea.vmem %s60_s28, 262144  ;;  %p22510_p12 = scmp.lt.s32.totalorder %s60_s28, %s60_s28 }
  0x1e   :  { %p22506_p11 = scmp.ne.s32.totalorder %s60_s28, %s22505_s17  ;;  %p22511_p13 = scmp.lt.s32.totalorder %s22505_s17, %s22505_s17 }
  0x20   :  { %p22512_p0 = por %p22511_p13, %p22510_p12 }
  0x22   :  { %p22513_p1 = pnand %p22512_p0, %p22506_p11 }
  0x24   :  { %22516 = shalt.err (!%p22513_p1)
}
  0x25   :  { %s22709_s1 = smov 2048   ;;  %s22710_s14 = smov 128  }
  0x26   :  { %65 = dma.hbm_to_vmem [thread:$0]  %s24051_s3, 262144, %s60_s28, [#allocation9], %s22709_s1, %s22709_s1, %s22710_s14  }
  0x27   :  { %s22711_s20 = smov [#allocation11]   ;;  %s22712_s22 = smov [#allocation2]  }
  0x28   :  { %s84_s21 = sshll.u32 %s22711_s20, 4  ;;  %s28_s23 = sshll.u32 %s22712_s22, 4  ;;  %s85_s21 = int_to_ptr.vmem [resolvable:$true] %s84_s21  ;;  %s29_s23 = int_to_ptr.vmem [resolvable:$true] %s28_s23 }
  0x29   :  { %s22517_s27 = scalar_lea.hbm %s24054_s6, 16 }
  0x2a   :  { %p22518_p2 = scmp.ne.s32.totalorder %s24054_s6, %s22517_s27  ;;  %p22521_p3 = scmp.lt.u32.totalorder %s22517_s27, %s24054_s6 }
  0x2c   :  { %p22523_p4 = pnand %p22521_p3, %p22518_p2 }
  0x2e   :  { %22526 = shalt.err (!%p22523_p4)
}
  0x2f   :  { %s22527_s3 = scalar_lea.vmem %s85_s21, 16  ;;  %s22531_s28 = scalar_lea.vmem %s85_s21, 32 }
  0x30   :  { %p22528_p5 = scmp.ne.s32.totalorder %s85_s21, %s22527_s3  ;;  %p22532_p6 = scmp.lt.s32.totalorder %s85_s21, %s85_s21 }
  0x31   :  { %p22533_p7 = scmp.lt.s32.totalorder %s22531_s28, %s22527_s3 }
  0x33   :  { %p22534_p8 = por %p22533_p7, %p22532_p6 }
  0x35   :  { %p22535_p9 = pnand %p22534_p8, %p22528_p5 }
  0x37   :  { %22538 = shalt.err (!%p22535_p9)
}
  0x38   :  { %87 = dma.hbm_to_vmem [thread:$0]  %s24054_s6, 16, %s85_s21, [#allocation12]  }
  0x39   :  { %s22539_s1 = scalar_lea.hbm %s24048_s0, 128 }
  0x3a   :  { %p22540_p10 = scmp.ne.s32.totalorder %s24048_s0, %s22539_s1  ;;  %p22543_p11 = scmp.lt.u32.totalorder %s22539_s1, %s24048_s0 }
  0x3c   :  { %p22545_p12 = pnand %p22543_p11, %p22540_p10 }
  0x3e   :  { %22548 = shalt.err (!%p22545_p12)
}
  0x3f   :  { %s22549_s22 = scalar_lea.vmem %s29_s23, 128  ;;  %p22554_p0 = scmp.lt.s32.totalorder %s29_s23, %s29_s23 }
  0x40   :  { %p22550_p13 = scmp.ne.s32.totalorder %s29_s23, %s22549_s22  ;;  %p22555_p1 = scmp.lt.s32.totalorder %s22549_s22, %s22549_s22 }
  0x42   :  { %p22556_p2 = por %p22555_p1, %p22554_p0 }
  0x44   :  { %p22557_p3 = pnand %p22556_p2, %p22550_p13 }
  0x46   :  { %22560 = shalt.err (!%p22557_p3)
}
  0x47   :  { %31 = dma.hbm_to_vmem [thread:$0]  %s24048_s0, 128, %s29_s23, [#allocation3]  }
  0x48   :  { %s22713_s25 = smov [#allocation7]   ;;  %s22714_s27 = smov [#allocation10]  }
  0x49   :  { %s50_s26 = sshll.u32 %s22713_s25, 4  ;;  %s72_s29 = sshll.u32 %s22714_s27, 4  ;;  %s51_s26 = int_to_ptr.vmem [resolvable:$true] %s50_s26  ;;  %s73_s29 = int_to_ptr.vmem [resolvable:$true] %s72_s29 }
  0x4a   :  { %s22561_s12 = scalar_lea.hbm %s24050_s2, 128 }
  0x4b   :  { %p22562_p4 = scmp.ne.s32.totalorder %s24050_s2, %s22561_s12  ;;  %p22565_p5 = scmp.lt.u32.totalorder %s22561_s12, %s24050_s2 }
  0x4d   :  { %p22567_p6 = pnand %p22565_p5, %p22562_p4 }
  0x4f   :  { %22570 = shalt.err (!%p22567_p6)
}
  0x50   :  { %s22571_s0 = scalar_lea.vmem %s51_s26, 128  ;;  %p22576_p8 = scmp.lt.s32.totalorder %s51_s26, %s51_s26 }
  0x51   :  { %p22572_p7 = scmp.ne.s32.totalorder %s51_s26, %s22571_s0  ;;  %p22577_p9 = scmp.lt.s32.totalorder %s22571_s0, %s22571_s0 }
  0x53   :  { %p22578_p10 = por %p22577_p9, %p22576_p8 }
  0x55   :  { %p22579_p11 = pnand %p22578_p10, %p22572_p7 }
  0x57   :  { %22582 = shalt.err (!%p22579_p11)
}
  0x58   :  { %53 = dma.hbm_to_vmem [thread:$0]  %s24050_s2, 128, %s51_s26, [#allocation6]  }
  0x59   :  { %s22583_s14 = scalar_lea.hbm %s24052_s4, 512 }
  0x5a   :  { %p22584_p12 = scmp.ne.s32.totalorder %s24052_s4, %s22583_s14  ;;  %p22587_p13 = scmp.lt.u32.totalorder %s22583_s14, %s24052_s4 }
  0x5c   :  { %p22589_p0 = pnand %p22587_p13, %p22584_p12 }
  0x5e   :  { %22592 = shalt.err (!%p22589_p0)
}
  0x5f   :  { %s22593_s6 = scalar_lea.vmem %s73_s29, 512  ;;  %p22598_p2 = scmp.lt.s32.totalorder %s73_s29, %s73_s29 }
  0x60   :  { %p22594_p1 = scmp.ne.s32.totalorder %s73_s29, %s22593_s6  ;;  %p22599_p3 = scmp.lt.s32.totalorder %s22593_s6, %s22593_s6 }
  0x62   :  { %p22600_p4 = por %p22599_p3, %p22598_p2 }
  0x64   :  { %p22601_p5 = pnand %p22600_p4, %p22594_p1 }
  0x66   :  { %22604 = shalt.err (!%p22601_p5)
}
  0x67   :  { %75 = dma.hbm_to_vmem [thread:$0]  %s24052_s4, 512, %s73_s29, [#allocation9]  }
  0x68   :  { %s22715_s25 = smov [#allocation13]   ;;  %s22605_s11 = scalar_lea.hbm %s24055_s7, 16 }
  0x69   :  { %s94_s26 = sshll.u32 %s22715_s25, 4  ;;  %p22606_p6 = scmp.ne.s32.totalorder %s24055_s7, %s22605_s11  ;;  %s95_s26 = int_to_ptr.vmem [resolvable:$true] %s94_s26 }
  0x6a   :  { %p22609_p7 = scmp.lt.u32.totalorder %s22605_s11, %s24055_s7 }
  0x6c   :  { %p22611_p8 = pnand %p22609_p7, %p22606_p6 }
  0x6e   :  { %22614 = shalt.err (!%p22611_p8)
}
  0x6f   :  { %s22615_s15 = scalar_lea.vmem %s95_s26, 16  ;;  %s22619_s4 = scalar_lea.vmem %s95_s26, 32 }
  0x70   :  { %p22616_p9 = scmp.ne.s32.totalorder %s95_s26, %s22615_s15  ;;  %p22620_p10 = scmp.lt.s32.totalorder %s95_s26, %s95_s26 }
  0x71   :  { %p22621_p11 = scmp.lt.s32.totalorder %s22619_s4, %s22615_s15 }
  0x73   :  { %p22622_p12 = por %p22621_p11, %p22620_p10 }
  0x75   :  { %p22623_p13 = pnand %p22622_p12, %p22616_p9 }
  0x77   :  { %22626 = shalt.err (!%p22623_p13)
}
  0x78   :  { %97 = dma.hbm_to_vmem [thread:$0]  %s24055_s7, 16, %s95_s26, [#allocation12]  }
  0x79   :  { %22693 = dma.done.wait [#allocation3], 128  }
  0x7a   :  { %22694 = vsyncadd [#allocation3], 4294967168 }
  0x7b   :  { %22695 = dma.done.wait [#allocation6], 1664  }
  0x7c   :  { %22696 = vsyncadd [#allocation6], 4294965632 }
  0x7d   :  { %22697 = dma.done.wait [#allocation9], 262656  }
  0x7e   :  { %22698 = vsyncadd [#allocation9], 4294704640 }
  0x7f   :  { %22699 = dma.done.wait [#allocation12], 32  }
  0x80   :  { %22700 = vsyncadd [#allocation12], 4294967264  ;;  %v22716_v0 = vmov 0   ;;  %v122_v1 = vld [vmem:[#allocation5] sm:$0xff]  ;;  %v123_v8 = vld [vmem:[#allocation5 + $0x8] sm:$0xff]  ;;  %vm240_vm0 = vcmask 1043456  }
  0x81   :  { %297 = vmatprep.mubr.bf16.mxu0 %v22716_v0  ;;  %338 = vmatprep.mubr.bf16.mxu1 %v22716_v0  ;;  %v126_v2 = vld [vmem:[#allocation5 + $0x20] sm:$0xff]  ;;  %v127_v9 = vld [vmem:[#allocation5 + $0x28] sm:$0xff]  ;;  %v124_v13 = vld [vmem:[#allocation5 + $0x10] sm:$0xff]  ;;  %vm236_vm1 = vcmask 195584   ;;  %vm17727_vm2 = vcmask 457984   ;;  %vm17710_vm3 = vcmask 261120  }
  0x82   :  { %v130_v3 = vld [vmem:[#allocation5 + $0x40] sm:$0xff]  ;;  %v17794_v4 = vcombine.high %v122_v1, %v126_v2  ;;  %v17793_v5 = vcombine.low %v122_v1, %v126_v2  ;;  %v17796_v10 = vcombine.high %v123_v8, %v127_v9  ;;  %v17795_v11 = vcombine.low %v123_v8, %v127_v9  ;;  %v131_v12 = vld [vmem:[#allocation5 + $0x48] sm:$0xff]  ;;  %v128_v14 = vld [vmem:[#allocation5 + $0x30] sm:$0xff]  ;;  %s22718_s27 = smov [#allocation15]   ;;  %s22719_s11 = smov [#allocation14]  }
  0x83   :  { %v17802_v6 = vcombine.high %v130_v3, %v130_v3  ;;  %v17801_v7 = vcombine.low %v130_v3, %v130_v3  ;;  %v17804_v15 = vcombine.high %v131_v12, %v131_v12  ;;  %v17803_v16 = vcombine.low %v131_v12, %v131_v12  ;;  %v125_v17 = vld [vmem:[#allocation5 + $0x18] sm:$0xff]  ;;  %v132_v23 = vld [vmem:[#allocation5 + $0x50] sm:$0xff]  ;;  %v445_v31 = vld [vmem:[#allocation8] sm:$0xff]  ;;  %s17764_s30 = sshll.u32 %s22718_s27, 4  ;;  %s17754_s12 = sshll.u32 %s22719_s11, 4  ;;  %s17765_s30 = int_to_ptr.vmem [resolvable:$true] %s17764_s30  ;;  %s17755_s12 = int_to_ptr.vmem [resolvable:$true] %s17754_s12 }
  0x84   :  { %265 = vmatprep.subr.bf16.mxu0 %v17794_v4  ;;  %v129_v18 = vld [vmem:[#allocation5 + $0x38] sm:$0xff]  ;;  %306 = vmatprep.subr.bf16.mxu1 %v17796_v10  ;;  %v17798_v21 = vcombine.high %v124_v13, %v128_v14  ;;  %v17797_v26 = vcombine.low %v124_v13, %v128_v14  ;;  %v17806_v28 = vcombine.high %v132_v23, %v132_v23  ;;  %v461_v32 = vld [vmem:[#allocation8 + $0x80] sm:$0xff]  ;;  %v446_v35 = vld [vmem:[#allocation8 + $0x8] sm:$0xff]  ;;  %s22627_s3 = scalar_lea.vmem %s17765_s30, 128  ;;  %p22632_p1 = scmp.lt.s32.totalorder %s17765_s30, %s17765_s30 }
  0x85   :  { %266 = vmatpush1.bf16.msra.mxu0 %v17793_v5  ;;  %v120_v19 = vld [vmem:[#allocation2] sm:$0xff]  ;;  %v242_v20 = vsel %vm240_vm0, %v17801_v7, 0  ;;  %307 = vmatpush1.bf16.msra.mxu1 %v17795_v11  ;;  %v248_v22 = vsel %vm240_vm0, %v17803_v16, 0  ;;  %v17800_v24 = vcombine.high %v125_v17, %v129_v18  ;;  %v17805_v29 = vcombine.low %v132_v23, %v132_v23  ;;  %v462_v36 = vld [vmem:[#allocation8 + $0x88] sm:$0xff]  ;;  %v477_v39 = vld [vmem:[#allocation8 + $0x100] sm:$0xff]  ;;  %p22628_p0 = scmp.ne.s32.totalorder %s17765_s30, %s22627_s3  ;;  %p22633_p2 = scmp.lt.s32.totalorder %s22627_s3, %s22627_s3 }
  0x86   :  { %17809 = vmatprep.subr.msk.bf16.mxu0 %vm240_vm0, %v17802_v6  ;;  %17811 = vmatprep.subr.msk.bf16.mxu1 %vm240_vm0, %v17804_v15  ;;  %v121_v25 = vpack.c.bf16 %v120_v19, %v120_v19  ;;  %v133_v27 = vld [vmem:[#allocation5 + $0x58] sm:$0xff]  ;;  %v17799_v30 = vcombine.low %v125_v17, %v129_v18  ;;  %v17818_v38 = vcombine.high %v445_v31, %v461_v32  ;;  %v493_v40 = vld [vmem:[#allocation8 + $0x180] sm:$0xff]  ;;  %v478_v44 = vld [vmem:[#allocation8 + $0x108] sm:$0xff] }
  0x87   :  { %v17808_v33 = vcombine.high %v133_v27, %v133_v27  ;;  %v17807_v34 = vcombine.low %v133_v27, %v133_v27  ;;  %v254_v37 = vsel %vm240_vm0, %v17805_v29, 0  ;;  %v17820_v42 = vcombine.high %v446_v35, %v462_v36  ;;  %v494_v45 = vld [vmem:[#allocation8 + $0x188] sm:$0xff]  ;;  %v509_v48 = vld [vmem:[#allocation8 + $0x200] sm:$0xff]  ;;  %p22634_p3 = por %p22633_p2, %p22632_p1 }
  0x88   :  { %v17817_v43 = vcombine.low %v445_v31, %v461_v32  ;;  %v17850_v46 = vcombine.high %v477_v39, %v493_v40  ;;  %v17819_v47 = vcombine.low %v446_v35, %v462_v36  ;;  %v525_v49 = vld [vmem:[#allocation8 + $0x280] sm:$0xff]  ;;  %v17852_v50 = vcombine.high %v478_v44, %v494_v45  ;;  %v510_v52 = vld [vmem:[#allocation8 + $0x208] sm:$0xff] }
  0x89   :  { %268 = vmatpush1.bf16.msra.mxu0 %v242_v20  ;;  %309 = vmatpush1.bf16.msra.mxu1 %v248_v22  ;;  %v260_v41 = vsel %vm240_vm0, %v17807_v34, 0  ;;  %v17849_v51 = vcombine.low %v477_v39, %v493_v40  ;;  %v526_v53 = vld [vmem:[#allocation8 + $0x288] sm:$0xff]  ;;  %v17882_v54 = vcombine.high %v509_v48, %v525_v49  ;;  %v17851_v55 = vcombine.low %v478_v44, %v494_v45  ;;  %v541_v56 = vld [vmem:[#allocation8 + $0x300] sm:$0xff]  ;;  %p22635_p4 = pnand %p22634_p3, %p22628_p0 }
  0x8a   :  { %347 = vmatprep.subr.bf16.mxu0 %v17798_v21  ;;  %388 = vmatprep.subr.bf16.mxu1 %v17800_v24  ;;  %v557_v57 = vld [vmem:[#allocation8 + $0x380] sm:$0xff]  ;;  %v17884_v58 = vcombine.high %v510_v52, %v526_v53  ;;  %v17881_v59 = vcombine.low %v509_v48, %v525_v49  ;;  %v542_v60 = vld [vmem:[#allocation8 + $0x308] sm:$0xff]  ;;  %v17883_v63 = vcombine.low %v510_v52, %v526_v53 }
  0x8b   :  { %v558_v61 = vld [vmem:[#allocation8 + $0x388] sm:$0xff]  ;;  %v17914_v62 = vcombine.high %v541_v56, %v557_v57  ;;  %v589_v1 = vld [vmem:[#allocation8 + $0x480] sm:$0xff]  ;;  %v17913_v3 = vcombine.low %v541_v56, %v557_v57 }
  0x8c   :  { %17810 = vmatmul.mubr.msk.bf16.vlgmr.msra.gmra.mrb[0].mxu0 %vm236_vm1, %v121_v25  ;;  %17812 = vmatmul.mubr.msk.bf16.vlgmr.msra.gmra.mrb[0].mxu1 %vm236_vm1, %v121_v25  ;;  %v17916_v2 = vcombine.high %v542_v60, %v558_v61  ;;  %v574_v4 = vld [vmem:[#allocation8 + $0x408] sm:$0xff]  ;;  %v17915_v7 = vcombine.low %v542_v60, %v558_v61  ;;  %v605_v8 = vld [vmem:[#allocation8 + $0x500] sm:$0xff] }
  0x8d   :  { %348 = vmatpush1.bf16.msra.mxu0 %v17797_v26  ;;  %379 = vmatprep.mubr.bf16.mxu0 %v22716_v0  ;;  %v590_v5 = vld [vmem:[#allocation8 + $0x488] sm:$0xff]  ;;  %v621_v9 = vld [vmem:[#allocation8 + $0x580] sm:$0xff] }
  0x8e   :  { %17813 = vmatprep.subr.msk.bf16.mxu0 %vm240_vm0, %v17806_v28  ;;  %389 = vmatpush1.bf16.msra.mxu1 %v17799_v30  ;;  %v17948_v10 = vcombine.high %v574_v4, %v590_v5  ;;  %v606_v12 = vld [vmem:[#allocation8 + $0x508] sm:$0xff]  ;;  %v17978_v14 = vcombine.high %v605_v8, %v621_v9  ;;  %v17947_v15 = vcombine.low %v574_v4, %v590_v5  ;;  %v637_v16 = vld [vmem:[#allocation8 + $0x600] sm:$0xff] }
  0x8f   :  { %420 = vmatprep.mubr.bf16.mxu1 %v22716_v0  ;;  %17815 = vmatprep.subr.msk.bf16.mxu1 %vm240_vm0, %v17808_v33  ;;  %v573_v0 = vld [vmem:[#allocation8 + $0x400] sm:$0xff]  ;;  %v622_v13 = vld [vmem:[#allocation8 + $0x588] sm:$0xff]  ;;  %v17977_v19 = vcombine.low %v605_v8, %v621_v9 }
  0x90   :  { %v17946_v6 = vcombine.high %v573_v0, %v589_v1  ;;  %v17945_v11 = vcombine.low %v573_v0, %v589_v1  ;;  %v653_v17 = vld [vmem:[#allocation8 + $0x680] sm:$0xff]  ;;  %v17980_v18 = vcombine.high %v606_v12, %v622_v13  ;;  %v638_v20 = vld [vmem:[#allocation8 + $0x608] sm:$0xff]  ;;  %v17979_v23 = vcombine.low %v606_v12, %v622_v13 }
  0x91   :  { %350 = vmatpush1.bf16.msra.mxu0 %v254_v37  ;;  %v654_v21 = vld [vmem:[#allocation8 + $0x688] sm:$0xff]  ;;  %v18010_v22 = vcombine.high %v637_v16, %v653_v17  ;;  %v669_v24 = vld [vmem:[#allocation8 + $0x700] sm:$0xff]  ;;  %v18009_v27 = vcombine.low %v637_v16, %v653_v17 }
  0x92   :  { %12901 = vmatprep.subr.bf16.mxu0 %v17818_v38  ;;  %391 = vmatpush1.bf16.msra.mxu1 %v260_v41  ;;  %v18012_v26 = vcombine.high %v638_v20, %v654_v21  ;;  %v670_v28 = vld [vmem:[#allocation8 + $0x708] sm:$0xff]  ;;  %v18011_v31 = vcombine.low %v638_v20, %v654_v21  ;;  %v701_v32 = vld [vmem:[#allocation8 + $0x800] sm:$0xff] }
  0x93   :  { %13065 = vmatprep.subr.bf16.mxu1 %v17820_v42  ;;  %v686_v29 = vld [vmem:[#allocation8 + $0x788] sm:$0xff]  ;;  %v717_v33 = vld [vmem:[#allocation8 + $0x880] sm:$0xff] }
  0x94   :  { %17814 = vmatmul.mubr.msk.bf16.vlgmr.msra.gmra.mrb[4].mxu0 %vm236_vm1, %v121_v25  ;;  %v18044_v34 = vcombine.high %v670_v28, %v686_v29  ;;  %v702_v36 = vld [vmem:[#allocation8 + $0x808] sm:$0xff]  ;;  %v18074_v38 = vcombine.high %v701_v32, %v717_v33  ;;  %v18043_v39 = vcombine.low %v670_v28, %v686_v29  ;;  %v733_v40 = vld [vmem:[#allocation8 + $0x900] sm:$0xff] }
  0x95   :  { %12902 = vmatpush1.bf16.msra.mxu0 %v17817_v43  ;;  %17816 = vmatmul.mubr.msk.bf16.vlgmr.msra.gmra.mrb[4].mxu1 %vm236_vm1, %v121_v25  ;;  %v685_v25 = vld [vmem:[#allocation8 + $0x780] sm:$0xff]  ;;  %v718_v37 = vld [vmem:[#allocation8 + $0x888] sm:$0xff]  ;;  %v18073_v43 = vcombine.low %v701_v32, %v717_v33 }
  0x96   :  { %12903 = vmatprep.subr.bf16.mxu0 %v17850_v46  ;;  %13066 = vmatpush1.bf16.msra.mxu1 %v17819_v47  ;;  %v18042_v30 = vcombine.high %v669_v24, %v685_v25  ;;  %v18041_v35 = vcombine.low %v669_v24, %v685_v25  ;;  %v749_v41 = vld [vmem:[#allocation8 + $0x980] sm:$0xff]  ;;  %v18076_v42 = vcombine.high %v702_v36, %v718_v37  ;;  %v734_v44 = vld [vmem:[#allocation8 + $0x908] sm:$0xff] }
  0x97   :  { %13067 = vmatprep.subr.bf16.mxu1 %v17852_v50  ;;  %v750_v45 = vld [vmem:[#allocation8 + $0x988] sm:$0xff]  ;;  %v18106_v46 = vcombine.high %v733_v40, %v749_v41  ;;  %v18075_v47 = vcombine.low %v702_v36, %v718_v37  ;;  %v765_v48 = vld [vmem:[#allocation8 + $0xa00] sm:$0xff] }
  0x98   :  { %v781_v49 = vld [vmem:[#allocation8 + $0xa80] sm:$0xff]  ;;  %v18108_v50 = vcombine.high %v734_v44, %v750_v45  ;;  %v766_v52 = vld [vmem:[#allocation8 + $0xa08] sm:$0xff] }
  0x99   :  { %12904 = vmatpush1.bf16.msra.mxu0 %v17849_v51  ;;  %v18105_v51 = vcombine.low %v733_v40, %v749_v41  ;;  %v782_v53 = vld [vmem:[#allocation8 + $0xa88] sm:$0xff]  ;;  %v797_v56 = vld [vmem:[#allocation8 + $0xb00] sm:$0xff] }
  0x9a   :  { %12905 = vmatprep.subr.bf16.mxu0 %v17882_v54  ;;  %13068 = vmatpush1.bf16.msra.mxu1 %v17851_v55  ;;  %v18138_v54 = vcombine.high %v765_v48, %v781_v49  ;;  %v18107_v55 = vcombine.low %v734_v44, %v750_v45  ;;  %v813_v57 = vld [vmem:[#allocation8 + $0xb80] sm:$0xff]  ;;  %v798_v60 = vld [vmem:[#allocation8 + $0xb08] sm:$0xff] }
  0x9b   :  { %13069 = vmatprep.subr.bf16.mxu1 %v17884_v58  ;;  %v18140_v58 = vcombine.high %v766_v52, %v782_v53  ;;  %v814_v61 = vld [vmem:[#allocation8 + $0xb88] sm:$0xff]  ;;  %v829_v0 = vld [vmem:[#allocation8 + $0xc00] sm:$0xff] }
  0x9c   :  { %v845_v1 = vld [vmem:[#allocation8 + $0xc80] sm:$0xff]  ;;  %v830_v4 = vld [vmem:[#allocation8 + $0xc08] sm:$0xff] }
  0x9d   :  { %12906 = vmatpush1.bf16.msra.mxu0 %v17881_v59  ;;  %v18137_v59 = vcombine.low %v765_v48, %v781_v49  ;;  %v846_v5 = vld [vmem:[#allocation8 + $0xc88] sm:$0xff]  ;;  %v861_v8 = vld [vmem:[#allocation8 + $0xd00] sm:$0xff] }
  0x9e   :  { %12907 = vmatprep.subr.bf16.mxu0 %v17914_v62  ;;  %13070 = vmatpush1.bf16.msra.mxu1 %v17883_v63  ;;  %v18170_v62 = vcombine.high %v797_v56, %v813_v57  ;;  %v18139_v63 = vcombine.low %v766_v52, %v782_v53  ;;  %v877_v9 = vld [vmem:[#allocation8 + $0xd80] sm:$0xff]  ;;  %v862_v12 = vld [vmem:[#allocation8 + $0xd08] sm:$0xff] }
  0x9f   :  { %13071 = vmatprep.subr.bf16.mxu1 %v17916_v2  ;;  %v18172_v2 = vcombine.high %v798_v60, %v814_v61  ;;  %v878_v13 = vld [vmem:[#allocation8 + $0xd88] sm:$0xff]  ;;  %v18233_v17 = vcombine.low %v861_v8, %v877_v9  ;;  %v909_v20 = vld [vmem:[#allocation8 + $0xe80] sm:$0xff] }
  0xa0   :  { %v18236_v16 = vcombine.high %v862_v12, %v878_v13  ;;  %v894_v21 = vld [vmem:[#allocation8 + $0xe08] sm:$0xff]  ;;  %v941_v28 = vld [vmem:[#allocation8 + $0xf80] sm:$0xff] }
  0xa1   :  { %12908 = vmatpush1.bf16.msra.mxu0 %v17913_v3  ;;  %v18169_v3 = vcombine.low %v797_v56, %v813_v57  ;;  %v926_v29 = vld [vmem:[#allocation8 + $0xf08] sm:$0xff]  ;;  %v973_v36 = vld [vmem:[#allocation8 + $0x1080] sm:$0xff] }
  0xa2   :  { %12909 = vmatprep.subr.bf16.mxu0 %v17946_v6  ;;  %13072 = vmatpush1.bf16.msra.mxu1 %v17915_v7  ;;  %v18202_v6 = vcombine.high %v829_v0, %v845_v1  ;;  %v18171_v7 = vcombine.low %v798_v60, %v814_v61  ;;  %v958_v37 = vld [vmem:[#allocation8 + $0x1008] sm:$0xff]  ;;  %v989_v61 = vld [vmem:[#allocation8 + $0x1100] sm:$0xff] }
  0xa3   :  { %13073 = vmatprep.subr.bf16.mxu1 %v17948_v10  ;;  %v18204_v10 = vcombine.high %v830_v4, %v846_v5 }
  0xa5   :  { %12910 = vmatpush1.bf16.msra.mxu0 %v17945_v11  ;;  %v18201_v11 = vcombine.low %v829_v0, %v845_v1  ;;  %v1005_v1 = vld [vmem:[#allocation8 + $0x1180] sm:$0xff] }
  0xa6   :  { %12911 = vmatprep.subr.bf16.mxu0 %v17978_v14  ;;  %13074 = vmatpush1.bf16.msra.mxu1 %v17947_v15  ;;  %v18234_v14 = vcombine.high %v861_v8, %v877_v9  ;;  %v18203_v15 = vcombine.low %v830_v4, %v846_v5  ;;  %v18362_v8 = vcombine.high %v989_v61, %v1005_v1 }
  0xa7   :  { %13075 = vmatprep.subr.bf16.mxu1 %v17980_v18  ;;  %v18235_v18 = vcombine.low %v862_v12, %v878_v13  ;;  %v1022_v12 = vld [vmem:[#allocation8 + $0x1208] sm:$0xff] }
  0xa8   :  { %v1038_v13 = vld [vmem:[#allocation8 + $0x1288] sm:$0xff] }
  0xa9   :  { %12912 = vmatpush1.bf16.msra.mxu0 %v17977_v19  ;;  %v893_v19 = vld [vmem:[#allocation8 + $0xe00] sm:$0xff] }
  0xaa   :  { %12913 = vmatprep.subr.bf16.mxu0 %v18010_v22  ;;  %13076 = vmatpush1.bf16.msra.mxu1 %v17979_v23  ;;  %v18266_v22 = vcombine.high %v893_v19, %v909_v20  ;;  %v910_v23 = vld [vmem:[#allocation8 + $0xe88] sm:$0xff]  ;;  %v18265_v24 = vcombine.low %v893_v19, %v909_v20 }
  0xab   :  { %13077 = vmatprep.subr.bf16.mxu1 %v18012_v26  ;;  %v18267_v25 = vcombine.low %v894_v21, %v910_v23  ;;  %v18268_v26 = vcombine.high %v894_v21, %v910_v23  ;;  %v18396_v21 = vcombine.high %v1022_v12, %v1038_v13 }
  0xad   :  { %12914 = vmatpush1.bf16.msra.mxu0 %v18009_v27  ;;  %v925_v27 = vld [vmem:[#allocation8 + $0xf00] sm:$0xff] }
  0xae   :  { %12915 = vmatprep.subr.bf16.mxu0 %v18042_v30  ;;  %13078 = vmatpush1.bf16.msra.mxu1 %v18011_v31  ;;  %v18298_v30 = vcombine.high %v925_v27, %v941_v28  ;;  %v942_v31 = vld [vmem:[#allocation8 + $0xf88] sm:$0xff]  ;;  %v18297_v32 = vcombine.low %v925_v27, %v941_v28  ;;  %v18395_v28 = vcombine.low %v1022_v12, %v1038_v13  ;;  %v1229_v12 = vld [vmem:[#allocation8 + $0x1880] sm:$0xff] }
  0xaf   :  { %13079 = vmatprep.subr.bf16.mxu1 %v18044_v34  ;;  %v18299_v33 = vcombine.low %v926_v29, %v942_v31  ;;  %v18300_v34 = vcombine.high %v926_v29, %v942_v31  ;;  %v1085_v31 = vld [vmem:[#allocation8 + $0x1400] sm:$0xff]  ;;  %v1214_v13 = vld [vmem:[#allocation8 + $0x1808] sm:$0xff] }
  0xb1   :  { %12916 = vmatpush1.bf16.msra.mxu0 %v18041_v35  ;;  %v957_v35 = vld [vmem:[#allocation8 + $0x1000] sm:$0xff] }
  0xb2   :  { %12917 = vmatprep.subr.bf16.mxu0 %v18074_v38  ;;  %13080 = vmatpush1.bf16.msra.mxu1 %v18043_v39  ;;  %v18330_v38 = vcombine.high %v957_v35, %v973_v36  ;;  %v974_v39 = vld [vmem:[#allocation8 + $0x1088] sm:$0xff]  ;;  %v18329_v40 = vcombine.low %v957_v35, %v973_v36 }
  0xb3   :  { %13081 = vmatprep.subr.bf16.mxu1 %v18076_v42  ;;  %v18331_v41 = vcombine.low %v958_v37, %v974_v39  ;;  %v18332_v42 = vcombine.high %v958_v37, %v974_v39  ;;  %v1117_v39 = vld [vmem:[#allocation8 + $0x1500] sm:$0xff] }
  0xb5   :  { %12918 = vmatpush1.bf16.msra.mxu0 %v18073_v43  ;;  %v136_v43 = vlaneseq }
  0xb6   :  { %12919 = vmatprep.subr.bf16.mxu0 %v18106_v46  ;;  %13082 = vmatpush1.bf16.msra.mxu1 %v18075_v47  ;;  %v22878_v46 = vld [vmem:[#allocation7] sm:$0xff] }
  0xb7   :  { %13083 = vmatprep.subr.bf16.mxu1 %v18108_v50  ;;  %v22873_v44 = vshrl.u32 %v136_v43, 7 }
  0xb9   :  { %12920 = vmatpush1.bf16.msra.mxu0 %v18105_v51  ;;  %v22876_v45 = vsub.s32 0, %v22873_v44  ;;  %v22881_v47 = vsub.s32 1, %v22873_v44  ;;  %v22884_v48 = vsub.s32 3, %v22873_v44 }
  0xba   :  { %12921 = vmatprep.subr.bf16.mxu0 %v18138_v54  ;;  %13084 = vmatpush1.bf16.msra.mxu1 %v18107_v55 }
  0xbb   :  { %13085 = vmatprep.subr.bf16.mxu1 %v18140_v58  ;;  %v139_v49 = vrot.slane %v22878_v46, %v22876_v45  ;;  %v143_v50 = vrot.slane %v22878_v46, %v22881_v47  ;;  %v151_v51 = vrot.slane %v22878_v46, %v22884_v48 }
  0xbd   :  { %12922 = vmatpush1.bf16.msra.mxu0 %v18137_v59 }
  0xbe   :  { %12923 = vmatprep.subr.bf16.mxu0 %v18170_v62  ;;  %13086 = vmatpush1.bf16.msra.mxu1 %v18139_v63 }
  0xbf   :  { %13087 = vmatprep.subr.bf16.mxu1 %v18172_v2  ;;  %v990_v2 = vld [vmem:[#allocation8 + $0x1108] sm:$0xff] }
  0xc1   :  { %12924 = vmatpush1.bf16.msra.mxu0 %v18169_v3  ;;  %v1006_v3 = vld [vmem:[#allocation8 + $0x1188] sm:$0xff] }
  0xc2   :  { %12925 = vmatprep.subr.bf16.mxu0 %v18202_v6  ;;  %13088 = vmatpush1.bf16.msra.mxu1 %v18171_v7  ;;  %v18364_v9 = vcombine.high %v990_v2, %v1006_v3 }
  0xc3   :  { %13089 = vmatprep.subr.bf16.mxu1 %v18204_v10  ;;  %v1021_v10 = vld [vmem:[#allocation8 + $0x1200] sm:$0xff] }
  0xc5   :  { %12926 = vmatpush1.bf16.msra.mxu0 %v18201_v11  ;;  %v1037_v11 = vld [vmem:[#allocation8 + $0x1280] sm:$0xff] }
  0xc6   :  { %12927 = vmatprep.subr.bf16.mxu0 %v18234_v14  ;;  %13090 = vmatpush1.bf16.msra.mxu1 %v18203_v15  ;;  %v18394_v20 = vcombine.high %v1021_v10, %v1037_v11  ;;  %v18393_v27 = vcombine.low %v1021_v10, %v1037_v11  ;;  %v1213_v11 = vld [vmem:[#allocation8 + $0x1800] sm:$0xff] }
  0xc7   :  { %13091 = vmatprep.subr.bf16.mxu1 %v18236_v16 }
  0xc9   :  { %12928 = vmatpush1.bf16.msra.mxu0 %v18233_v17  ;;  %v18361_v17 = vcombine.low %v989_v61, %v1005_v1  ;;  %v1182_v1 = vld [vmem:[#allocation8 + $0x1708] sm:$0xff] }
  0xca   :  { %13092 = vmatpush1.bf16.msra.mxu1 %v18235_v18  ;;  %12929 = vmatprep.subr.bf16.mxu0 %v18266_v22  ;;  %v18363_v18 = vcombine.low %v990_v2, %v1006_v3  ;;  %v1053_v22 = vld [vmem:[#allocation8 + $0x1300] sm:$0xff]  ;;  %v1198_v2 = vld [vmem:[#allocation8 + $0x1788] sm:$0xff] }
  0xcb   :  { %13093 = vmatprep.subr.bf16.mxu1 %v18268_v26  ;;  %v1070_v26 = vld [vmem:[#allocation8 + $0x1388] sm:$0xff]  ;;  %v18556_v10 = vcombine.high %v1182_v1, %v1198_v2 }
  0xcd   :  { %12930 = vmatpush1.bf16.msra.mxu0 %v18265_v24  ;;  %v1069_v24 = vld [vmem:[#allocation8 + $0x1380] sm:$0xff] }
  0xce   :  { %13094 = vmatpush1.bf16.msra.mxu1 %v18267_v25  ;;  %12931 = vmatprep.subr.bf16.mxu0 %v18298_v30  ;;  %v1054_v25 = vld [vmem:[#allocation8 + $0x1308] sm:$0xff]  ;;  %v18426_v29 = vcombine.high %v1053_v22, %v1069_v24  ;;  %v18425_v35 = vcombine.low %v1053_v22, %v1069_v24  ;;  %v1245_v22 = vld [vmem:[#allocation8 + $0x1900] sm:$0xff] }
  0xcf   :  { %13095 = vmatprep.subr.bf16.mxu1 %v18300_v34  ;;  %v18428_v30 = vcombine.high %v1054_v25, %v1070_v26  ;;  %v1102_v34 = vld [vmem:[#allocation8 + $0x1488] sm:$0xff]  ;;  %v18427_v36 = vcombine.low %v1054_v25, %v1070_v26  ;;  %v18585_v26 = vcombine.low %v1213_v11, %v1229_v12 }
  0xd0   :  { %v1246_v24 = vld [vmem:[#allocation8 + $0x1908] sm:$0xff] }
  0xd1   :  { %12932 = vmatpush1.bf16.msra.mxu0 %v18297_v32  ;;  %v1101_v32 = vld [vmem:[#allocation8 + $0x1480] sm:$0xff]  ;;  %v1262_v25 = vld [vmem:[#allocation8 + $0x1988] sm:$0xff] }
  0xd2   :  { %13096 = vmatpush1.bf16.msra.mxu1 %v18299_v33  ;;  %12942 = vmatprep.subr.bf16.mxu0 %v18330_v38  ;;  %v1086_v33 = vld [vmem:[#allocation8 + $0x1408] sm:$0xff]  ;;  %v18458_v37 = vcombine.high %v1085_v31, %v1101_v32  ;;  %v18457_v43 = vcombine.low %v1085_v31, %v1101_v32  ;;  %v1293_v31 = vld [vmem:[#allocation8 + $0x1a80] sm:$0xff] }
  0xd3   :  { %13106 = vmatprep.subr.bf16.mxu1 %v18332_v42  ;;  %v18460_v38 = vcombine.high %v1086_v33, %v1102_v34  ;;  %v1134_v42 = vld [vmem:[#allocation8 + $0x1588] sm:$0xff] }
  0xd4   :  { %v1278_v32 = vld [vmem:[#allocation8 + $0x1a08] sm:$0xff] }
 0x15f   :  { %v299_v52 = vpop.f32.mrb[0].mxu0  ;;  %v22892_v55 = vpop.f32.mrb[0].mxu1 }
 0x160   :  { %v300_v53 = vadd.f32 %v299_v52, %v139_v49  ;;  %v301_v54 = vpop.f32.mrb[1].mxu0  ;;  %v342_v58 = vpop.f32.mrb[1].mxu1  ;;  %v18459_v49 = vcombine.low %v1086_v33, %v1102_v34  ;;  %v1149_v52 = vld [vmem:[#allocation8 + $0x1600] sm:$0xff]  ;;  %v1294_v33 = vld [vmem:[#allocation8 + $0x1a88] sm:$0xff] }
 0x161   :  { %v302_v56 = vadd.f32 %v301_v54, %v143_v50  ;;  %v303_v57 = vpop.f32.mrb[2].mxu0  ;;  %v343_v62 = vadd.f32 %v342_v58, %v151_v51  ;;  %v344_v63 = vpop.f32.mrb[2].mxu1  ;;  %v1150_v54 = vld [vmem:[#allocation8 + $0x1608] sm:$0xff] }
 0x162   :  { %v429_v59 = vmax.f32 %v300_v53, 0.0  ;;  %v304_v60 = vpop.f32.mrb[3].mxu0  ;;  %v345_v4 = vpop.f32.mrb[3].mxu1  ;;  %v1165_v53 = vld [vmem:[#allocation8 + $0x1680] sm:$0xff] }
 0x163   :  { %v430_v0 = vmax.f32 %v302_v56, 0.0  ;;  %v432_v5 = vmax.f32 %v343_v62, 0.0  ;;  %v1166_v56 = vld [vmem:[#allocation8 + $0x1688] sm:$0xff]  ;;  %v18522_v60 = vcombine.high %v1149_v52, %v1165_v53  ;;  %v1181_v62 = vld [vmem:[#allocation8 + $0x1700] sm:$0xff] }
 0x164   :  { %v22896_v7 = vpack.c.bf16 %v429_v59, %v429_v59  ;;  %v18524_v61 = vcombine.high %v1150_v54, %v1166_v56 }
 0x165   :  { %v22894_v6 = vpack.c.bf16 %v430_v0, %v430_v0  ;;  %v22900_v14 = vpack.c.bf16 %v432_v5, %v432_v5  ;;  %v1197_v0 = vld [vmem:[#allocation8 + $0x1780] sm:$0xff]  ;;  %v18521_v5 = vcombine.low %v1149_v52, %v1165_v53  ;;  %v1342_v53 = vld [vmem:[#allocation8 + $0x1c08] sm:$0xff] }
 0x166   :  { %v1357_v52 = vld [vmem:[#allocation8 + $0x1c80] sm:$0xff] }
 0x167   :  { %12933 = vmatprep.mubr.bf16.mxu0 %v22894_v6  ;;  %13097 = vmatprep.mubr.bf16.mxu1 %v22894_v6  ;;  %v22902_v15 = vpop.f32.mrb[4].mxu0 }
 0x168   :  { %12934 = vmatmul.mubr.bf16.vlgmr.msra.gmra.mrb[8].mxu0 %v22896_v7  ;;  %13098 = vmatmul.mubr.bf16.vlgmr.msra.gmra.mrb[8].mxu1 %v22896_v7  ;;  %v22906_v16 = vpop.f32.mrb[5].mxu0  ;;  %v22910_v59 = vpop.f32.mrb[4].mxu1 }
 0x169   :  { %12943 = vmatpush1.bf16.msra.mxu0 %v18329_v40  ;;  %13107 = vmatpush1.bf16.msra.mxu1 %v18331_v41  ;;  %v385_v19 = vpop.f32.mrb[6].mxu0  ;;  %v1133_v40 = vld [vmem:[#allocation8 + $0x1580] sm:$0xff]  ;;  %v1118_v41 = vld [vmem:[#allocation8 + $0x1508] sm:$0xff]  ;;  %v22912_v63 = vpop.f32.mrb[5].mxu1 }
 0x16a   :  { %12944 = vmatprep.subr.bf16.mxu0 %v18362_v8  ;;  %13108 = vmatprep.subr.bf16.mxu1 %v18364_v9  ;;  %v386_v23 = vpop.f32.mrb[7].mxu0  ;;  %v18490_v50 = vcombine.high %v1117_v39, %v1133_v40  ;;  %v18492_v51 = vcombine.high %v1118_v41, %v1134_v42  ;;  %v18489_v57 = vcombine.low %v1117_v39, %v1133_v40  ;;  %v426_v3 = vpop.f32.mrb[6].mxu1  ;;  %v1325_v39 = vld [vmem:[#allocation8 + $0x1b80] sm:$0xff]  ;;  %v1310_v40 = vld [vmem:[#allocation8 + $0x1b08] sm:$0xff] }
 0x16b   :  { %12974 = vmatprep.mubr.bf16.mxu0 %v22900_v14  ;;  %13138 = vmatprep.mubr.bf16.mxu1 %v22900_v14  ;;  %v18491_v58 = vcombine.low %v1118_v41, %v1134_v42  ;;  %v427_v4 = vpop.f32.mrb[7].mxu1  ;;  %v18523_v8 = vcombine.low %v1150_v54, %v1166_v56  ;;  %v18554_v9 = vcombine.high %v1181_v62, %v1197_v0  ;;  %v1261_v23 = vld [vmem:[#allocation8 + $0x1980] sm:$0xff]  ;;  %v1326_v41 = vld [vmem:[#allocation8 + $0x1b88] sm:$0xff] }
 0x16c   :  { %v18555_v19 = vcombine.low %v1182_v1, %v1198_v2  ;;  %v18617_v34 = vcombine.low %v1245_v22, %v1261_v23  ;;  %v1358_v54 = vld [vmem:[#allocation8 + $0x1c88] sm:$0xff]  ;;  %v22915_v2 = vsub.s32 2, %v22873_v44 }
 0x16d   :  { %12945 = vmatpush1.bf16.msra.mxu0 %v18361_v17  ;;  %13109 = vmatpush1.bf16.msra.mxu1 %v18363_v18  ;;  %v1230_v17 = vld [vmem:[#allocation8 + $0x1888] sm:$0xff]  ;;  %v18553_v18 = vcombine.low %v1181_v62, %v1197_v0  ;;  %v1389_v62 = vld [vmem:[#allocation8 + $0x1d80] sm:$0xff]  ;;  %v18715_v4 = vcombine.low %v1342_v53, %v1358_v54 }
 0x16e   :  { %12946 = vmatprep.subr.bf16.mxu0 %v18394_v20  ;;  %13110 = vmatprep.subr.bf16.mxu1 %v18396_v21  ;;  %v18586_v20 = vcombine.high %v1213_v11, %v1229_v12  ;;  %v18588_v21 = vcombine.high %v1214_v13, %v1230_v17  ;;  %v1374_v0 = vld [vmem:[#allocation8 + $0x1d08] sm:$0xff] }
 0x16f   :  { %v1390_v1 = vld [vmem:[#allocation8 + $0x1d88] sm:$0xff] }
 0x170   :  { %v1406_v11 = vld [vmem:[#allocation8 + $0x1e08] sm:$0xff] }
 0x171   :  { %12947 = vmatpush1.bf16.msra.mxu0 %v18393_v27  ;;  %13111 = vmatpush1.bf16.msra.mxu1 %v18395_v28  ;;  %v18587_v27 = vcombine.low %v1214_v13, %v1230_v17  ;;  %v18618_v28 = vcombine.high %v1245_v22, %v1261_v23  ;;  %v1422_v12 = vld [vmem:[#allocation8 + $0x1e88] sm:$0xff]  ;;  %v22918_v13 = vsub.s32 5, %v22873_v44  ;;  %v147_v17 = vrot.slane %v22878_v46, %v22915_v2  ;;  %v1437_v22 = vld [vmem:[#allocation8 + $0x1f00] sm:$0xff] }
 0x172   :  { %12948 = vmatprep.subr.bf16.mxu0 %v18426_v29  ;;  %13112 = vmatprep.subr.bf16.mxu1 %v18428_v30  ;;  %v18620_v29 = vcombine.high %v1246_v24, %v1262_v25  ;;  %v1277_v30 = vld [vmem:[#allocation8 + $0x1a00] sm:$0xff] }
 0x173   :  { %v18649_v42 = vcombine.low %v1277_v30, %v1293_v31  ;;  %v1453_v23 = vld [vmem:[#allocation8 + $0x1f80] sm:$0xff] }
 0x175   :  { %12949 = vmatpush1.bf16.msra.mxu0 %v18425_v35  ;;  %13113 = vmatpush1.bf16.msra.mxu1 %v18427_v36  ;;  %v18619_v35 = vcombine.low %v1246_v24, %v1262_v25  ;;  %v18650_v36 = vcombine.high %v1277_v30, %v1293_v31  ;;  %v1438_v24 = vld [vmem:[#allocation8 + $0x1f08] sm:$0xff]  ;;  %v18810_v30 = vcombine.high %v1437_v22, %v1453_v23 }
 0x176   :  { %12950 = vmatprep.subr.bf16.mxu0 %v18458_v37  ;;  %13114 = vmatprep.subr.bf16.mxu1 %v18460_v38  ;;  %v18652_v37 = vcombine.high %v1278_v32, %v1294_v33  ;;  %v1309_v38 = vld [vmem:[#allocation8 + $0x1b00] sm:$0xff]  ;;  %v1454_v25 = vld [vmem:[#allocation8 + $0x1f88] sm:$0xff] }
 0x177   :  { %v18681_v56 = vcombine.low %v1309_v38, %v1325_v39  ;;  %v18812_v31 = vcombine.high %v1438_v24, %v1454_v25 }
 0x179   :  { %12951 = vmatpush1.bf16.msra.mxu0 %v18457_v43  ;;  %13115 = vmatpush1.bf16.msra.mxu1 %v18459_v49  ;;  %v18651_v43 = vcombine.low %v1278_v32, %v1294_v33  ;;  %v18682_v49 = vcombine.high %v1309_v38, %v1325_v39  ;;  %v1469_v32 = vld [vmem:[#allocation8 + $0x2000] sm:$0xff]  ;;  %v18809_v38 = vcombine.low %v1437_v22, %v1453_v23 }
 0x17a   :  { %12952 = vmatprep.subr.bf16.mxu0 %v18490_v50  ;;  %13116 = vmatprep.subr.bf16.mxu1 %v18492_v51  ;;  %v18684_v50 = vcombine.high %v1310_v40, %v1326_v41  ;;  %v1341_v51 = vld [vmem:[#allocation8 + $0x1c00] sm:$0xff]  ;;  %v18811_v39 = vcombine.low %v1438_v24, %v1454_v25 }
 0x17b   :  { %v18713_v3 = vcombine.low %v1341_v51, %v1357_v52  ;;  %v1485_v33 = vld [vmem:[#allocation8 + $0x2080] sm:$0xff] }
 0x17d   :  { %12953 = vmatpush1.bf16.msra.mxu0 %v18489_v57  ;;  %13117 = vmatpush1.bf16.msra.mxu1 %v18491_v58  ;;  %v18683_v57 = vcombine.low %v1310_v40, %v1326_v41  ;;  %v18714_v58 = vcombine.high %v1341_v51, %v1357_v52  ;;  %v1501_v41 = vld [vmem:[#allocation8 + $0x2100] sm:$0xff]  ;;  %v18841_v52 = vcombine.low %v1469_v32, %v1485_v33 }
 0x17e   :  { %12954 = vmatprep.subr.bf16.mxu0 %v18522_v60  ;;  %13118 = vmatprep.subr.bf16.mxu1 %v18524_v61  ;;  %v18716_v60 = vcombine.high %v1342_v53, %v1358_v54  ;;  %v1373_v61 = vld [vmem:[#allocation8 + $0x1d00] sm:$0xff] }
 0x181   :  { %12955 = vmatpush1.bf16.msra.mxu0 %v18521_v5  ;;  %13119 = vmatpush1.bf16.msra.mxu1 %v18523_v8  ;;  %v18746_v5 = vcombine.high %v1373_v61, %v1389_v62  ;;  %v18748_v8 = vcombine.high %v1374_v0, %v1390_v1 }
 0x182   :  { %12956 = vmatprep.subr.bf16.mxu0 %v18554_v9  ;;  %13120 = vmatprep.subr.bf16.mxu1 %v18556_v10  ;;  %v1405_v9 = vld [vmem:[#allocation8 + $0x1e00] sm:$0xff] }
 0x183   :  { %v1421_v10 = vld [vmem:[#allocation8 + $0x1e80] sm:$0xff] }
 0x185   :  { %12957 = vmatpush1.bf16.msra.mxu0 %v18553_v18  ;;  %13121 = vmatpush1.bf16.msra.mxu1 %v18555_v19  ;;  %v18745_v18 = vcombine.low %v1373_v61, %v1389_v62  ;;  %v18747_v19 = vcombine.low %v1374_v0, %v1390_v1 }
 0x186   :  { %12958 = vmatprep.subr.bf16.mxu0 %v18586_v20  ;;  %13122 = vmatprep.subr.bf16.mxu1 %v18588_v21  ;;  %v18778_v20 = vcombine.high %v1405_v9, %v1421_v10  ;;  %v18780_v21 = vcombine.high %v1406_v11, %v1422_v12 }
 0x189   :  { %12959 = vmatpush1.bf16.msra.mxu0 %v18585_v26  ;;  %13123 = vmatpush1.bf16.msra.mxu1 %v18587_v27  ;;  %v159_v26 = vrot.slane %v22878_v46, %v22918_v13  ;;  %v341_v27 = vadd.f32 %v22892_v55, %v147_v17  ;;  %v18842_v55 = vcombine.high %v1469_v32, %v1485_v33 }
 0x18a   :  { %12960 = vmatprep.subr.bf16.mxu0 %v18618_v28  ;;  %13124 = vmatprep.subr.bf16.mxu1 %v18620_v29  ;;  %v18777_v28 = vcombine.low %v1405_v9, %v1421_v10  ;;  %v18779_v29 = vcombine.low %v1406_v11, %v1422_v12  ;;  %v1582_v9 = vld [vmem:[#allocation8 + $0x2388] sm:$0xff] }
 0x18d   :  { %12961 = vmatpush1.bf16.msra.mxu0 %v18617_v34  ;;  %13125 = vmatpush1.bf16.msra.mxu1 %v18619_v35  ;;  %v1470_v34 = vld [vmem:[#allocation8 + $0x2008] sm:$0xff] }
 0x18e   :  { %12962 = vmatprep.subr.bf16.mxu0 %v18650_v36  ;;  %13126 = vmatprep.subr.bf16.mxu1 %v18652_v37  ;;  %v1486_v35 = vld [vmem:[#allocation8 + $0x2088] sm:$0xff]  ;;  %v384_v36 = vadd.f32 %v22906_v16, %v159_v26  ;;  %v431_v37 = vmax.f32 %v341_v27, 0.0  ;;  %v1629_v26 = vld [vmem:[#allocation8 + $0x2500] sm:$0xff] }
 0x18f   :  { %v18844_v40 = vcombine.high %v1470_v34, %v1486_v35  ;;  %v18843_v16 = vcombine.low %v1470_v34, %v1486_v35  ;;  %v1645_v27 = vld [vmem:[#allocation8 + $0x2580] sm:$0xff] }
 0x190   :  { %v22926_v51 = vpack.c.bf16 %v431_v37, %v431_v37  ;;  %v19002_v32 = vcombine.high %v1629_v26, %v1645_v27  ;;  %v1661_v34 = vld [vmem:[#allocation8 + $0x2600] sm:$0xff]  ;;  %v1678_v37 = vld [vmem:[#allocation8 + $0x2688] sm:$0xff] }
 0x191   :  { %12963 = vmatpush1.bf16.msra.mxu0 %v18649_v42  ;;  %13127 = vmatpush1.bf16.msra.mxu1 %v18651_v43  ;;  %v1517_v42 = vld [vmem:[#allocation8 + $0x2180] sm:$0xff]  ;;  %v1502_v43 = vld [vmem:[#allocation8 + $0x2108] sm:$0xff] }
 0x192   :  { %12964 = vmatprep.subr.bf16.mxu0 %v18682_v49  ;;  %13128 = vmatprep.subr.bf16.mxu1 %v18684_v50  ;;  %v1518_v49 = vld [vmem:[#allocation8 + $0x2188] sm:$0xff]  ;;  %v434_v50 = vmax.f32 %v384_v36, 0.0  ;;  %v18874_v53 = vcombine.high %v1501_v41, %v1517_v42  ;;  %v18873_v62 = vcombine.low %v1501_v41, %v1517_v42  ;;  %v1677_v35 = vld [vmem:[#allocation8 + $0x2680] sm:$0xff] }
 0x193   :  { %v18876_v54 = vcombine.high %v1502_v43, %v1518_v49  ;;  %v18875_v0 = vcombine.low %v1502_v43, %v1518_v49  ;;  %v1662_v36 = vld [vmem:[#allocation8 + $0x2608] sm:$0xff]  ;;  %v1693_v41 = vld [vmem:[#allocation8 + $0x2700] sm:$0xff] }
 0x194   :  { %v22928_v61 = vpack.c.bf16 %v434_v50, %v434_v50  ;;  %v1709_v42 = vld [vmem:[#allocation8 + $0x2780] sm:$0xff]  ;;  %v1694_v43 = vld [vmem:[#allocation8 + $0x2708] sm:$0xff]  ;;  %v19033_v50 = vcombine.low %v1661_v34, %v1677_v35 }
 0x195   :  { %12965 = vmatpush1.bf16.msra.mxu0 %v18681_v56  ;;  %13129 = vmatpush1.bf16.msra.mxu1 %v18683_v57  ;;  %v1533_v56 = vld [vmem:[#allocation8 + $0x2200] sm:$0xff]  ;;  %v1710_v49 = vld [vmem:[#allocation8 + $0x2788] sm:$0xff] }
 0x196   :  { %12966 = vmatprep.subr.bf16.mxu0 %v18714_v58  ;;  %13130 = vmatprep.subr.bf16.mxu1 %v18716_v60  ;;  %v1549_v57 = vld [vmem:[#allocation8 + $0x2280] sm:$0xff]  ;;  %v1534_v58 = vld [vmem:[#allocation8 + $0x2208] sm:$0xff] }
 0x197   :  { %v1550_v60 = vld [vmem:[#allocation8 + $0x2288] sm:$0xff]  ;;  %v18906_v1 = vcombine.high %v1533_v56, %v1549_v57  ;;  %v18905_v10 = vcombine.low %v1533_v56, %v1549_v57  ;;  %v1741_v56 = vld [vmem:[#allocation8 + $0x2880] sm:$0xff] }
 0x198   :  { %v18907_v11 = vcombine.low %v1534_v58, %v1550_v60  ;;  %v1726_v57 = vld [vmem:[#allocation8 + $0x2808] sm:$0xff] }
 0x199   :  { %12967 = vmatpush1.bf16.msra.mxu0 %v18713_v3  ;;  %13131 = vmatpush1.bf16.msra.mxu1 %v18715_v4  ;;  %v18908_v3 = vcombine.high %v1534_v58, %v1550_v60  ;;  %v1565_v4 = vld [vmem:[#allocation8 + $0x2300] sm:$0xff]  ;;  %v1742_v58 = vld [vmem:[#allocation8 + $0x2888] sm:$0xff]  ;;  %v19065_v60 = vcombine.low %v1693_v41, %v1709_v42 }
 0x19a   :  { %12968 = vmatprep.subr.bf16.mxu0 %v18746_v5  ;;  %13132 = vmatprep.subr.bf16.mxu1 %v18748_v8  ;;  %v1581_v5 = vld [vmem:[#allocation8 + $0x2380] sm:$0xff]  ;;  %v1566_v8 = vld [vmem:[#allocation8 + $0x2308] sm:$0xff] }
 0x19b   :  { %v18938_v12 = vcombine.high %v1565_v4, %v1581_v5  ;;  %v18940_v17 = vcombine.high %v1566_v8, %v1582_v9  ;;  %v18937_v22 = vcombine.low %v1565_v4, %v1581_v5  ;;  %v18939_v23 = vcombine.low %v1566_v8, %v1582_v9  ;;  %v1773_v4 = vld [vmem:[#allocation8 + $0x2980] sm:$0xff]  ;;  %v1758_v5 = vld [vmem:[#allocation8 + $0x2908] sm:$0xff] }
 0x19c   :  { %v1774_v8 = vld [vmem:[#allocation8 + $0x2988] sm:$0xff] }
 0x19d   :  { %12969 = vmatpush1.bf16.msra.mxu0 %v18745_v18  ;;  %13133 = vmatpush1.bf16.msra.mxu1 %v18747_v19  ;;  %v1597_v18 = vld [vmem:[#allocation8 + $0x2400] sm:$0xff] }
 0x19e   :  { %12970 = vmatprep.subr.bf16.mxu0 %v18778_v20  ;;  %13134 = vmatprep.subr.bf16.mxu1 %v18780_v21  ;;  %v1613_v19 = vld [vmem:[#allocation8 + $0x2480] sm:$0xff]  ;;  %v1598_v20 = vld [vmem:[#allocation8 + $0x2408] sm:$0xff] }
 0x19f   :  { %v1614_v21 = vld [vmem:[#allocation8 + $0x2488] sm:$0xff]  ;;  %v18970_v24 = vcombine.high %v1597_v18, %v1613_v19 }
 0x1a0   :  { %v18972_v25 = vcombine.high %v1598_v20, %v1614_v21 }
 0x1a1   :  { %12971 = vmatpush1.bf16.msra.mxu0 %v18777_v28  ;;  %13135 = vmatpush1.bf16.msra.mxu1 %v18779_v29  ;;  %v1630_v28 = vld [vmem:[#allocation8 + $0x2508] sm:$0xff] }
 0x1a2   :  { %12972 = vmatprep.subr.bf16.mxu0 %v18810_v30  ;;  %13136 = vmatprep.subr.bf16.mxu1 %v18812_v31  ;;  %v1646_v29 = vld [vmem:[#allocation8 + $0x2588] sm:$0xff]  ;;  %v18969_v30 = vcombine.low %v1597_v18, %v1613_v19  ;;  %v18971_v31 = vcombine.low %v1598_v20, %v1614_v21  ;;  %v1805_v18 = vld [vmem:[#allocation8 + $0x2a80] sm:$0xff] }
 0x1a3   :  { %v19004_v33 = vcombine.high %v1630_v28, %v1646_v29  ;;  %v1790_v19 = vld [vmem:[#allocation8 + $0x2a08] sm:$0xff] }
 0x1a4   :  { %v1806_v20 = vld [vmem:[#allocation8 + $0x2a88] sm:$0xff] }
 0x1a5   :  { %12973 = vmatpush1.bf16.msra.mxu0 %v18809_v38  ;;  %13137 = vmatpush1.bf16.msra.mxu1 %v18811_v39  ;;  %v19001_v38 = vcombine.low %v1629_v26, %v1645_v27  ;;  %v19003_v39 = vcombine.low %v1630_v28, %v1646_v29  ;;  %v1837_v26 = vld [vmem:[#allocation8 + $0x2b80] sm:$0xff]  ;;  %v1822_v27 = vld [vmem:[#allocation8 + $0x2b08] sm:$0xff] }
 0x1a6   :  { %12983 = vmatprep.subr.bf16.mxu0 %v18842_v55  ;;  %13147 = vmatprep.subr.bf16.mxu1 %v18844_v40  ;;  %v19034_v55 = vcombine.high %v1661_v34, %v1677_v35  ;;  %v19036_v40 = vcombine.high %v1662_v36, %v1678_v37  ;;  %v1838_v28 = vld [vmem:[#allocation8 + $0x2b88] sm:$0xff]  ;;  %v1869_v34 = vld [vmem:[#allocation8 + $0x2c80] sm:$0xff] }
 0x1a7   :  { %v1854_v35 = vld [vmem:[#allocation8 + $0x2c08] sm:$0xff] }
 0x1a8   :  { %12975 = vmatmul.mubr.bf16.vlgmr.msra.gmra.mrb[8].mxu0 %v22926_v51  ;;  %13139 = vmatmul.mubr.bf16.vlgmr.msra.gmra.mrb[8].mxu1 %v22926_v51 }
 0x1a9   :  { %12984 = vmatpush1.bf16.msra.mxu0 %v18841_v52  ;;  %13148 = vmatpush1.bf16.msra.mxu1 %v18843_v16  ;;  %v19035_v52 = vcombine.low %v1662_v36, %v1678_v37  ;;  %v19066_v16 = vcombine.high %v1693_v41, %v1709_v42  ;;  %v1870_v36 = vld [vmem:[#allocation8 + $0x2c88] sm:$0xff]  ;;  %v1901_v41 = vld [vmem:[#allocation8 + $0x2d80] sm:$0xff] }
 0x1aa   :  { %12985 = vmatprep.subr.bf16.mxu0 %v18874_v53  ;;  %13149 = vmatprep.subr.bf16.mxu1 %v18876_v54  ;;  %v19068_v53 = vcombine.high %v1694_v43, %v1710_v49  ;;  %v1725_v54 = vld [vmem:[#allocation8 + $0x2800] sm:$0xff]  ;;  %v1886_v42 = vld [vmem:[#allocation8 + $0x2d08] sm:$0xff] }
 0x1ab   :  { %13015 = vmatprep.mubr.bf16.mxu0 %v22928_v61  ;;  %13179 = vmatprep.mubr.bf16.mxu1 %v22928_v61  ;;  %v19097_v9 = vcombine.low %v1725_v54, %v1741_v56 }
 0x1ad   :  { %12986 = vmatpush1.bf16.msra.mxu0 %v18873_v62  ;;  %13150 = vmatpush1.bf16.msra.mxu1 %v18875_v0  ;;  %v19067_v62 = vcombine.low %v1694_v43, %v1710_v49  ;;  %v19098_v0 = vcombine.high %v1725_v54, %v1741_v56  ;;  %v1902_v43 = vld [vmem:[#allocation8 + $0x2d88] sm:$0xff]  ;;  %v22935_v49 = vsub.s32 4, %v22873_v44  ;;  %v1917_v54 = vld [vmem:[#allocation8 + $0x2e00] sm:$0xff] }
 0x1ae   :  { %12987 = vmatprep.subr.bf16.mxu0 %v18906_v1  ;;  %13151 = vmatprep.subr.bf16.mxu1 %v18908_v3  ;;  %v19100_v1 = vcombine.high %v1726_v57, %v1742_v58  ;;  %v1757_v3 = vld [vmem:[#allocation8 + $0x2900] sm:$0xff] }
 0x1af   :  { %v19129_v21 = vcombine.low %v1757_v3, %v1773_v4  ;;  %v1933_v56 = vld [vmem:[#allocation8 + $0x2e80] sm:$0xff] }
 0x1b1   :  { %12988 = vmatpush1.bf16.msra.mxu0 %v18905_v10  ;;  %13152 = vmatpush1.bf16.msra.mxu1 %v18907_v11  ;;  %v19099_v10 = vcombine.low %v1726_v57, %v1742_v58  ;;  %v19130_v11 = vcombine.high %v1757_v3, %v1773_v4  ;;  %v1918_v57 = vld [vmem:[#allocation8 + $0x2e08] sm:$0xff]  ;;  %v19290_v3 = vcombine.high %v1917_v54, %v1933_v56 }
 0x1b2   :  { %12989 = vmatprep.subr.bf16.mxu0 %v18938_v12  ;;  %13153 = vmatprep.subr.bf16.mxu1 %v18940_v17  ;;  %v19132_v12 = vcombine.high %v1758_v5, %v1774_v8  ;;  %v1789_v17 = vld [vmem:[#allocation8 + $0x2a00] sm:$0xff]  ;;  %v1934_v58 = vld [vmem:[#allocation8 + $0x2e88] sm:$0xff] }
 0x1b3   :  { %v19161_v29 = vcombine.low %v1789_v17, %v1805_v18  ;;  %v19292_v4 = vcombine.high %v1918_v57, %v1934_v58 }
 0x1b5   :  { %12990 = vmatpush1.bf16.msra.mxu0 %v18937_v22  ;;  %13154 = vmatpush1.bf16.msra.mxu1 %v18939_v23  ;;  %v19131_v22 = vcombine.low %v1758_v5, %v1774_v8  ;;  %v19162_v23 = vcombine.high %v1789_v17, %v1805_v18  ;;  %v1949_v5 = vld [vmem:[#allocation8 + $0x2f00] sm:$0xff]  ;;  %v19289_v17 = vcombine.low %v1917_v54, %v1933_v56  ;;  %v2078_v54 = vld [vmem:[#allocation8 + $0x3308] sm:$0xff] }
 0x1b6   :  { %12991 = vmatprep.subr.bf16.mxu0 %v18970_v24  ;;  %13155 = vmatprep.subr.bf16.mxu1 %v18972_v25  ;;  %v19164_v24 = vcombine.high %v1790_v19, %v1806_v20  ;;  %v1821_v25 = vld [vmem:[#allocation8 + $0x2b00] sm:$0xff]  ;;  %v19291_v18 = vcombine.low %v1918_v57, %v1934_v58  ;;  %v2094_v56 = vld [vmem:[#allocation8 + $0x3388] sm:$0xff] }
 0x1b7   :  { %v19193_v37 = vcombine.low %v1821_v25, %v1837_v26  ;;  %v1965_v8 = vld [vmem:[#allocation8 + $0x2f80] sm:$0xff] }
 0x1b9   :  { %12992 = vmatpush1.bf16.msra.mxu0 %v18969_v30  ;;  %13156 = vmatpush1.bf16.msra.mxu1 %v18971_v31  ;;  %v19163_v30 = vcombine.low %v1790_v19, %v1806_v20  ;;  %v19194_v31 = vcombine.high %v1821_v25, %v1837_v26  ;;  %v19322_v19 = vcombine.high %v1949_v5, %v1965_v8 }
 0x1ba   :  { %12993 = vmatprep.subr.bf16.mxu0 %v19002_v32  ;;  %13157 = vmatprep.subr.bf16.mxu1 %v19004_v33  ;;  %v19196_v32 = vcombine.high %v1822_v27, %v1838_v28  ;;  %v1853_v33 = vld [vmem:[#allocation8 + $0x2c00] sm:$0xff] }
 0x1bd   :  { %12994 = vmatpush1.bf16.msra.mxu0 %v19001_v38  ;;  %13158 = vmatpush1.bf16.msra.mxu1 %v19003_v39  ;;  %v19195_v38 = vcombine.low %v1822_v27, %v1838_v28  ;;  %v19226_v39 = vcombine.high %v1853_v33, %v1869_v34 }
 0x1be   :  { %12995 = vmatprep.subr.bf16.mxu0 %v19034_v55  ;;  %13159 = vmatprep.subr.bf16.mxu1 %v19036_v40  ;;  %v19228_v55 = vcombine.high %v1854_v35, %v1870_v36  ;;  %v1885_v40 = vld [vmem:[#allocation8 + $0x2d00] sm:$0xff] }
 0x1c1   :  { %12996 = vmatpush1.bf16.msra.mxu0 %v19033_v50  ;;  %13160 = vmatpush1.bf16.msra.mxu1 %v19035_v52  ;;  %v19225_v50 = vcombine.low %v1853_v33, %v1869_v34  ;;  %v19227_v52 = vcombine.low %v1854_v35, %v1870_v36 }
 0x1c2   :  { %12997 = vmatprep.subr.bf16.mxu0 %v19066_v16  ;;  %13161 = vmatprep.subr.bf16.mxu1 %v19068_v53  ;;  %v19258_v16 = vcombine.high %v1885_v40, %v1901_v41  ;;  %v19260_v53 = vcombine.high %v1886_v42, %v1902_v43 }
 0x1c5   :  { %12998 = vmatpush1.bf16.msra.mxu0 %v19065_v60  ;;  %13162 = vmatpush1.bf16.msra.mxu1 %v19067_v62  ;;  %v22938_v60 = vsub.s32 7, %v22873_v44  ;;  %v155_v62 = vrot.slane %v22878_v46, %v22935_v49 }
 0x1c6   :  { %12999 = vmatprep.subr.bf16.mxu0 %v19098_v0  ;;  %13163 = vmatprep.subr.bf16.mxu1 %v19100_v1  ;;  %v19257_v0 = vcombine.low %v1885_v40, %v1901_v41  ;;  %v19259_v1 = vcombine.low %v1886_v42, %v1902_v43  ;;  %v2062_v40 = vld [vmem:[#allocation8 + $0x3288] sm:$0xff] }
 0x1c9   :  { %13000 = vmatpush1.bf16.msra.mxu0 %v19097_v9  ;;  %13164 = vmatpush1.bf16.msra.mxu1 %v19099_v10  ;;  %v1950_v9 = vld [vmem:[#allocation8 + $0x2f08] sm:$0xff] }
 0x1ca   :  { %13001 = vmatprep.subr.bf16.mxu0 %v19130_v11  ;;  %13165 = vmatprep.subr.bf16.mxu1 %v19132_v12  ;;  %v1966_v10 = vld [vmem:[#allocation8 + $0x2f88] sm:$0xff]  ;;  %v167_v11 = vrot.slane %v22878_v46, %v22938_v60  ;;  %v382_v12 = vadd.f32 %v22902_v15, %v155_v62  ;;  %v19321_v46 = vcombine.low %v1949_v5, %v1965_v8 }
 0x1cb   :  { %v19324_v20 = vcombine.high %v1950_v9, %v1966_v10  ;;  %v19323_v27 = vcombine.low %v1950_v9, %v1966_v10  ;;  %v2126_v5 = vld [vmem:[#allocation8 + $0x3488] sm:$0xff]  ;;  %v19451_v9 = vcombine.low %v2078_v54, %v2094_v56 }
 0x1cc   :  { %v425_v25 = vadd.f32 %v22912_v63, %v167_v11  ;;  %v433_v26 = vmax.f32 %v382_v12, 0.0  ;;  %v2141_v12 = vld [vmem:[#allocation8 + $0x3500] sm:$0xff] }
 0x1cd   :  { %13002 = vmatpush1.bf16.msra.mxu0 %v19129_v21  ;;  %13166 = vmatpush1.bf16.msra.mxu1 %v19131_v22  ;;  %v1981_v21 = vld [vmem:[#allocation8 + $0x3000] sm:$0xff] }
 0x1ce   :  { %13003 = vmatprep.subr.bf16.mxu0 %v19162_v23  ;;  %13167 = vmatprep.subr.bf16.mxu1 %v19164_v24  ;;  %v1997_v22 = vld [vmem:[#allocation8 + $0x3080] sm:$0xff]  ;;  %v1982_v23 = vld [vmem:[#allocation8 + $0x3008] sm:$0xff]  ;;  %v436_v33 = vmax.f32 %v425_v25, 0.0  ;;  %v22946_v34 = vpack.c.bf16 %v433_v26, %v433_v26 }
 0x1cf   :  { %v1998_v24 = vld [vmem:[#allocation8 + $0x3088] sm:$0xff]  ;;  %v19354_v15 = vcombine.high %v1981_v21, %v1997_v22  ;;  %v19353_v35 = vcombine.low %v1981_v21, %v1997_v22  ;;  %v2189_v25 = vld [vmem:[#allocation8 + $0x3680] sm:$0xff] }
 0x1d0   :  { %v19356_v28 = vcombine.high %v1982_v23, %v1998_v24  ;;  %v19355_v63 = vcombine.low %v1982_v23, %v1998_v24  ;;  %v22948_v41 = vpack.c.bf16 %v436_v33, %v436_v33  ;;  %v2173_v24 = vld [vmem:[#allocation8 + $0x3600] sm:$0xff]  ;;  %v2174_v26 = vld [vmem:[#allocation8 + $0x3608] sm:$0xff] }
 0x1d1   :  { %13004 = vmatpush1.bf16.msra.mxu0 %v19161_v29  ;;  %13168 = vmatpush1.bf16.msra.mxu1 %v19163_v30  ;;  %v2013_v29 = vld [vmem:[#allocation8 + $0x3100] sm:$0xff]  ;;  %v2222_v33 = vld [vmem:[#allocation8 + $0x3788] sm:$0xff] }
 0x1d2   :  { %13005 = vmatprep.subr.bf16.mxu0 %v19194_v31  ;;  %13169 = vmatprep.subr.bf16.mxu1 %v19196_v32  ;;  %v2029_v30 = vld [vmem:[#allocation8 + $0x3180] sm:$0xff]  ;;  %v2014_v31 = vld [vmem:[#allocation8 + $0x3108] sm:$0xff] }
 0x1d3   :  { %v2030_v32 = vld [vmem:[#allocation8 + $0x3188] sm:$0xff]  ;;  %v19386_v36 = vcombine.high %v2013_v29, %v2029_v30  ;;  %v19385_v42 = vcombine.low %v2013_v29, %v2029_v30  ;;  %v2205_v30 = vld [vmem:[#allocation8 + $0x3700] sm:$0xff] }
 0x1d4   :  { %v19387_v43 = vcombine.low %v2014_v31, %v2030_v32 }
 0x1d5   :  { %13006 = vmatpush1.bf16.msra.mxu0 %v19193_v37  ;;  %13170 = vmatpush1.bf16.msra.mxu1 %v19195_v38  ;;  %v19388_v37 = vcombine.high %v2014_v31, %v2030_v32  ;;  %v2045_v38 = vld [vmem:[#allocation8 + $0x3200] sm:$0xff]  ;;  %v2206_v32 = vld [vmem:[#allocation8 + $0x3708] sm:$0xff] }
 0x1d6   :  { %13007 = vmatprep.subr.bf16.mxu0 %v19226_v39  ;;  %13171 = vmatprep.subr.bf16.mxu1 %v19228_v55  ;;  %v2061_v39 = vld [vmem:[#allocation8 + $0x3280] sm:$0xff]  ;;  %v2046_v55 = vld [vmem:[#allocation8 + $0x3208] sm:$0xff] }
 0x1d7   :  { %v19417_v57 = vcombine.low %v2045_v38, %v2061_v39  ;;  %v19419_v58 = vcombine.low %v2046_v55, %v2062_v40  ;;  %v2221_v31 = vld [vmem:[#allocation8 + $0x3780] sm:$0xff] }
 0x1d9   :  { %13008 = vmatpush1.bf16.msra.mxu0 %v19225_v50  ;;  %13172 = vmatpush1.bf16.msra.mxu1 %v19227_v52  ;;  %v19418_v50 = vcombine.high %v2045_v38, %v2061_v39  ;;  %v19420_v52 = vcombine.high %v2046_v55, %v2062_v40  ;;  %v2237_v38 = vld [vmem:[#allocation8 + $0x3800] sm:$0xff]  ;;  %v2238_v55 = vld [vmem:[#allocation8 + $0x3808] sm:$0xff] }
 0x1da   :  { %13009 = vmatprep.subr.bf16.mxu0 %v19258_v16  ;;  %13173 = vmatprep.subr.bf16.mxu1 %v19260_v53  ;;  %v2077_v16 = vld [vmem:[#allocation8 + $0x3300] sm:$0xff]  ;;  %v2254_v40 = vld [vmem:[#allocation8 + $0x3888] sm:$0xff] }
 0x1db   :  { %v2093_v53 = vld [vmem:[#allocation8 + $0x3380] sm:$0xff] }
 0x1dc   :  { %v19450_v62 = vcombine.high %v2077_v16, %v2093_v53  ;;  %v19449_v8 = vcombine.low %v2077_v16, %v2093_v53  ;;  %v2253_v39 = vld [vmem:[#allocation8 + $0x3880] sm:$0xff] }
 0x1dd   :  { %13010 = vmatpush1.bf16.msra.mxu0 %v19257_v0  ;;  %13174 = vmatpush1.bf16.msra.mxu1 %v19259_v1  ;;  %v19452_v0 = vcombine.high %v2078_v54, %v2094_v56  ;;  %v2109_v1 = vld [vmem:[#allocation8 + $0x3400] sm:$0xff]  ;;  %v2270_v54 = vld [vmem:[#allocation8 + $0x3908] sm:$0xff] }
 0x1de   :  { %13011 = vmatprep.subr.bf16.mxu0 %v19290_v3  ;;  %13175 = vmatprep.subr.bf16.mxu1 %v19292_v4  ;;  %v2125_v3 = vld [vmem:[#allocation8 + $0x3480] sm:$0xff]  ;;  %v2110_v4 = vld [vmem:[#allocation8 + $0x3408] sm:$0xff] }
 0x1df   :  { %v19482_v10 = vcombine.high %v2109_v1, %v2125_v3  ;;  %v19484_v11 = vcombine.high %v2110_v4, %v2126_v5  ;;  %v19483_v21 = vcombine.low %v2110_v4, %v2126_v5  ;;  %v2269_v16 = vld [vmem:[#allocation8 + $0x3900] sm:$0xff]  ;;  %v2286_v56 = vld [vmem:[#allocation8 + $0x3988] sm:$0xff] }
 0x1e0   :  { %v2285_v53 = vld [vmem:[#allocation8 + $0x3980] sm:$0xff]  ;;  %v2302_v4 = vld [vmem:[#allocation8 + $0x3a08] sm:$0xff] }
 0x1e1   :  { %13012 = vmatpush1.bf16.msra.mxu0 %v19289_v17  ;;  %13176 = vmatpush1.bf16.msra.mxu1 %v19291_v18  ;;  %v2157_v17 = vld [vmem:[#allocation8 + $0x3580] sm:$0xff]  ;;  %v2142_v18 = vld [vmem:[#allocation8 + $0x3508] sm:$0xff] }
 0x1e2   :  { %13013 = vmatprep.subr.bf16.mxu0 %v19322_v19  ;;  %13177 = vmatprep.subr.bf16.mxu1 %v19324_v20  ;;  %v2158_v19 = vld [vmem:[#allocation8 + $0x3588] sm:$0xff]  ;;  %v19481_v20 = vcombine.low %v2109_v1, %v2125_v3  ;;  %v19514_v22 = vcombine.high %v2141_v12, %v2157_v17  ;;  %v2301_v1 = vld [vmem:[#allocation8 + $0x3a00] sm:$0xff] }
 0x1e3   :  { %v19516_v23 = vcombine.high %v2142_v18, %v2158_v19  ;;  %v2317_v3 = vld [vmem:[#allocation8 + $0x3a80] sm:$0xff]  ;;  %v2318_v5 = vld [vmem:[#allocation8 + $0x3a88] sm:$0xff] }
 0x1e5   :  { %13014 = vmatpush1.bf16.msra.mxu0 %v19321_v46  ;;  %13178 = vmatpush1.bf16.msra.mxu1 %v19323_v27  ;;  %v2190_v46 = vld [vmem:[#allocation8 + $0x3688] sm:$0xff]  ;;  %v19513_v27 = vcombine.low %v2141_v12, %v2157_v17  ;;  %v2333_v12 = vld [vmem:[#allocation8 + $0x3b00] sm:$0xff] }
 0x1e6   :  { %13024 = vmatprep.subr.bf16.mxu0 %v19354_v15  ;;  %13188 = vmatprep.subr.bf16.mxu1 %v19356_v28  ;;  %v19515_v15 = vcombine.low %v2142_v18, %v2158_v19  ;;  %v19546_v28 = vcombine.high %v2173_v24, %v2189_v25  ;;  %v19548_v29 = vcombine.high %v2174_v26, %v2190_v46  ;;  %v2349_v17 = vld [vmem:[#allocation8 + $0x3b80] sm:$0xff]  ;;  %v2334_v18 = vld [vmem:[#allocation8 + $0x3b08] sm:$0xff] }
 0x1e7   :  { %v2350_v19 = vld [vmem:[#allocation8 + $0x3b88] sm:$0xff] }
 0x1e8   :  { %13016 = vmatmul.mubr.bf16.vlgmr.msra.gmra.mrb[8].mxu0 %v22946_v34  ;;  %13180 = vmatmul.mubr.bf16.vlgmr.msra.gmra.mrb[8].mxu1 %v22946_v34 }
 0x1e9   :  { %13025 = vmatpush1.bf16.msra.mxu0 %v19353_v35  ;;  %13189 = vmatpush1.bf16.msra.mxu1 %v19355_v63  ;;  %v19545_v35 = vcombine.low %v2173_v24, %v2189_v25  ;;  %v19547_v63 = vcombine.low %v2174_v26, %v2190_v46  ;;  %v2365_v24 = vld [vmem:[#allocation8 + $0x3c00] sm:$0xff]  ;;  %v2366_v26 = vld [vmem:[#allocation8 + $0x3c08] sm:$0xff] }
 0x1ea   :  { %13026 = vmatprep.subr.bf16.mxu0 %v19386_v36  ;;  %13190 = vmatprep.subr.bf16.mxu1 %v19388_v37  ;;  %v19578_v36 = vcombine.high %v2205_v30, %v2221_v31  ;;  %v19580_v37 = vcombine.high %v2206_v32, %v2222_v33  ;;  %v2381_v25 = vld [vmem:[#allocation8 + $0x3c80] sm:$0xff]  ;;  %v2382_v46 = vld [vmem:[#allocation8 + $0x3c88] sm:$0xff] }
 0x1eb   :  { %13056 = vmatprep.mubr.bf16.mxu0 %v22948_v41  ;;  %13220 = vmatprep.mubr.bf16.mxu1 %v22948_v41 }
 0x1ed   :  { %13027 = vmatpush1.bf16.msra.mxu0 %v19385_v42  ;;  %13191 = vmatpush1.bf16.msra.mxu1 %v19387_v43  ;;  %v19577_v42 = vcombine.low %v2205_v30, %v2221_v31  ;;  %v19579_v43 = vcombine.low %v2206_v32, %v2222_v33  ;;  %v2397_v30 = vld [vmem:[#allocation8 + $0x3d00] sm:$0xff]  ;;  %v2398_v32 = vld [vmem:[#allocation8 + $0x3d08] sm:$0xff] }
 0x1ee   :  { %13028 = vmatprep.subr.bf16.mxu0 %v19418_v50  ;;  %13192 = vmatprep.subr.bf16.mxu1 %v19420_v52  ;;  %v19610_v50 = vcombine.high %v2237_v38, %v2253_v39  ;;  %v19612_v52 = vcombine.high %v2238_v55, %v2254_v40  ;;  %v2413_v31 = vld [vmem:[#allocation8 + $0x3d80] sm:$0xff]  ;;  %v2414_v33 = vld [vmem:[#allocation8 + $0x3d88] sm:$0xff] }
 0x1f1   :  { %13029 = vmatpush1.bf16.msra.mxu0 %v19417_v57  ;;  %13193 = vmatpush1.bf16.msra.mxu1 %v19419_v58  ;;  %v19609_v57 = vcombine.low %v2237_v38, %v2253_v39  ;;  %v19611_v58 = vcombine.low %v2238_v55, %v2254_v40  ;;  %v19772_v38 = vcombine.high %v2398_v32, %v2414_v33  ;;  %v2429_v39 = vld [vmem:[#allocation8 + $0x3e00] sm:$0xff]  ;;  %v2430_v40 = vld [vmem:[#allocation8 + $0x3e08] sm:$0xff] }
 0x1f2   :  { %13030 = vmatprep.subr.bf16.mxu0 %v19450_v62  ;;  %13194 = vmatprep.subr.bf16.mxu1 %v19452_v0  ;;  %v19642_v62 = vcombine.high %v2269_v16, %v2285_v53  ;;  %v19644_v0 = vcombine.high %v2270_v54, %v2286_v56  ;;  %v2445_v55 = vld [vmem:[#allocation8 + $0x3e80] sm:$0xff] }
 0x1f5   :  { %13031 = vmatpush1.bf16.msra.mxu0 %v19449_v8  ;;  %13195 = vmatpush1.bf16.msra.mxu1 %v19451_v9  ;;  %v19641_v8 = vcombine.low %v2269_v16, %v2285_v53  ;;  %v19643_v9 = vcombine.low %v2270_v54, %v2286_v56  ;;  %v19802_v53 = vcombine.high %v2429_v39, %v2445_v55  ;;  %v2461_v54 = vld [vmem:[#allocation8 + $0x3f00] sm:$0xff] }
 0x1f6   :  { %13032 = vmatprep.subr.bf16.mxu0 %v19482_v10  ;;  %13196 = vmatprep.subr.bf16.mxu1 %v19484_v11  ;;  %v19674_v10 = vcombine.high %v2301_v1, %v2317_v3  ;;  %v19676_v11 = vcombine.high %v2302_v4, %v2318_v5  ;;  %v2477_v56 = vld [vmem:[#allocation8 + $0x3f80] sm:$0xff] }
 0x1f9   :  { %13033 = vmatpush1.bf16.msra.mxu0 %v19481_v20  ;;  %13197 = vmatpush1.bf16.msra.mxu1 %v19483_v21  ;;  %v19673_v20 = vcombine.low %v2301_v1, %v2317_v3  ;;  %v19675_v21 = vcombine.low %v2302_v4, %v2318_v5  ;;  %v19834_v3 = vcombine.high %v2461_v54, %v2477_v56  ;;  %v447_v5 = vld [vmem:[#allocation8 + $0x10] sm:$0xff] }
 0x1fa   :  { %13034 = vmatprep.subr.bf16.mxu0 %v19514_v22  ;;  %13198 = vmatprep.subr.bf16.mxu1 %v19516_v23  ;;  %v19706_v22 = vcombine.high %v2333_v12, %v2349_v17  ;;  %v19708_v23 = vcombine.high %v2334_v18, %v2350_v19 }
 0x1fd   :  { %13035 = vmatpush1.bf16.msra.mxu0 %v19513_v27  ;;  %13199 = vmatpush1.bf16.msra.mxu1 %v19515_v15  ;;  %v19705_v27 = vcombine.low %v2333_v12, %v2349_v17  ;;  %v19707_v15 = vcombine.low %v2334_v18, %v2350_v19 }
 0x1fe   :  { %13036 = vmatprep.subr.bf16.mxu0 %v19546_v28  ;;  %13200 = vmatprep.subr.bf16.mxu1 %v19548_v29  ;;  %v19738_v28 = vcombine.high %v2365_v24, %v2381_v25  ;;  %v19740_v29 = vcombine.high %v2366_v26, %v2382_v46 }
 0x201   :  { %13037 = vmatpush1.bf16.msra.mxu0 %v19545_v35  ;;  %13201 = vmatpush1.bf16.msra.mxu1 %v19547_v63  ;;  %v19737_v35 = vcombine.low %v2365_v24, %v2381_v25  ;;  %v19739_v63 = vcombine.low %v2366_v26, %v2382_v46 }
 0x202   :  { %13038 = vmatprep.subr.bf16.mxu0 %v19578_v36  ;;  %13202 = vmatprep.subr.bf16.mxu1 %v19580_v37  ;;  %v22955_v36 = vsub.s32 6, %v22873_v44  ;;  %v19770_v37 = vcombine.high %v2397_v30, %v2413_v31 }
 0x205   :  { %13039 = vmatpush1.bf16.msra.mxu0 %v19577_v42  ;;  %13203 = vmatpush1.bf16.msra.mxu1 %v19579_v43  ;;  %v2446_v42 = vld [vmem:[#allocation8 + $0x3e88] sm:$0xff]  ;;  %v19769_v43 = vcombine.low %v2397_v30, %v2413_v31 }
 0x206   :  { %13040 = vmatprep.subr.bf16.mxu0 %v19610_v50  ;;  %13204 = vmatprep.subr.bf16.mxu1 %v19612_v52  ;;  %v19771_v50 = vcombine.low %v2398_v32, %v2414_v33  ;;  %v22472_v52 = vld [vmem:[#allocation7] sm:$0xff]  ;;  %v19804_v44 = vcombine.high %v2430_v40, %v2446_v42 }
 0x207   :  { %v163_v16 = vrot.slane %v22472_v52, %v22955_v36  ;;  %v576_v52 = vld [vmem:[#allocation8 + $0x418] sm:$0xff] }
 0x209   :  { %13041 = vmatpush1.bf16.msra.mxu0 %v19609_v57  ;;  %13205 = vmatpush1.bf16.msra.mxu1 %v19611_v58  ;;  %v2462_v57 = vld [vmem:[#allocation8 + $0x3f08] sm:$0xff]  ;;  %v423_v1 = vadd.f32 %v22910_v59, %v163_v16  ;;  %v480_v59 = vld [vmem:[#allocation8 + $0x118] sm:$0xff] }
 0x20a   :  { %13042 = vmatprep.subr.bf16.mxu0 %v19642_v62  ;;  %13206 = vmatprep.subr.bf16.mxu1 %v19644_v0  ;;  %v2478_v58 = vld [vmem:[#allocation8 + $0x3f88] sm:$0xff]  ;;  %v19801_v62 = vcombine.low %v2429_v39, %v2445_v55  ;;  %v19803_v0 = vcombine.low %v2430_v40, %v2446_v42  ;;  %v592_v16 = vld [vmem:[#allocation8 + $0x498] sm:$0xff] }
 0x20b   :  { %v19836_v4 = vcombine.high %v2462_v57, %v2478_v58  ;;  %v19835_v12 = vcombine.low %v2462_v57, %v2478_v58  ;;  %v435_v17 = vmax.f32 %v423_v1, 0.0  ;;  %v607_v57 = vld [vmem:[#allocation8 + $0x510] sm:$0xff] }
 0x20c   :  { %v623_v58 = vld [vmem:[#allocation8 + $0x590] sm:$0xff] }
 0x20d   :  { %13043 = vmatpush1.bf16.msra.mxu0 %v19641_v8  ;;  %13207 = vmatpush1.bf16.msra.mxu1 %v19643_v9  ;;  %v463_v8 = vld [vmem:[#allocation8 + $0x90] sm:$0xff]  ;;  %v448_v9 = vld [vmem:[#allocation8 + $0x18] sm:$0xff]  ;;  %v22959_v24 = vpack.c.bf16 %v435_v17, %v435_v17 }
 0x20e   :  { %13044 = vmatprep.subr.bf16.mxu0 %v19674_v10  ;;  %13208 = vmatprep.subr.bf16.mxu1 %v19676_v11  ;;  %v464_v10 = vld [vmem:[#allocation8 + $0x98] sm:$0xff]  ;;  %v19833_v11 = vcombine.low %v2461_v54, %v2477_v56  ;;  %v17822_v18 = vcombine.high %v447_v5, %v463_v8  ;;  %v17952_v56 = vcombine.high %v576_v52, %v592_v16 }
 0x20f   :  { %v17824_v19 = vcombine.high %v448_v9, %v464_v10  ;;  %v17823_v25 = vcombine.low %v448_v9, %v464_v10  ;;  %v655_v9 = vld [vmem:[#allocation8 + $0x690] sm:$0xff]  ;;  %v640_v10 = vld [vmem:[#allocation8 + $0x618] sm:$0xff] }
 0x211   :  { %13045 = vmatpush1.bf16.msra.mxu0 %v19673_v20  ;;  %13209 = vmatpush1.bf16.msra.mxu1 %v19675_v21  ;;  %v479_v20 = vld [vmem:[#allocation8 + $0x110] sm:$0xff] }
 0x212   :  { %13046 = vmatprep.subr.bf16.mxu0 %v19706_v22  ;;  %13210 = vmatprep.subr.bf16.mxu1 %v19708_v23  ;;  %v495_v21 = vld [vmem:[#allocation8 + $0x190] sm:$0xff]  ;;  %v496_v22 = vld [vmem:[#allocation8 + $0x198] sm:$0xff]  ;;  %v17821_v23 = vcombine.low %v447_v5, %v463_v8 }
 0x213   :  { %v17854_v26 = vcombine.high %v479_v20, %v495_v21  ;;  %v17856_v46 = vcombine.high %v480_v59, %v496_v22  ;;  %v17853_v30 = vcombine.low %v479_v20, %v495_v21  ;;  %v17855_v31 = vcombine.low %v480_v59, %v496_v22  ;;  %v639_v8 = vld [vmem:[#allocation8 + $0x610] sm:$0xff]  ;;  %v672_v59 = vld [vmem:[#allocation8 + $0x718] sm:$0xff] }
 0x214   :  { %v671_v20 = vld [vmem:[#allocation8 + $0x710] sm:$0xff]  ;;  %v688_v22 = vld [vmem:[#allocation8 + $0x798] sm:$0xff] }
 0x215   :  { %13047 = vmatpush1.bf16.msra.mxu0 %v19705_v27  ;;  %13211 = vmatpush1.bf16.msra.mxu1 %v19707_v15  ;;  %v511_v27 = vld [vmem:[#allocation8 + $0x210] sm:$0xff] }
 0x216   :  { %13048 = vmatprep.subr.bf16.mxu0 %v19738_v28  ;;  %13212 = vmatprep.subr.bf16.mxu1 %v19740_v29  ;;  %v527_v15 = vld [vmem:[#allocation8 + $0x290] sm:$0xff]  ;;  %v512_v28 = vld [vmem:[#allocation8 + $0x218] sm:$0xff] }
 0x217   :  { %v528_v29 = vld [vmem:[#allocation8 + $0x298] sm:$0xff]  ;;  %v17886_v32 = vcombine.high %v511_v27, %v527_v15  ;;  %v17885_v39 = vcombine.low %v511_v27, %v527_v15  ;;  %v687_v21 = vld [vmem:[#allocation8 + $0x790] sm:$0xff] }
 0x218   :  { %v17888_v33 = vcombine.high %v512_v28, %v528_v29  ;;  %v17887_v55 = vcombine.low %v512_v28, %v528_v29  ;;  %v703_v27 = vld [vmem:[#allocation8 + $0x810] sm:$0xff]  ;;  %v704_v28 = vld [vmem:[#allocation8 + $0x818] sm:$0xff] }
 0x219   :  { %13049 = vmatpush1.bf16.msra.mxu0 %v19737_v35  ;;  %13213 = vmatpush1.bf16.msra.mxu1 %v19739_v63  ;;  %v543_v35 = vld [vmem:[#allocation8 + $0x310] sm:$0xff]  ;;  %v720_v29 = vld [vmem:[#allocation8 + $0x898] sm:$0xff] }
 0x21a   :  { %13050 = vmatprep.subr.bf16.mxu0 %v19770_v37  ;;  %13214 = vmatprep.subr.bf16.mxu1 %v19772_v38  ;;  %v559_v63 = vld [vmem:[#allocation8 + $0x390] sm:$0xff]  ;;  %v544_v37 = vld [vmem:[#allocation8 + $0x318] sm:$0xff] }
 0x21b   :  { %v560_v38 = vld [vmem:[#allocation8 + $0x398] sm:$0xff]  ;;  %v17918_v40 = vcombine.high %v543_v35, %v559_v63  ;;  %v719_v15 = vld [vmem:[#allocation8 + $0x890] sm:$0xff] }
 0x21c   :  { %v17920_v42 = vcombine.high %v544_v37, %v560_v38 }
 0x21d   :  { %13051 = vmatpush1.bf16.msra.mxu0 %v19769_v43  ;;  %13215 = vmatpush1.bf16.msra.mxu1 %v19771_v50  ;;  %v575_v43 = vld [vmem:[#allocation8 + $0x410] sm:$0xff] }
 0x21e   :  { %13052 = vmatprep.subr.bf16.mxu0 %v19802_v53  ;;  %13216 = vmatprep.subr.bf16.mxu1 %v19804_v44  ;;  %v591_v50 = vld [vmem:[#allocation8 + $0x490] sm:$0xff]  ;;  %v17917_v53 = vcombine.low %v543_v35, %v559_v63  ;;  %v17919_v44 = vcombine.low %v544_v37, %v560_v38  ;;  %v736_v37 = vld [vmem:[#allocation8 + $0x918] sm:$0xff] }
 0x21f   :  { %v17950_v54 = vcombine.high %v575_v43, %v591_v50  ;;  %v17949_v1 = vcombine.low %v575_v43, %v591_v50  ;;  %v735_v35 = vld [vmem:[#allocation8 + $0x910] sm:$0xff]  ;;  %v752_v38 = vld [vmem:[#allocation8 + $0x998] sm:$0xff] }
 0x220   :  { %v751_v63 = vld [vmem:[#allocation8 + $0x990] sm:$0xff] }
 0x221   :  { %13053 = vmatpush1.bf16.msra.mxu0 %v19801_v62  ;;  %13217 = vmatpush1.bf16.msra.mxu1 %v19803_v0  ;;  %v608_v62 = vld [vmem:[#allocation8 + $0x518] sm:$0xff]  ;;  %v767_v43 = vld [vmem:[#allocation8 + $0xa10] sm:$0xff] }
 0x222   :  { %13054 = vmatprep.subr.bf16.mxu0 %v19834_v3  ;;  %13218 = vmatprep.subr.bf16.mxu1 %v19836_v4  ;;  %v624_v0 = vld [vmem:[#allocation8 + $0x598] sm:$0xff]  ;;  %v17951_v3 = vcombine.low %v576_v52, %v592_v16  ;;  %v17982_v4 = vcombine.high %v607_v57, %v623_v58  ;;  %v783_v50 = vld [vmem:[#allocation8 + $0xa90] sm:$0xff] }
 0x223   :  { %v17984_v5 = vcombine.high %v608_v62, %v624_v0  ;;  %v17983_v17 = vcombine.low %v608_v62, %v624_v0  ;;  %v768_v52 = vld [vmem:[#allocation8 + $0xa18] sm:$0xff] }
 0x224   :  { %v784_v16 = vld [vmem:[#allocation8 + $0xa98] sm:$0xff] }
 0x225   :  { %13055 = vmatpush1.bf16.msra.mxu0 %v19833_v11  ;;  %13219 = vmatpush1.bf16.msra.mxu1 %v19835_v12  ;;  %v656_v11 = vld [vmem:[#allocation8 + $0x698] sm:$0xff]  ;;  %v17981_v12 = vcombine.low %v607_v57, %v623_v58  ;;  %v799_v57 = vld [vmem:[#allocation8 + $0xb10] sm:$0xff] }
 0x226   :  { %13229 = vmatprep.subr.bf16.mxu0 %v17822_v18  ;;  %13393 = vmatprep.subr.bf16.mxu1 %v17824_v19  ;;  %v18014_v18 = vcombine.high %v639_v8, %v655_v9  ;;  %v18016_v19 = vcombine.high %v640_v10, %v656_v11  ;;  %v815_v58 = vld [vmem:[#allocation8 + $0xb90] sm:$0xff]  ;;  %v800_v62 = vld [vmem:[#allocation8 + $0xb18] sm:$0xff] }
 0x227   :  { %v816_v0 = vld [vmem:[#allocation8 + $0xb98] sm:$0xff] }
 0x228   :  { %13057 = vmatmul.mubr.bf16.vlgmr.msra.gmra.mrb[8].mxu0 %v22959_v24  ;;  %13221 = vmatmul.mubr.bf16.vlgmr.msra.gmra.mrb[8].mxu1 %v22959_v24 }
 0x229   :  { %13230 = vmatpush1.bf16.msra.mxu0 %v17821_v23  ;;  %13261 = vmatprep.mubr.bf16.mxu0 %v22894_v6  ;;  %v18013_v23 = vcombine.low %v639_v8, %v655_v9  ;;  %v831_v8 = vld [vmem:[#allocation8 + $0xc10] sm:$0xff] }
 0x22a   :  { %13394 = vmatpush1.bf16.msra.mxu1 %v17823_v25  ;;  %13425 = vmatprep.mubr.bf16.mxu1 %v22894_v6  ;;  %v18015_v25 = vcombine.low %v640_v10, %v656_v11  ;;  %v847_v9 = vld [vmem:[#allocation8 + $0xc90] sm:$0xff]  ;;  %v832_v10 = vld [vmem:[#allocation8 + $0xc18] sm:$0xff] }
 0x22b   :  { %13231 = vmatprep.subr.bf16.mxu0 %v17854_v26  ;;  %13395 = vmatprep.subr.bf16.mxu1 %v17856_v46  ;;  %v18046_v26 = vcombine.high %v671_v20, %v687_v21  ;;  %v18048_v46 = vcombine.high %v672_v59, %v688_v22  ;;  %v848_v11 = vld [vmem:[#allocation8 + $0xc98] sm:$0xff] }
 0x22d   :  { %13232 = vmatpush1.bf16.msra.mxu0 %v17853_v30  ;;  %v18045_v30 = vcombine.low %v671_v20, %v687_v21  ;;  %v863_v20 = vld [vmem:[#allocation8 + $0xd10] sm:$0xff] }
 0x22e   :  { %13396 = vmatpush1.bf16.msra.mxu1 %v17855_v31  ;;  %13233 = vmatprep.subr.bf16.mxu0 %v17886_v32  ;;  %v18047_v31 = vcombine.low %v672_v59, %v688_v22  ;;  %v18078_v32 = vcombine.high %v703_v27, %v719_v15  ;;  %v879_v21 = vld [vmem:[#allocation8 + $0xd90] sm:$0xff]  ;;  %v864_v59 = vld [vmem:[#allocation8 + $0xd18] sm:$0xff] }
 0x22f   :  { %13397 = vmatprep.subr.bf16.mxu1 %v17888_v33  ;;  %v18080_v33 = vcombine.high %v704_v28, %v720_v29  ;;  %v880_v22 = vld [vmem:[#allocation8 + $0xd98] sm:$0xff] }
 0x231   :  { %13234 = vmatpush1.bf16.msra.mxu0 %v17885_v39  ;;  %v18077_v39 = vcombine.low %v703_v27, %v719_v15  ;;  %v895_v27 = vld [vmem:[#allocation8 + $0xe10] sm:$0xff] }
 0x232   :  { %13398 = vmatpush1.bf16.msra.mxu1 %v17887_v55  ;;  %13235 = vmatprep.subr.bf16.mxu0 %v17918_v40  ;;  %v18079_v55 = vcombine.low %v704_v28, %v720_v29  ;;  %v18110_v40 = vcombine.high %v735_v35, %v751_v63  ;;  %v911_v15 = vld [vmem:[#allocation8 + $0xe90] sm:$0xff]  ;;  %v896_v28 = vld [vmem:[#allocation8 + $0xe18] sm:$0xff] }
 0x233   :  { %13399 = vmatprep.subr.bf16.mxu1 %v17920_v42  ;;  %v18112_v42 = vcombine.high %v736_v37, %v752_v38  ;;  %v912_v29 = vld [vmem:[#allocation8 + $0xe98] sm:$0xff] }
 0x235   :  { %13236 = vmatpush1.bf16.msra.mxu0 %v17917_v53  ;;  %v18109_v53 = vcombine.low %v735_v35, %v751_v63  ;;  %v927_v35 = vld [vmem:[#allocation8 + $0xf10] sm:$0xff] }
 0x236   :  { %13400 = vmatpush1.bf16.msra.mxu1 %v17919_v44  ;;  %13237 = vmatprep.subr.bf16.mxu0 %v17950_v54  ;;  %v18111_v44 = vcombine.low %v736_v37, %v752_v38  ;;  %v18142_v54 = vcombine.high %v767_v43, %v783_v50  ;;  %v943_v63 = vld [vmem:[#allocation8 + $0xf90] sm:$0xff]  ;;  %v928_v37 = vld [vmem:[#allocation8 + $0xf18] sm:$0xff] }
 0x237   :  { %13401 = vmatprep.subr.bf16.mxu1 %v17952_v56  ;;  %v18144_v56 = vcombine.high %v768_v52, %v784_v16  ;;  %v944_v38 = vld [vmem:[#allocation8 + $0xf98] sm:$0xff] }
 0x239   :  { %13238 = vmatpush1.bf16.msra.mxu0 %v17949_v1  ;;  %v18141_v1 = vcombine.low %v767_v43, %v783_v50  ;;  %v959_v43 = vld [vmem:[#allocation8 + $0x1010] sm:$0xff] }
 0x23a   :  { %13402 = vmatpush1.bf16.msra.mxu1 %v17951_v3  ;;  %13239 = vmatprep.subr.bf16.mxu0 %v17982_v4  ;;  %v18143_v3 = vcombine.low %v768_v52, %v784_v16  ;;  %v18174_v4 = vcombine.high %v799_v57, %v815_v58  ;;  %v975_v50 = vld [vmem:[#allocation8 + $0x1090] sm:$0xff]  ;;  %v960_v52 = vld [vmem:[#allocation8 + $0x1018] sm:$0xff] }
 0x23b   :  { %13403 = vmatprep.subr.bf16.mxu1 %v17984_v5  ;;  %v18176_v5 = vcombine.high %v800_v62, %v816_v0  ;;  %v976_v16 = vld [vmem:[#allocation8 + $0x1098] sm:$0xff] }
 0x23d   :  { %13240 = vmatpush1.bf16.msra.mxu0 %v17981_v12  ;;  %v18173_v12 = vcombine.low %v799_v57, %v815_v58  ;;  %v991_v57 = vld [vmem:[#allocation8 + $0x1110] sm:$0xff] }
 0x23e   :  { %13404 = vmatpush1.bf16.msra.mxu1 %v17983_v17  ;;  %13241 = vmatprep.subr.bf16.mxu0 %v18014_v18  ;;  %v18175_v17 = vcombine.low %v800_v62, %v816_v0  ;;  %v18206_v18 = vcombine.high %v831_v8, %v847_v9  ;;  %v1007_v58 = vld [vmem:[#allocation8 + $0x1190] sm:$0xff]  ;;  %v18333_v62 = vcombine.low %v959_v43, %v975_v50  ;;  %v992_v0 = vld [vmem:[#allocation8 + $0x1118] sm:$0xff] }
 0x23f   :  { %13405 = vmatprep.subr.bf16.mxu1 %v18016_v19  ;;  %v18208_v19 = vcombine.high %v832_v10, %v848_v11 }
 0x241   :  { %13242 = vmatpush1.bf16.msra.mxu0 %v18013_v23  ;;  %v18205_v23 = vcombine.low %v831_v8, %v847_v9  ;;  %v1039_v8 = vld [vmem:[#allocation8 + $0x1290] sm:$0xff] }
 0x242   :  { %13406 = vmatpush1.bf16.msra.mxu1 %v18015_v25  ;;  %13243 = vmatprep.subr.bf16.mxu0 %v18046_v26  ;;  %v18207_v25 = vcombine.low %v832_v10, %v848_v11  ;;  %v18238_v26 = vcombine.high %v863_v20, %v879_v21  ;;  %v1024_v10 = vld [vmem:[#allocation8 + $0x1218] sm:$0xff] }
 0x243   :  { %13407 = vmatprep.subr.bf16.mxu1 %v18048_v46  ;;  %v18240_v46 = vcombine.high %v864_v59, %v880_v22  ;;  %v1040_v11 = vld [vmem:[#allocation8 + $0x1298] sm:$0xff] }
 0x245   :  { %13244 = vmatpush1.bf16.msra.mxu0 %v18045_v30  ;;  %v18237_v30 = vcombine.low %v863_v20, %v879_v21  ;;  %v1055_v20 = vld [vmem:[#allocation8 + $0x1310] sm:$0xff] }
 0x246   :  { %13408 = vmatpush1.bf16.msra.mxu1 %v18047_v31  ;;  %13245 = vmatprep.subr.bf16.mxu0 %v18078_v32  ;;  %v18239_v31 = vcombine.low %v864_v59, %v880_v22  ;;  %v18270_v32 = vcombine.high %v895_v27, %v911_v15  ;;  %v1071_v21 = vld [vmem:[#allocation8 + $0x1390] sm:$0xff]  ;;  %v1056_v59 = vld [vmem:[#allocation8 + $0x1318] sm:$0xff] }
 0x247   :  { %13409 = vmatprep.subr.bf16.mxu1 %v18080_v33  ;;  %v18272_v33 = vcombine.high %v896_v28, %v912_v29  ;;  %v1072_v22 = vld [vmem:[#allocation8 + $0x1398] sm:$0xff] }
 0x249   :  { %13246 = vmatpush1.bf16.msra.mxu0 %v18077_v39  ;;  %v18269_v39 = vcombine.low %v895_v27, %v911_v15  ;;  %v1087_v27 = vld [vmem:[#allocation8 + $0x1410] sm:$0xff] }
 0x24a   :  { %13410 = vmatpush1.bf16.msra.mxu1 %v18079_v55  ;;  %13247 = vmatprep.subr.bf16.mxu0 %v18110_v40  ;;  %v18271_v55 = vcombine.low %v896_v28, %v912_v29  ;;  %v18302_v40 = vcombine.high %v927_v35, %v943_v63  ;;  %v1103_v15 = vld [vmem:[#allocation8 + $0x1490] sm:$0xff]  ;;  %v1088_v28 = vld [vmem:[#allocation8 + $0x1418] sm:$0xff] }
 0x24b   :  { %13411 = vmatprep.subr.bf16.mxu1 %v18112_v42  ;;  %v18304_v42 = vcombine.high %v928_v37, %v944_v38  ;;  %v1104_v29 = vld [vmem:[#allocation8 + $0x1498] sm:$0xff] }
 0x24d   :  { %13248 = vmatpush1.bf16.msra.mxu0 %v18109_v53  ;;  %v18301_v53 = vcombine.low %v927_v35, %v943_v63  ;;  %v1119_v35 = vld [vmem:[#allocation8 + $0x1510] sm:$0xff] }
 0x24e   :  { %13412 = vmatpush1.bf16.msra.mxu1 %v18111_v44  ;;  %13249 = vmatprep.subr.bf16.mxu0 %v18142_v54  ;;  %v18303_v44 = vcombine.low %v928_v37, %v944_v38  ;;  %v18334_v54 = vcombine.high %v959_v43, %v975_v50  ;;  %v1135_v63 = vld [vmem:[#allocation8 + $0x1590] sm:$0xff]  ;;  %v1120_v37 = vld [vmem:[#allocation8 + $0x1518] sm:$0xff] }
 0x24f   :  { %13413 = vmatprep.subr.bf16.mxu1 %v18144_v56  ;;  %v18336_v56 = vcombine.high %v960_v52, %v976_v16  ;;  %v1136_v38 = vld [vmem:[#allocation8 + $0x1598] sm:$0xff]  ;;  %v1151_v43 = vld [vmem:[#allocation8 + $0x1610] sm:$0xff] }
 0x250   :  { %v1167_v50 = vld [vmem:[#allocation8 + $0x1690] sm:$0xff] }
 0x251   :  { %13250 = vmatpush1.bf16.msra.mxu0 %v18141_v1  ;;  %v1008_v1 = vld [vmem:[#allocation8 + $0x1198] sm:$0xff] }
 0x252   :  { %13414 = vmatpush1.bf16.msra.mxu1 %v18143_v3  ;;  %13251 = vmatprep.subr.bf16.mxu0 %v18174_v4  ;;  %v18335_v3 = vcombine.low %v960_v52, %v976_v16  ;;  %v18366_v4 = vcombine.high %v991_v57, %v1007_v58  ;;  %v18368_v9 = vcombine.high %v992_v0, %v1008_v1  ;;  %v1152_v52 = vld [vmem:[#allocation8 + $0x1618] sm:$0xff] }
 0x253   :  { %13415 = vmatprep.subr.bf16.mxu1 %v18176_v5  ;;  %v1023_v5 = vld [vmem:[#allocation8 + $0x1210] sm:$0xff]  ;;  %v1168_v16 = vld [vmem:[#allocation8 + $0x1698] sm:$0xff] }
 0x255   :  { %13252 = vmatpush1.bf16.msra.mxu0 %v18173_v12  ;;  %v18365_v12 = vcombine.low %v991_v57, %v1007_v58  ;;  %v1183_v57 = vld [vmem:[#allocation8 + $0x1710] sm:$0xff] }
 0x256   :  { %13416 = vmatpush1.bf16.msra.mxu1 %v18175_v17  ;;  %13253 = vmatprep.subr.bf16.mxu0 %v18206_v18  ;;  %v18367_v17 = vcombine.low %v992_v0, %v1008_v1  ;;  %v18398_v18 = vcombine.high %v1023_v5, %v1039_v8  ;;  %v1199_v58 = vld [vmem:[#allocation8 + $0x1790] sm:$0xff]  ;;  %v1200_v0 = vld [vmem:[#allocation8 + $0x1798] sm:$0xff]  ;;  %v18525_v1 = vcombine.low %v1151_v43, %v1167_v50 }
 0x257   :  { %13417 = vmatprep.subr.bf16.mxu1 %v18208_v19  ;;  %v18400_v19 = vcombine.high %v1024_v10, %v1040_v11 }
 0x259   :  { %13254 = vmatpush1.bf16.msra.mxu0 %v18205_v23  ;;  %v18397_v23 = vcombine.low %v1023_v5, %v1039_v8  ;;  %v1215_v8 = vld [vmem:[#allocation8 + $0x1810] sm:$0xff] }
 0x25a   :  { %13418 = vmatpush1.bf16.msra.mxu1 %v18207_v25  ;;  %13255 = vmatprep.subr.bf16.mxu0 %v18238_v26  ;;  %v18399_v25 = vcombine.low %v1024_v10, %v1040_v11  ;;  %v18430_v26 = vcombine.high %v1055_v20, %v1071_v21  ;;  %v1216_v10 = vld [vmem:[#allocation8 + $0x1818] sm:$0xff] }
 0x25b   :  { %13419 = vmatprep.subr.bf16.mxu1 %v18240_v46  ;;  %v18432_v46 = vcombine.high %v1056_v59, %v1072_v22  ;;  %v1232_v11 = vld [vmem:[#allocation8 + $0x1898] sm:$0xff] }
 0x25d   :  { %13256 = vmatpush1.bf16.msra.mxu0 %v18237_v30  ;;  %v18429_v30 = vcombine.low %v1055_v20, %v1071_v21  ;;  %v1247_v20 = vld [vmem:[#allocation8 + $0x1910] sm:$0xff] }
 0x25e   :  { %13420 = vmatpush1.bf16.msra.mxu1 %v18239_v31  ;;  %13257 = vmatprep.subr.bf16.mxu0 %v18270_v32  ;;  %v18431_v31 = vcombine.low %v1056_v59, %v1072_v22  ;;  %v18462_v32 = vcombine.high %v1087_v27, %v1103_v15  ;;  %v1263_v21 = vld [vmem:[#allocation8 + $0x1990] sm:$0xff]  ;;  %v1248_v59 = vld [vmem:[#allocation8 + $0x1918] sm:$0xff] }
 0x25f   :  { %13421 = vmatprep.subr.bf16.mxu1 %v18272_v33  ;;  %v18464_v33 = vcombine.high %v1088_v28, %v1104_v29  ;;  %v1264_v22 = vld [vmem:[#allocation8 + $0x1998] sm:$0xff] }
 0x261   :  { %13258 = vmatpush1.bf16.msra.mxu0 %v18269_v39  ;;  %v18461_v39 = vcombine.low %v1087_v27, %v1103_v15  ;;  %v1279_v27 = vld [vmem:[#allocation8 + $0x1a10] sm:$0xff] }
 0x262   :  { %13422 = vmatpush1.bf16.msra.mxu1 %v18271_v55  ;;  %13259 = vmatprep.subr.bf16.mxu0 %v18302_v40  ;;  %v18463_v55 = vcombine.low %v1088_v28, %v1104_v29  ;;  %v18494_v40 = vcombine.high %v1119_v35, %v1135_v63  ;;  %v1295_v15 = vld [vmem:[#allocation8 + $0x1a90] sm:$0xff]  ;;  %v1280_v28 = vld [vmem:[#allocation8 + $0x1a18] sm:$0xff] }
 0x263   :  { %13423 = vmatprep.subr.bf16.mxu1 %v18304_v42  ;;  %v18496_v42 = vcombine.high %v1120_v37, %v1136_v38  ;;  %v1296_v29 = vld [vmem:[#allocation8 + $0x1a98] sm:$0xff] }
 0x265   :  { %13260 = vmatpush1.bf16.msra.mxu0 %v18301_v53  ;;  %v18493_v53 = vcombine.low %v1119_v35, %v1135_v63  ;;  %v1311_v35 = vld [vmem:[#allocation8 + $0x1b10] sm:$0xff] }
 0x266   :  { %13424 = vmatpush1.bf16.msra.mxu1 %v18303_v44  ;;  %13270 = vmatprep.subr.bf16.mxu0 %v18334_v54  ;;  %v18495_v44 = vcombine.low %v1120_v37, %v1136_v38  ;;  %v18526_v54 = vcombine.high %v1151_v43, %v1167_v50  ;;  %v1327_v63 = vld [vmem:[#allocation8 + $0x1b90] sm:$0xff]  ;;  %v1312_v37 = vld [vmem:[#allocation8 + $0x1b18] sm:$0xff] }
 0x267   :  { %13434 = vmatprep.subr.bf16.mxu1 %v18336_v56  ;;  %v18528_v56 = vcombine.high %v1152_v52, %v1168_v16  ;;  %v1328_v38 = vld [vmem:[#allocation8 + $0x1b98] sm:$0xff]  ;;  %v1343_v43 = vld [vmem:[#allocation8 + $0x1c10] sm:$0xff] }
 0x268   :  { %13262 = vmatmul.mubr.bf16.vlgmr.msra.gmra.mrb[12].mxu0 %v22896_v7  ;;  %v1359_v50 = vld [vmem:[#allocation8 + $0x1c90] sm:$0xff] }
 0x269   :  { %13426 = vmatmul.mubr.bf16.vlgmr.msra.gmra.mrb[12].mxu1 %v22896_v7  ;;  %13271 = vmatpush1.bf16.msra.mxu0 %v18333_v62  ;;  %v1184_v62 = vld [vmem:[#allocation8 + $0x1718] sm:$0xff] }
 0x26a   :  { %13302 = vmatprep.mubr.bf16.mxu0 %v22900_v14  ;;  %13435 = vmatpush1.bf16.msra.mxu1 %v18335_v3  ;;  %v18527_v3 = vcombine.low %v1152_v52, %v1168_v16  ;;  %v18560_v5 = vcombine.high %v1184_v62, %v1200_v0  ;;  %v1344_v52 = vld [vmem:[#allocation8 + $0x1c18] sm:$0xff] }
 0x26b   :  { %13466 = vmatprep.mubr.bf16.mxu1 %v22900_v14  ;;  %13272 = vmatprep.subr.bf16.mxu0 %v18366_v4  ;;  %v18558_v4 = vcombine.high %v1183_v57, %v1199_v58  ;;  %v1360_v16 = vld [vmem:[#allocation8 + $0x1c98] sm:$0xff] }
 0x26c   :  { %13436 = vmatprep.subr.bf16.mxu1 %v18368_v9  ;;  %v1231_v9 = vld [vmem:[#allocation8 + $0x1890] sm:$0xff] }
 0x26d   :  { %13273 = vmatpush1.bf16.msra.mxu0 %v18365_v12  ;;  %v18557_v12 = vcombine.low %v1183_v57, %v1199_v58  ;;  %v1375_v57 = vld [vmem:[#allocation8 + $0x1d10] sm:$0xff] }
 0x26e   :  { %13437 = vmatpush1.bf16.msra.mxu1 %v18367_v17  ;;  %13274 = vmatprep.subr.bf16.mxu0 %v18398_v18  ;;  %v18559_v17 = vcombine.low %v1184_v62, %v1200_v0  ;;  %v18590_v18 = vcombine.high %v1215_v8, %v1231_v9  ;;  %v1391_v58 = vld [vmem:[#allocation8 + $0x1d90] sm:$0xff]  ;;  %v1376_v62 = vld [vmem:[#allocation8 + $0x1d18] sm:$0xff] }
 0x26f   :  { %13438 = vmatprep.subr.bf16.mxu1 %v18400_v19  ;;  %v18592_v19 = vcombine.high %v1216_v10, %v1232_v11  ;;  %v1392_v0 = vld [vmem:[#allocation8 + $0x1d98] sm:$0xff] }
 0x271   :  { %13275 = vmatpush1.bf16.msra.mxu0 %v18397_v23  ;;  %v18589_v23 = vcombine.low %v1215_v8, %v1231_v9  ;;  %v1407_v8 = vld [vmem:[#allocation8 + $0x1e10] sm:$0xff] }
 0x272   :  { %13439 = vmatpush1.bf16.msra.mxu1 %v18399_v25  ;;  %13276 = vmatprep.subr.bf16.mxu0 %v18430_v26  ;;  %v18591_v25 = vcombine.low %v1216_v10, %v1232_v11  ;;  %v18622_v26 = vcombine.high %v1247_v20, %v1263_v21  ;;  %v1423_v9 = vld [vmem:[#allocation8 + $0x1e90] sm:$0xff]  ;;  %v1408_v10 = vld [vmem:[#allocation8 + $0x1e18] sm:$0xff] }
 0x273   :  { %13440 = vmatprep.subr.bf16.mxu1 %v18432_v46  ;;  %v18624_v46 = vcombine.high %v1248_v59, %v1264_v22  ;;  %v1424_v11 = vld [vmem:[#allocation8 + $0x1e98] sm:$0xff] }
 0x275   :  { %13277 = vmatpush1.bf16.msra.mxu0 %v18429_v30  ;;  %v18621_v30 = vcombine.low %v1247_v20, %v1263_v21  ;;  %v1439_v20 = vld [vmem:[#allocation8 + $0x1f10] sm:$0xff] }
 0x276   :  { %13441 = vmatpush1.bf16.msra.mxu1 %v18431_v31  ;;  %13278 = vmatprep.subr.bf16.mxu0 %v18462_v32  ;;  %v18623_v31 = vcombine.low %v1248_v59, %v1264_v22  ;;  %v18654_v32 = vcombine.high %v1279_v27, %v1295_v15  ;;  %v1455_v21 = vld [vmem:[#allocation8 + $0x1f90] sm:$0xff]  ;;  %v1440_v59 = vld [vmem:[#allocation8 + $0x1f18] sm:$0xff] }
 0x277   :  { %13442 = vmatprep.subr.bf16.mxu1 %v18464_v33  ;;  %v18656_v33 = vcombine.high %v1280_v28, %v1296_v29  ;;  %v1456_v22 = vld [vmem:[#allocation8 + $0x1f98] sm:$0xff] }
 0x279   :  { %13279 = vmatpush1.bf16.msra.mxu0 %v18461_v39  ;;  %v18653_v39 = vcombine.low %v1279_v27, %v1295_v15  ;;  %v1471_v27 = vld [vmem:[#allocation8 + $0x2010] sm:$0xff] }
 0x27a   :  { %13443 = vmatpush1.bf16.msra.mxu1 %v18463_v55  ;;  %13280 = vmatprep.subr.bf16.mxu0 %v18494_v40  ;;  %v18655_v55 = vcombine.low %v1280_v28, %v1296_v29  ;;  %v18686_v40 = vcombine.high %v1311_v35, %v1327_v63  ;;  %v1487_v15 = vld [vmem:[#allocation8 + $0x2090] sm:$0xff]  ;;  %v1472_v28 = vld [vmem:[#allocation8 + $0x2018] sm:$0xff] }
 0x27b   :  { %13444 = vmatprep.subr.bf16.mxu1 %v18496_v42  ;;  %v18688_v42 = vcombine.high %v1312_v37, %v1328_v38  ;;  %v1488_v29 = vld [vmem:[#allocation8 + $0x2098] sm:$0xff] }
 0x27d   :  { %13281 = vmatpush1.bf16.msra.mxu0 %v18493_v53  ;;  %v18685_v53 = vcombine.low %v1311_v35, %v1327_v63  ;;  %v1503_v35 = vld [vmem:[#allocation8 + $0x2110] sm:$0xff] }
 0x27e   :  { %13445 = vmatpush1.bf16.msra.mxu1 %v18495_v44  ;;  %13282 = vmatprep.subr.bf16.mxu0 %v18526_v54  ;;  %v18687_v44 = vcombine.low %v1312_v37, %v1328_v38  ;;  %v18718_v54 = vcombine.high %v1343_v43, %v1359_v50  ;;  %v1519_v63 = vld [vmem:[#allocation8 + $0x2190] sm:$0xff]  ;;  %v18845_v37 = vcombine.low %v1471_v27, %v1487_v15  ;;  %v1504_v38 = vld [vmem:[#allocation8 + $0x2118] sm:$0xff] }
 0x27f   :  { %13446 = vmatprep.subr.bf16.mxu1 %v18528_v56  ;;  %v18720_v56 = vcombine.high %v1344_v52, %v1360_v16 }
 0x281   :  { %13283 = vmatpush1.bf16.msra.mxu0 %v18525_v1  ;;  %v18717_v1 = vcombine.low %v1343_v43, %v1359_v50  ;;  %v1551_v43 = vld [vmem:[#allocation8 + $0x2290] sm:$0xff] }
 0x282   :  { %13447 = vmatpush1.bf16.msra.mxu1 %v18527_v3  ;;  %13284 = vmatprep.subr.bf16.mxu0 %v18558_v4  ;;  %v18719_v3 = vcombine.low %v1344_v52, %v1360_v16  ;;  %v18750_v4 = vcombine.high %v1375_v57, %v1391_v58  ;;  %v1536_v52 = vld [vmem:[#allocation8 + $0x2218] sm:$0xff] }
 0x283   :  { %13448 = vmatprep.subr.bf16.mxu1 %v18560_v5  ;;  %v18752_v5 = vcombine.high %v1376_v62, %v1392_v0  ;;  %v1552_v16 = vld [vmem:[#allocation8 + $0x2298] sm:$0xff] }
 0x285   :  { %13285 = vmatpush1.bf16.msra.mxu0 %v18557_v12  ;;  %v18749_v12 = vcombine.low %v1375_v57, %v1391_v58  ;;  %v1567_v57 = vld [vmem:[#allocation8 + $0x2310] sm:$0xff] }
 0x286   :  { %13449 = vmatpush1.bf16.msra.mxu1 %v18559_v17  ;;  %13286 = vmatprep.subr.bf16.mxu0 %v18590_v18  ;;  %v18751_v17 = vcombine.low %v1376_v62, %v1392_v0  ;;  %v18782_v18 = vcombine.high %v1407_v8, %v1423_v9  ;;  %v1583_v58 = vld [vmem:[#allocation8 + $0x2390] sm:$0xff]  ;;  %v1568_v62 = vld [vmem:[#allocation8 + $0x2318] sm:$0xff] }
 0x287   :  { %13450 = vmatprep.subr.bf16.mxu1 %v18592_v19  ;;  %v18784_v19 = vcombine.high %v1408_v10, %v1424_v11  ;;  %v1584_v0 = vld [vmem:[#allocation8 + $0x2398] sm:$0xff] }
 0x289   :  { %13287 = vmatpush1.bf16.msra.mxu0 %v18589_v23  ;;  %v18781_v23 = vcombine.low %v1407_v8, %v1423_v9  ;;  %v1599_v8 = vld [vmem:[#allocation8 + $0x2410] sm:$0xff] }
 0x28a   :  { %13451 = vmatpush1.bf16.msra.mxu1 %v18591_v25  ;;  %13288 = vmatprep.subr.bf16.mxu0 %v18622_v26  ;;  %v18783_v25 = vcombine.low %v1408_v10, %v1424_v11  ;;  %v18814_v26 = vcombine.high %v1439_v20, %v1455_v21  ;;  %v1615_v9 = vld [vmem:[#allocation8 + $0x2490] sm:$0xff]  ;;  %v1600_v10 = vld [vmem:[#allocation8 + $0x2418] sm:$0xff] }
 0x28b   :  { %13452 = vmatprep.subr.bf16.mxu1 %v18624_v46  ;;  %v18816_v46 = vcombine.high %v1440_v59, %v1456_v22  ;;  %v1616_v11 = vld [vmem:[#allocation8 + $0x2498] sm:$0xff] }
 0x28d   :  { %13289 = vmatpush1.bf16.msra.mxu0 %v18621_v30  ;;  %v18813_v30 = vcombine.low %v1439_v20, %v1455_v21  ;;  %v1631_v20 = vld [vmem:[#allocation8 + $0x2510] sm:$0xff] }
 0x28e   :  { %13453 = vmatpush1.bf16.msra.mxu1 %v18623_v31  ;;  %13290 = vmatprep.subr.bf16.mxu0 %v18654_v32  ;;  %v18815_v31 = vcombine.low %v1440_v59, %v1456_v22  ;;  %v18846_v32 = vcombine.high %v1471_v27, %v1487_v15  ;;  %v1647_v21 = vld [vmem:[#allocation8 + $0x2590] sm:$0xff]  ;;  %v1632_v59 = vld [vmem:[#allocation8 + $0x2518] sm:$0xff] }
 0x28f   :  { %13454 = vmatprep.subr.bf16.mxu1 %v18656_v33  ;;  %v18848_v33 = vcombine.high %v1472_v28, %v1488_v29  ;;  %v1648_v22 = vld [vmem:[#allocation8 + $0x2598] sm:$0xff]  ;;  %v1663_v27 = vld [vmem:[#allocation8 + $0x2610] sm:$0xff] }
 0x290   :  { %v1679_v15 = vld [vmem:[#allocation8 + $0x2690] sm:$0xff] }
 0x291   :  { %13291 = vmatpush1.bf16.msra.mxu0 %v18653_v39  ;;  %v1520_v39 = vld [vmem:[#allocation8 + $0x2198] sm:$0xff] }
 0x292   :  { %13455 = vmatpush1.bf16.msra.mxu1 %v18655_v55  ;;  %13292 = vmatprep.subr.bf16.mxu0 %v18686_v40  ;;  %v18847_v55 = vcombine.low %v1472_v28, %v1488_v29  ;;  %v18878_v40 = vcombine.high %v1503_v35, %v1519_v63  ;;  %v18880_v50 = vcombine.high %v1504_v38, %v1520_v39  ;;  %v1664_v28 = vld [vmem:[#allocation8 + $0x2618] sm:$0xff] }
 0x293   :  { %13456 = vmatprep.subr.bf16.mxu1 %v18688_v42  ;;  %v1535_v42 = vld [vmem:[#allocation8 + $0x2210] sm:$0xff]  ;;  %v1680_v29 = vld [vmem:[#allocation8 + $0x2698] sm:$0xff] }
 0x295   :  { %13293 = vmatpush1.bf16.msra.mxu0 %v18685_v53  ;;  %v18877_v53 = vcombine.low %v1503_v35, %v1519_v63  ;;  %v1695_v35 = vld [vmem:[#allocation8 + $0x2710] sm:$0xff] }
 0x296   :  { %13457 = vmatpush1.bf16.msra.mxu1 %v18687_v44  ;;  %13294 = vmatprep.subr.bf16.mxu0 %v18718_v54  ;;  %v18879_v44 = vcombine.low %v1504_v38, %v1520_v39  ;;  %v18910_v54 = vcombine.high %v1535_v42, %v1551_v43  ;;  %v1711_v63 = vld [vmem:[#allocation8 + $0x2790] sm:$0xff]  ;;  %v1712_v38 = vld [vmem:[#allocation8 + $0x2798] sm:$0xff]  ;;  %v19037_v39 = vcombine.low %v1663_v27, %v1679_v15 }
 0x297   :  { %13458 = vmatprep.subr.bf16.mxu1 %v18720_v56  ;;  %v18912_v56 = vcombine.high %v1536_v52, %v1552_v16 }
 0x299   :  { %13295 = vmatpush1.bf16.msra.mxu0 %v18717_v1  ;;  %v18909_v1 = vcombine.low %v1535_v42, %v1551_v43  ;;  %v1727_v43 = vld [vmem:[#allocation8 + $0x2810] sm:$0xff] }
 0x29a   :  { %13459 = vmatpush1.bf16.msra.mxu1 %v18719_v3  ;;  %13296 = vmatprep.subr.bf16.mxu0 %v18750_v4  ;;  %v18911_v3 = vcombine.low %v1536_v52, %v1552_v16  ;;  %v18942_v4 = vcombine.high %v1567_v57, %v1583_v58  ;;  %v1728_v52 = vld [vmem:[#allocation8 + $0x2818] sm:$0xff] }
 0x29b   :  { %13460 = vmatprep.subr.bf16.mxu1 %v18752_v5  ;;  %v18944_v5 = vcombine.high %v1568_v62, %v1584_v0  ;;  %v1744_v16 = vld [vmem:[#allocation8 + $0x2898] sm:$0xff] }
 0x29d   :  { %13297 = vmatpush1.bf16.msra.mxu0 %v18749_v12  ;;  %v18941_v12 = vcombine.low %v1567_v57, %v1583_v58  ;;  %v1759_v57 = vld [vmem:[#allocation8 + $0x2910] sm:$0xff] }
 0x29e   :  { %13461 = vmatpush1.bf16.msra.mxu1 %v18751_v17  ;;  %13298 = vmatprep.subr.bf16.mxu0 %v18782_v18  ;;  %v18943_v17 = vcombine.low %v1568_v62, %v1584_v0  ;;  %v18974_v18 = vcombine.high %v1599_v8, %v1615_v9  ;;  %v1775_v58 = vld [vmem:[#allocation8 + $0x2990] sm:$0xff]  ;;  %v1760_v62 = vld [vmem:[#allocation8 + $0x2918] sm:$0xff] }
 0x29f   :  { %13462 = vmatprep.subr.bf16.mxu1 %v18784_v19  ;;  %v18976_v19 = vcombine.high %v1600_v10, %v1616_v11  ;;  %v1776_v0 = vld [vmem:[#allocation8 + $0x2998] sm:$0xff] }
 0x2a1   :  { %13299 = vmatpush1.bf16.msra.mxu0 %v18781_v23  ;;  %v18973_v23 = vcombine.low %v1599_v8, %v1615_v9  ;;  %v1791_v8 = vld [vmem:[#allocation8 + $0x2a10] sm:$0xff] }
 0x2a2   :  { %13463 = vmatpush1.bf16.msra.mxu1 %v18783_v25  ;;  %13300 = vmatprep.subr.bf16.mxu0 %v18814_v26  ;;  %v18975_v25 = vcombine.low %v1600_v10, %v1616_v11  ;;  %v19006_v26 = vcombine.high %v1631_v20, %v1647_v21  ;;  %v1807_v9 = vld [vmem:[#allocation8 + $0x2a90] sm:$0xff]  ;;  %v1792_v10 = vld [vmem:[#allocation8 + $0x2a18] sm:$0xff] }
 0x2a3   :  { %13464 = vmatprep.subr.bf16.mxu1 %v18816_v46  ;;  %v19008_v46 = vcombine.high %v1632_v59, %v1648_v22  ;;  %v1808_v11 = vld [vmem:[#allocation8 + $0x2a98] sm:$0xff] }
 0x2a5   :  { %13301 = vmatpush1.bf16.msra.mxu0 %v18813_v30  ;;  %v19005_v30 = vcombine.low %v1631_v20, %v1647_v21  ;;  %v1823_v20 = vld [vmem:[#allocation8 + $0x2b10] sm:$0xff] }
 0x2a6   :  { %13465 = vmatpush1.bf16.msra.mxu1 %v18815_v31  ;;  %13311 = vmatprep.subr.bf16.mxu0 %v18846_v32  ;;  %v19007_v31 = vcombine.low %v1632_v59, %v1648_v22  ;;  %v19038_v32 = vcombine.high %v1663_v27, %v1679_v15  ;;  %v1839_v21 = vld [vmem:[#allocation8 + $0x2b90] sm:$0xff]  ;;  %v1824_v59 = vld [vmem:[#allocation8 + $0x2b18] sm:$0xff] }
 0x2a7   :  { %13475 = vmatprep.subr.bf16.mxu1 %v18848_v33  ;;  %v19040_v33 = vcombine.high %v1664_v28, %v1680_v29  ;;  %v1840_v22 = vld [vmem:[#allocation8 + $0x2b98] sm:$0xff]  ;;  %v1855_v27 = vld [vmem:[#allocation8 + $0x2c10] sm:$0xff] }
 0x2a8   :  { %13303 = vmatmul.mubr.bf16.vlgmr.msra.gmra.mrb[12].mxu0 %v22926_v51  ;;  %v1871_v15 = vld [vmem:[#allocation8 + $0x2c90] sm:$0xff] }
 0x2a9   :  { %13467 = vmatmul.mubr.bf16.vlgmr.msra.gmra.mrb[12].mxu1 %v22926_v51  ;;  %13312 = vmatpush1.bf16.msra.mxu0 %v18845_v37  ;;  %v1696_v37 = vld [vmem:[#allocation8 + $0x2718] sm:$0xff] }
 0x2aa   :  { %13343 = vmatprep.mubr.bf16.mxu0 %v22928_v61  ;;  %13476 = vmatpush1.bf16.msra.mxu1 %v18847_v55  ;;  %v19039_v55 = vcombine.low %v1664_v28, %v1680_v29  ;;  %v19072_v42 = vcombine.high %v1696_v37, %v1712_v38  ;;  %v1856_v28 = vld [vmem:[#allocation8 + $0x2c18] sm:$0xff] }
 0x2ab   :  { %13507 = vmatprep.mubr.bf16.mxu1 %v22928_v61  ;;  %13313 = vmatprep.subr.bf16.mxu0 %v18878_v40  ;;  %v19070_v40 = vcombine.high %v1695_v35, %v1711_v63  ;;  %v1872_v29 = vld [vmem:[#allocation8 + $0x2c98] sm:$0xff] }
 0x2ac   :  { %13477 = vmatprep.subr.bf16.mxu1 %v18880_v50  ;;  %v1743_v50 = vld [vmem:[#allocation8 + $0x2890] sm:$0xff] }
 0x2ad   :  { %13314 = vmatpush1.bf16.msra.mxu0 %v18877_v53  ;;  %v19069_v53 = vcombine.low %v1695_v35, %v1711_v63  ;;  %v1887_v35 = vld [vmem:[#allocation8 + $0x2d10] sm:$0xff] }
 0x2ae   :  { %13478 = vmatpush1.bf16.msra.mxu1 %v18879_v44  ;;  %13315 = vmatprep.subr.bf16.mxu0 %v18910_v54  ;;  %v19071_v44 = vcombine.low %v1696_v37, %v1712_v38  ;;  %v19102_v54 = vcombine.high %v1727_v43, %v1743_v50  ;;  %v1903_v63 = vld [vmem:[#allocation8 + $0x2d90] sm:$0xff]  ;;  %v1888_v37 = vld [vmem:[#allocation8 + $0x2d18] sm:$0xff] }
 0x2af   :  { %13479 = vmatprep.subr.bf16.mxu1 %v18912_v56  ;;  %v19104_v56 = vcombine.high %v1728_v52, %v1744_v16  ;;  %v1904_v38 = vld [vmem:[#allocation8 + $0x2d98] sm:$0xff] }
 0x2b1   :  { %13316 = vmatpush1.bf16.msra.mxu0 %v18909_v1  ;;  %v19101_v1 = vcombine.low %v1727_v43, %v1743_v50  ;;  %v1919_v43 = vld [vmem:[#allocation8 + $0x2e10] sm:$0xff] }
 0x2b2   :  { %13480 = vmatpush1.bf16.msra.mxu1 %v18911_v3  ;;  %13317 = vmatprep.subr.bf16.mxu0 %v18942_v4  ;;  %v19103_v3 = vcombine.low %v1728_v52, %v1744_v16  ;;  %v19134_v4 = vcombine.high %v1759_v57, %v1775_v58  ;;  %v1935_v50 = vld [vmem:[#allocation8 + $0x2e90] sm:$0xff]  ;;  %v1920_v52 = vld [vmem:[#allocation8 + $0x2e18] sm:$0xff] }
 0x2b3   :  { %13481 = vmatprep.subr.bf16.mxu1 %v18944_v5  ;;  %v19136_v5 = vcombine.high %v1760_v62, %v1776_v0  ;;  %v1936_v16 = vld [vmem:[#allocation8 + $0x2e98] sm:$0xff] }
 0x2b5   :  { %13318 = vmatpush1.bf16.msra.mxu0 %v18941_v12  ;;  %v19133_v12 = vcombine.low %v1759_v57, %v1775_v58  ;;  %v1951_v57 = vld [vmem:[#allocation8 + $0x2f10] sm:$0xff] }
 0x2b6   :  { %13482 = vmatpush1.bf16.msra.mxu1 %v18943_v17  ;;  %13319 = vmatprep.subr.bf16.mxu0 %v18974_v18  ;;  %v19135_v17 = vcombine.low %v1760_v62, %v1776_v0  ;;  %v19166_v18 = vcombine.high %v1791_v8, %v1807_v9  ;;  %v1967_v58 = vld [vmem:[#allocation8 + $0x2f90] sm:$0xff]  ;;  %v1952_v62 = vld [vmem:[#allocation8 + $0x2f18] sm:$0xff] }
 0x2b7   :  { %13483 = vmatprep.subr.bf16.mxu1 %v18976_v19  ;;  %v19168_v19 = vcombine.high %v1792_v10, %v1808_v11  ;;  %v1968_v0 = vld [vmem:[#allocation8 + $0x2f98] sm:$0xff] }
 0x2b9   :  { %13320 = vmatpush1.bf16.msra.mxu0 %v18973_v23  ;;  %v19165_v23 = vcombine.low %v1791_v8, %v1807_v9  ;;  %v1983_v8 = vld [vmem:[#allocation8 + $0x3010] sm:$0xff] }
 0x2ba   :  { %13484 = vmatpush1.bf16.msra.mxu1 %v18975_v25  ;;  %13321 = vmatprep.subr.bf16.mxu0 %v19006_v26  ;;  %v19167_v25 = vcombine.low %v1792_v10, %v1808_v11  ;;  %v19198_v26 = vcombine.high %v1823_v20, %v1839_v21  ;;  %v1999_v9 = vld [vmem:[#allocation8 + $0x3090] sm:$0xff]  ;;  %v1984_v10 = vld [vmem:[#allocation8 + $0x3018] sm:$0xff] }
 0x2bb   :  { %13485 = vmatprep.subr.bf16.mxu1 %v19008_v46  ;;  %v19200_v46 = vcombine.high %v1824_v59, %v1840_v22  ;;  %v2000_v11 = vld [vmem:[#allocation8 + $0x3098] sm:$0xff] }
 0x2bd   :  { %13322 = vmatpush1.bf16.msra.mxu0 %v19005_v30  ;;  %v19197_v30 = vcombine.low %v1823_v20, %v1839_v21  ;;  %v2015_v20 = vld [vmem:[#allocation8 + $0x3110] sm:$0xff] }
 0x2be   :  { %13486 = vmatpush1.bf16.msra.mxu1 %v19007_v31  ;;  %13323 = vmatprep.subr.bf16.mxu0 %v19038_v32  ;;  %v19199_v31 = vcombine.low %v1824_v59, %v1840_v22  ;;  %v19230_v32 = vcombine.high %v1855_v27, %v1871_v15  ;;  %v2031_v21 = vld [vmem:[#allocation8 + $0x3190] sm:$0xff]  ;;  %v19357_v59 = vcombine.low %v1983_v8, %v1999_v9  ;;  %v2016_v22 = vld [vmem:[#allocation8 + $0x3118] sm:$0xff] }
 0x2bf   :  { %13487 = vmatprep.subr.bf16.mxu1 %v19040_v33  ;;  %v19232_v33 = vcombine.high %v1856_v28, %v1872_v29 }
 0x2c1   :  { %13324 = vmatpush1.bf16.msra.mxu0 %v19037_v39  ;;  %v19229_v39 = vcombine.low %v1855_v27, %v1871_v15  ;;  %v2063_v27 = vld [vmem:[#allocation8 + $0x3290] sm:$0xff] }
 0x2c2   :  { %13488 = vmatpush1.bf16.msra.mxu1 %v19039_v55  ;;  %13325 = vmatprep.subr.bf16.mxu0 %v19070_v40  ;;  %v19231_v55 = vcombine.low %v1856_v28, %v1872_v29  ;;  %v19262_v40 = vcombine.high %v1887_v35, %v1903_v63  ;;  %v2048_v28 = vld [vmem:[#allocation8 + $0x3218] sm:$0xff] }
 0x2c3   :  { %13489 = vmatprep.subr.bf16.mxu1 %v19072_v42  ;;  %v19264_v42 = vcombine.high %v1888_v37, %v1904_v38  ;;  %v2064_v29 = vld [vmem:[#allocation8 + $0x3298] sm:$0xff] }
 0x2c5   :  { %13326 = vmatpush1.bf16.msra.mxu0 %v19069_v53  ;;  %v19261_v53 = vcombine.low %v1887_v35, %v1903_v63  ;;  %v2079_v35 = vld [vmem:[#allocation8 + $0x3310] sm:$0xff] }
 0x2c6   :  { %13490 = vmatpush1.bf16.msra.mxu1 %v19071_v44  ;;  %13327 = vmatprep.subr.bf16.mxu0 %v19102_v54  ;;  %v19263_v44 = vcombine.low %v1888_v37, %v1904_v38  ;;  %v19294_v54 = vcombine.high %v1919_v43, %v1935_v50  ;;  %v2095_v63 = vld [vmem:[#allocation8 + $0x3390] sm:$0xff]  ;;  %v2080_v37 = vld [vmem:[#allocation8 + $0x3318] sm:$0xff] }
 0x2c7   :  { %13491 = vmatprep.subr.bf16.mxu1 %v19104_v56  ;;  %v19296_v56 = vcombine.high %v1920_v52, %v1936_v16  ;;  %v2096_v38 = vld [vmem:[#allocation8 + $0x3398] sm:$0xff] }
 0x2c9   :  { %13328 = vmatpush1.bf16.msra.mxu0 %v19101_v1  ;;  %v19293_v1 = vcombine.low %v1919_v43, %v1935_v50  ;;  %v2111_v43 = vld [vmem:[#allocation8 + $0x3410] sm:$0xff] }
 0x2ca   :  { %13492 = vmatpush1.bf16.msra.mxu1 %v19103_v3  ;;  %13329 = vmatprep.subr.bf16.mxu0 %v19134_v4  ;;  %v19295_v3 = vcombine.low %v1920_v52, %v1936_v16  ;;  %v19326_v4 = vcombine.high %v1951_v57, %v1967_v58  ;;  %v2127_v50 = vld [vmem:[#allocation8 + $0x3490] sm:$0xff]  ;;  %v2112_v52 = vld [vmem:[#allocation8 + $0x3418] sm:$0xff] }
 0x2cb   :  { %13493 = vmatprep.subr.bf16.mxu1 %v19136_v5  ;;  %v19328_v5 = vcombine.high %v1952_v62, %v1968_v0  ;;  %v2128_v16 = vld [vmem:[#allocation8 + $0x3498] sm:$0xff] }
 0x2cd   :  { %13330 = vmatpush1.bf16.msra.mxu0 %v19133_v12  ;;  %v19325_v12 = vcombine.low %v1951_v57, %v1967_v58  ;;  %v2143_v57 = vld [vmem:[#allocation8 + $0x3510] sm:$0xff] }
 0x2ce   :  { %13494 = vmatpush1.bf16.msra.mxu1 %v19135_v17  ;;  %13331 = vmatprep.subr.bf16.mxu0 %v19166_v18  ;;  %v19327_v17 = vcombine.low %v1952_v62, %v1968_v0  ;;  %v19358_v18 = vcombine.high %v1983_v8, %v1999_v9  ;;  %v2159_v58 = vld [vmem:[#allocation8 + $0x3590] sm:$0xff]  ;;  %v2144_v62 = vld [vmem:[#allocation8 + $0x3518] sm:$0xff] }
 0x2cf   :  { %13495 = vmatprep.subr.bf16.mxu1 %v19168_v19  ;;  %v19360_v19 = vcombine.high %v1984_v10, %v2000_v11  ;;  %v2160_v0 = vld [vmem:[#allocation8 + $0x3598] sm:$0xff]  ;;  %v2175_v8 = vld [vmem:[#allocation8 + $0x3610] sm:$0xff] }
 0x2d0   :  { %v2191_v9 = vld [vmem:[#allocation8 + $0x3690] sm:$0xff] }
 0x2d1   :  { %13332 = vmatpush1.bf16.msra.mxu0 %v19165_v23  ;;  %v2032_v23 = vld [vmem:[#allocation8 + $0x3198] sm:$0xff] }
 0x2d2   :  { %13496 = vmatpush1.bf16.msra.mxu1 %v19167_v25  ;;  %13333 = vmatprep.subr.bf16.mxu0 %v19198_v26  ;;  %v19359_v25 = vcombine.low %v1984_v10, %v2000_v11  ;;  %v19390_v26 = vcombine.high %v2015_v20, %v2031_v21  ;;  %v19392_v15 = vcombine.high %v2016_v22, %v2032_v23  ;;  %v2176_v10 = vld [vmem:[#allocation8 + $0x3618] sm:$0xff] }
 0x2d3   :  { %13497 = vmatprep.subr.bf16.mxu1 %v19200_v46  ;;  %v2047_v46 = vld [vmem:[#allocation8 + $0x3210] sm:$0xff]  ;;  %v2192_v11 = vld [vmem:[#allocation8 + $0x3698] sm:$0xff] }
 0x2d5   :  { %13334 = vmatpush1.bf16.msra.mxu0 %v19197_v30  ;;  %v19389_v30 = vcombine.low %v2015_v20, %v2031_v21  ;;  %v19552_v21 = vcombine.high %v2176_v10, %v2192_v11 }
 0x2d6   :  { %13498 = vmatpush1.bf16.msra.mxu1 %v19199_v31  ;;  %13335 = vmatprep.subr.bf16.mxu0 %v19230_v32  ;;  %v19391_v31 = vcombine.low %v2016_v22, %v2032_v23  ;;  %v19422_v32 = vcombine.high %v2047_v46, %v2063_v27  ;;  %v2223_v22 = vld [vmem:[#allocation8 + $0x3790] sm:$0xff] }
 0x2d7   :  { %13499 = vmatprep.subr.bf16.mxu1 %v19232_v33  ;;  %v19424_v33 = vcombine.high %v2048_v28, %v2064_v29 }
 0x2d9   :  { %13336 = vmatpush1.bf16.msra.mxu0 %v19229_v39  ;;  %v19421_v39 = vcombine.low %v2047_v46, %v2063_v27  ;;  %v2224_v46 = vld [vmem:[#allocation8 + $0x3798] sm:$0xff] }
 0x2da   :  { %13500 = vmatpush1.bf16.msra.mxu1 %v19231_v55  ;;  %13337 = vmatprep.subr.bf16.mxu0 %v19262_v40  ;;  %v19423_v55 = vcombine.low %v2048_v28, %v2064_v29  ;;  %v19454_v40 = vcombine.high %v2079_v35, %v2095_v63  ;;  %v19549_v28 = vcombine.low %v2175_v8, %v2191_v9 }
 0x2db   :  { %13501 = vmatprep.subr.bf16.mxu1 %v19264_v42  ;;  %v19456_v42 = vcombine.high %v2080_v37, %v2096_v38 }
 0x2dd   :  { %13338 = vmatpush1.bf16.msra.mxu0 %v19261_v53  ;;  %v19453_v53 = vcombine.low %v2079_v35, %v2095_v63  ;;  %v2239_v35 = vld [vmem:[#allocation8 + $0x3810] sm:$0xff] }
 0x2de   :  { %13502 = vmatpush1.bf16.msra.mxu1 %v19263_v44  ;;  %13339 = vmatprep.subr.bf16.mxu0 %v19294_v54  ;;  %v19455_v44 = vcombine.low %v2080_v37, %v2096_v38  ;;  %v19486_v54 = vcombine.high %v2111_v43, %v2127_v50  ;;  %v2255_v63 = vld [vmem:[#allocation8 + $0x3890] sm:$0xff]  ;;  %v2240_v37 = vld [vmem:[#allocation8 + $0x3818] sm:$0xff] }
 0x2df   :  { %13503 = vmatprep.subr.bf16.mxu1 %v19296_v56  ;;  %v19488_v56 = vcombine.high %v2112_v52, %v2128_v16  ;;  %v2256_v38 = vld [vmem:[#allocation8 + $0x3898] sm:$0xff] }
 0x2e1   :  { %13340 = vmatpush1.bf16.msra.mxu0 %v19293_v1  ;;  %v19485_v1 = vcombine.low %v2111_v43, %v2127_v50  ;;  %v2271_v43 = vld [vmem:[#allocation8 + $0x3910] sm:$0xff] }
 0x2e2   :  { %13504 = vmatpush1.bf16.msra.mxu1 %v19295_v3  ;;  %13341 = vmatprep.subr.bf16.mxu0 %v19326_v4  ;;  %v19487_v3 = vcombine.low %v2112_v52, %v2128_v16  ;;  %v19518_v4 = vcombine.high %v2143_v57, %v2159_v58  ;;  %v2287_v50 = vld [vmem:[#allocation8 + $0x3990] sm:$0xff]  ;;  %v2272_v52 = vld [vmem:[#allocation8 + $0x3918] sm:$0xff] }
 0x2e3   :  { %13505 = vmatprep.subr.bf16.mxu1 %v19328_v5  ;;  %v19520_v5 = vcombine.high %v2144_v62, %v2160_v0  ;;  %v2288_v16 = vld [vmem:[#allocation8 + $0x3998] sm:$0xff] }
 0x2e5   :  { %13342 = vmatpush1.bf16.msra.mxu0 %v19325_v12  ;;  %v19517_v12 = vcombine.low %v2143_v57, %v2159_v58  ;;  %v2303_v57 = vld [vmem:[#allocation8 + $0x3a10] sm:$0xff] }
 0x2e6   :  { %13506 = vmatpush1.bf16.msra.mxu1 %v19327_v17  ;;  %13352 = vmatprep.subr.bf16.mxu0 %v19358_v18  ;;  %v19519_v17 = vcombine.low %v2144_v62, %v2160_v0  ;;  %v19550_v18 = vcombine.high %v2175_v8, %v2191_v9  ;;  %v2319_v58 = vld [vmem:[#allocation8 + $0x3a90] sm:$0xff]  ;;  %v2304_v62 = vld [vmem:[#allocation8 + $0x3a18] sm:$0xff] }
 0x2e7   :  { %13516 = vmatprep.subr.bf16.mxu1 %v19360_v19  ;;  %v2320_v0 = vld [vmem:[#allocation8 + $0x3a98] sm:$0xff]  ;;  %v2335_v8 = vld [vmem:[#allocation8 + $0x3b10] sm:$0xff] }
 0x2e8   :  { %13344 = vmatmul.mubr.bf16.vlgmr.msra.gmra.mrb[12].mxu0 %v22946_v34  ;;  %v2351_v9 = vld [vmem:[#allocation8 + $0x3b90] sm:$0xff] }
 0x2e9   :  { %13508 = vmatmul.mubr.bf16.vlgmr.msra.gmra.mrb[12].mxu1 %v22946_v34  ;;  %13353 = vmatpush1.bf16.msra.mxu0 %v19357_v59  ;;  %v2207_v59 = vld [vmem:[#allocation8 + $0x3710] sm:$0xff] }
 0x2ea   :  { %13384 = vmatprep.mubr.bf16.mxu0 %v22948_v41  ;;  %13517 = vmatpush1.bf16.msra.mxu1 %v19359_v25 }
 0x2eb   :  { %13548 = vmatprep.mubr.bf16.mxu1 %v22948_v41  ;;  %13354 = vmatprep.subr.bf16.mxu0 %v19390_v26  ;;  %v2208_v26 = vld [vmem:[#allocation8 + $0x3718] sm:$0xff] }
 0x2ec   :  { %13518 = vmatprep.subr.bf16.mxu1 %v19392_v15 }
 0x2ed   :  { %13355 = vmatpush1.bf16.msra.mxu0 %v19389_v30 }
 0x2ee   :  { %13519 = vmatpush1.bf16.msra.mxu1 %v19391_v31  ;;  %13356 = vmatprep.subr.bf16.mxu0 %v19422_v32  ;;  %v19551_v31 = vcombine.low %v2176_v10, %v2192_v11  ;;  %v19582_v32 = vcombine.high %v2207_v59, %v2223_v22  ;;  %v2336_v10 = vld [vmem:[#allocation8 + $0x3b18] sm:$0xff] }
 0x2ef   :  { %13520 = vmatprep.subr.bf16.mxu1 %v19424_v33  ;;  %v19584_v33 = vcombine.high %v2208_v26, %v2224_v46  ;;  %v2352_v11 = vld [vmem:[#allocation8 + $0x3b98] sm:$0xff] }
 0x2f1   :  { %13357 = vmatpush1.bf16.msra.mxu0 %v19421_v39  ;;  %v19581_v39 = vcombine.low %v2207_v59, %v2223_v22  ;;  %v2367_v59 = vld [vmem:[#allocation8 + $0x3c10] sm:$0xff] }
 0x2f2   :  { %13521 = vmatpush1.bf16.msra.mxu1 %v19423_v55  ;;  %13358 = vmatprep.subr.bf16.mxu0 %v19454_v40  ;;  %v19583_v55 = vcombine.low %v2208_v26, %v2224_v46  ;;  %v19614_v40 = vcombine.high %v2239_v35, %v2255_v63  ;;  %v2383_v22 = vld [vmem:[#allocation8 + $0x3c90] sm:$0xff]  ;;  %v2368_v26 = vld [vmem:[#allocation8 + $0x3c18] sm:$0xff] }
 0x2f3   :  { %13522 = vmatprep.subr.bf16.mxu1 %v19456_v42  ;;  %v19616_v42 = vcombine.high %v2240_v37, %v2256_v38  ;;  %v2384_v46 = vld [vmem:[#allocation8 + $0x3c98] sm:$0xff] }
 0x2f5   :  { %13359 = vmatpush1.bf16.msra.mxu0 %v19453_v53  ;;  %v19613_v53 = vcombine.low %v2239_v35, %v2255_v63  ;;  %v19741_v35 = vcombine.low %v2367_v59, %v2383_v22  ;;  %v19743_v63 = vcombine.low %v2368_v26, %v2384_v46 }
 0x2f6   :  { %13523 = vmatpush1.bf16.msra.mxu1 %v19455_v44  ;;  %13360 = vmatprep.subr.bf16.mxu0 %v19486_v54  ;;  %v19615_v44 = vcombine.low %v2240_v37, %v2256_v38  ;;  %v19646_v54 = vcombine.high %v2271_v43, %v2287_v50 }
 0x2f7   :  { %13524 = vmatprep.subr.bf16.mxu1 %v19488_v56  ;;  %v19648_v56 = vcombine.high %v2272_v52, %v2288_v16 }
 0x2f9   :  { %13361 = vmatpush1.bf16.msra.mxu0 %v19485_v1  ;;  %v19645_v1 = vcombine.low %v2271_v43, %v2287_v50 }
 0x2fa   :  { %13525 = vmatpush1.bf16.msra.mxu1 %v19487_v3  ;;  %13362 = vmatprep.subr.bf16.mxu0 %v19518_v4  ;;  %v19647_v3 = vcombine.low %v2272_v52, %v2288_v16  ;;  %v19678_v4 = vcombine.high %v2303_v57, %v2319_v58 }
 0x2fb   :  { %v22977_v19 = vpop.f32.mrb[8].mxu0  ;;  %v22979_v20 = vpop.f32.mrb[8].mxu1  ;;  %13526 = vmatprep.subr.bf16.mxu1 %v19520_v5  ;;  %v19680_v5 = vcombine.high %v2304_v62, %v2320_v0 }
 0x2fc   :  { %v22981_v23 = vpop.f32.mrb[9].mxu0  ;;  %v22983_v25 = vpop.f32.mrb[9].mxu1 }
 0x2fd   :  { %v13062_v27 = vpop.f32.mrb[10].mxu0  ;;  %v13226_v15 = vpop.f32.mrb[10].mxu1  ;;  %13363 = vmatpush1.bf16.msra.mxu0 %v19517_v12  ;;  %v19677_v12 = vcombine.low %v2303_v57, %v2319_v58 }
 0x2fe   :  { %13527 = vmatpush1.bf16.msra.mxu1 %v19519_v17  ;;  %v13063_v29 = vpop.f32.mrb[11].mxu0  ;;  %v13227_v30 = vpop.f32.mrb[11].mxu1  ;;  %13364 = vmatprep.subr.bf16.mxu0 %v19550_v18  ;;  %v19679_v17 = vcombine.low %v2304_v62, %v2320_v0  ;;  %v19710_v18 = vcombine.high %v2335_v8, %v2351_v9  ;;  %v19709_v27 = vcombine.low %v2335_v8, %v2351_v9 }
 0x2ff   :  { %13528 = vmatprep.subr.bf16.mxu1 %v19552_v21  ;;  %v19712_v21 = vcombine.high %v2336_v10, %v2352_v11  ;;  %v19711_v15 = vcombine.low %v2336_v10, %v2352_v11  ;;  %v19744_v29 = vcombine.high %v2368_v26, %v2384_v46  ;;  %v2399_v30 = vld [vmem:[#allocation8 + $0x3d10] sm:$0xff]  ;;  %v513_v46 = vld [vmem:[#allocation8 + $0x220] sm:$0xff] }
 0x301   :  { %13365 = vmatpush1.bf16.msra.mxu0 %v19549_v28  ;;  %v19742_v28 = vcombine.high %v2367_v59, %v2383_v22  ;;  %v498_v59 = vld [vmem:[#allocation8 + $0x1a8] sm:$0xff] }
 0x302   :  { %13529 = vmatpush1.bf16.msra.mxu1 %v19551_v31  ;;  %13366 = vmatprep.subr.bf16.mxu0 %v19582_v32  ;;  %v2415_v31 = vld [vmem:[#allocation8 + $0x3d90] sm:$0xff]  ;;  %v2400_v32 = vld [vmem:[#allocation8 + $0x3d18] sm:$0xff] }
 0x303   :  { %13530 = vmatprep.subr.bf16.mxu1 %v19584_v33  ;;  %v2416_v33 = vld [vmem:[#allocation8 + $0x3d98] sm:$0xff]  ;;  %v19774_v37 = vcombine.high %v2399_v30, %v2415_v31  ;;  %v19773_v43 = vcombine.low %v2399_v30, %v2415_v31 }
 0x304   :  { %v19776_v38 = vcombine.high %v2400_v32, %v2416_v33  ;;  %v19775_v50 = vcombine.low %v2400_v32, %v2416_v33 }
 0x305   :  { %13367 = vmatpush1.bf16.msra.mxu0 %v19581_v39  ;;  %v2431_v39 = vld [vmem:[#allocation8 + $0x3e10] sm:$0xff] }
 0x306   :  { %13531 = vmatpush1.bf16.msra.mxu1 %v19583_v55  ;;  %13368 = vmatprep.subr.bf16.mxu0 %v19614_v40  ;;  %v2447_v55 = vld [vmem:[#allocation8 + $0x3e90] sm:$0xff]  ;;  %v2432_v40 = vld [vmem:[#allocation8 + $0x3e18] sm:$0xff] }
 0x307   :  { %13532 = vmatprep.subr.bf16.mxu1 %v19616_v42  ;;  %v2448_v42 = vld [vmem:[#allocation8 + $0x3e98] sm:$0xff]  ;;  %v19806_v52 = vcombine.high %v2431_v39, %v2447_v55  ;;  %v19805_v57 = vcombine.low %v2431_v39, %v2447_v55 }
 0x308   :  { %v19808_v16 = vcombine.high %v2432_v40, %v2448_v42  ;;  %v19807_v58 = vcombine.low %v2432_v40, %v2448_v42 }
 0x309   :  { %13369 = vmatpush1.bf16.msra.mxu0 %v19613_v53  ;;  %v2463_v53 = vld [vmem:[#allocation8 + $0x3f10] sm:$0xff] }
 0x30a   :  { %13533 = vmatpush1.bf16.msra.mxu1 %v19615_v44  ;;  %13370 = vmatprep.subr.bf16.mxu0 %v19646_v54  ;;  %v2479_v44 = vld [vmem:[#allocation8 + $0x3f90] sm:$0xff]  ;;  %v2464_v54 = vld [vmem:[#allocation8 + $0x3f18] sm:$0xff] }
 0x30b   :  { %13534 = vmatprep.subr.bf16.mxu1 %v19648_v56  ;;  %v2480_v56 = vld [vmem:[#allocation8 + $0x3f98] sm:$0xff]  ;;  %v19838_v62 = vcombine.high %v2463_v53, %v2479_v44  ;;  %v19837_v8 = vcombine.low %v2463_v53, %v2479_v44 }
 0x30c   :  { %v19840_v0 = vcombine.high %v2464_v54, %v2480_v56  ;;  %v19839_v9 = vcombine.low %v2464_v54, %v2480_v56 }
 0x30d   :  { %13371 = vmatpush1.bf16.msra.mxu0 %v19645_v1  ;;  %v449_v1 = vld [vmem:[#allocation8 + $0x20] sm:$0xff] }
 0x30e   :  { %13535 = vmatpush1.bf16.msra.mxu1 %v19647_v3  ;;  %13372 = vmatprep.subr.bf16.mxu0 %v19678_v4  ;;  %v465_v3 = vld [vmem:[#allocation8 + $0xa0] sm:$0xff]  ;;  %v450_v4 = vld [vmem:[#allocation8 + $0x28] sm:$0xff] }
 0x30f   :  { %13536 = vmatprep.subr.bf16.mxu1 %v19680_v5  ;;  %v466_v5 = vld [vmem:[#allocation8 + $0xa8] sm:$0xff]  ;;  %v17826_v10 = vcombine.high %v449_v1, %v465_v3 }
 0x310   :  { %v17828_v11 = vcombine.high %v450_v4, %v466_v5  ;;  %v17827_v22 = vcombine.low %v450_v4, %v466_v5 }
 0x311   :  { %13373 = vmatpush1.bf16.msra.mxu0 %v19677_v12  ;;  %v481_v12 = vld [vmem:[#allocation8 + $0x120] sm:$0xff] }
 0x312   :  { %13537 = vmatpush1.bf16.msra.mxu1 %v19679_v17  ;;  %13374 = vmatprep.subr.bf16.mxu0 %v19710_v18  ;;  %v497_v17 = vld [vmem:[#allocation8 + $0x1a0] sm:$0xff]  ;;  %v17825_v18 = vcombine.low %v449_v1, %v465_v3 }
 0x313   :  { %13538 = vmatprep.subr.bf16.mxu1 %v19712_v21  ;;  %v482_v21 = vld [vmem:[#allocation8 + $0x128] sm:$0xff]  ;;  %v17858_v26 = vcombine.high %v481_v12, %v497_v17  ;;  %v17857_v30 = vcombine.low %v481_v12, %v497_v17 }
 0x314   :  { %v17859_v31 = vcombine.low %v482_v21, %v498_v59 }
 0x315   :  { %13375 = vmatpush1.bf16.msra.mxu0 %v19709_v27  ;;  %v529_v27 = vld [vmem:[#allocation8 + $0x2a0] sm:$0xff] }
 0x316   :  { %13539 = vmatpush1.bf16.msra.mxu1 %v19711_v15  ;;  %13376 = vmatprep.subr.bf16.mxu0 %v19742_v28  ;;  %v17860_v15 = vcombine.high %v482_v21, %v498_v59  ;;  %v514_v28 = vld [vmem:[#allocation8 + $0x228] sm:$0xff]  ;;  %v17890_v32 = vcombine.high %v513_v46, %v529_v27  ;;  %v17889_v39 = vcombine.low %v513_v46, %v529_v27  ;;  %v673_v59 = vld [vmem:[#allocation8 + $0x720] sm:$0xff] }
 0x317   :  { %13540 = vmatprep.subr.bf16.mxu1 %v19744_v29  ;;  %v530_v29 = vld [vmem:[#allocation8 + $0x2a8] sm:$0xff] }
 0x318   :  { %v17892_v33 = vcombine.high %v514_v28, %v530_v29  ;;  %v17891_v55 = vcombine.low %v514_v28, %v530_v29  ;;  %v690_v46 = vld [vmem:[#allocation8 + $0x7a8] sm:$0xff] }
 0x319   :  { %13377 = vmatpush1.bf16.msra.mxu0 %v19741_v35  ;;  %v545_v35 = vld [vmem:[#allocation8 + $0x320] sm:$0xff] }
 0x31a   :  { %13541 = vmatpush1.bf16.msra.mxu1 %v19743_v63  ;;  %13378 = vmatprep.subr.bf16.mxu0 %v19774_v37  ;;  %v561_v63 = vld [vmem:[#allocation8 + $0x3a0] sm:$0xff]  ;;  %v546_v37 = vld [vmem:[#allocation8 + $0x328] sm:$0xff] }
 0x31b   :  { %13542 = vmatprep.subr.bf16.mxu1 %v19776_v38  ;;  %v562_v38 = vld [vmem:[#allocation8 + $0x3a8] sm:$0xff]  ;;  %v17922_v40 = vcombine.high %v545_v35, %v561_v63  ;;  %v17921_v53 = vcombine.low %v545_v35, %v561_v63 }
 0x31c   :  { %v17924_v42 = vcombine.high %v546_v37, %v562_v38  ;;  %v17923_v44 = vcombine.low %v546_v37, %v562_v38 }
 0x31d   :  { %13379 = vmatpush1.bf16.msra.mxu0 %v19773_v43  ;;  %v577_v43 = vld [vmem:[#allocation8 + $0x420] sm:$0xff] }
 0x31e   :  { %13543 = vmatpush1.bf16.msra.mxu1 %v19775_v50  ;;  %13380 = vmatprep.subr.bf16.mxu0 %v19806_v52  ;;  %v593_v50 = vld [vmem:[#allocation8 + $0x4a0] sm:$0xff]  ;;  %v578_v52 = vld [vmem:[#allocation8 + $0x428] sm:$0xff] }
 0x31f   :  { %13544 = vmatprep.subr.bf16.mxu1 %v19808_v16  ;;  %v594_v16 = vld [vmem:[#allocation8 + $0x4a8] sm:$0xff]  ;;  %v17954_v54 = vcombine.high %v577_v43, %v593_v50  ;;  %v17953_v1 = vcombine.low %v577_v43, %v593_v50 }
 0x320   :  { %v17956_v56 = vcombine.high %v578_v52, %v594_v16  ;;  %v17955_v3 = vcombine.low %v578_v52, %v594_v16 }
 0x321   :  { %13381 = vmatpush1.bf16.msra.mxu0 %v19805_v57  ;;  %v609_v57 = vld [vmem:[#allocation8 + $0x520] sm:$0xff] }
 0x322   :  { %13545 = vmatpush1.bf16.msra.mxu1 %v19807_v58  ;;  %13382 = vmatprep.subr.bf16.mxu0 %v19838_v62  ;;  %v625_v58 = vld [vmem:[#allocation8 + $0x5a0] sm:$0xff]  ;;  %v610_v62 = vld [vmem:[#allocation8 + $0x528] sm:$0xff] }
 0x323   :  { %13546 = vmatprep.subr.bf16.mxu1 %v19840_v0  ;;  %v626_v0 = vld [vmem:[#allocation8 + $0x5a8] sm:$0xff]  ;;  %v17986_v4 = vcombine.high %v609_v57, %v625_v58  ;;  %v17985_v12 = vcombine.low %v609_v57, %v625_v58 }
 0x324   :  { %v17988_v5 = vcombine.high %v610_v62, %v626_v0  ;;  %v17987_v17 = vcombine.low %v610_v62, %v626_v0 }
 0x325   :  { %13383 = vmatpush1.bf16.msra.mxu0 %v19837_v8  ;;  %v641_v8 = vld [vmem:[#allocation8 + $0x620] sm:$0xff] }
 0x326   :  { %13547 = vmatpush1.bf16.msra.mxu1 %v19839_v9  ;;  %13557 = vmatprep.subr.bf16.mxu0 %v17826_v10  ;;  %v657_v9 = vld [vmem:[#allocation8 + $0x6a0] sm:$0xff]  ;;  %v642_v10 = vld [vmem:[#allocation8 + $0x628] sm:$0xff] }
 0x327   :  { %13721 = vmatprep.subr.bf16.mxu1 %v17828_v11  ;;  %v658_v11 = vld [vmem:[#allocation8 + $0x6a8] sm:$0xff]  ;;  %v18017_v27 = vcombine.low %v641_v8, %v657_v9 }
 0x328   :  { %13385 = vmatmul.mubr.bf16.vlgmr.msra.gmra.mrb[12].mxu0 %v22959_v24  ;;  %v18020_v21 = vcombine.high %v642_v10, %v658_v11 }
 0x329   :  { %13549 = vmatmul.mubr.bf16.vlgmr.msra.gmra.mrb[12].mxu1 %v22959_v24  ;;  %13558 = vmatpush1.bf16.msra.mxu0 %v17825_v18  ;;  %v18018_v18 = vcombine.high %v641_v8, %v657_v9 }
 0x32a   :  { %13589 = vmatprep.mubr.bf16.mxu0 %v22894_v6  ;;  %13722 = vmatpush1.bf16.msra.mxu1 %v17827_v22  ;;  %v689_v22 = vld [vmem:[#allocation8 + $0x7a0] sm:$0xff] }
 0x32b   :  { %13753 = vmatprep.mubr.bf16.mxu1 %v22894_v6  ;;  %13559 = vmatprep.subr.bf16.mxu0 %v17858_v26  ;;  %v674_v26 = vld [vmem:[#allocation8 + $0x728] sm:$0xff]  ;;  %v18050_v28 = vcombine.high %v673_v59, %v689_v22  ;;  %v18049_v35 = vcombine.low %v673_v59, %v689_v22 }
 0x32c   :  { %13723 = vmatprep.subr.bf16.mxu1 %v17860_v15  ;;  %v18019_v15 = vcombine.low %v642_v10, %v658_v11  ;;  %v18052_v29 = vcombine.high %v674_v26, %v690_v46  ;;  %v18051_v63 = vcombine.low %v674_v26, %v690_v46 }
 0x32d   :  { %13560 = vmatpush1.bf16.msra.mxu0 %v17857_v30  ;;  %v705_v30 = vld [vmem:[#allocation8 + $0x820] sm:$0xff] }
 0x32e   :  { %13724 = vmatpush1.bf16.msra.mxu1 %v17859_v31  ;;  %13561 = vmatprep.subr.bf16.mxu0 %v17890_v32  ;;  %v721_v31 = vld [vmem:[#allocation8 + $0x8a0] sm:$0xff]  ;;  %v706_v32 = vld [vmem:[#allocation8 + $0x828] sm:$0xff] }
 0x32f   :  { %13725 = vmatprep.subr.bf16.mxu1 %v17892_v33  ;;  %v722_v33 = vld [vmem:[#allocation8 + $0x8a8] sm:$0xff]  ;;  %v18082_v37 = vcombine.high %v705_v30, %v721_v31  ;;  %v18081_v43 = vcombine.low %v705_v30, %v721_v31 }
 0x330   :  { %v18084_v38 = vcombine.high %v706_v32, %v722_v33  ;;  %v18083_v50 = vcombine.low %v706_v32, %v722_v33 }
 0x331   :  { %13562 = vmatpush1.bf16.msra.mxu0 %v17889_v39  ;;  %v737_v39 = vld [vmem:[#allocation8 + $0x920] sm:$0xff] }
 0x332   :  { %13726 = vmatpush1.bf16.msra.mxu1 %v17891_v55  ;;  %13563 = vmatprep.subr.bf16.mxu0 %v17922_v40  ;;  %v753_v55 = vld [vmem:[#allocation8 + $0x9a0] sm:$0xff]  ;;  %v738_v40 = vld [vmem:[#allocation8 + $0x928] sm:$0xff] }
 0x333   :  { %13727 = vmatprep.subr.bf16.mxu1 %v17924_v42  ;;  %v754_v42 = vld [vmem:[#allocation8 + $0x9a8] sm:$0xff]  ;;  %v18114_v52 = vcombine.high %v737_v39, %v753_v55  ;;  %v18113_v57 = vcombine.low %v737_v39, %v753_v55 }
 0x334   :  { %v18116_v16 = vcombine.high %v738_v40, %v754_v42  ;;  %v18115_v58 = vcombine.low %v738_v40, %v754_v42 }
 0x335   :  { %13564 = vmatpush1.bf16.msra.mxu0 %v17921_v53  ;;  %v769_v53 = vld [vmem:[#allocation8 + $0xa20] sm:$0xff] }
 0x336   :  { %13728 = vmatpush1.bf16.msra.mxu1 %v17923_v44  ;;  %13565 = vmatprep.subr.bf16.mxu0 %v17954_v54  ;;  %v785_v44 = vld [vmem:[#allocation8 + $0xaa0] sm:$0xff]  ;;  %v770_v54 = vld [vmem:[#allocation8 + $0xa28] sm:$0xff] }
 0x337   :  { %13729 = vmatprep.subr.bf16.mxu1 %v17956_v56  ;;  %v786_v56 = vld [vmem:[#allocation8 + $0xaa8] sm:$0xff]  ;;  %v18146_v62 = vcombine.high %v769_v53, %v785_v44  ;;  %v18145_v8 = vcombine.low %v769_v53, %v785_v44 }
 0x338   :  { %v18148_v0 = vcombine.high %v770_v54, %v786_v56  ;;  %v18147_v9 = vcombine.low %v770_v54, %v786_v56 }
 0x339   :  { %13566 = vmatpush1.bf16.msra.mxu0 %v17953_v1  ;;  %v801_v1 = vld [vmem:[#allocation8 + $0xb20] sm:$0xff] }
 0x33a   :  { %13730 = vmatpush1.bf16.msra.mxu1 %v17955_v3  ;;  %13567 = vmatprep.subr.bf16.mxu0 %v17986_v4  ;;  %v817_v3 = vld [vmem:[#allocation8 + $0xba0] sm:$0xff]  ;;  %v802_v4 = vld [vmem:[#allocation8 + $0xb28] sm:$0xff] }
 0x33b   :  { %13731 = vmatprep.subr.bf16.mxu1 %v17988_v5  ;;  %v818_v5 = vld [vmem:[#allocation8 + $0xba8] sm:$0xff]  ;;  %v18178_v10 = vcombine.high %v801_v1, %v817_v3  ;;  %v18177_v59 = vcombine.low %v801_v1, %v817_v3 }
 0x33c   :  { %v18180_v11 = vcombine.high %v802_v4, %v818_v5  ;;  %v18179_v22 = vcombine.low %v802_v4, %v818_v5 }
 0x33d   :  { %13568 = vmatpush1.bf16.msra.mxu0 %v17985_v12  ;;  %v833_v12 = vld [vmem:[#allocation8 + $0xc20] sm:$0xff] }
 0x33e   :  { %13732 = vmatpush1.bf16.msra.mxu1 %v17987_v17  ;;  %13569 = vmatprep.subr.bf16.mxu0 %v18018_v18  ;;  %v849_v17 = vld [vmem:[#allocation8 + $0xca0] sm:$0xff]  ;;  %v834_v18 = vld [vmem:[#allocation8 + $0xc28] sm:$0xff] }
 0x33f   :  { %13733 = vmatprep.subr.bf16.mxu1 %v18020_v21  ;;  %v850_v21 = vld [vmem:[#allocation8 + $0xca8] sm:$0xff]  ;;  %v18210_v26 = vcombine.high %v833_v12, %v849_v17  ;;  %v18209_v30 = vcombine.low %v833_v12, %v849_v17 }
 0x340   :  { %v18212_v46 = vcombine.high %v834_v18, %v850_v21  ;;  %v18211_v31 = vcombine.low %v834_v18, %v850_v21  ;;  %v1010_v12 = vld [vmem:[#allocation8 + $0x11a8] sm:$0xff]  ;;  %v1025_v21 = vld [vmem:[#allocation8 + $0x1220] sm:$0xff] }
 0x341   :  { %13570 = vmatpush1.bf16.msra.mxu0 %v18017_v27  ;;  %v865_v27 = vld [vmem:[#allocation8 + $0xd20] sm:$0xff] }
 0x342   :  { %13734 = vmatpush1.bf16.msra.mxu1 %v18019_v15  ;;  %13571 = vmatprep.subr.bf16.mxu0 %v18050_v28  ;;  %v881_v15 = vld [vmem:[#allocation8 + $0xda0] sm:$0xff]  ;;  %v866_v28 = vld [vmem:[#allocation8 + $0xd28] sm:$0xff] }
 0x343   :  { %13735 = vmatprep.subr.bf16.mxu1 %v18052_v29  ;;  %v882_v29 = vld [vmem:[#allocation8 + $0xda8] sm:$0xff]  ;;  %v18242_v32 = vcombine.high %v865_v27, %v881_v15  ;;  %v18241_v39 = vcombine.low %v865_v27, %v881_v15 }
 0x344   :  { %v18244_v33 = vcombine.high %v866_v28, %v882_v29  ;;  %v18243_v55 = vcombine.low %v866_v28, %v882_v29 }
 0x345   :  { %13572 = vmatpush1.bf16.msra.mxu0 %v18049_v35  ;;  %v897_v35 = vld [vmem:[#allocation8 + $0xe20] sm:$0xff] }
 0x346   :  { %13736 = vmatpush1.bf16.msra.mxu1 %v18051_v63  ;;  %13573 = vmatprep.subr.bf16.mxu0 %v18082_v37  ;;  %v913_v63 = vld [vmem:[#allocation8 + $0xea0] sm:$0xff]  ;;  %v898_v37 = vld [vmem:[#allocation8 + $0xe28] sm:$0xff] }
 0x347   :  { %13737 = vmatprep.subr.bf16.mxu1 %v18084_v38  ;;  %v914_v38 = vld [vmem:[#allocation8 + $0xea8] sm:$0xff]  ;;  %v18274_v40 = vcombine.high %v897_v35, %v913_v63  ;;  %v18273_v53 = vcombine.low %v897_v35, %v913_v63 }
 0x348   :  { %v18276_v42 = vcombine.high %v898_v37, %v914_v38  ;;  %v18275_v44 = vcombine.low %v898_v37, %v914_v38 }
 0x349   :  { %13574 = vmatpush1.bf16.msra.mxu0 %v18081_v43  ;;  %v929_v43 = vld [vmem:[#allocation8 + $0xf20] sm:$0xff] }
 0x34a   :  { %13738 = vmatpush1.bf16.msra.mxu1 %v18083_v50  ;;  %13575 = vmatprep.subr.bf16.mxu0 %v18114_v52  ;;  %v945_v50 = vld [vmem:[#allocation8 + $0xfa0] sm:$0xff]  ;;  %v930_v52 = vld [vmem:[#allocation8 + $0xf28] sm:$0xff] }
 0x34b   :  { %13739 = vmatprep.subr.bf16.mxu1 %v18116_v16  ;;  %v946_v16 = vld [vmem:[#allocation8 + $0xfa8] sm:$0xff]  ;;  %v18306_v54 = vcombine.high %v929_v43, %v945_v50  ;;  %v18305_v1 = vcombine.low %v929_v43, %v945_v50 }
 0x34c   :  { %v18308_v56 = vcombine.high %v930_v52, %v946_v16  ;;  %v18307_v3 = vcombine.low %v930_v52, %v946_v16 }
 0x34d   :  { %13576 = vmatpush1.bf16.msra.mxu0 %v18113_v57  ;;  %v961_v57 = vld [vmem:[#allocation8 + $0x1020] sm:$0xff] }
 0x34e   :  { %13740 = vmatpush1.bf16.msra.mxu1 %v18115_v58  ;;  %13577 = vmatprep.subr.bf16.mxu0 %v18146_v62  ;;  %v977_v58 = vld [vmem:[#allocation8 + $0x10a0] sm:$0xff]  ;;  %v962_v62 = vld [vmem:[#allocation8 + $0x1028] sm:$0xff] }
 0x34f   :  { %13741 = vmatprep.subr.bf16.mxu1 %v18148_v0  ;;  %v978_v0 = vld [vmem:[#allocation8 + $0x10a8] sm:$0xff]  ;;  %v18338_v4 = vcombine.high %v961_v57, %v977_v58 }
 0x350   :  { %v18340_v5 = vcombine.high %v962_v62, %v978_v0  ;;  %v18339_v17 = vcombine.low %v962_v62, %v978_v0 }
 0x351   :  { %13578 = vmatpush1.bf16.msra.mxu0 %v18145_v8  ;;  %v993_v8 = vld [vmem:[#allocation8 + $0x1120] sm:$0xff] }
 0x352   :  { %13742 = vmatpush1.bf16.msra.mxu1 %v18147_v9  ;;  %13579 = vmatprep.subr.bf16.mxu0 %v18178_v10  ;;  %v1009_v9 = vld [vmem:[#allocation8 + $0x11a0] sm:$0xff]  ;;  %v18337_v10 = vcombine.low %v961_v57, %v977_v58 }
 0x353   :  { %13743 = vmatprep.subr.bf16.mxu1 %v18180_v11  ;;  %v994_v11 = vld [vmem:[#allocation8 + $0x1128] sm:$0xff]  ;;  %v18370_v18 = vcombine.high %v993_v8, %v1009_v9  ;;  %v18369_v27 = vcombine.low %v993_v8, %v1009_v9 }
 0x354   :  { %v18371_v15 = vcombine.low %v994_v11, %v1010_v12 }
 0x355   :  { %13580 = vmatpush1.bf16.msra.mxu0 %v18177_v59  ;;  %v1041_v59 = vld [vmem:[#allocation8 + $0x12a0] sm:$0xff] }
 0x356   :  { %13744 = vmatpush1.bf16.msra.mxu1 %v18179_v22  ;;  %13581 = vmatprep.subr.bf16.mxu0 %v18210_v26  ;;  %v18372_v22 = vcombine.high %v994_v11, %v1010_v12  ;;  %v1026_v26 = vld [vmem:[#allocation8 + $0x1228] sm:$0xff]  ;;  %v18402_v28 = vcombine.high %v1025_v21, %v1041_v59  ;;  %v18401_v35 = vcombine.low %v1025_v21, %v1041_v59  ;;  %v1185_v12 = vld [vmem:[#allocation8 + $0x1720] sm:$0xff] }
 0x357   :  { %13745 = vmatprep.subr.bf16.mxu1 %v18212_v46  ;;  %v1042_v46 = vld [vmem:[#allocation8 + $0x12a8] sm:$0xff] }
 0x358   :  { %v18404_v29 = vcombine.high %v1026_v26, %v1042_v46  ;;  %v18403_v63 = vcombine.low %v1026_v26, %v1042_v46  ;;  %v1202_v21 = vld [vmem:[#allocation8 + $0x17a8] sm:$0xff] }
 0x359   :  { %13582 = vmatpush1.bf16.msra.mxu0 %v18209_v30  ;;  %v1057_v30 = vld [vmem:[#allocation8 + $0x1320] sm:$0xff] }
 0x35a   :  { %13746 = vmatpush1.bf16.msra.mxu1 %v18211_v31  ;;  %13583 = vmatprep.subr.bf16.mxu0 %v18242_v32  ;;  %v1073_v31 = vld [vmem:[#allocation8 + $0x13a0] sm:$0xff]  ;;  %v1058_v32 = vld [vmem:[#allocation8 + $0x1328] sm:$0xff] }
 0x35b   :  { %13747 = vmatprep.subr.bf16.mxu1 %v18244_v33  ;;  %v1074_v33 = vld [vmem:[#allocation8 + $0x13a8] sm:$0xff]  ;;  %v18434_v37 = vcombine.high %v1057_v30, %v1073_v31  ;;  %v18433_v43 = vcombine.low %v1057_v30, %v1073_v31 }
 0x35c   :  { %v18436_v38 = vcombine.high %v1058_v32, %v1074_v33  ;;  %v18435_v50 = vcombine.low %v1058_v32, %v1074_v33 }
 0x35d   :  { %13584 = vmatpush1.bf16.msra.mxu0 %v18241_v39  ;;  %v1089_v39 = vld [vmem:[#allocation8 + $0x1420] sm:$0xff] }
 0x35e   :  { %13748 = vmatpush1.bf16.msra.mxu1 %v18243_v55  ;;  %13585 = vmatprep.subr.bf16.mxu0 %v18274_v40  ;;  %v1105_v55 = vld [vmem:[#allocation8 + $0x14a0] sm:$0xff]  ;;  %v1090_v40 = vld [vmem:[#allocation8 + $0x1428] sm:$0xff] }
 0x35f   :  { %13749 = vmatprep.subr.bf16.mxu1 %v18276_v42  ;;  %v1106_v42 = vld [vmem:[#allocation8 + $0x14a8] sm:$0xff]  ;;  %v18466_v52 = vcombine.high %v1089_v39, %v1105_v55  ;;  %v18465_v57 = vcombine.low %v1089_v39, %v1105_v55 }
 0x360   :  { %v18468_v16 = vcombine.high %v1090_v40, %v1106_v42  ;;  %v18467_v58 = vcombine.low %v1090_v40, %v1106_v42 }
 0x361   :  { %13586 = vmatpush1.bf16.msra.mxu0 %v18273_v53  ;;  %v1121_v53 = vld [vmem:[#allocation8 + $0x1520] sm:$0xff] }
 0x362   :  { %13750 = vmatpush1.bf16.msra.mxu1 %v18275_v44  ;;  %13587 = vmatprep.subr.bf16.mxu0 %v18306_v54  ;;  %v1137_v44 = vld [vmem:[#allocation8 + $0x15a0] sm:$0xff]  ;;  %v1122_v54 = vld [vmem:[#allocation8 + $0x1528] sm:$0xff] }
 0x363   :  { %13751 = vmatprep.subr.bf16.mxu1 %v18308_v56  ;;  %v1138_v56 = vld [vmem:[#allocation8 + $0x15a8] sm:$0xff]  ;;  %v18498_v62 = vcombine.high %v1121_v53, %v1137_v44  ;;  %v18497_v8 = vcombine.low %v1121_v53, %v1137_v44 }
 0x364   :  { %v18500_v0 = vcombine.high %v1122_v54, %v1138_v56  ;;  %v18499_v9 = vcombine.low %v1122_v54, %v1138_v56 }
 0x365   :  { %13588 = vmatpush1.bf16.msra.mxu0 %v18305_v1  ;;  %v1153_v1 = vld [vmem:[#allocation8 + $0x1620] sm:$0xff] }
 0x366   :  { %13752 = vmatpush1.bf16.msra.mxu1 %v18307_v3  ;;  %13598 = vmatprep.subr.bf16.mxu0 %v18338_v4  ;;  %v1169_v3 = vld [vmem:[#allocation8 + $0x16a0] sm:$0xff]  ;;  %v1154_v4 = vld [vmem:[#allocation8 + $0x1628] sm:$0xff] }
 0x367   :  { %13762 = vmatprep.subr.bf16.mxu1 %v18340_v5  ;;  %v1170_v5 = vld [vmem:[#allocation8 + $0x16a8] sm:$0xff]  ;;  %v18529_v59 = vcombine.low %v1153_v1, %v1169_v3 }
 0x368   :  { %13590 = vmatmul.mubr.bf16.vlgmr.msra.gmra.mrb[16].mxu0 %v22896_v7  ;;  %v18532_v11 = vcombine.high %v1154_v4, %v1170_v5 }
 0x369   :  { %13754 = vmatmul.mubr.bf16.vlgmr.msra.gmra.mrb[16].mxu1 %v22896_v7  ;;  %13599 = vmatpush1.bf16.msra.mxu0 %v18337_v10  ;;  %v18530_v10 = vcombine.high %v1153_v1, %v1169_v3 }
 0x36a   :  { %13630 = vmatprep.mubr.bf16.mxu0 %v22900_v14  ;;  %13763 = vmatpush1.bf16.msra.mxu1 %v18339_v17  ;;  %v1201_v17 = vld [vmem:[#allocation8 + $0x17a0] sm:$0xff] }
 0x36b   :  { %13794 = vmatprep.mubr.bf16.mxu1 %v22900_v14  ;;  %13600 = vmatprep.subr.bf16.mxu0 %v18370_v18  ;;  %v1186_v18 = vld [vmem:[#allocation8 + $0x1728] sm:$0xff]  ;;  %v18562_v26 = vcombine.high %v1185_v12, %v1201_v17  ;;  %v18561_v30 = vcombine.low %v1185_v12, %v1201_v17 }
 0x36c   :  { %13764 = vmatprep.subr.bf16.mxu1 %v18372_v22  ;;  %v18531_v22 = vcombine.low %v1154_v4, %v1170_v5  ;;  %v18564_v46 = vcombine.high %v1186_v18, %v1202_v21  ;;  %v18563_v31 = vcombine.low %v1186_v18, %v1202_v21 }
 0x36d   :  { %13601 = vmatpush1.bf16.msra.mxu0 %v18369_v27  ;;  %v1217_v27 = vld [vmem:[#allocation8 + $0x1820] sm:$0xff] }
 0x36e   :  { %13765 = vmatpush1.bf16.msra.mxu1 %v18371_v15  ;;  %13602 = vmatprep.subr.bf16.mxu0 %v18402_v28  ;;  %v1233_v15 = vld [vmem:[#allocation8 + $0x18a0] sm:$0xff]  ;;  %v1218_v28 = vld [vmem:[#allocation8 + $0x1828] sm:$0xff] }
 0x36f   :  { %13766 = vmatprep.subr.bf16.mxu1 %v18404_v29  ;;  %v1234_v29 = vld [vmem:[#allocation8 + $0x18a8] sm:$0xff]  ;;  %v18594_v32 = vcombine.high %v1217_v27, %v1233_v15  ;;  %v18593_v39 = vcombine.low %v1217_v27, %v1233_v15 }
 0x370   :  { %v18596_v33 = vcombine.high %v1218_v28, %v1234_v29  ;;  %v18595_v55 = vcombine.low %v1218_v28, %v1234_v29 }
 0x371   :  { %13603 = vmatpush1.bf16.msra.mxu0 %v18401_v35  ;;  %v1249_v35 = vld [vmem:[#allocation8 + $0x1920] sm:$0xff] }
 0x372   :  { %13767 = vmatpush1.bf16.msra.mxu1 %v18403_v63  ;;  %13604 = vmatprep.subr.bf16.mxu0 %v18434_v37  ;;  %v1265_v63 = vld [vmem:[#allocation8 + $0x19a0] sm:$0xff]  ;;  %v1250_v37 = vld [vmem:[#allocation8 + $0x1928] sm:$0xff] }
 0x373   :  { %13768 = vmatprep.subr.bf16.mxu1 %v18436_v38  ;;  %v1266_v38 = vld [vmem:[#allocation8 + $0x19a8] sm:$0xff]  ;;  %v18626_v40 = vcombine.high %v1249_v35, %v1265_v63  ;;  %v18625_v53 = vcombine.low %v1249_v35, %v1265_v63 }
 0x374   :  { %v18628_v42 = vcombine.high %v1250_v37, %v1266_v38  ;;  %v18627_v44 = vcombine.low %v1250_v37, %v1266_v38 }
 0x375   :  { %13605 = vmatpush1.bf16.msra.mxu0 %v18433_v43  ;;  %v1281_v43 = vld [vmem:[#allocation8 + $0x1a20] sm:$0xff] }
 0x376   :  { %13769 = vmatpush1.bf16.msra.mxu1 %v18435_v50  ;;  %13606 = vmatprep.subr.bf16.mxu0 %v18466_v52  ;;  %v1297_v50 = vld [vmem:[#allocation8 + $0x1aa0] sm:$0xff]  ;;  %v1282_v52 = vld [vmem:[#allocation8 + $0x1a28] sm:$0xff] }
 0x377   :  { %13770 = vmatprep.subr.bf16.mxu1 %v18468_v16  ;;  %v1298_v16 = vld [vmem:[#allocation8 + $0x1aa8] sm:$0xff]  ;;  %v18658_v54 = vcombine.high %v1281_v43, %v1297_v50  ;;  %v18657_v1 = vcombine.low %v1281_v43, %v1297_v50 }
 0x378   :  { %v18660_v56 = vcombine.high %v1282_v52, %v1298_v16  ;;  %v18659_v3 = vcombine.low %v1282_v52, %v1298_v16 }
 0x379   :  { %13607 = vmatpush1.bf16.msra.mxu0 %v18465_v57  ;;  %v1313_v57 = vld [vmem:[#allocation8 + $0x1b20] sm:$0xff] }
 0x37a   :  { %13771 = vmatpush1.bf16.msra.mxu1 %v18467_v58  ;;  %13608 = vmatprep.subr.bf16.mxu0 %v18498_v62  ;;  %v1329_v58 = vld [vmem:[#allocation8 + $0x1ba0] sm:$0xff]  ;;  %v1314_v62 = vld [vmem:[#allocation8 + $0x1b28] sm:$0xff] }
 0x37b   :  { %13772 = vmatprep.subr.bf16.mxu1 %v18500_v0  ;;  %v1330_v0 = vld [vmem:[#allocation8 + $0x1ba8] sm:$0xff]  ;;  %v18690_v4 = vcombine.high %v1313_v57, %v1329_v58  ;;  %v18689_v12 = vcombine.low %v1313_v57, %v1329_v58 }
 0x37c   :  { %v18692_v5 = vcombine.high %v1314_v62, %v1330_v0  ;;  %v18691_v17 = vcombine.low %v1314_v62, %v1330_v0 }
 0x37d   :  { %13609 = vmatpush1.bf16.msra.mxu0 %v18497_v8  ;;  %v1345_v8 = vld [vmem:[#allocation8 + $0x1c20] sm:$0xff] }
 0x37e   :  { %13773 = vmatpush1.bf16.msra.mxu1 %v18499_v9  ;;  %13610 = vmatprep.subr.bf16.mxu0 %v18530_v10  ;;  %v1361_v9 = vld [vmem:[#allocation8 + $0x1ca0] sm:$0xff]  ;;  %v1346_v10 = vld [vmem:[#allocation8 + $0x1c28] sm:$0xff] }
 0x37f   :  { %13774 = vmatprep.subr.bf16.mxu1 %v18532_v11  ;;  %v1362_v11 = vld [vmem:[#allocation8 + $0x1ca8] sm:$0xff]  ;;  %v18722_v18 = vcombine.high %v1345_v8, %v1361_v9  ;;  %v18721_v27 = vcombine.low %v1345_v8, %v1361_v9 }
 0x380   :  { %v18724_v21 = vcombine.high %v1346_v10, %v1362_v11  ;;  %v18723_v15 = vcombine.low %v1346_v10, %v1362_v11  ;;  %v1522_v8 = vld [vmem:[#allocation8 + $0x21a8] sm:$0xff]  ;;  %v1537_v11 = vld [vmem:[#allocation8 + $0x2220] sm:$0xff] }
 0x381   :  { %13611 = vmatpush1.bf16.msra.mxu0 %v18529_v59  ;;  %v1377_v59 = vld [vmem:[#allocation8 + $0x1d20] sm:$0xff] }
 0x382   :  { %13775 = vmatpush1.bf16.msra.mxu1 %v18531_v22  ;;  %13612 = vmatprep.subr.bf16.mxu0 %v18562_v26  ;;  %v1393_v22 = vld [vmem:[#allocation8 + $0x1da0] sm:$0xff]  ;;  %v1378_v26 = vld [vmem:[#allocation8 + $0x1d28] sm:$0xff] }
 0x383   :  { %13776 = vmatprep.subr.bf16.mxu1 %v18564_v46  ;;  %v1394_v46 = vld [vmem:[#allocation8 + $0x1da8] sm:$0xff]  ;;  %v18754_v28 = vcombine.high %v1377_v59, %v1393_v22  ;;  %v18753_v35 = vcombine.low %v1377_v59, %v1393_v22 }
 0x384   :  { %v18756_v29 = vcombine.high %v1378_v26, %v1394_v46  ;;  %v18755_v63 = vcombine.low %v1378_v26, %v1394_v46 }
 0x385   :  { %13613 = vmatpush1.bf16.msra.mxu0 %v18561_v30  ;;  %v1409_v30 = vld [vmem:[#allocation8 + $0x1e20] sm:$0xff] }
 0x386   :  { %13777 = vmatpush1.bf16.msra.mxu1 %v18563_v31  ;;  %13614 = vmatprep.subr.bf16.mxu0 %v18594_v32  ;;  %v1425_v31 = vld [vmem:[#allocation8 + $0x1ea0] sm:$0xff]  ;;  %v1410_v32 = vld [vmem:[#allocation8 + $0x1e28] sm:$0xff] }
 0x387   :  { %13778 = vmatprep.subr.bf16.mxu1 %v18596_v33  ;;  %v1426_v33 = vld [vmem:[#allocation8 + $0x1ea8] sm:$0xff]  ;;  %v18786_v37 = vcombine.high %v1409_v30, %v1425_v31  ;;  %v18785_v43 = vcombine.low %v1409_v30, %v1425_v31 }
 0x388   :  { %v18788_v38 = vcombine.high %v1410_v32, %v1426_v33  ;;  %v18787_v50 = vcombine.low %v1410_v32, %v1426_v33 }
 0x389   :  { %13615 = vmatpush1.bf16.msra.mxu0 %v18593_v39  ;;  %v1441_v39 = vld [vmem:[#allocation8 + $0x1f20] sm:$0xff] }
 0x38a   :  { %13779 = vmatpush1.bf16.msra.mxu1 %v18595_v55  ;;  %13616 = vmatprep.subr.bf16.mxu0 %v18626_v40  ;;  %v1457_v55 = vld [vmem:[#allocation8 + $0x1fa0] sm:$0xff]  ;;  %v1442_v40 = vld [vmem:[#allocation8 + $0x1f28] sm:$0xff] }
 0x38b   :  { %13780 = vmatprep.subr.bf16.mxu1 %v18628_v42  ;;  %v1458_v42 = vld [vmem:[#allocation8 + $0x1fa8] sm:$0xff]  ;;  %v18818_v52 = vcombine.high %v1441_v39, %v1457_v55  ;;  %v18817_v57 = vcombine.low %v1441_v39, %v1457_v55 }
 0x38c   :  { %v18820_v16 = vcombine.high %v1442_v40, %v1458_v42  ;;  %v18819_v58 = vcombine.low %v1442_v40, %v1458_v42 }
 0x38d   :  { %13617 = vmatpush1.bf16.msra.mxu0 %v18625_v53  ;;  %v1473_v53 = vld [vmem:[#allocation8 + $0x2020] sm:$0xff] }
 0x38e   :  { %13781 = vmatpush1.bf16.msra.mxu1 %v18627_v44  ;;  %13618 = vmatprep.subr.bf16.mxu0 %v18658_v54  ;;  %v1489_v44 = vld [vmem:[#allocation8 + $0x20a0] sm:$0xff]  ;;  %v1474_v54 = vld [vmem:[#allocation8 + $0x2028] sm:$0xff] }
 0x38f   :  { %13782 = vmatprep.subr.bf16.mxu1 %v18660_v56  ;;  %v1490_v56 = vld [vmem:[#allocation8 + $0x20a8] sm:$0xff]  ;;  %v18850_v62 = vcombine.high %v1473_v53, %v1489_v44 }
 0x390   :  { %v18852_v0 = vcombine.high %v1474_v54, %v1490_v56  ;;  %v18851_v9 = vcombine.low %v1474_v54, %v1490_v56 }
 0x391   :  { %13619 = vmatpush1.bf16.msra.mxu0 %v18657_v1  ;;  %v1505_v1 = vld [vmem:[#allocation8 + $0x2120] sm:$0xff] }
 0x392   :  { %13783 = vmatpush1.bf16.msra.mxu1 %v18659_v3  ;;  %13620 = vmatprep.subr.bf16.mxu0 %v18690_v4  ;;  %v1521_v3 = vld [vmem:[#allocation8 + $0x21a0] sm:$0xff]  ;;  %v18849_v4 = vcombine.low %v1473_v53, %v1489_v44 }
 0x393   :  { %13784 = vmatprep.subr.bf16.mxu1 %v18692_v5  ;;  %v1506_v5 = vld [vmem:[#allocation8 + $0x2128] sm:$0xff]  ;;  %v18882_v10 = vcombine.high %v1505_v1, %v1521_v3  ;;  %v18881_v59 = vcombine.low %v1505_v1, %v1521_v3 }
 0x394   :  { %v18883_v22 = vcombine.low %v1506_v5, %v1522_v8 }
 0x395   :  { %13621 = vmatpush1.bf16.msra.mxu0 %v18689_v12  ;;  %v1553_v12 = vld [vmem:[#allocation8 + $0x22a0] sm:$0xff] }
 0x396   :  { %13785 = vmatpush1.bf16.msra.mxu1 %v18691_v17  ;;  %13622 = vmatprep.subr.bf16.mxu0 %v18722_v18  ;;  %v18884_v17 = vcombine.high %v1506_v5, %v1522_v8  ;;  %v1538_v18 = vld [vmem:[#allocation8 + $0x2228] sm:$0xff]  ;;  %v18914_v26 = vcombine.high %v1537_v11, %v1553_v12  ;;  %v18913_v30 = vcombine.low %v1537_v11, %v1553_v12  ;;  %v1697_v8 = vld [vmem:[#allocation8 + $0x2720] sm:$0xff] }
 0x397   :  { %13786 = vmatprep.subr.bf16.mxu1 %v18724_v21  ;;  %v1554_v21 = vld [vmem:[#allocation8 + $0x22a8] sm:$0xff] }
 0x398   :  { %v18916_v46 = vcombine.high %v1538_v18, %v1554_v21  ;;  %v18915_v31 = vcombine.low %v1538_v18, %v1554_v21  ;;  %v1714_v11 = vld [vmem:[#allocation8 + $0x27a8] sm:$0xff] }
 0x399   :  { %13623 = vmatpush1.bf16.msra.mxu0 %v18721_v27  ;;  %v1569_v27 = vld [vmem:[#allocation8 + $0x2320] sm:$0xff] }
 0x39a   :  { %13787 = vmatpush1.bf16.msra.mxu1 %v18723_v15  ;;  %13624 = vmatprep.subr.bf16.mxu0 %v18754_v28  ;;  %v1585_v15 = vld [vmem:[#allocation8 + $0x23a0] sm:$0xff]  ;;  %v1570_v28 = vld [vmem:[#allocation8 + $0x2328] sm:$0xff] }
 0x39b   :  { %13788 = vmatprep.subr.bf16.mxu1 %v18756_v29  ;;  %v1586_v29 = vld [vmem:[#allocation8 + $0x23a8] sm:$0xff]  ;;  %v18946_v32 = vcombine.high %v1569_v27, %v1585_v15  ;;  %v18945_v39 = vcombine.low %v1569_v27, %v1585_v15 }
 0x39c   :  { %v18948_v33 = vcombine.high %v1570_v28, %v1586_v29  ;;  %v18947_v55 = vcombine.low %v1570_v28, %v1586_v29 }
 0x39d   :  { %13625 = vmatpush1.bf16.msra.mxu0 %v18753_v35  ;;  %v1601_v35 = vld [vmem:[#allocation8 + $0x2420] sm:$0xff] }
 0x39e   :  { %13789 = vmatpush1.bf16.msra.mxu1 %v18755_v63  ;;  %13626 = vmatprep.subr.bf16.mxu0 %v18786_v37  ;;  %v1617_v63 = vld [vmem:[#allocation8 + $0x24a0] sm:$0xff]  ;;  %v1602_v37 = vld [vmem:[#allocation8 + $0x2428] sm:$0xff] }
 0x39f   :  { %13790 = vmatprep.subr.bf16.mxu1 %v18788_v38  ;;  %v1618_v38 = vld [vmem:[#allocation8 + $0x24a8] sm:$0xff]  ;;  %v18978_v40 = vcombine.high %v1601_v35, %v1617_v63  ;;  %v18977_v53 = vcombine.low %v1601_v35, %v1617_v63 }
 0x3a0   :  { %v18980_v42 = vcombine.high %v1602_v37, %v1618_v38  ;;  %v18979_v44 = vcombine.low %v1602_v37, %v1618_v38 }
 0x3a1   :  { %13627 = vmatpush1.bf16.msra.mxu0 %v18785_v43  ;;  %v1633_v43 = vld [vmem:[#allocation8 + $0x2520] sm:$0xff] }
 0x3a2   :  { %13791 = vmatpush1.bf16.msra.mxu1 %v18787_v50  ;;  %13628 = vmatprep.subr.bf16.mxu0 %v18818_v52  ;;  %v1649_v50 = vld [vmem:[#allocation8 + $0x25a0] sm:$0xff]  ;;  %v1634_v52 = vld [vmem:[#allocation8 + $0x2528] sm:$0xff] }
 0x3a3   :  { %13792 = vmatprep.subr.bf16.mxu1 %v18820_v16  ;;  %v1650_v16 = vld [vmem:[#allocation8 + $0x25a8] sm:$0xff]  ;;  %v19010_v54 = vcombine.high %v1633_v43, %v1649_v50  ;;  %v19009_v1 = vcombine.low %v1633_v43, %v1649_v50 }
 0x3a4   :  { %v19012_v56 = vcombine.high %v1634_v52, %v1650_v16  ;;  %v19011_v3 = vcombine.low %v1634_v52, %v1650_v16 }
 0x3a5   :  { %13629 = vmatpush1.bf16.msra.mxu0 %v18817_v57  ;;  %v1665_v57 = vld [vmem:[#allocation8 + $0x2620] sm:$0xff] }
 0x3a6   :  { %13793 = vmatpush1.bf16.msra.mxu1 %v18819_v58  ;;  %13639 = vmatprep.subr.bf16.mxu0 %v18850_v62  ;;  %v1681_v58 = vld [vmem:[#allocation8 + $0x26a0] sm:$0xff]  ;;  %v1666_v62 = vld [vmem:[#allocation8 + $0x2628] sm:$0xff] }
 0x3a7   :  { %13803 = vmatprep.subr.bf16.mxu1 %v18852_v0  ;;  %v1682_v0 = vld [vmem:[#allocation8 + $0x26a8] sm:$0xff]  ;;  %v19041_v12 = vcombine.low %v1665_v57, %v1681_v58 }
 0x3a8   :  { %13631 = vmatmul.mubr.bf16.vlgmr.msra.gmra.mrb[16].mxu0 %v22926_v51  ;;  %v19044_v5 = vcombine.high %v1666_v62, %v1682_v0 }
 0x3a9   :  { %13795 = vmatmul.mubr.bf16.vlgmr.msra.gmra.mrb[16].mxu1 %v22926_v51  ;;  %13640 = vmatpush1.bf16.msra.mxu0 %v18849_v4  ;;  %v19042_v4 = vcombine.high %v1665_v57, %v1681_v58 }
 0x3aa   :  { %13671 = vmatprep.mubr.bf16.mxu0 %v22928_v61  ;;  %13804 = vmatpush1.bf16.msra.mxu1 %v18851_v9  ;;  %v1713_v9 = vld [vmem:[#allocation8 + $0x27a0] sm:$0xff] }
 0x3ab   :  { %13835 = vmatprep.mubr.bf16.mxu1 %v22928_v61  ;;  %13641 = vmatprep.subr.bf16.mxu0 %v18882_v10  ;;  %v1698_v10 = vld [vmem:[#allocation8 + $0x2728] sm:$0xff]  ;;  %v19074_v18 = vcombine.high %v1697_v8, %v1713_v9  ;;  %v19073_v27 = vcombine.low %v1697_v8, %v1713_v9 }
 0x3ac   :  { %13805 = vmatprep.subr.bf16.mxu1 %v18884_v17  ;;  %v19043_v17 = vcombine.low %v1666_v62, %v1682_v0  ;;  %v19076_v21 = vcombine.high %v1698_v10, %v1714_v11  ;;  %v19075_v15 = vcombine.low %v1698_v10, %v1714_v11 }
 0x3ad   :  { %13642 = vmatpush1.bf16.msra.mxu0 %v18881_v59  ;;  %v1729_v59 = vld [vmem:[#allocation8 + $0x2820] sm:$0xff] }
 0x3ae   :  { %13806 = vmatpush1.bf16.msra.mxu1 %v18883_v22  ;;  %13643 = vmatprep.subr.bf16.mxu0 %v18914_v26  ;;  %v1745_v22 = vld [vmem:[#allocation8 + $0x28a0] sm:$0xff]  ;;  %v1730_v26 = vld [vmem:[#allocation8 + $0x2828] sm:$0xff] }
 0x3af   :  { %13807 = vmatprep.subr.bf16.mxu1 %v18916_v46  ;;  %v1746_v46 = vld [vmem:[#allocation8 + $0x28a8] sm:$0xff]  ;;  %v19106_v28 = vcombine.high %v1729_v59, %v1745_v22  ;;  %v19105_v35 = vcombine.low %v1729_v59, %v1745_v22 }
 0x3b0   :  { %v19108_v29 = vcombine.high %v1730_v26, %v1746_v46  ;;  %v19107_v63 = vcombine.low %v1730_v26, %v1746_v46 }
 0x3b1   :  { %13644 = vmatpush1.bf16.msra.mxu0 %v18913_v30  ;;  %v1761_v30 = vld [vmem:[#allocation8 + $0x2920] sm:$0xff] }
 0x3b2   :  { %13808 = vmatpush1.bf16.msra.mxu1 %v18915_v31  ;;  %13645 = vmatprep.subr.bf16.mxu0 %v18946_v32  ;;  %v1777_v31 = vld [vmem:[#allocation8 + $0x29a0] sm:$0xff]  ;;  %v1762_v32 = vld [vmem:[#allocation8 + $0x2928] sm:$0xff] }
 0x3b3   :  { %13809 = vmatprep.subr.bf16.mxu1 %v18948_v33  ;;  %v1778_v33 = vld [vmem:[#allocation8 + $0x29a8] sm:$0xff]  ;;  %v19138_v37 = vcombine.high %v1761_v30, %v1777_v31  ;;  %v19137_v43 = vcombine.low %v1761_v30, %v1777_v31 }
 0x3b4   :  { %v19140_v38 = vcombine.high %v1762_v32, %v1778_v33  ;;  %v19139_v50 = vcombine.low %v1762_v32, %v1778_v33 }
 0x3b5   :  { %13646 = vmatpush1.bf16.msra.mxu0 %v18945_v39  ;;  %v1793_v39 = vld [vmem:[#allocation8 + $0x2a20] sm:$0xff] }
 0x3b6   :  { %13810 = vmatpush1.bf16.msra.mxu1 %v18947_v55  ;;  %13647 = vmatprep.subr.bf16.mxu0 %v18978_v40  ;;  %v1809_v55 = vld [vmem:[#allocation8 + $0x2aa0] sm:$0xff]  ;;  %v1794_v40 = vld [vmem:[#allocation8 + $0x2a28] sm:$0xff] }
 0x3b7   :  { %13811 = vmatprep.subr.bf16.mxu1 %v18980_v42  ;;  %v1810_v42 = vld [vmem:[#allocation8 + $0x2aa8] sm:$0xff]  ;;  %v19170_v52 = vcombine.high %v1793_v39, %v1809_v55  ;;  %v19169_v57 = vcombine.low %v1793_v39, %v1809_v55 }
 0x3b8   :  { %v19172_v16 = vcombine.high %v1794_v40, %v1810_v42  ;;  %v19171_v58 = vcombine.low %v1794_v40, %v1810_v42 }
 0x3b9   :  { %13648 = vmatpush1.bf16.msra.mxu0 %v18977_v53  ;;  %v1825_v53 = vld [vmem:[#allocation8 + $0x2b20] sm:$0xff] }
 0x3ba   :  { %13812 = vmatpush1.bf16.msra.mxu1 %v18979_v44  ;;  %13649 = vmatprep.subr.bf16.mxu0 %v19010_v54  ;;  %v1841_v44 = vld [vmem:[#allocation8 + $0x2ba0] sm:$0xff]  ;;  %v1826_v54 = vld [vmem:[#allocation8 + $0x2b28] sm:$0xff] }
 0x3bb   :  { %13813 = vmatprep.subr.bf16.mxu1 %v19012_v56  ;;  %v1842_v56 = vld [vmem:[#allocation8 + $0x2ba8] sm:$0xff]  ;;  %v19202_v62 = vcombine.high %v1825_v53, %v1841_v44  ;;  %v19201_v8 = vcombine.low %v1825_v53, %v1841_v44 }
 0x3bc   :  { %v19204_v0 = vcombine.high %v1826_v54, %v1842_v56  ;;  %v19203_v9 = vcombine.low %v1826_v54, %v1842_v56 }
 0x3bd   :  { %13650 = vmatpush1.bf16.msra.mxu0 %v19009_v1  ;;  %v1857_v1 = vld [vmem:[#allocation8 + $0x2c20] sm:$0xff] }
 0x3be   :  { %13814 = vmatpush1.bf16.msra.mxu1 %v19011_v3  ;;  %13651 = vmatprep.subr.bf16.mxu0 %v19042_v4  ;;  %v1873_v3 = vld [vmem:[#allocation8 + $0x2ca0] sm:$0xff]  ;;  %v1858_v4 = vld [vmem:[#allocation8 + $0x2c28] sm:$0xff] }
 0x3bf   :  { %13815 = vmatprep.subr.bf16.mxu1 %v19044_v5  ;;  %v1874_v5 = vld [vmem:[#allocation8 + $0x2ca8] sm:$0xff]  ;;  %v19234_v10 = vcombine.high %v1857_v1, %v1873_v3  ;;  %v19233_v59 = vcombine.low %v1857_v1, %v1873_v3 }
 0x3c0   :  { %v19236_v11 = vcombine.high %v1858_v4, %v1874_v5  ;;  %v19235_v22 = vcombine.low %v1858_v4, %v1874_v5  ;;  %v2034_v1 = vld [vmem:[#allocation8 + $0x31a8] sm:$0xff]  ;;  %v2049_v5 = vld [vmem:[#allocation8 + $0x3220] sm:$0xff] }
 0x3c1   :  { %13652 = vmatpush1.bf16.msra.mxu0 %v19041_v12  ;;  %v1889_v12 = vld [vmem:[#allocation8 + $0x2d20] sm:$0xff] }
 0x3c2   :  { %13816 = vmatpush1.bf16.msra.mxu1 %v19043_v17  ;;  %13653 = vmatprep.subr.bf16.mxu0 %v19074_v18  ;;  %v1905_v17 = vld [vmem:[#allocation8 + $0x2da0] sm:$0xff]  ;;  %v1890_v18 = vld [vmem:[#allocation8 + $0x2d28] sm:$0xff] }
 0x3c3   :  { %13817 = vmatprep.subr.bf16.mxu1 %v19076_v21  ;;  %v1906_v21 = vld [vmem:[#allocation8 + $0x2da8] sm:$0xff]  ;;  %v19266_v26 = vcombine.high %v1889_v12, %v1905_v17  ;;  %v19265_v30 = vcombine.low %v1889_v12, %v1905_v17 }
 0x3c4   :  { %v19268_v46 = vcombine.high %v1890_v18, %v1906_v21  ;;  %v19267_v31 = vcombine.low %v1890_v18, %v1906_v21 }
 0x3c5   :  { %13654 = vmatpush1.bf16.msra.mxu0 %v19073_v27  ;;  %v1921_v27 = vld [vmem:[#allocation8 + $0x2e20] sm:$0xff] }
 0x3c6   :  { %13818 = vmatpush1.bf16.msra.mxu1 %v19075_v15  ;;  %13655 = vmatprep.subr.bf16.mxu0 %v19106_v28  ;;  %v1937_v15 = vld [vmem:[#allocation8 + $0x2ea0] sm:$0xff]  ;;  %v1922_v28 = vld [vmem:[#allocation8 + $0x2e28] sm:$0xff] }
 0x3c7   :  { %13819 = vmatprep.subr.bf16.mxu1 %v19108_v29  ;;  %v1938_v29 = vld [vmem:[#allocation8 + $0x2ea8] sm:$0xff]  ;;  %v19298_v32 = vcombine.high %v1921_v27, %v1937_v15  ;;  %v19297_v39 = vcombine.low %v1921_v27, %v1937_v15 }
 0x3c8   :  { %v19300_v33 = vcombine.high %v1922_v28, %v1938_v29  ;;  %v19299_v55 = vcombine.low %v1922_v28, %v1938_v29 }
 0x3c9   :  { %13656 = vmatpush1.bf16.msra.mxu0 %v19105_v35  ;;  %v1953_v35 = vld [vmem:[#allocation8 + $0x2f20] sm:$0xff] }
 0x3ca   :  { %13820 = vmatpush1.bf16.msra.mxu1 %v19107_v63  ;;  %13657 = vmatprep.subr.bf16.mxu0 %v19138_v37  ;;  %v1969_v63 = vld [vmem:[#allocation8 + $0x2fa0] sm:$0xff]  ;;  %v1954_v37 = vld [vmem:[#allocation8 + $0x2f28] sm:$0xff] }
 0x3cb   :  { %13821 = vmatprep.subr.bf16.mxu1 %v19140_v38  ;;  %v1970_v38 = vld [vmem:[#allocation8 + $0x2fa8] sm:$0xff]  ;;  %v19330_v40 = vcombine.high %v1953_v35, %v1969_v63  ;;  %v19329_v53 = vcombine.low %v1953_v35, %v1969_v63 }
 0x3cc   :  { %v19332_v42 = vcombine.high %v1954_v37, %v1970_v38  ;;  %v19331_v44 = vcombine.low %v1954_v37, %v1970_v38 }
 0x3cd   :  { %13658 = vmatpush1.bf16.msra.mxu0 %v19137_v43  ;;  %v1985_v43 = vld [vmem:[#allocation8 + $0x3020] sm:$0xff] }
 0x3ce   :  { %13822 = vmatpush1.bf16.msra.mxu1 %v19139_v50  ;;  %13659 = vmatprep.subr.bf16.mxu0 %v19170_v52  ;;  %v2001_v50 = vld [vmem:[#allocation8 + $0x30a0] sm:$0xff]  ;;  %v1986_v52 = vld [vmem:[#allocation8 + $0x3028] sm:$0xff] }
 0x3cf   :  { %13823 = vmatprep.subr.bf16.mxu1 %v19172_v16  ;;  %v2002_v16 = vld [vmem:[#allocation8 + $0x30a8] sm:$0xff]  ;;  %v19362_v54 = vcombine.high %v1985_v43, %v2001_v50 }
 0x3d0   :  { %v19364_v56 = vcombine.high %v1986_v52, %v2002_v16  ;;  %v19363_v3 = vcombine.low %v1986_v52, %v2002_v16 }
 0x3d1   :  { %13660 = vmatpush1.bf16.msra.mxu0 %v19169_v57  ;;  %v2017_v57 = vld [vmem:[#allocation8 + $0x3120] sm:$0xff] }
 0x3d2   :  { %13824 = vmatpush1.bf16.msra.mxu1 %v19171_v58  ;;  %13661 = vmatprep.subr.bf16.mxu0 %v19202_v62  ;;  %v2033_v58 = vld [vmem:[#allocation8 + $0x31a0] sm:$0xff]  ;;  %v19361_v62 = vcombine.low %v1985_v43, %v2001_v50 }
 0x3d3   :  { %13825 = vmatprep.subr.bf16.mxu1 %v19204_v0  ;;  %v2018_v0 = vld [vmem:[#allocation8 + $0x3128] sm:$0xff]  ;;  %v19394_v4 = vcombine.high %v2017_v57, %v2033_v58  ;;  %v19393_v12 = vcombine.low %v2017_v57, %v2033_v58 }
 0x3d4   :  { %v19395_v17 = vcombine.low %v2018_v0, %v2034_v1 }
 0x3d5   :  { %13662 = vmatpush1.bf16.msra.mxu0 %v19201_v8  ;;  %v2065_v8 = vld [vmem:[#allocation8 + $0x32a0] sm:$0xff] }
 0x3d6   :  { %13826 = vmatpush1.bf16.msra.mxu1 %v19203_v9  ;;  %13663 = vmatprep.subr.bf16.mxu0 %v19234_v10  ;;  %v19396_v9 = vcombine.high %v2018_v0, %v2034_v1  ;;  %v2050_v10 = vld [vmem:[#allocation8 + $0x3228] sm:$0xff]  ;;  %v19426_v18 = vcombine.high %v2049_v5, %v2065_v8  ;;  %v19425_v27 = vcombine.low %v2049_v5, %v2065_v8 }
 0x3d7   :  { %13827 = vmatprep.subr.bf16.mxu1 %v19236_v11  ;;  %v2066_v11 = vld [vmem:[#allocation8 + $0x32a8] sm:$0xff] }
 0x3d8   :  { %v19428_v21 = vcombine.high %v2050_v10, %v2066_v11  ;;  %v19427_v15 = vcombine.low %v2050_v10, %v2066_v11  ;;  %v2226_v10 = vld [vmem:[#allocation8 + $0x37a8] sm:$0xff] }
 0x3d9   :  { %13664 = vmatpush1.bf16.msra.mxu0 %v19233_v59  ;;  %v2081_v59 = vld [vmem:[#allocation8 + $0x3320] sm:$0xff] }
 0x3da   :  { %13828 = vmatpush1.bf16.msra.mxu1 %v19235_v22  ;;  %13665 = vmatprep.subr.bf16.mxu0 %v19266_v26  ;;  %v2097_v22 = vld [vmem:[#allocation8 + $0x33a0] sm:$0xff]  ;;  %v2082_v26 = vld [vmem:[#allocation8 + $0x3328] sm:$0xff] }
 0x3db   :  { %13829 = vmatprep.subr.bf16.mxu1 %v19268_v46  ;;  %v2098_v46 = vld [vmem:[#allocation8 + $0x33a8] sm:$0xff]  ;;  %v19458_v28 = vcombine.high %v2081_v59, %v2097_v22  ;;  %v19457_v35 = vcombine.low %v2081_v59, %v2097_v22 }
 0x3dc   :  { %v19460_v29 = vcombine.high %v2082_v26, %v2098_v46  ;;  %v19459_v63 = vcombine.low %v2082_v26, %v2098_v46 }
 0x3dd   :  { %13666 = vmatpush1.bf16.msra.mxu0 %v19265_v30  ;;  %v2113_v30 = vld [vmem:[#allocation8 + $0x3420] sm:$0xff] }
 0x3de   :  { %13830 = vmatpush1.bf16.msra.mxu1 %v19267_v31  ;;  %13667 = vmatprep.subr.bf16.mxu0 %v19298_v32  ;;  %v2129_v31 = vld [vmem:[#allocation8 + $0x34a0] sm:$0xff]  ;;  %v2114_v32 = vld [vmem:[#allocation8 + $0x3428] sm:$0xff] }
 0x3df   :  { %13831 = vmatprep.subr.bf16.mxu1 %v19300_v33  ;;  %v2130_v33 = vld [vmem:[#allocation8 + $0x34a8] sm:$0xff]  ;;  %v19490_v37 = vcombine.high %v2113_v30, %v2129_v31  ;;  %v19489_v43 = vcombine.low %v2113_v30, %v2129_v31 }
 0x3e0   :  { %v19492_v38 = vcombine.high %v2114_v32, %v2130_v33  ;;  %v19491_v50 = vcombine.low %v2114_v32, %v2130_v33 }
 0x3e1   :  { %13668 = vmatpush1.bf16.msra.mxu0 %v19297_v39  ;;  %v2145_v39 = vld [vmem:[#allocation8 + $0x3520] sm:$0xff] }
 0x3e2   :  { %13832 = vmatpush1.bf16.msra.mxu1 %v19299_v55  ;;  %13669 = vmatprep.subr.bf16.mxu0 %v19330_v40  ;;  %v2161_v55 = vld [vmem:[#allocation8 + $0x35a0] sm:$0xff]  ;;  %v2146_v40 = vld [vmem:[#allocation8 + $0x3528] sm:$0xff] }
 0x3e3   :  { %13833 = vmatprep.subr.bf16.mxu1 %v19332_v42  ;;  %v2162_v42 = vld [vmem:[#allocation8 + $0x35a8] sm:$0xff]  ;;  %v19522_v52 = vcombine.high %v2145_v39, %v2161_v55  ;;  %v19521_v57 = vcombine.low %v2145_v39, %v2161_v55 }
 0x3e4   :  { %v19524_v16 = vcombine.high %v2146_v40, %v2162_v42  ;;  %v19523_v58 = vcombine.low %v2146_v40, %v2162_v42 }
 0x3e5   :  { %13670 = vmatpush1.bf16.msra.mxu0 %v19329_v53  ;;  %v2177_v53 = vld [vmem:[#allocation8 + $0x3620] sm:$0xff] }
 0x3e6   :  { %13834 = vmatpush1.bf16.msra.mxu1 %v19331_v44  ;;  %13680 = vmatprep.subr.bf16.mxu0 %v19362_v54  ;;  %v2193_v44 = vld [vmem:[#allocation8 + $0x36a0] sm:$0xff]  ;;  %v2178_v54 = vld [vmem:[#allocation8 + $0x3628] sm:$0xff] }
 0x3e7   :  { %13844 = vmatprep.subr.bf16.mxu1 %v19364_v56  ;;  %v2194_v56 = vld [vmem:[#allocation8 + $0x36a8] sm:$0xff] }
 0x3e8   :  { %13672 = vmatmul.mubr.bf16.vlgmr.msra.gmra.mrb[16].mxu0 %v22946_v34  ;;  %v19556_v1 = vcombine.high %v2178_v54, %v2194_v56  ;;  %v19555_v59 = vcombine.low %v2178_v54, %v2194_v56 }
 0x3e9   :  { %13836 = vmatmul.mubr.bf16.vlgmr.msra.gmra.mrb[16].mxu1 %v22946_v34  ;;  %13681 = vmatpush1.bf16.msra.mxu0 %v19361_v62  ;;  %v19554_v62 = vcombine.high %v2177_v53, %v2193_v44 }
 0x3ea   :  { %13712 = vmatprep.mubr.bf16.mxu0 %v22948_v41  ;;  %13845 = vmatpush1.bf16.msra.mxu1 %v19363_v3  ;;  %v2209_v3 = vld [vmem:[#allocation8 + $0x3720] sm:$0xff] }
 0x3eb   :  { %13876 = vmatprep.mubr.bf16.mxu1 %v22948_v41  ;;  %13682 = vmatprep.subr.bf16.mxu0 %v19394_v4  ;;  %v2225_v4 = vld [vmem:[#allocation8 + $0x37a0] sm:$0xff] }
 0x3ec   :  { %13846 = vmatprep.subr.bf16.mxu1 %v19396_v9  ;;  %v2210_v9 = vld [vmem:[#allocation8 + $0x3728] sm:$0xff]  ;;  %v19586_v22 = vcombine.high %v2209_v3, %v2225_v4  ;;  %v19585_v30 = vcombine.low %v2209_v3, %v2225_v4 }
 0x3ed   :  { %13683 = vmatpush1.bf16.msra.mxu0 %v19393_v12  ;;  %v19588_v46 = vcombine.high %v2210_v9, %v2226_v10  ;;  %v19587_v31 = vcombine.low %v2210_v9, %v2226_v10 }
 0x3ee   :  { %13847 = vmatpush1.bf16.msra.mxu1 %v19395_v17  ;;  %13684 = vmatprep.subr.bf16.mxu0 %v19426_v18  ;;  %v19553_v17 = vcombine.low %v2177_v53, %v2193_v44 }
 0x3ef   :  { %13848 = vmatprep.subr.bf16.mxu1 %v19428_v21 }
 0x3f1   :  { %13685 = vmatpush1.bf16.msra.mxu0 %v19425_v27  ;;  %v2241_v27 = vld [vmem:[#allocation8 + $0x3820] sm:$0xff] }
 0x3f2   :  { %13849 = vmatpush1.bf16.msra.mxu1 %v19427_v15  ;;  %13686 = vmatprep.subr.bf16.mxu0 %v19458_v28  ;;  %v2257_v15 = vld [vmem:[#allocation8 + $0x38a0] sm:$0xff]  ;;  %v2242_v28 = vld [vmem:[#allocation8 + $0x3828] sm:$0xff] }
 0x3f3   :  { %13850 = vmatprep.subr.bf16.mxu1 %v19460_v29  ;;  %v2258_v29 = vld [vmem:[#allocation8 + $0x38a8] sm:$0xff]  ;;  %v19618_v32 = vcombine.high %v2241_v27, %v2257_v15  ;;  %v19617_v39 = vcombine.low %v2241_v27, %v2257_v15  ;;  %v2401_v27 = vld [vmem:[#allocation8 + $0x3d20] sm:$0xff] }
 0x3f4   :  { %v19620_v33 = vcombine.high %v2242_v28, %v2258_v29  ;;  %v19619_v55 = vcombine.low %v2242_v28, %v2258_v29  ;;  %v2417_v15 = vld [vmem:[#allocation8 + $0x3da0] sm:$0xff]  ;;  %v2402_v28 = vld [vmem:[#allocation8 + $0x3d28] sm:$0xff] }
 0x3f5   :  { %13687 = vmatpush1.bf16.msra.mxu0 %v19457_v35  ;;  %v2273_v35 = vld [vmem:[#allocation8 + $0x3920] sm:$0xff]  ;;  %v2418_v29 = vld [vmem:[#allocation8 + $0x3da8] sm:$0xff] }
 0x3f6   :  { %13851 = vmatpush1.bf16.msra.mxu1 %v19459_v63  ;;  %13688 = vmatprep.subr.bf16.mxu0 %v19490_v37  ;;  %v2289_v63 = vld [vmem:[#allocation8 + $0x39a0] sm:$0xff]  ;;  %v2274_v37 = vld [vmem:[#allocation8 + $0x3928] sm:$0xff] }
 0x3f7   :  { %13852 = vmatprep.subr.bf16.mxu1 %v19492_v38  ;;  %v2290_v38 = vld [vmem:[#allocation8 + $0x39a8] sm:$0xff]  ;;  %v19650_v40 = vcombine.high %v2273_v35, %v2289_v63  ;;  %v19649_v53 = vcombine.low %v2273_v35, %v2289_v63  ;;  %v2433_v35 = vld [vmem:[#allocation8 + $0x3e20] sm:$0xff] }
 0x3f8   :  { %v19652_v42 = vcombine.high %v2274_v37, %v2290_v38  ;;  %v19651_v44 = vcombine.low %v2274_v37, %v2290_v38  ;;  %v2449_v63 = vld [vmem:[#allocation8 + $0x3ea0] sm:$0xff]  ;;  %v2434_v37 = vld [vmem:[#allocation8 + $0x3e28] sm:$0xff] }
 0x3f9   :  { %13689 = vmatpush1.bf16.msra.mxu0 %v19489_v43  ;;  %v2305_v43 = vld [vmem:[#allocation8 + $0x3a20] sm:$0xff]  ;;  %v2450_v38 = vld [vmem:[#allocation8 + $0x3ea8] sm:$0xff] }
 0x3fa   :  { %13853 = vmatpush1.bf16.msra.mxu1 %v19491_v50  ;;  %13690 = vmatprep.subr.bf16.mxu0 %v19522_v52  ;;  %v2321_v50 = vld [vmem:[#allocation8 + $0x3aa0] sm:$0xff]  ;;  %v2306_v52 = vld [vmem:[#allocation8 + $0x3a28] sm:$0xff] }
 0x3fb   :  { %v23001_v0 = vpop.f32.mrb[12].mxu0  ;;  %13854 = vmatprep.subr.bf16.mxu1 %v19524_v16  ;;  %v2322_v16 = vld [vmem:[#allocation8 + $0x3aa8] sm:$0xff]  ;;  %v19682_v54 = vcombine.high %v2305_v43, %v2321_v50  ;;  %v19681_v3 = vcombine.low %v2305_v43, %v2321_v50  ;;  %v2465_v43 = vld [vmem:[#allocation8 + $0x3f20] sm:$0xff] }
 0x3fc   :  { %v23003_v5 = vpop.f32.mrb[12].mxu1  ;;  %v23005_v8 = vpop.f32.mrb[13].mxu0  ;;  %v19684_v56 = vcombine.high %v2306_v52, %v2322_v16  ;;  %v19683_v4 = vcombine.low %v2306_v52, %v2322_v16  ;;  %v2481_v50 = vld [vmem:[#allocation8 + $0x3fa0] sm:$0xff]  ;;  %v2466_v52 = vld [vmem:[#allocation8 + $0x3f28] sm:$0xff] }
 0x3fd   :  { %v23007_v11 = vpop.f32.mrb[13].mxu1  ;;  %v13390_v12 = vpop.f32.mrb[14].mxu0  ;;  %13691 = vmatpush1.bf16.msra.mxu0 %v19521_v57  ;;  %v2337_v57 = vld [vmem:[#allocation8 + $0x3b20] sm:$0xff]  ;;  %v2482_v16 = vld [vmem:[#allocation8 + $0x3fa8] sm:$0xff] }
 0x3fe   :  { %v13554_v18 = vpop.f32.mrb[14].mxu1  ;;  %13855 = vmatpush1.bf16.msra.mxu1 %v19523_v58  ;;  %v13391_v21 = vpop.f32.mrb[15].mxu0  ;;  %13692 = vmatprep.subr.bf16.mxu0 %v19554_v62  ;;  %v2353_v58 = vld [vmem:[#allocation8 + $0x3ba0] sm:$0xff]  ;;  %v2338_v62 = vld [vmem:[#allocation8 + $0x3b28] sm:$0xff] }
 0x3ff   :  { %v13555_v26 = vpop.f32.mrb[15].mxu1  ;;  %13856 = vmatprep.subr.bf16.mxu1 %v19556_v1  ;;  %v2354_v1 = vld [vmem:[#allocation8 + $0x3ba8] sm:$0xff]  ;;  %v19714_v9 = vcombine.high %v2337_v57, %v2353_v58  ;;  %v2369_v12 = vld [vmem:[#allocation8 + $0x3c20] sm:$0xff] }
 0x400   :  { %v19716_v10 = vcombine.high %v2338_v62, %v2354_v1  ;;  %v2370_v18 = vld [vmem:[#allocation8 + $0x3c28] sm:$0xff] }
 0x401   :  { %13693 = vmatpush1.bf16.msra.mxu0 %v19553_v17  ;;  %v2385_v17 = vld [vmem:[#allocation8 + $0x3ca0] sm:$0xff]  ;;  %v2386_v21 = vld [vmem:[#allocation8 + $0x3ca8] sm:$0xff] }
 0x402   :  { %13857 = vmatpush1.bf16.msra.mxu1 %v19555_v59  ;;  %13694 = vmatprep.subr.bf16.mxu0 %v19586_v22  ;;  %v19713_v59 = vcombine.low %v2337_v57, %v2353_v58  ;;  %v19715_v22 = vcombine.low %v2338_v62, %v2354_v1  ;;  %v19746_v26 = vcombine.high %v2369_v12, %v2385_v17  ;;  %v451_v57 = vld [vmem:[#allocation8 + $0x30] sm:$0xff]  ;;  %v452_v62 = vld [vmem:[#allocation8 + $0x38] sm:$0xff] }
 0x403   :  { %13858 = vmatprep.subr.bf16.mxu1 %v19588_v46  ;;  %v19748_v46 = vcombine.high %v2370_v18, %v2386_v21  ;;  %v467_v58 = vld [vmem:[#allocation8 + $0xb0] sm:$0xff]  ;;  %v468_v1 = vld [vmem:[#allocation8 + $0xb8] sm:$0xff] }
 0x405   :  { %13695 = vmatpush1.bf16.msra.mxu0 %v19585_v30  ;;  %v19745_v30 = vcombine.low %v2369_v12, %v2385_v17  ;;  %v483_v12 = vld [vmem:[#allocation8 + $0x130] sm:$0xff] }
 0x406   :  { %13859 = vmatpush1.bf16.msra.mxu1 %v19587_v31  ;;  %13696 = vmatprep.subr.bf16.mxu0 %v19618_v32  ;;  %v19747_v31 = vcombine.low %v2370_v18, %v2386_v21  ;;  %v19778_v32 = vcombine.high %v2401_v27, %v2417_v15  ;;  %v499_v17 = vld [vmem:[#allocation8 + $0x1b0] sm:$0xff]  ;;  %v17829_v18 = vcombine.low %v451_v57, %v467_v58  ;;  %v484_v21 = vld [vmem:[#allocation8 + $0x138] sm:$0xff] }
 0x407   :  { %13860 = vmatprep.subr.bf16.mxu1 %v19620_v33  ;;  %v19780_v33 = vcombine.high %v2402_v28, %v2418_v29 }
 0x409   :  { %13697 = vmatpush1.bf16.msra.mxu0 %v19617_v39  ;;  %v19777_v39 = vcombine.low %v2401_v27, %v2417_v15  ;;  %v531_v27 = vld [vmem:[#allocation8 + $0x2b0] sm:$0xff] }
 0x40a   :  { %13861 = vmatpush1.bf16.msra.mxu1 %v19619_v55  ;;  %13698 = vmatprep.subr.bf16.mxu0 %v19650_v40  ;;  %v19779_v55 = vcombine.low %v2402_v28, %v2418_v29  ;;  %v19810_v40 = vcombine.high %v2433_v35, %v2449_v63  ;;  %v516_v28 = vld [vmem:[#allocation8 + $0x238] sm:$0xff] }
 0x40b   :  { %13862 = vmatprep.subr.bf16.mxu1 %v19652_v42  ;;  %v19812_v42 = vcombine.high %v2434_v37, %v2450_v38  ;;  %v532_v29 = vld [vmem:[#allocation8 + $0x2b8] sm:$0xff] }
 0x40d   :  { %13699 = vmatpush1.bf16.msra.mxu0 %v19649_v53  ;;  %v19809_v53 = vcombine.low %v2433_v35, %v2449_v63  ;;  %v547_v35 = vld [vmem:[#allocation8 + $0x330] sm:$0xff] }
 0x40e   :  { %13863 = vmatpush1.bf16.msra.mxu1 %v19651_v44  ;;  %13700 = vmatprep.subr.bf16.mxu0 %v19682_v54  ;;  %v19811_v44 = vcombine.low %v2434_v37, %v2450_v38  ;;  %v19842_v54 = vcombine.high %v2465_v43, %v2481_v50  ;;  %v563_v63 = vld [vmem:[#allocation8 + $0x3b0] sm:$0xff]  ;;  %v548_v37 = vld [vmem:[#allocation8 + $0x338] sm:$0xff] }
 0x40f   :  { %13864 = vmatprep.subr.bf16.mxu1 %v19684_v56  ;;  %v19844_v56 = vcombine.high %v2466_v52, %v2482_v16  ;;  %v564_v38 = vld [vmem:[#allocation8 + $0x3b8] sm:$0xff] }
 0x411   :  { %13701 = vmatpush1.bf16.msra.mxu0 %v19681_v3  ;;  %v19841_v3 = vcombine.low %v2465_v43, %v2481_v50  ;;  %v579_v43 = vld [vmem:[#allocation8 + $0x430] sm:$0xff] }
 0x412   :  { %13865 = vmatpush1.bf16.msra.mxu1 %v19683_v4  ;;  %13702 = vmatprep.subr.bf16.mxu0 %v19714_v9  ;;  %v19843_v4 = vcombine.low %v2466_v52, %v2482_v16  ;;  %v17830_v9 = vcombine.high %v451_v57, %v467_v58  ;;  %v595_v50 = vld [vmem:[#allocation8 + $0x4b0] sm:$0xff]  ;;  %v580_v52 = vld [vmem:[#allocation8 + $0x438] sm:$0xff] }
 0x413   :  { %13866 = vmatprep.subr.bf16.mxu1 %v19716_v10  ;;  %v17832_v10 = vcombine.high %v452_v62, %v468_v1  ;;  %v596_v16 = vld [vmem:[#allocation8 + $0x4b8] sm:$0xff]  ;;  %v611_v57 = vld [vmem:[#allocation8 + $0x530] sm:$0xff] }
 0x414   :  { %v627_v58 = vld [vmem:[#allocation8 + $0x5b0] sm:$0xff] }
 0x415   :  { %13703 = vmatpush1.bf16.msra.mxu0 %v19713_v59  ;;  %v500_v59 = vld [vmem:[#allocation8 + $0x1b8] sm:$0xff] }
 0x416   :  { %13867 = vmatpush1.bf16.msra.mxu1 %v19715_v22  ;;  %13704 = vmatprep.subr.bf16.mxu0 %v19746_v26  ;;  %v17831_v22 = vcombine.low %v452_v62, %v468_v1  ;;  %v17862_v26 = vcombine.high %v483_v12, %v499_v17  ;;  %v17864_v15 = vcombine.high %v484_v21, %v500_v59  ;;  %v612_v62 = vld [vmem:[#allocation8 + $0x538] sm:$0xff] }
 0x417   :  { %13868 = vmatprep.subr.bf16.mxu1 %v19748_v46  ;;  %v515_v46 = vld [vmem:[#allocation8 + $0x230] sm:$0xff]  ;;  %v628_v1 = vld [vmem:[#allocation8 + $0x5b8] sm:$0xff] }
 0x419   :  { %13705 = vmatpush1.bf16.msra.mxu0 %v19745_v30  ;;  %v17861_v30 = vcombine.low %v483_v12, %v499_v17  ;;  %v643_v12 = vld [vmem:[#allocation8 + $0x630] sm:$0xff] }
 0x41a   :  { %13869 = vmatpush1.bf16.msra.mxu1 %v19747_v31  ;;  %13706 = vmatprep.subr.bf16.mxu0 %v19778_v32  ;;  %v17863_v31 = vcombine.low %v484_v21, %v500_v59  ;;  %v17894_v32 = vcombine.high %v515_v46, %v531_v27  ;;  %v659_v17 = vld [vmem:[#allocation8 + $0x6b0] sm:$0xff]  ;;  %v660_v21 = vld [vmem:[#allocation8 + $0x6b8] sm:$0xff]  ;;  %v17989_v59 = vcombine.low %v611_v57, %v627_v58 }
 0x41b   :  { %13870 = vmatprep.subr.bf16.mxu1 %v19780_v33  ;;  %v17896_v33 = vcombine.high %v516_v28, %v532_v29 }
 0x41d   :  { %13707 = vmatpush1.bf16.msra.mxu0 %v19777_v39  ;;  %v17893_v39 = vcombine.low %v515_v46, %v531_v27  ;;  %v675_v27 = vld [vmem:[#allocation8 + $0x730] sm:$0xff] }
 0x41e   :  { %13871 = vmatpush1.bf16.msra.mxu1 %v19779_v55  ;;  %13708 = vmatprep.subr.bf16.mxu0 %v19810_v40  ;;  %v17895_v55 = vcombine.low %v516_v28, %v532_v29  ;;  %v17926_v40 = vcombine.high %v547_v35, %v563_v63  ;;  %v676_v28 = vld [vmem:[#allocation8 + $0x738] sm:$0xff] }
 0x41f   :  { %13872 = vmatprep.subr.bf16.mxu1 %v19812_v42  ;;  %v17928_v42 = vcombine.high %v548_v37, %v564_v38  ;;  %v692_v29 = vld [vmem:[#allocation8 + $0x7b8] sm:$0xff] }
 0x421   :  { %13709 = vmatpush1.bf16.msra.mxu0 %v19809_v53  ;;  %v17925_v53 = vcombine.low %v547_v35, %v563_v63  ;;  %v707_v35 = vld [vmem:[#allocation8 + $0x830] sm:$0xff] }
 0x422   :  { %13873 = vmatpush1.bf16.msra.mxu1 %v19811_v44  ;;  %13710 = vmatprep.subr.bf16.mxu0 %v19842_v54  ;;  %v17927_v44 = vcombine.low %v548_v37, %v564_v38  ;;  %v17958_v54 = vcombine.high %v579_v43, %v595_v50  ;;  %v723_v63 = vld [vmem:[#allocation8 + $0x8b0] sm:$0xff]  ;;  %v708_v37 = vld [vmem:[#allocation8 + $0x838] sm:$0xff] }
 0x423   :  { %13874 = vmatprep.subr.bf16.mxu1 %v19844_v56  ;;  %v17960_v56 = vcombine.high %v580_v52, %v596_v16  ;;  %v724_v38 = vld [vmem:[#allocation8 + $0x8b8] sm:$0xff] }
 0x425   :  { %13711 = vmatpush1.bf16.msra.mxu0 %v19841_v3  ;;  %v17957_v3 = vcombine.low %v579_v43, %v595_v50  ;;  %v739_v43 = vld [vmem:[#allocation8 + $0x930] sm:$0xff] }
 0x426   :  { %13875 = vmatpush1.bf16.msra.mxu1 %v19843_v4  ;;  %13885 = vmatprep.subr.bf16.mxu0 %v17830_v9  ;;  %v17959_v4 = vcombine.low %v580_v52, %v596_v16  ;;  %v17990_v9 = vcombine.high %v611_v57, %v627_v58  ;;  %v755_v50 = vld [vmem:[#allocation8 + $0x9b0] sm:$0xff]  ;;  %v740_v52 = vld [vmem:[#allocation8 + $0x938] sm:$0xff] }
 0x427   :  { %14049 = vmatprep.subr.bf16.mxu1 %v17832_v10  ;;  %v17992_v10 = vcombine.high %v612_v62, %v628_v1  ;;  %v756_v16 = vld [vmem:[#allocation8 + $0x9b8] sm:$0xff]  ;;  %v771_v57 = vld [vmem:[#allocation8 + $0xa30] sm:$0xff] }
 0x428   :  { %13713 = vmatmul.mubr.bf16.vlgmr.msra.gmra.mrb[16].mxu0 %v22959_v24  ;;  %v787_v58 = vld [vmem:[#allocation8 + $0xab0] sm:$0xff] }
 0x429   :  { %13877 = vmatmul.mubr.bf16.vlgmr.msra.gmra.mrb[16].mxu1 %v22959_v24  ;;  %13886 = vmatpush1.bf16.msra.mxu0 %v17829_v18  ;;  %v644_v18 = vld [vmem:[#allocation8 + $0x638] sm:$0xff] }
 0x42a   :  { %13917 = vmatprep.mubr.bf16.mxu0 %v22894_v6  ;;  %14050 = vmatpush1.bf16.msra.mxu1 %v17831_v22  ;;  %v17991_v22 = vcombine.low %v612_v62, %v628_v1  ;;  %v18024_v46 = vcombine.high %v644_v18, %v660_v21  ;;  %v772_v62 = vld [vmem:[#allocation8 + $0xa38] sm:$0xff] }
 0x42b   :  { %14081 = vmatprep.mubr.bf16.mxu1 %v22894_v6  ;;  %13887 = vmatprep.subr.bf16.mxu0 %v17862_v26  ;;  %v18022_v26 = vcombine.high %v643_v12, %v659_v17  ;;  %v788_v1 = vld [vmem:[#allocation8 + $0xab8] sm:$0xff] }
 0x42c   :  { %14051 = vmatprep.subr.bf16.mxu1 %v17864_v15  ;;  %v691_v15 = vld [vmem:[#allocation8 + $0x7b0] sm:$0xff] }
 0x42d   :  { %13888 = vmatpush1.bf16.msra.mxu0 %v17861_v30  ;;  %v18021_v30 = vcombine.low %v643_v12, %v659_v17  ;;  %v803_v12 = vld [vmem:[#allocation8 + $0xb30] sm:$0xff] }
 0x42e   :  { %14052 = vmatpush1.bf16.msra.mxu1 %v17863_v31  ;;  %13889 = vmatprep.subr.bf16.mxu0 %v17894_v32  ;;  %v18023_v31 = vcombine.low %v644_v18, %v660_v21  ;;  %v18054_v32 = vcombine.high %v675_v27, %v691_v15  ;;  %v819_v17 = vld [vmem:[#allocation8 + $0xbb0] sm:$0xff]  ;;  %v804_v18 = vld [vmem:[#allocation8 + $0xb38] sm:$0xff] }
 0x42f   :  { %14053 = vmatprep.subr.bf16.mxu1 %v17896_v33  ;;  %v18056_v33 = vcombine.high %v676_v28, %v692_v29  ;;  %v820_v21 = vld [vmem:[#allocation8 + $0xbb8] sm:$0xff] }
 0x431   :  { %13890 = vmatpush1.bf16.msra.mxu0 %v17893_v39  ;;  %v18053_v39 = vcombine.low %v675_v27, %v691_v15  ;;  %v835_v27 = vld [vmem:[#allocation8 + $0xc30] sm:$0xff] }
 0x432   :  { %14054 = vmatpush1.bf16.msra.mxu1 %v17895_v55  ;;  %13891 = vmatprep.subr.bf16.mxu0 %v17926_v40  ;;  %v18055_v55 = vcombine.low %v676_v28, %v692_v29  ;;  %v18086_v40 = vcombine.high %v707_v35, %v723_v63  ;;  %v851_v15 = vld [vmem:[#allocation8 + $0xcb0] sm:$0xff]  ;;  %v836_v28 = vld [vmem:[#allocation8 + $0xc38] sm:$0xff] }
 0x433   :  { %14055 = vmatprep.subr.bf16.mxu1 %v17928_v42  ;;  %v18088_v42 = vcombine.high %v708_v37, %v724_v38  ;;  %v852_v29 = vld [vmem:[#allocation8 + $0xcb8] sm:$0xff] }
 0x435   :  { %13892 = vmatpush1.bf16.msra.mxu0 %v17925_v53  ;;  %v18085_v53 = vcombine.low %v707_v35, %v723_v63  ;;  %v867_v35 = vld [vmem:[#allocation8 + $0xd30] sm:$0xff] }
 0x436   :  { %14056 = vmatpush1.bf16.msra.mxu1 %v17927_v44  ;;  %13893 = vmatprep.subr.bf16.mxu0 %v17958_v54  ;;  %v18087_v44 = vcombine.low %v708_v37, %v724_v38  ;;  %v18118_v54 = vcombine.high %v739_v43, %v755_v50  ;;  %v883_v63 = vld [vmem:[#allocation8 + $0xdb0] sm:$0xff]  ;;  %v868_v37 = vld [vmem:[#allocation8 + $0xd38] sm:$0xff] }
 0x437   :  { %14057 = vmatprep.subr.bf16.mxu1 %v17960_v56  ;;  %v18120_v56 = vcombine.high %v740_v52, %v756_v16  ;;  %v884_v38 = vld [vmem:[#allocation8 + $0xdb8] sm:$0xff] }
 0x439   :  { %13894 = vmatpush1.bf16.msra.mxu0 %v17957_v3  ;;  %v18117_v3 = vcombine.low %v739_v43, %v755_v50  ;;  %v899_v43 = vld [vmem:[#allocation8 + $0xe30] sm:$0xff] }
 0x43a   :  { %14058 = vmatpush1.bf16.msra.mxu1 %v17959_v4  ;;  %13895 = vmatprep.subr.bf16.mxu0 %v17990_v9  ;;  %v18119_v4 = vcombine.low %v740_v52, %v756_v16  ;;  %v18150_v9 = vcombine.high %v771_v57, %v787_v58  ;;  %v915_v50 = vld [vmem:[#allocation8 + $0xeb0] sm:$0xff]  ;;  %v900_v52 = vld [vmem:[#allocation8 + $0xe38] sm:$0xff] }
 0x43b   :  { %14059 = vmatprep.subr.bf16.mxu1 %v17992_v10  ;;  %v18152_v10 = vcombine.high %v772_v62, %v788_v1  ;;  %v916_v16 = vld [vmem:[#allocation8 + $0xeb8] sm:$0xff] }
 0x43d   :  { %13896 = vmatpush1.bf16.msra.mxu0 %v17989_v59  ;;  %v18149_v59 = vcombine.low %v771_v57, %v787_v58  ;;  %v931_v57 = vld [vmem:[#allocation8 + $0xf30] sm:$0xff] }
 0x43e   :  { %14060 = vmatpush1.bf16.msra.mxu1 %v17991_v22  ;;  %13897 = vmatprep.subr.bf16.mxu0 %v18022_v26  ;;  %v18151_v22 = vcombine.low %v772_v62, %v788_v1  ;;  %v18182_v26 = vcombine.high %v803_v12, %v819_v17  ;;  %v947_v58 = vld [vmem:[#allocation8 + $0xfb0] sm:$0xff]  ;;  %v932_v62 = vld [vmem:[#allocation8 + $0xf38] sm:$0xff] }
 0x43f   :  { %14061 = vmatprep.subr.bf16.mxu1 %v18024_v46  ;;  %v18184_v46 = vcombine.high %v804_v18, %v820_v21  ;;  %v948_v1 = vld [vmem:[#allocation8 + $0xfb8] sm:$0xff] }
 0x441   :  { %13898 = vmatpush1.bf16.msra.mxu0 %v18021_v30  ;;  %v18181_v30 = vcombine.low %v803_v12, %v819_v17  ;;  %v963_v12 = vld [vmem:[#allocation8 + $0x1030] sm:$0xff] }
 0x442   :  { %14062 = vmatpush1.bf16.msra.mxu1 %v18023_v31  ;;  %13899 = vmatprep.subr.bf16.mxu0 %v18054_v32  ;;  %v18183_v31 = vcombine.low %v804_v18, %v820_v21  ;;  %v18214_v32 = vcombine.high %v835_v27, %v851_v15  ;;  %v979_v17 = vld [vmem:[#allocation8 + $0x10b0] sm:$0xff]  ;;  %v964_v18 = vld [vmem:[#allocation8 + $0x1038] sm:$0xff] }
 0x443   :  { %14063 = vmatprep.subr.bf16.mxu1 %v18056_v33  ;;  %v18216_v33 = vcombine.high %v836_v28, %v852_v29  ;;  %v980_v21 = vld [vmem:[#allocation8 + $0x10b8] sm:$0xff] }
 0x445   :  { %13900 = vmatpush1.bf16.msra.mxu0 %v18053_v39  ;;  %v18213_v39 = vcombine.low %v835_v27, %v851_v15  ;;  %v995_v27 = vld [vmem:[#allocation8 + $0x1130] sm:$0xff] }
 0x446   :  { %14064 = vmatpush1.bf16.msra.mxu1 %v18055_v55  ;;  %13901 = vmatprep.subr.bf16.mxu0 %v18086_v40  ;;  %v18215_v55 = vcombine.low %v836_v28, %v852_v29  ;;  %v18246_v40 = vcombine.high %v867_v35, %v883_v63  ;;  %v1011_v15 = vld [vmem:[#allocation8 + $0x11b0] sm:$0xff]  ;;  %v18341_v28 = vcombine.low %v963_v12, %v979_v17  ;;  %v996_v29 = vld [vmem:[#allocation8 + $0x1138] sm:$0xff] }
 0x447   :  { %14065 = vmatprep.subr.bf16.mxu1 %v18088_v42  ;;  %v18248_v42 = vcombine.high %v868_v37, %v884_v38 }
 0x449   :  { %13902 = vmatpush1.bf16.msra.mxu0 %v18085_v53  ;;  %v18245_v53 = vcombine.low %v867_v35, %v883_v63  ;;  %v1043_v35 = vld [vmem:[#allocation8 + $0x12b0] sm:$0xff] }
 0x44a   :  { %14066 = vmatpush1.bf16.msra.mxu1 %v18087_v44  ;;  %13903 = vmatprep.subr.bf16.mxu0 %v18118_v54  ;;  %v18247_v44 = vcombine.low %v868_v37, %v884_v38  ;;  %v18278_v54 = vcombine.high %v899_v43, %v915_v50  ;;  %v1028_v37 = vld [vmem:[#allocation8 + $0x1238] sm:$0xff] }
 0x44b   :  { %14067 = vmatprep.subr.bf16.mxu1 %v18120_v56  ;;  %v18280_v56 = vcombine.high %v900_v52, %v916_v16  ;;  %v1044_v38 = vld [vmem:[#allocation8 + $0x12b8] sm:$0xff] }
 0x44d   :  { %13904 = vmatpush1.bf16.msra.mxu0 %v18117_v3  ;;  %v18277_v3 = vcombine.low %v899_v43, %v915_v50  ;;  %v1059_v43 = vld [vmem:[#allocation8 + $0x1330] sm:$0xff] }
 0x44e   :  { %14068 = vmatpush1.bf16.msra.mxu1 %v18119_v4  ;;  %13905 = vmatprep.subr.bf16.mxu0 %v18150_v9  ;;  %v18279_v4 = vcombine.low %v900_v52, %v916_v16  ;;  %v18310_v9 = vcombine.high %v931_v57, %v947_v58  ;;  %v1075_v50 = vld [vmem:[#allocation8 + $0x13b0] sm:$0xff]  ;;  %v1060_v52 = vld [vmem:[#allocation8 + $0x1338] sm:$0xff] }
 0x44f   :  { %14069 = vmatprep.subr.bf16.mxu1 %v18152_v10  ;;  %v18312_v10 = vcombine.high %v932_v62, %v948_v1  ;;  %v1076_v16 = vld [vmem:[#allocation8 + $0x13b8] sm:$0xff] }
 0x451   :  { %13906 = vmatpush1.bf16.msra.mxu0 %v18149_v59  ;;  %v18309_v59 = vcombine.low %v931_v57, %v947_v58  ;;  %v1091_v57 = vld [vmem:[#allocation8 + $0x1430] sm:$0xff] }
 0x452   :  { %14070 = vmatpush1.bf16.msra.mxu1 %v18151_v22  ;;  %13907 = vmatprep.subr.bf16.mxu0 %v18182_v26  ;;  %v18311_v22 = vcombine.low %v932_v62, %v948_v1  ;;  %v18342_v26 = vcombine.high %v963_v12, %v979_v17  ;;  %v1107_v58 = vld [vmem:[#allocation8 + $0x14b0] sm:$0xff]  ;;  %v1092_v62 = vld [vmem:[#allocation8 + $0x1438] sm:$0xff] }
 0x453   :  { %14071 = vmatprep.subr.bf16.mxu1 %v18184_v46  ;;  %v18344_v46 = vcombine.high %v964_v18, %v980_v21  ;;  %v1108_v1 = vld [vmem:[#allocation8 + $0x14b8] sm:$0xff]  ;;  %v1123_v12 = vld [vmem:[#allocation8 + $0x1530] sm:$0xff] }
 0x454   :  { %v1139_v17 = vld [vmem:[#allocation8 + $0x15b0] sm:$0xff] }
 0x455   :  { %13908 = vmatpush1.bf16.msra.mxu0 %v18181_v30  ;;  %v1012_v30 = vld [vmem:[#allocation8 + $0x11b8] sm:$0xff] }
 0x456   :  { %14072 = vmatpush1.bf16.msra.mxu1 %v18183_v31  ;;  %13909 = vmatprep.subr.bf16.mxu0 %v18214_v32  ;;  %v18343_v31 = vcombine.low %v964_v18, %v980_v21  ;;  %v18374_v32 = vcombine.high %v995_v27, %v1011_v15  ;;  %v18376_v63 = vcombine.high %v996_v29, %v1012_v30  ;;  %v1124_v18 = vld [vmem:[#allocation8 + $0x1538] sm:$0xff] }
 0x457   :  { %14073 = vmatprep.subr.bf16.mxu1 %v18216_v33  ;;  %v1027_v33 = vld [vmem:[#allocation8 + $0x1230] sm:$0xff]  ;;  %v1140_v21 = vld [vmem:[#allocation8 + $0x15b8] sm:$0xff] }
 0x459   :  { %13910 = vmatpush1.bf16.msra.mxu0 %v18213_v39  ;;  %v18373_v39 = vcombine.low %v995_v27, %v1011_v15  ;;  %v1155_v27 = vld [vmem:[#allocation8 + $0x1630] sm:$0xff] }
 0x45a   :  { %14074 = vmatpush1.bf16.msra.mxu1 %v18215_v55  ;;  %13911 = vmatprep.subr.bf16.mxu0 %v18246_v40  ;;  %v18375_v55 = vcombine.low %v996_v29, %v1012_v30  ;;  %v18406_v40 = vcombine.high %v1027_v33, %v1043_v35  ;;  %v1171_v15 = vld [vmem:[#allocation8 + $0x16b0] sm:$0xff]  ;;  %v1172_v29 = vld [vmem:[#allocation8 + $0x16b8] sm:$0xff]  ;;  %v18501_v30 = vcombine.low %v1123_v12, %v1139_v17 }
 0x45b   :  { %14075 = vmatprep.subr.bf16.mxu1 %v18248_v42  ;;  %v18408_v42 = vcombine.high %v1028_v37, %v1044_v38 }
 0x45d   :  { %13912 = vmatpush1.bf16.msra.mxu0 %v18245_v53  ;;  %v18405_v53 = vcombine.low %v1027_v33, %v1043_v35  ;;  %v1187_v35 = vld [vmem:[#allocation8 + $0x1730] sm:$0xff] }
 0x45e   :  { %14076 = vmatpush1.bf16.msra.mxu1 %v18247_v44  ;;  %13913 = vmatprep.subr.bf16.mxu0 %v18278_v54  ;;  %v18407_v44 = vcombine.low %v1028_v37, %v1044_v38  ;;  %v18438_v54 = vcombine.high %v1059_v43, %v1075_v50  ;;  %v1188_v37 = vld [vmem:[#allocation8 + $0x1738] sm:$0xff] }
 0x45f   :  { %14077 = vmatprep.subr.bf16.mxu1 %v18280_v56  ;;  %v18440_v56 = vcombine.high %v1060_v52, %v1076_v16  ;;  %v1204_v38 = vld [vmem:[#allocation8 + $0x17b8] sm:$0xff] }
 0x461   :  { %13914 = vmatpush1.bf16.msra.mxu0 %v18277_v3  ;;  %v18437_v3 = vcombine.low %v1059_v43, %v1075_v50  ;;  %v1219_v43 = vld [vmem:[#allocation8 + $0x1830] sm:$0xff] }
 0x462   :  { %14078 = vmatpush1.bf16.msra.mxu1 %v18279_v4  ;;  %13915 = vmatprep.subr.bf16.mxu0 %v18310_v9  ;;  %v18439_v4 = vcombine.low %v1060_v52, %v1076_v16  ;;  %v18470_v9 = vcombine.high %v1091_v57, %v1107_v58  ;;  %v1235_v50 = vld [vmem:[#allocation8 + $0x18b0] sm:$0xff]  ;;  %v1220_v52 = vld [vmem:[#allocation8 + $0x1838] sm:$0xff] }
 0x463   :  { %14079 = vmatprep.subr.bf16.mxu1 %v18312_v10  ;;  %v18472_v10 = vcombine.high %v1092_v62, %v1108_v1  ;;  %v1236_v16 = vld [vmem:[#allocation8 + $0x18b8] sm:$0xff] }
 0x465   :  { %13916 = vmatpush1.bf16.msra.mxu0 %v18309_v59  ;;  %v18469_v59 = vcombine.low %v1091_v57, %v1107_v58  ;;  %v1251_v57 = vld [vmem:[#allocation8 + $0x1930] sm:$0xff] }
 0x466   :  { %14080 = vmatpush1.bf16.msra.mxu1 %v18311_v22  ;;  %13926 = vmatprep.subr.bf16.mxu0 %v18342_v26  ;;  %v18471_v22 = vcombine.low %v1092_v62, %v1108_v1  ;;  %v18502_v26 = vcombine.high %v1123_v12, %v1139_v17  ;;  %v1267_v58 = vld [vmem:[#allocation8 + $0x19b0] sm:$0xff]  ;;  %v1252_v62 = vld [vmem:[#allocation8 + $0x1938] sm:$0xff] }
 0x467   :  { %14090 = vmatprep.subr.bf16.mxu1 %v18344_v46  ;;  %v18504_v46 = vcombine.high %v1124_v18, %v1140_v21  ;;  %v1268_v1 = vld [vmem:[#allocation8 + $0x19b8] sm:$0xff]  ;;  %v1283_v12 = vld [vmem:[#allocation8 + $0x1a30] sm:$0xff] }
 0x468   :  { %13918 = vmatmul.mubr.bf16.vlgmr.msra.gmra.mrb[20].mxu0 %v22896_v7  ;;  %v1299_v17 = vld [vmem:[#allocation8 + $0x1ab0] sm:$0xff] }
 0x469   :  { %14082 = vmatmul.mubr.bf16.vlgmr.msra.gmra.mrb[20].mxu1 %v22896_v7  ;;  %13927 = vmatpush1.bf16.msra.mxu0 %v18341_v28  ;;  %v1156_v28 = vld [vmem:[#allocation8 + $0x1638] sm:$0xff] }
 0x46a   :  { %13958 = vmatprep.mubr.bf16.mxu0 %v22900_v14  ;;  %14091 = vmatpush1.bf16.msra.mxu1 %v18343_v31  ;;  %v18503_v31 = vcombine.low %v1124_v18, %v1140_v21  ;;  %v18536_v33 = vcombine.high %v1156_v28, %v1172_v29  ;;  %v1284_v18 = vld [vmem:[#allocation8 + $0x1a38] sm:$0xff] }
 0x46b   :  { %14122 = vmatprep.mubr.bf16.mxu1 %v22900_v14  ;;  %13928 = vmatprep.subr.bf16.mxu0 %v18374_v32  ;;  %v18534_v32 = vcombine.high %v1155_v27, %v1171_v15  ;;  %v1300_v21 = vld [vmem:[#allocation8 + $0x1ab8] sm:$0xff] }
 0x46c   :  { %14092 = vmatprep.subr.bf16.mxu1 %v18376_v63  ;;  %v1203_v63 = vld [vmem:[#allocation8 + $0x17b0] sm:$0xff] }
 0x46d   :  { %13929 = vmatpush1.bf16.msra.mxu0 %v18373_v39  ;;  %v18533_v39 = vcombine.low %v1155_v27, %v1171_v15  ;;  %v1315_v27 = vld [vmem:[#allocation8 + $0x1b30] sm:$0xff] }
 0x46e   :  { %14093 = vmatpush1.bf16.msra.mxu1 %v18375_v55  ;;  %13930 = vmatprep.subr.bf16.mxu0 %v18406_v40  ;;  %v18535_v55 = vcombine.low %v1156_v28, %v1172_v29  ;;  %v18566_v40 = vcombine.high %v1187_v35, %v1203_v63  ;;  %v1331_v15 = vld [vmem:[#allocation8 + $0x1bb0] sm:$0xff]  ;;  %v1316_v28 = vld [vmem:[#allocation8 + $0x1b38] sm:$0xff] }
 0x46f   :  { %14094 = vmatprep.subr.bf16.mxu1 %v18408_v42  ;;  %v18568_v42 = vcombine.high %v1188_v37, %v1204_v38  ;;  %v1332_v29 = vld [vmem:[#allocation8 + $0x1bb8] sm:$0xff] }
 0x471   :  { %13931 = vmatpush1.bf16.msra.mxu0 %v18405_v53  ;;  %v18565_v53 = vcombine.low %v1187_v35, %v1203_v63  ;;  %v1347_v35 = vld [vmem:[#allocation8 + $0x1c30] sm:$0xff] }
 0x472   :  { %14095 = vmatpush1.bf16.msra.mxu1 %v18407_v44  ;;  %13932 = vmatprep.subr.bf16.mxu0 %v18438_v54  ;;  %v18567_v44 = vcombine.low %v1188_v37, %v1204_v38  ;;  %v18598_v54 = vcombine.high %v1219_v43, %v1235_v50  ;;  %v1363_v63 = vld [vmem:[#allocation8 + $0x1cb0] sm:$0xff]  ;;  %v1348_v37 = vld [vmem:[#allocation8 + $0x1c38] sm:$0xff] }
 0x473   :  { %14096 = vmatprep.subr.bf16.mxu1 %v18440_v56  ;;  %v18600_v56 = vcombine.high %v1220_v52, %v1236_v16  ;;  %v1364_v38 = vld [vmem:[#allocation8 + $0x1cb8] sm:$0xff] }
 0x475   :  { %13933 = vmatpush1.bf16.msra.mxu0 %v18437_v3  ;;  %v18597_v3 = vcombine.low %v1219_v43, %v1235_v50  ;;  %v1379_v43 = vld [vmem:[#allocation8 + $0x1d30] sm:$0xff] }
 0x476   :  { %14097 = vmatpush1.bf16.msra.mxu1 %v18439_v4  ;;  %13934 = vmatprep.subr.bf16.mxu0 %v18470_v9  ;;  %v18599_v4 = vcombine.low %v1220_v52, %v1236_v16  ;;  %v18630_v9 = vcombine.high %v1251_v57, %v1267_v58  ;;  %v1395_v50 = vld [vmem:[#allocation8 + $0x1db0] sm:$0xff]  ;;  %v1380_v52 = vld [vmem:[#allocation8 + $0x1d38] sm:$0xff] }
 0x477   :  { %14098 = vmatprep.subr.bf16.mxu1 %v18472_v10  ;;  %v18632_v10 = vcombine.high %v1252_v62, %v1268_v1  ;;  %v1396_v16 = vld [vmem:[#allocation8 + $0x1db8] sm:$0xff] }
 0x479   :  { %13935 = vmatpush1.bf16.msra.mxu0 %v18469_v59  ;;  %v18629_v59 = vcombine.low %v1251_v57, %v1267_v58  ;;  %v1411_v57 = vld [vmem:[#allocation8 + $0x1e30] sm:$0xff] }
 0x47a   :  { %14099 = vmatpush1.bf16.msra.mxu1 %v18471_v22  ;;  %13936 = vmatprep.subr.bf16.mxu0 %v18502_v26  ;;  %v18631_v22 = vcombine.low %v1252_v62, %v1268_v1  ;;  %v18662_v26 = vcombine.high %v1283_v12, %v1299_v17  ;;  %v1427_v58 = vld [vmem:[#allocation8 + $0x1eb0] sm:$0xff]  ;;  %v1412_v62 = vld [vmem:[#allocation8 + $0x1e38] sm:$0xff] }
 0x47b   :  { %14100 = vmatprep.subr.bf16.mxu1 %v18504_v46  ;;  %v18664_v46 = vcombine.high %v1284_v18, %v1300_v21  ;;  %v1428_v1 = vld [vmem:[#allocation8 + $0x1eb8] sm:$0xff] }
 0x47d   :  { %13937 = vmatpush1.bf16.msra.mxu0 %v18501_v30  ;;  %v18661_v30 = vcombine.low %v1283_v12, %v1299_v17  ;;  %v1443_v12 = vld [vmem:[#allocation8 + $0x1f30] sm:$0xff] }
 0x47e   :  { %14101 = vmatpush1.bf16.msra.mxu1 %v18503_v31  ;;  %13938 = vmatprep.subr.bf16.mxu0 %v18534_v32  ;;  %v18663_v31 = vcombine.low %v1284_v18, %v1300_v21  ;;  %v18694_v32 = vcombine.high %v1315_v27, %v1331_v15  ;;  %v1459_v17 = vld [vmem:[#allocation8 + $0x1fb0] sm:$0xff]  ;;  %v1444_v18 = vld [vmem:[#allocation8 + $0x1f38] sm:$0xff] }
 0x47f   :  { %14102 = vmatprep.subr.bf16.mxu1 %v18536_v33  ;;  %v18696_v33 = vcombine.high %v1316_v28, %v1332_v29  ;;  %v1460_v21 = vld [vmem:[#allocation8 + $0x1fb8] sm:$0xff] }
 0x481   :  { %13939 = vmatpush1.bf16.msra.mxu0 %v18533_v39  ;;  %v18693_v39 = vcombine.low %v1315_v27, %v1331_v15  ;;  %v1475_v27 = vld [vmem:[#allocation8 + $0x2030] sm:$0xff] }
 0x482   :  { %14103 = vmatpush1.bf16.msra.mxu1 %v18535_v55  ;;  %13940 = vmatprep.subr.bf16.mxu0 %v18566_v40  ;;  %v18695_v55 = vcombine.low %v1316_v28, %v1332_v29  ;;  %v18726_v40 = vcombine.high %v1347_v35, %v1363_v63  ;;  %v1491_v15 = vld [vmem:[#allocation8 + $0x20b0] sm:$0xff]  ;;  %v1476_v28 = vld [vmem:[#allocation8 + $0x2038] sm:$0xff] }
 0x483   :  { %14104 = vmatprep.subr.bf16.mxu1 %v18568_v42  ;;  %v18728_v42 = vcombine.high %v1348_v37, %v1364_v38  ;;  %v1492_v29 = vld [vmem:[#allocation8 + $0x20b8] sm:$0xff] }
 0x485   :  { %13941 = vmatpush1.bf16.msra.mxu0 %v18565_v53  ;;  %v18725_v53 = vcombine.low %v1347_v35, %v1363_v63  ;;  %v1507_v35 = vld [vmem:[#allocation8 + $0x2130] sm:$0xff] }
 0x486   :  { %14105 = vmatpush1.bf16.msra.mxu1 %v18567_v44  ;;  %13942 = vmatprep.subr.bf16.mxu0 %v18598_v54  ;;  %v18727_v44 = vcombine.low %v1348_v37, %v1364_v38  ;;  %v18758_v54 = vcombine.high %v1379_v43, %v1395_v50  ;;  %v1523_v63 = vld [vmem:[#allocation8 + $0x21b0] sm:$0xff]  ;;  %v18853_v37 = vcombine.low %v1475_v27, %v1491_v15  ;;  %v1508_v38 = vld [vmem:[#allocation8 + $0x2138] sm:$0xff] }
 0x487   :  { %14106 = vmatprep.subr.bf16.mxu1 %v18600_v56  ;;  %v18760_v56 = vcombine.high %v1380_v52, %v1396_v16 }
 0x489   :  { %13943 = vmatpush1.bf16.msra.mxu0 %v18597_v3  ;;  %v18757_v3 = vcombine.low %v1379_v43, %v1395_v50  ;;  %v1555_v43 = vld [vmem:[#allocation8 + $0x22b0] sm:$0xff] }
 0x48a   :  { %14107 = vmatpush1.bf16.msra.mxu1 %v18599_v4  ;;  %13944 = vmatprep.subr.bf16.mxu0 %v18630_v9  ;;  %v18759_v4 = vcombine.low %v1380_v52, %v1396_v16  ;;  %v18790_v9 = vcombine.high %v1411_v57, %v1427_v58  ;;  %v1540_v52 = vld [vmem:[#allocation8 + $0x2238] sm:$0xff] }
 0x48b   :  { %14108 = vmatprep.subr.bf16.mxu1 %v18632_v10  ;;  %v18792_v10 = vcombine.high %v1412_v62, %v1428_v1  ;;  %v1556_v16 = vld [vmem:[#allocation8 + $0x22b8] sm:$0xff] }
 0x48d   :  { %13945 = vmatpush1.bf16.msra.mxu0 %v18629_v59  ;;  %v18789_v59 = vcombine.low %v1411_v57, %v1427_v58  ;;  %v1571_v57 = vld [vmem:[#allocation8 + $0x2330] sm:$0xff] }
 0x48e   :  { %14109 = vmatpush1.bf16.msra.mxu1 %v18631_v22  ;;  %13946 = vmatprep.subr.bf16.mxu0 %v18662_v26  ;;  %v18791_v22 = vcombine.low %v1412_v62, %v1428_v1  ;;  %v18822_v26 = vcombine.high %v1443_v12, %v1459_v17  ;;  %v1587_v58 = vld [vmem:[#allocation8 + $0x23b0] sm:$0xff]  ;;  %v1572_v62 = vld [vmem:[#allocation8 + $0x2338] sm:$0xff] }
 0x48f   :  { %14110 = vmatprep.subr.bf16.mxu1 %v18664_v46  ;;  %v18824_v46 = vcombine.high %v1444_v18, %v1460_v21  ;;  %v1588_v1 = vld [vmem:[#allocation8 + $0x23b8] sm:$0xff] }
 0x491   :  { %13947 = vmatpush1.bf16.msra.mxu0 %v18661_v30  ;;  %v18821_v30 = vcombine.low %v1443_v12, %v1459_v17  ;;  %v1603_v12 = vld [vmem:[#allocation8 + $0x2430] sm:$0xff] }
 0x492   :  { %14111 = vmatpush1.bf16.msra.mxu1 %v18663_v31  ;;  %13948 = vmatprep.subr.bf16.mxu0 %v18694_v32  ;;  %v18823_v31 = vcombine.low %v1444_v18, %v1460_v21  ;;  %v18854_v32 = vcombine.high %v1475_v27, %v1491_v15  ;;  %v1619_v17 = vld [vmem:[#allocation8 + $0x24b0] sm:$0xff]  ;;  %v1604_v18 = vld [vmem:[#allocation8 + $0x2438] sm:$0xff] }
 0x493   :  { %14112 = vmatprep.subr.bf16.mxu1 %v18696_v33  ;;  %v18856_v33 = vcombine.high %v1476_v28, %v1492_v29  ;;  %v1620_v21 = vld [vmem:[#allocation8 + $0x24b8] sm:$0xff]  ;;  %v1635_v27 = vld [vmem:[#allocation8 + $0x2530] sm:$0xff] }
 0x494   :  { %v1651_v15 = vld [vmem:[#allocation8 + $0x25b0] sm:$0xff] }
 0x495   :  { %13949 = vmatpush1.bf16.msra.mxu0 %v18693_v39  ;;  %v1524_v39 = vld [vmem:[#allocation8 + $0x21b8] sm:$0xff] }
 0x496   :  { %14113 = vmatpush1.bf16.msra.mxu1 %v18695_v55  ;;  %13950 = vmatprep.subr.bf16.mxu0 %v18726_v40  ;;  %v18855_v55 = vcombine.low %v1476_v28, %v1492_v29  ;;  %v18886_v40 = vcombine.high %v1507_v35, %v1523_v63  ;;  %v18888_v50 = vcombine.high %v1508_v38, %v1524_v39  ;;  %v1636_v28 = vld [vmem:[#allocation8 + $0x2538] sm:$0xff] }
 0x497   :  { %14114 = vmatprep.subr.bf16.mxu1 %v18728_v42  ;;  %v1539_v42 = vld [vmem:[#allocation8 + $0x2230] sm:$0xff]  ;;  %v1652_v29 = vld [vmem:[#allocation8 + $0x25b8] sm:$0xff] }
 0x499   :  { %13951 = vmatpush1.bf16.msra.mxu0 %v18725_v53  ;;  %v18885_v53 = vcombine.low %v1507_v35, %v1523_v63  ;;  %v1667_v35 = vld [vmem:[#allocation8 + $0x2630] sm:$0xff] }
 0x49a   :  { %14115 = vmatpush1.bf16.msra.mxu1 %v18727_v44  ;;  %13952 = vmatprep.subr.bf16.mxu0 %v18758_v54  ;;  %v18887_v44 = vcombine.low %v1508_v38, %v1524_v39  ;;  %v18918_v54 = vcombine.high %v1539_v42, %v1555_v43  ;;  %v1683_v63 = vld [vmem:[#allocation8 + $0x26b0] sm:$0xff]  ;;  %v1684_v38 = vld [vmem:[#allocation8 + $0x26b8] sm:$0xff]  ;;  %v19013_v39 = vcombine.low %v1635_v27, %v1651_v15 }
 0x49b   :  { %14116 = vmatprep.subr.bf16.mxu1 %v18760_v56  ;;  %v18920_v56 = vcombine.high %v1540_v52, %v1556_v16 }
 0x49d   :  { %13953 = vmatpush1.bf16.msra.mxu0 %v18757_v3  ;;  %v18917_v3 = vcombine.low %v1539_v42, %v1555_v43  ;;  %v1699_v43 = vld [vmem:[#allocation8 + $0x2730] sm:$0xff] }
 0x49e   :  { %14117 = vmatpush1.bf16.msra.mxu1 %v18759_v4  ;;  %13954 = vmatprep.subr.bf16.mxu0 %v18790_v9  ;;  %v18919_v4 = vcombine.low %v1540_v52, %v1556_v16  ;;  %v18950_v9 = vcombine.high %v1571_v57, %v1587_v58  ;;  %v1700_v52 = vld [vmem:[#allocation8 + $0x2738] sm:$0xff] }
 0x49f   :  { %14118 = vmatprep.subr.bf16.mxu1 %v18792_v10  ;;  %v18952_v10 = vcombine.high %v1572_v62, %v1588_v1  ;;  %v1716_v16 = vld [vmem:[#allocation8 + $0x27b8] sm:$0xff] }
 0x4a1   :  { %13955 = vmatpush1.bf16.msra.mxu0 %v18789_v59  ;;  %v18949_v59 = vcombine.low %v1571_v57, %v1587_v58  ;;  %v1731_v57 = vld [vmem:[#allocation8 + $0x2830] sm:$0xff] }
 0x4a2   :  { %14119 = vmatpush1.bf16.msra.mxu1 %v18791_v22  ;;  %13956 = vmatprep.subr.bf16.mxu0 %v18822_v26  ;;  %v18951_v22 = vcombine.low %v1572_v62, %v1588_v1  ;;  %v18982_v26 = vcombine.high %v1603_v12, %v1619_v17  ;;  %v1747_v58 = vld [vmem:[#allocation8 + $0x28b0] sm:$0xff]  ;;  %v1732_v62 = vld [vmem:[#allocation8 + $0x2838] sm:$0xff] }
 0x4a3   :  { %14120 = vmatprep.subr.bf16.mxu1 %v18824_v46  ;;  %v18984_v46 = vcombine.high %v1604_v18, %v1620_v21  ;;  %v1748_v1 = vld [vmem:[#allocation8 + $0x28b8] sm:$0xff] }
 0x4a5   :  { %13957 = vmatpush1.bf16.msra.mxu0 %v18821_v30  ;;  %v18981_v30 = vcombine.low %v1603_v12, %v1619_v17  ;;  %v1763_v12 = vld [vmem:[#allocation8 + $0x2930] sm:$0xff] }
 0x4a6   :  { %14121 = vmatpush1.bf16.msra.mxu1 %v18823_v31  ;;  %13967 = vmatprep.subr.bf16.mxu0 %v18854_v32  ;;  %v18983_v31 = vcombine.low %v1604_v18, %v1620_v21  ;;  %v19014_v32 = vcombine.high %v1635_v27, %v1651_v15  ;;  %v1779_v17 = vld [vmem:[#allocation8 + $0x29b0] sm:$0xff]  ;;  %v1764_v18 = vld [vmem:[#allocation8 + $0x2938] sm:$0xff] }
 0x4a7   :  { %14131 = vmatprep.subr.bf16.mxu1 %v18856_v33  ;;  %v19016_v33 = vcombine.high %v1636_v28, %v1652_v29  ;;  %v1780_v21 = vld [vmem:[#allocation8 + $0x29b8] sm:$0xff]  ;;  %v1795_v27 = vld [vmem:[#allocation8 + $0x2a30] sm:$0xff] }
 0x4a8   :  { %13959 = vmatmul.mubr.bf16.vlgmr.msra.gmra.mrb[20].mxu0 %v22926_v51  ;;  %v1811_v15 = vld [vmem:[#allocation8 + $0x2ab0] sm:$0xff] }
 0x4a9   :  { %14123 = vmatmul.mubr.bf16.vlgmr.msra.gmra.mrb[20].mxu1 %v22926_v51  ;;  %13968 = vmatpush1.bf16.msra.mxu0 %v18853_v37  ;;  %v1668_v37 = vld [vmem:[#allocation8 + $0x2638] sm:$0xff] }
 0x4aa   :  { %13999 = vmatprep.mubr.bf16.mxu0 %v22928_v61  ;;  %14132 = vmatpush1.bf16.msra.mxu1 %v18855_v55  ;;  %v19015_v55 = vcombine.low %v1636_v28, %v1652_v29  ;;  %v19048_v42 = vcombine.high %v1668_v37, %v1684_v38  ;;  %v1796_v28 = vld [vmem:[#allocation8 + $0x2a38] sm:$0xff] }
 0x4ab   :  { %14163 = vmatprep.mubr.bf16.mxu1 %v22928_v61  ;;  %13969 = vmatprep.subr.bf16.mxu0 %v18886_v40  ;;  %v19046_v40 = vcombine.high %v1667_v35, %v1683_v63  ;;  %v1812_v29 = vld [vmem:[#allocation8 + $0x2ab8] sm:$0xff] }
 0x4ac   :  { %14133 = vmatprep.subr.bf16.mxu1 %v18888_v50  ;;  %v1715_v50 = vld [vmem:[#allocation8 + $0x27b0] sm:$0xff] }
 0x4ad   :  { %13970 = vmatpush1.bf16.msra.mxu0 %v18885_v53  ;;  %v19045_v53 = vcombine.low %v1667_v35, %v1683_v63  ;;  %v1827_v35 = vld [vmem:[#allocation8 + $0x2b30] sm:$0xff] }
 0x4ae   :  { %14134 = vmatpush1.bf16.msra.mxu1 %v18887_v44  ;;  %13971 = vmatprep.subr.bf16.mxu0 %v18918_v54  ;;  %v19047_v44 = vcombine.low %v1668_v37, %v1684_v38  ;;  %v19078_v54 = vcombine.high %v1699_v43, %v1715_v50  ;;  %v1843_v63 = vld [vmem:[#allocation8 + $0x2bb0] sm:$0xff]  ;;  %v1828_v37 = vld [vmem:[#allocation8 + $0x2b38] sm:$0xff] }
 0x4af   :  { %14135 = vmatprep.subr.bf16.mxu1 %v18920_v56  ;;  %v19080_v56 = vcombine.high %v1700_v52, %v1716_v16  ;;  %v1844_v38 = vld [vmem:[#allocation8 + $0x2bb8] sm:$0xff] }
 0x4b1   :  { %13972 = vmatpush1.bf16.msra.mxu0 %v18917_v3  ;;  %v19077_v3 = vcombine.low %v1699_v43, %v1715_v50  ;;  %v1859_v43 = vld [vmem:[#allocation8 + $0x2c30] sm:$0xff] }
 0x4b2   :  { %14136 = vmatpush1.bf16.msra.mxu1 %v18919_v4  ;;  %13973 = vmatprep.subr.bf16.mxu0 %v18950_v9  ;;  %v19079_v4 = vcombine.low %v1700_v52, %v1716_v16  ;;  %v19110_v9 = vcombine.high %v1731_v57, %v1747_v58  ;;  %v1875_v50 = vld [vmem:[#allocation8 + $0x2cb0] sm:$0xff]  ;;  %v1860_v52 = vld [vmem:[#allocation8 + $0x2c38] sm:$0xff] }
 0x4b3   :  { %14137 = vmatprep.subr.bf16.mxu1 %v18952_v10  ;;  %v19112_v10 = vcombine.high %v1732_v62, %v1748_v1  ;;  %v1876_v16 = vld [vmem:[#allocation8 + $0x2cb8] sm:$0xff] }
 0x4b5   :  { %13974 = vmatpush1.bf16.msra.mxu0 %v18949_v59  ;;  %v19109_v59 = vcombine.low %v1731_v57, %v1747_v58  ;;  %v1891_v57 = vld [vmem:[#allocation8 + $0x2d30] sm:$0xff] }
 0x4b6   :  { %14138 = vmatpush1.bf16.msra.mxu1 %v18951_v22  ;;  %13975 = vmatprep.subr.bf16.mxu0 %v18982_v26  ;;  %v19111_v22 = vcombine.low %v1732_v62, %v1748_v1  ;;  %v19142_v26 = vcombine.high %v1763_v12, %v1779_v17  ;;  %v1907_v58 = vld [vmem:[#allocation8 + $0x2db0] sm:$0xff]  ;;  %v1892_v62 = vld [vmem:[#allocation8 + $0x2d38] sm:$0xff] }
 0x4b7   :  { %14139 = vmatprep.subr.bf16.mxu1 %v18984_v46  ;;  %v19144_v46 = vcombine.high %v1764_v18, %v1780_v21  ;;  %v1908_v1 = vld [vmem:[#allocation8 + $0x2db8] sm:$0xff] }
 0x4b9   :  { %13976 = vmatpush1.bf16.msra.mxu0 %v18981_v30  ;;  %v19141_v30 = vcombine.low %v1763_v12, %v1779_v17  ;;  %v1923_v12 = vld [vmem:[#allocation8 + $0x2e30] sm:$0xff] }
 0x4ba   :  { %14140 = vmatpush1.bf16.msra.mxu1 %v18983_v31  ;;  %13977 = vmatprep.subr.bf16.mxu0 %v19014_v32  ;;  %v19143_v31 = vcombine.low %v1764_v18, %v1780_v21  ;;  %v19174_v32 = vcombine.high %v1795_v27, %v1811_v15  ;;  %v1939_v17 = vld [vmem:[#allocation8 + $0x2eb0] sm:$0xff]  ;;  %v1924_v18 = vld [vmem:[#allocation8 + $0x2e38] sm:$0xff] }
 0x4bb   :  { %14141 = vmatprep.subr.bf16.mxu1 %v19016_v33  ;;  %v19176_v33 = vcombine.high %v1796_v28, %v1812_v29  ;;  %v1940_v21 = vld [vmem:[#allocation8 + $0x2eb8] sm:$0xff] }
 0x4bd   :  { %13978 = vmatpush1.bf16.msra.mxu0 %v19013_v39  ;;  %v19173_v39 = vcombine.low %v1795_v27, %v1811_v15  ;;  %v1955_v27 = vld [vmem:[#allocation8 + $0x2f30] sm:$0xff] }
 0x4be   :  { %14142 = vmatpush1.bf16.msra.mxu1 %v19015_v55  ;;  %13979 = vmatprep.subr.bf16.mxu0 %v19046_v40  ;;  %v19175_v55 = vcombine.low %v1796_v28, %v1812_v29  ;;  %v19206_v40 = vcombine.high %v1827_v35, %v1843_v63  ;;  %v1971_v15 = vld [vmem:[#allocation8 + $0x2fb0] sm:$0xff]  ;;  %v1956_v28 = vld [vmem:[#allocation8 + $0x2f38] sm:$0xff] }
 0x4bf   :  { %14143 = vmatprep.subr.bf16.mxu1 %v19048_v42  ;;  %v19208_v42 = vcombine.high %v1828_v37, %v1844_v38  ;;  %v1972_v29 = vld [vmem:[#allocation8 + $0x2fb8] sm:$0xff] }
 0x4c1   :  { %13980 = vmatpush1.bf16.msra.mxu0 %v19045_v53  ;;  %v19205_v53 = vcombine.low %v1827_v35, %v1843_v63  ;;  %v1987_v35 = vld [vmem:[#allocation8 + $0x3030] sm:$0xff] }
 0x4c2   :  { %14144 = vmatpush1.bf16.msra.mxu1 %v19047_v44  ;;  %13981 = vmatprep.subr.bf16.mxu0 %v19078_v54  ;;  %v19207_v44 = vcombine.low %v1828_v37, %v1844_v38  ;;  %v19238_v54 = vcombine.high %v1859_v43, %v1875_v50  ;;  %v2003_v63 = vld [vmem:[#allocation8 + $0x30b0] sm:$0xff]  ;;  %v1988_v37 = vld [vmem:[#allocation8 + $0x3038] sm:$0xff] }
 0x4c3   :  { %14145 = vmatprep.subr.bf16.mxu1 %v19080_v56  ;;  %v19240_v56 = vcombine.high %v1860_v52, %v1876_v16  ;;  %v2004_v38 = vld [vmem:[#allocation8 + $0x30b8] sm:$0xff] }
 0x4c5   :  { %13982 = vmatpush1.bf16.msra.mxu0 %v19077_v3  ;;  %v19237_v3 = vcombine.low %v1859_v43, %v1875_v50  ;;  %v2019_v43 = vld [vmem:[#allocation8 + $0x3130] sm:$0xff] }
 0x4c6   :  { %14146 = vmatpush1.bf16.msra.mxu1 %v19079_v4  ;;  %13983 = vmatprep.subr.bf16.mxu0 %v19110_v9  ;;  %v19239_v4 = vcombine.low %v1860_v52, %v1876_v16  ;;  %v19270_v9 = vcombine.high %v1891_v57, %v1907_v58  ;;  %v2035_v50 = vld [vmem:[#allocation8 + $0x31b0] sm:$0xff]  ;;  %v19365_v52 = vcombine.low %v1987_v35, %v2003_v63  ;;  %v2020_v16 = vld [vmem:[#allocation8 + $0x3138] sm:$0xff] }
 0x4c7   :  { %14147 = vmatprep.subr.bf16.mxu1 %v19112_v10  ;;  %v19272_v10 = vcombine.high %v1892_v62, %v1908_v1 }
 0x4c9   :  { %13984 = vmatpush1.bf16.msra.mxu0 %v19109_v59  ;;  %v19269_v59 = vcombine.low %v1891_v57, %v1907_v58  ;;  %v2067_v57 = vld [vmem:[#allocation8 + $0x32b0] sm:$0xff] }
 0x4ca   :  { %14148 = vmatpush1.bf16.msra.mxu1 %v19111_v22  ;;  %13985 = vmatprep.subr.bf16.mxu0 %v19142_v26  ;;  %v19271_v22 = vcombine.low %v1892_v62, %v1908_v1  ;;  %v19302_v26 = vcombine.high %v1923_v12, %v1939_v17  ;;  %v2052_v62 = vld [vmem:[#allocation8 + $0x3238] sm:$0xff] }
 0x4cb   :  { %14149 = vmatprep.subr.bf16.mxu1 %v19144_v46  ;;  %v19304_v46 = vcombine.high %v1924_v18, %v1940_v21  ;;  %v2068_v1 = vld [vmem:[#allocation8 + $0x32b8] sm:$0xff] }
 0x4cd   :  { %13986 = vmatpush1.bf16.msra.mxu0 %v19141_v30  ;;  %v19301_v30 = vcombine.low %v1923_v12, %v1939_v17  ;;  %v2083_v12 = vld [vmem:[#allocation8 + $0x3330] sm:$0xff] }
 0x4ce   :  { %14150 = vmatpush1.bf16.msra.mxu1 %v19143_v31  ;;  %13987 = vmatprep.subr.bf16.mxu0 %v19174_v32  ;;  %v19303_v31 = vcombine.low %v1924_v18, %v1940_v21  ;;  %v19334_v32 = vcombine.high %v1955_v27, %v1971_v15  ;;  %v2099_v17 = vld [vmem:[#allocation8 + $0x33b0] sm:$0xff]  ;;  %v2084_v18 = vld [vmem:[#allocation8 + $0x3338] sm:$0xff] }
 0x4cf   :  { %14151 = vmatprep.subr.bf16.mxu1 %v19176_v33  ;;  %v19336_v33 = vcombine.high %v1956_v28, %v1972_v29  ;;  %v2100_v21 = vld [vmem:[#allocation8 + $0x33b8] sm:$0xff] }
 0x4d1   :  { %13988 = vmatpush1.bf16.msra.mxu0 %v19173_v39  ;;  %v19333_v39 = vcombine.low %v1955_v27, %v1971_v15  ;;  %v2115_v27 = vld [vmem:[#allocation8 + $0x3430] sm:$0xff] }
 0x4d2   :  { %14152 = vmatpush1.bf16.msra.mxu1 %v19175_v55  ;;  %13989 = vmatprep.subr.bf16.mxu0 %v19206_v40  ;;  %v19335_v55 = vcombine.low %v1956_v28, %v1972_v29  ;;  %v19366_v40 = vcombine.high %v1987_v35, %v2003_v63  ;;  %v2131_v15 = vld [vmem:[#allocation8 + $0x34b0] sm:$0xff]  ;;  %v2116_v28 = vld [vmem:[#allocation8 + $0x3438] sm:$0xff] }
 0x4d3   :  { %14153 = vmatprep.subr.bf16.mxu1 %v19208_v42  ;;  %v19368_v42 = vcombine.high %v1988_v37, %v2004_v38  ;;  %v2132_v29 = vld [vmem:[#allocation8 + $0x34b8] sm:$0xff]  ;;  %v2147_v35 = vld [vmem:[#allocation8 + $0x3530] sm:$0xff] }
 0x4d4   :  { %v2163_v63 = vld [vmem:[#allocation8 + $0x35b0] sm:$0xff] }
 0x4d5   :  { %13990 = vmatpush1.bf16.msra.mxu0 %v19205_v53  ;;  %v2036_v53 = vld [vmem:[#allocation8 + $0x31b8] sm:$0xff] }
 0x4d6   :  { %14154 = vmatpush1.bf16.msra.mxu1 %v19207_v44  ;;  %13991 = vmatprep.subr.bf16.mxu0 %v19238_v54  ;;  %v19367_v44 = vcombine.low %v1988_v37, %v2004_v38  ;;  %v19398_v54 = vcombine.high %v2019_v43, %v2035_v50  ;;  %v19400_v58 = vcombine.high %v2020_v16, %v2036_v53  ;;  %v2148_v37 = vld [vmem:[#allocation8 + $0x3538] sm:$0xff] }
 0x4d7   :  { %14155 = vmatprep.subr.bf16.mxu1 %v19240_v56  ;;  %v2051_v56 = vld [vmem:[#allocation8 + $0x3230] sm:$0xff]  ;;  %v2164_v38 = vld [vmem:[#allocation8 + $0x35b8] sm:$0xff] }
 0x4d9   :  { %13992 = vmatpush1.bf16.msra.mxu0 %v19237_v3  ;;  %v19397_v3 = vcombine.low %v2019_v43, %v2035_v50  ;;  %v2179_v43 = vld [vmem:[#allocation8 + $0x3630] sm:$0xff] }
 0x4da   :  { %14156 = vmatpush1.bf16.msra.mxu1 %v19239_v4  ;;  %13993 = vmatprep.subr.bf16.mxu0 %v19270_v9  ;;  %v19399_v4 = vcombine.low %v2020_v16, %v2036_v53  ;;  %v19430_v9 = vcombine.high %v2051_v56, %v2067_v57  ;;  %v2195_v50 = vld [vmem:[#allocation8 + $0x36b0] sm:$0xff]  ;;  %v2196_v16 = vld [vmem:[#allocation8 + $0x36b8] sm:$0xff]  ;;  %v19525_v53 = vcombine.low %v2147_v35, %v2163_v63 }
 0x4db   :  { %14157 = vmatprep.subr.bf16.mxu1 %v19272_v10  ;;  %v19432_v10 = vcombine.high %v2052_v62, %v2068_v1 }
 0x4dd   :  { %13994 = vmatpush1.bf16.msra.mxu0 %v19269_v59  ;;  %v19429_v59 = vcombine.low %v2051_v56, %v2067_v57 }
 0x4de   :  { %14158 = vmatpush1.bf16.msra.mxu1 %v19271_v22  ;;  %13995 = vmatprep.subr.bf16.mxu0 %v19302_v26  ;;  %v19431_v22 = vcombine.low %v2052_v62, %v2068_v1  ;;  %v19462_v26 = vcombine.high %v2083_v12, %v2099_v17  ;;  %v2227_v62 = vld [vmem:[#allocation8 + $0x37b0] sm:$0xff] }
 0x4df   :  { %14159 = vmatprep.subr.bf16.mxu1 %v19304_v46  ;;  %v19464_v46 = vcombine.high %v2084_v18, %v2100_v21 }
 0x4e1   :  { %13996 = vmatpush1.bf16.msra.mxu0 %v19301_v30  ;;  %v19461_v30 = vcombine.low %v2083_v12, %v2099_v17  ;;  %v19557_v17 = vcombine.low %v2179_v43, %v2195_v50 }
 0x4e2   :  { %14160 = vmatpush1.bf16.msra.mxu1 %v19303_v31  ;;  %13997 = vmatprep.subr.bf16.mxu0 %v19334_v32  ;;  %v19463_v31 = vcombine.low %v2084_v18, %v2100_v21  ;;  %v19494_v32 = vcombine.high %v2115_v27, %v2131_v15 }
 0x4e3   :  { %14161 = vmatprep.subr.bf16.mxu1 %v19336_v33  ;;  %v19496_v33 = vcombine.high %v2116_v28, %v2132_v29 }
 0x4e5   :  { %13998 = vmatpush1.bf16.msra.mxu0 %v19333_v39  ;;  %v19493_v39 = vcombine.low %v2115_v27, %v2131_v15  ;;  %v2243_v27 = vld [vmem:[#allocation8 + $0x3830] sm:$0xff] }
 0x4e6   :  { %14162 = vmatpush1.bf16.msra.mxu1 %v19335_v55  ;;  %14008 = vmatprep.subr.bf16.mxu0 %v19366_v40  ;;  %v19495_v55 = vcombine.low %v2116_v28, %v2132_v29  ;;  %v19526_v40 = vcombine.high %v2147_v35, %v2163_v63  ;;  %v2259_v15 = vld [vmem:[#allocation8 + $0x38b0] sm:$0xff]  ;;  %v2244_v28 = vld [vmem:[#allocation8 + $0x3838] sm:$0xff] }
 0x4e7   :  { %14172 = vmatprep.subr.bf16.mxu1 %v19368_v42  ;;  %v19528_v42 = vcombine.high %v2148_v37, %v2164_v38  ;;  %v2260_v29 = vld [vmem:[#allocation8 + $0x38b8] sm:$0xff]  ;;  %v2275_v35 = vld [vmem:[#allocation8 + $0x3930] sm:$0xff] }
 0x4e8   :  { %14000 = vmatmul.mubr.bf16.vlgmr.msra.gmra.mrb[20].mxu0 %v22946_v34  ;;  %v2291_v63 = vld [vmem:[#allocation8 + $0x39b0] sm:$0xff] }
 0x4e9   :  { %14164 = vmatmul.mubr.bf16.vlgmr.msra.gmra.mrb[20].mxu1 %v22946_v34  ;;  %14009 = vmatpush1.bf16.msra.mxu0 %v19365_v52  ;;  %v2180_v52 = vld [vmem:[#allocation8 + $0x3638] sm:$0xff] }
 0x4ea   :  { %14040 = vmatprep.mubr.bf16.mxu0 %v22948_v41  ;;  %14173 = vmatpush1.bf16.msra.mxu1 %v19367_v44  ;;  %v19527_v44 = vcombine.low %v2148_v37, %v2164_v38  ;;  %v19560_v57 = vcombine.high %v2180_v52, %v2196_v16  ;;  %v2276_v37 = vld [vmem:[#allocation8 + $0x3938] sm:$0xff] }
 0x4eb   :  { %14204 = vmatprep.mubr.bf16.mxu1 %v22948_v41  ;;  %14010 = vmatprep.subr.bf16.mxu0 %v19398_v54  ;;  %v19558_v54 = vcombine.high %v2179_v43, %v2195_v50  ;;  %v2292_v38 = vld [vmem:[#allocation8 + $0x39b8] sm:$0xff]  ;;  %v2307_v43 = vld [vmem:[#allocation8 + $0x3a30] sm:$0xff] }
 0x4ec   :  { %14174 = vmatprep.subr.bf16.mxu1 %v19400_v58  ;;  %v2211_v58 = vld [vmem:[#allocation8 + $0x3730] sm:$0xff] }
 0x4ed   :  { %14011 = vmatpush1.bf16.msra.mxu0 %v19397_v3  ;;  %v2323_v50 = vld [vmem:[#allocation8 + $0x3ab0] sm:$0xff] }
 0x4ee   :  { %14175 = vmatpush1.bf16.msra.mxu1 %v19399_v4  ;;  %14012 = vmatprep.subr.bf16.mxu0 %v19430_v9  ;;  %v2212_v4 = vld [vmem:[#allocation8 + $0x3738] sm:$0xff] }
 0x4ef   :  { %14176 = vmatprep.subr.bf16.mxu1 %v19432_v10  ;;  %v2228_v9 = vld [vmem:[#allocation8 + $0x37b8] sm:$0xff] }
 0x4f1   :  { %14013 = vmatpush1.bf16.msra.mxu0 %v19429_v59  ;;  %v19559_v59 = vcombine.low %v2180_v52, %v2196_v16  ;;  %v2308_v52 = vld [vmem:[#allocation8 + $0x3a38] sm:$0xff] }
 0x4f2   :  { %14177 = vmatpush1.bf16.msra.mxu1 %v19431_v22  ;;  %14014 = vmatprep.subr.bf16.mxu0 %v19462_v26  ;;  %v19590_v22 = vcombine.high %v2211_v58, %v2227_v62  ;;  %v2324_v16 = vld [vmem:[#allocation8 + $0x3ab8] sm:$0xff] }
 0x4f3   :  { %14178 = vmatprep.subr.bf16.mxu1 %v19464_v46  ;;  %v19592_v46 = vcombine.high %v2212_v4, %v2228_v9 }
 0x4f5   :  { %14015 = vmatpush1.bf16.msra.mxu0 %v19461_v30  ;;  %v19589_v30 = vcombine.low %v2211_v58, %v2227_v62  ;;  %v2339_v58 = vld [vmem:[#allocation8 + $0x3b30] sm:$0xff] }
 0x4f6   :  { %14179 = vmatpush1.bf16.msra.mxu1 %v19463_v31  ;;  %14016 = vmatprep.subr.bf16.mxu0 %v19494_v32  ;;  %v19591_v31 = vcombine.low %v2212_v4, %v2228_v9  ;;  %v19622_v32 = vcombine.high %v2243_v27, %v2259_v15  ;;  %v2355_v62 = vld [vmem:[#allocation8 + $0x3bb0] sm:$0xff]  ;;  %v2340_v4 = vld [vmem:[#allocation8 + $0x3b38] sm:$0xff] }
 0x4f7   :  { %14180 = vmatprep.subr.bf16.mxu1 %v19496_v33  ;;  %v19624_v33 = vcombine.high %v2244_v28, %v2260_v29  ;;  %v2356_v9 = vld [vmem:[#allocation8 + $0x3bb8] sm:$0xff] }
 0x4f9   :  { %14017 = vmatpush1.bf16.msra.mxu0 %v19493_v39  ;;  %v19621_v39 = vcombine.low %v2243_v27, %v2259_v15  ;;  %v19717_v27 = vcombine.low %v2339_v58, %v2355_v62  ;;  %v19719_v15 = vcombine.low %v2340_v4, %v2356_v9 }
 0x4fa   :  { %14181 = vmatpush1.bf16.msra.mxu1 %v19495_v55  ;;  %14018 = vmatprep.subr.bf16.mxu0 %v19526_v40  ;;  %v19623_v55 = vcombine.low %v2244_v28, %v2260_v29  ;;  %v19654_v40 = vcombine.high %v2275_v35, %v2291_v63 }
 0x4fb   :  { %v23025_v56 = vpop.f32.mrb[16].mxu0  ;;  %14182 = vmatprep.subr.bf16.mxu1 %v19528_v42  ;;  %v19656_v42 = vcombine.high %v2276_v37, %v2292_v38 }
 0x4fc   :  { %v23027_v1 = vpop.f32.mrb[16].mxu1  ;;  %v23029_v3 = vpop.f32.mrb[17].mxu0 }
 0x4fd   :  { %v23031_v10 = vpop.f32.mrb[17].mxu1  ;;  %v13718_v12 = vpop.f32.mrb[18].mxu0  ;;  %14019 = vmatpush1.bf16.msra.mxu0 %v19525_v53  ;;  %v19653_v53 = vcombine.low %v2275_v35, %v2291_v63 }
 0x4fe   :  { %v13882_v18 = vpop.f32.mrb[18].mxu1  ;;  %14183 = vmatpush1.bf16.msra.mxu1 %v19527_v44  ;;  %v13719_v21 = vpop.f32.mrb[19].mxu0  ;;  %14020 = vmatprep.subr.bf16.mxu0 %v19558_v54  ;;  %v19655_v44 = vcombine.low %v2276_v37, %v2292_v38  ;;  %v19686_v54 = vcombine.high %v2307_v43, %v2323_v50  ;;  %v19685_v12 = vcombine.low %v2307_v43, %v2323_v50 }
 0x4ff   :  { %v13883_v26 = vpop.f32.mrb[19].mxu1  ;;  %14184 = vmatprep.subr.bf16.mxu1 %v19560_v57  ;;  %v19688_v57 = vcombine.high %v2308_v52, %v2324_v16  ;;  %v19718_v18 = vcombine.high %v2339_v58, %v2355_v62  ;;  %v19720_v21 = vcombine.high %v2340_v4, %v2356_v9 }
 0x500   :  { %v2372_v26 = vld [vmem:[#allocation8 + $0x3c38] sm:$0xff] }
 0x501   :  { %14021 = vmatpush1.bf16.msra.mxu0 %v19557_v17  ;;  %v19687_v17 = vcombine.low %v2308_v52, %v2324_v16 }
 0x502   :  { %14185 = vmatpush1.bf16.msra.mxu1 %v19559_v59  ;;  %14022 = vmatprep.subr.bf16.mxu0 %v19590_v22  ;;  %v2371_v59 = vld [vmem:[#allocation8 + $0x3c30] sm:$0xff] }
 0x503   :  { %14186 = vmatprep.subr.bf16.mxu1 %v19592_v46  ;;  %v2387_v22 = vld [vmem:[#allocation8 + $0x3cb0] sm:$0xff]  ;;  %v2388_v46 = vld [vmem:[#allocation8 + $0x3cb8] sm:$0xff] }
 0x504   :  { %v19750_v28 = vcombine.high %v2371_v59, %v2387_v22  ;;  %v19752_v29 = vcombine.high %v2372_v26, %v2388_v46  ;;  %v19749_v35 = vcombine.low %v2371_v59, %v2387_v22  ;;  %v19751_v63 = vcombine.low %v2372_v26, %v2388_v46 }
 0x505   :  { %14023 = vmatpush1.bf16.msra.mxu0 %v19589_v30  ;;  %v2403_v30 = vld [vmem:[#allocation8 + $0x3d30] sm:$0xff] }
 0x506   :  { %14187 = vmatpush1.bf16.msra.mxu1 %v19591_v31  ;;  %14024 = vmatprep.subr.bf16.mxu0 %v19622_v32  ;;  %v2419_v31 = vld [vmem:[#allocation8 + $0x3db0] sm:$0xff]  ;;  %v2404_v32 = vld [vmem:[#allocation8 + $0x3d38] sm:$0xff] }
 0x507   :  { %14188 = vmatprep.subr.bf16.mxu1 %v19624_v33  ;;  %v2420_v33 = vld [vmem:[#allocation8 + $0x3db8] sm:$0xff]  ;;  %v19782_v37 = vcombine.high %v2403_v30, %v2419_v31  ;;  %v19781_v43 = vcombine.low %v2403_v30, %v2419_v31  ;;  %v502_v30 = vld [vmem:[#allocation8 + $0x1c8] sm:$0xff] }
 0x508   :  { %v19784_v38 = vcombine.high %v2404_v32, %v2420_v33  ;;  %v19783_v50 = vcombine.low %v2404_v32, %v2420_v33  ;;  %v517_v33 = vld [vmem:[#allocation8 + $0x240] sm:$0xff] }
 0x509   :  { %14025 = vmatpush1.bf16.msra.mxu0 %v19621_v39  ;;  %v2435_v39 = vld [vmem:[#allocation8 + $0x3e30] sm:$0xff] }
 0x50a   :  { %14189 = vmatpush1.bf16.msra.mxu1 %v19623_v55  ;;  %14026 = vmatprep.subr.bf16.mxu0 %v19654_v40  ;;  %v2451_v55 = vld [vmem:[#allocation8 + $0x3eb0] sm:$0xff]  ;;  %v2436_v40 = vld [vmem:[#allocation8 + $0x3e38] sm:$0xff] }
 0x50b   :  { %14190 = vmatprep.subr.bf16.mxu1 %v19656_v42  ;;  %v2452_v42 = vld [vmem:[#allocation8 + $0x3eb8] sm:$0xff]  ;;  %v19814_v52 = vcombine.high %v2435_v39, %v2451_v55  ;;  %v19813_v58 = vcombine.low %v2435_v39, %v2451_v55 }
 0x50c   :  { %v19816_v16 = vcombine.high %v2436_v40, %v2452_v42  ;;  %v19815_v62 = vcombine.low %v2436_v40, %v2452_v42 }
 0x50d   :  { %14027 = vmatpush1.bf16.msra.mxu0 %v19653_v53  ;;  %v2467_v53 = vld [vmem:[#allocation8 + $0x3f30] sm:$0xff] }
 0x50e   :  { %14191 = vmatpush1.bf16.msra.mxu1 %v19655_v44  ;;  %14028 = vmatprep.subr.bf16.mxu0 %v19686_v54  ;;  %v2483_v44 = vld [vmem:[#allocation8 + $0x3fb0] sm:$0xff]  ;;  %v2468_v54 = vld [vmem:[#allocation8 + $0x3f38] sm:$0xff] }
 0x50f   :  { %14192 = vmatprep.subr.bf16.mxu1 %v19688_v57  ;;  %v2484_v57 = vld [vmem:[#allocation8 + $0x3fb8] sm:$0xff]  ;;  %v19846_v4 = vcombine.high %v2467_v53, %v2483_v44  ;;  %v19845_v59 = vcombine.low %v2467_v53, %v2483_v44 }
 0x510   :  { %v19848_v9 = vcombine.high %v2468_v54, %v2484_v57  ;;  %v19847_v22 = vcombine.low %v2468_v54, %v2484_v57 }
 0x511   :  { %14029 = vmatpush1.bf16.msra.mxu0 %v19685_v12  ;;  %v453_v12 = vld [vmem:[#allocation8 + $0x40] sm:$0xff] }
 0x512   :  { %14193 = vmatpush1.bf16.msra.mxu1 %v19687_v17  ;;  %14030 = vmatprep.subr.bf16.mxu0 %v19718_v18  ;;  %v469_v17 = vld [vmem:[#allocation8 + $0xc0] sm:$0xff]  ;;  %v454_v18 = vld [vmem:[#allocation8 + $0x48] sm:$0xff] }
 0x513   :  { %14194 = vmatprep.subr.bf16.mxu1 %v19720_v21  ;;  %v470_v21 = vld [vmem:[#allocation8 + $0xc8] sm:$0xff]  ;;  %v17834_v26 = vcombine.high %v453_v12, %v469_v17 }
 0x514   :  { %v17836_v46 = vcombine.high %v454_v18, %v470_v21  ;;  %v17835_v31 = vcombine.low %v454_v18, %v470_v21 }
 0x515   :  { %14031 = vmatpush1.bf16.msra.mxu0 %v19717_v27  ;;  %v485_v27 = vld [vmem:[#allocation8 + $0x140] sm:$0xff] }
 0x516   :  { %14195 = vmatpush1.bf16.msra.mxu1 %v19719_v15  ;;  %14032 = vmatprep.subr.bf16.mxu0 %v19750_v28  ;;  %v501_v15 = vld [vmem:[#allocation8 + $0x1c0] sm:$0xff]  ;;  %v17833_v28 = vcombine.low %v453_v12, %v469_v17 }
 0x517   :  { %14196 = vmatprep.subr.bf16.mxu1 %v19752_v29  ;;  %v486_v29 = vld [vmem:[#allocation8 + $0x148] sm:$0xff]  ;;  %v17866_v32 = vcombine.high %v485_v27, %v501_v15  ;;  %v17865_v39 = vcombine.low %v485_v27, %v501_v15 }
 0x518   :  { %v17867_v55 = vcombine.low %v486_v29, %v502_v30 }
 0x519   :  { %14033 = vmatpush1.bf16.msra.mxu0 %v19749_v35  ;;  %v533_v35 = vld [vmem:[#allocation8 + $0x2c0] sm:$0xff] }
 0x51a   :  { %14197 = vmatpush1.bf16.msra.mxu1 %v19751_v63  ;;  %14034 = vmatprep.subr.bf16.mxu0 %v19782_v37  ;;  %v17868_v63 = vcombine.high %v486_v29, %v502_v30  ;;  %v518_v37 = vld [vmem:[#allocation8 + $0x248] sm:$0xff]  ;;  %v17898_v40 = vcombine.high %v517_v33, %v533_v35  ;;  %v17897_v53 = vcombine.low %v517_v33, %v533_v35  ;;  %v645_v30 = vld [vmem:[#allocation8 + $0x640] sm:$0xff] }
 0x51b   :  { %14198 = vmatprep.subr.bf16.mxu1 %v19784_v38  ;;  %v534_v38 = vld [vmem:[#allocation8 + $0x2c8] sm:$0xff] }
 0x51c   :  { %v17900_v42 = vcombine.high %v518_v37, %v534_v38  ;;  %v17899_v44 = vcombine.low %v518_v37, %v534_v38  ;;  %v662_v33 = vld [vmem:[#allocation8 + $0x6c8] sm:$0xff] }
 0x51d   :  { %14035 = vmatpush1.bf16.msra.mxu0 %v19781_v43  ;;  %v549_v43 = vld [vmem:[#allocation8 + $0x340] sm:$0xff] }
 0x51e   :  { %14199 = vmatpush1.bf16.msra.mxu1 %v19783_v50  ;;  %14036 = vmatprep.subr.bf16.mxu0 %v19814_v52  ;;  %v565_v50 = vld [vmem:[#allocation8 + $0x3c0] sm:$0xff]  ;;  %v550_v52 = vld [vmem:[#allocation8 + $0x348] sm:$0xff] }
 0x51f   :  { %14200 = vmatprep.subr.bf16.mxu1 %v19816_v16  ;;  %v566_v16 = vld [vmem:[#allocation8 + $0x3c8] sm:$0xff]  ;;  %v17930_v54 = vcombine.high %v549_v43, %v565_v50  ;;  %v17929_v12 = vcombine.low %v549_v43, %v565_v50 }
 0x520   :  { %v17932_v57 = vcombine.high %v550_v52, %v566_v16  ;;  %v17931_v17 = vcombine.low %v550_v52, %v566_v16 }
 0x521   :  { %14037 = vmatpush1.bf16.msra.mxu0 %v19813_v58  ;;  %v581_v58 = vld [vmem:[#allocation8 + $0x440] sm:$0xff] }
 0x522   :  { %14201 = vmatpush1.bf16.msra.mxu1 %v19815_v62  ;;  %14038 = vmatprep.subr.bf16.mxu0 %v19846_v4  ;;  %v597_v62 = vld [vmem:[#allocation8 + $0x4c0] sm:$0xff]  ;;  %v582_v4 = vld [vmem:[#allocation8 + $0x448] sm:$0xff] }
 0x523   :  { %14202 = vmatprep.subr.bf16.mxu1 %v19848_v9  ;;  %v598_v9 = vld [vmem:[#allocation8 + $0x4c8] sm:$0xff]  ;;  %v17962_v18 = vcombine.high %v581_v58, %v597_v62  ;;  %v17961_v27 = vcombine.low %v581_v58, %v597_v62 }
 0x524   :  { %v17964_v21 = vcombine.high %v582_v4, %v598_v9  ;;  %v17963_v15 = vcombine.low %v582_v4, %v598_v9 }
 0x525   :  { %14039 = vmatpush1.bf16.msra.mxu0 %v19845_v59  ;;  %v613_v59 = vld [vmem:[#allocation8 + $0x540] sm:$0xff] }
 0x526   :  { %14203 = vmatpush1.bf16.msra.mxu1 %v19847_v22  ;;  %14213 = vmatprep.subr.bf16.mxu0 %v17834_v26  ;;  %v629_v22 = vld [vmem:[#allocation8 + $0x5c0] sm:$0xff]  ;;  %v614_v26 = vld [vmem:[#allocation8 + $0x548] sm:$0xff] }
 0x527   :  { %14377 = vmatprep.subr.bf16.mxu1 %v17836_v46  ;;  %v630_v46 = vld [vmem:[#allocation8 + $0x5c8] sm:$0xff]  ;;  %v17993_v35 = vcombine.low %v613_v59, %v629_v22 }
 0x528   :  { %14041 = vmatmul.mubr.bf16.vlgmr.msra.gmra.mrb[20].mxu0 %v22959_v24  ;;  %v17996_v29 = vcombine.high %v614_v26, %v630_v46 }
 0x529   :  { %14205 = vmatmul.mubr.bf16.vlgmr.msra.gmra.mrb[20].mxu1 %v22959_v24  ;;  %14214 = vmatpush1.bf16.msra.mxu0 %v17833_v28  ;;  %v17994_v28 = vcombine.high %v613_v59, %v629_v22 }
 0x52a   :  { %14245 = vmatprep.mubr.bf16.mxu0 %v22894_v6  ;;  %14378 = vmatpush1.bf16.msra.mxu1 %v17835_v31  ;;  %v661_v31 = vld [vmem:[#allocation8 + $0x6c0] sm:$0xff] }
 0x52b   :  { %14409 = vmatprep.mubr.bf16.mxu1 %v22894_v6  ;;  %14215 = vmatprep.subr.bf16.mxu0 %v17866_v32  ;;  %v646_v32 = vld [vmem:[#allocation8 + $0x648] sm:$0xff]  ;;  %v18026_v37 = vcombine.high %v645_v30, %v661_v31  ;;  %v18025_v43 = vcombine.low %v645_v30, %v661_v31 }
 0x52c   :  { %14379 = vmatprep.subr.bf16.mxu1 %v17868_v63  ;;  %v17995_v63 = vcombine.low %v614_v26, %v630_v46  ;;  %v18028_v38 = vcombine.high %v646_v32, %v662_v33  ;;  %v18027_v50 = vcombine.low %v646_v32, %v662_v33 }
 0x52d   :  { %14216 = vmatpush1.bf16.msra.mxu0 %v17865_v39  ;;  %v677_v39 = vld [vmem:[#allocation8 + $0x740] sm:$0xff] }
 0x52e   :  { %14380 = vmatpush1.bf16.msra.mxu1 %v17867_v55  ;;  %14217 = vmatprep.subr.bf16.mxu0 %v17898_v40  ;;  %v693_v55 = vld [vmem:[#allocation8 + $0x7c0] sm:$0xff]  ;;  %v678_v40 = vld [vmem:[#allocation8 + $0x748] sm:$0xff] }
 0x52f   :  { %14381 = vmatprep.subr.bf16.mxu1 %v17900_v42  ;;  %v694_v42 = vld [vmem:[#allocation8 + $0x7c8] sm:$0xff]  ;;  %v18058_v52 = vcombine.high %v677_v39, %v693_v55  ;;  %v18057_v58 = vcombine.low %v677_v39, %v693_v55 }
 0x530   :  { %v18060_v16 = vcombine.high %v678_v40, %v694_v42  ;;  %v18059_v62 = vcombine.low %v678_v40, %v694_v42 }
 0x531   :  { %14218 = vmatpush1.bf16.msra.mxu0 %v17897_v53  ;;  %v709_v53 = vld [vmem:[#allocation8 + $0x840] sm:$0xff] }
 0x532   :  { %14382 = vmatpush1.bf16.msra.mxu1 %v17899_v44  ;;  %14219 = vmatprep.subr.bf16.mxu0 %v17930_v54  ;;  %v725_v44 = vld [vmem:[#allocation8 + $0x8c0] sm:$0xff]  ;;  %v710_v54 = vld [vmem:[#allocation8 + $0x848] sm:$0xff] }
 0x533   :  { %14383 = vmatprep.subr.bf16.mxu1 %v17932_v57  ;;  %v726_v57 = vld [vmem:[#allocation8 + $0x8c8] sm:$0xff]  ;;  %v18090_v4 = vcombine.high %v709_v53, %v725_v44  ;;  %v18089_v59 = vcombine.low %v709_v53, %v725_v44 }
 0x534   :  { %v18092_v9 = vcombine.high %v710_v54, %v726_v57  ;;  %v18091_v22 = vcombine.low %v710_v54, %v726_v57 }
 0x535   :  { %14220 = vmatpush1.bf16.msra.mxu0 %v17929_v12  ;;  %v741_v12 = vld [vmem:[#allocation8 + $0x940] sm:$0xff] }
 0x536   :  { %14384 = vmatpush1.bf16.msra.mxu1 %v17931_v17  ;;  %14221 = vmatprep.subr.bf16.mxu0 %v17962_v18  ;;  %v757_v17 = vld [vmem:[#allocation8 + $0x9c0] sm:$0xff]  ;;  %v742_v18 = vld [vmem:[#allocation8 + $0x948] sm:$0xff] }
 0x537   :  { %14385 = vmatprep.subr.bf16.mxu1 %v17964_v21  ;;  %v758_v21 = vld [vmem:[#allocation8 + $0x9c8] sm:$0xff]  ;;  %v18122_v26 = vcombine.high %v741_v12, %v757_v17  ;;  %v18121_v30 = vcombine.low %v741_v12, %v757_v17 }
 0x538   :  { %v18124_v46 = vcombine.high %v742_v18, %v758_v21  ;;  %v18123_v31 = vcombine.low %v742_v18, %v758_v21 }
 0x539   :  { %14222 = vmatpush1.bf16.msra.mxu0 %v17961_v27  ;;  %v773_v27 = vld [vmem:[#allocation8 + $0xa40] sm:$0xff] }
 0x53a   :  { %14386 = vmatpush1.bf16.msra.mxu1 %v17963_v15  ;;  %14223 = vmatprep.subr.bf16.mxu0 %v17994_v28  ;;  %v789_v15 = vld [vmem:[#allocation8 + $0xac0] sm:$0xff]  ;;  %v774_v28 = vld [vmem:[#allocation8 + $0xa48] sm:$0xff] }
 0x53b   :  { %14387 = vmatprep.subr.bf16.mxu1 %v17996_v29  ;;  %v790_v29 = vld [vmem:[#allocation8 + $0xac8] sm:$0xff]  ;;  %v18154_v32 = vcombine.high %v773_v27, %v789_v15  ;;  %v18153_v39 = vcombine.low %v773_v27, %v789_v15 }
 0x53c   :  { %v18156_v33 = vcombine.high %v774_v28, %v790_v29  ;;  %v18155_v55 = vcombine.low %v774_v28, %v790_v29 }
 0x53d   :  { %14224 = vmatpush1.bf16.msra.mxu0 %v17993_v35  ;;  %v805_v35 = vld [vmem:[#allocation8 + $0xb40] sm:$0xff] }
 0x53e   :  { %14388 = vmatpush1.bf16.msra.mxu1 %v17995_v63  ;;  %14225 = vmatprep.subr.bf16.mxu0 %v18026_v37  ;;  %v821_v63 = vld [vmem:[#allocation8 + $0xbc0] sm:$0xff]  ;;  %v806_v37 = vld [vmem:[#allocation8 + $0xb48] sm:$0xff] }
 0x53f   :  { %14389 = vmatprep.subr.bf16.mxu1 %v18028_v38  ;;  %v822_v38 = vld [vmem:[#allocation8 + $0xbc8] sm:$0xff]  ;;  %v18186_v40 = vcombine.high %v805_v35, %v821_v63  ;;  %v18185_v53 = vcombine.low %v805_v35, %v821_v63 }
 0x540   :  { %v18188_v42 = vcombine.high %v806_v37, %v822_v38  ;;  %v18187_v44 = vcombine.low %v806_v37, %v822_v38 }
 0x541   :  { %14226 = vmatpush1.bf16.msra.mxu0 %v18025_v43  ;;  %v837_v43 = vld [vmem:[#allocation8 + $0xc40] sm:$0xff] }
 0x542   :  { %14390 = vmatpush1.bf16.msra.mxu1 %v18027_v50  ;;  %14227 = vmatprep.subr.bf16.mxu0 %v18058_v52  ;;  %v853_v50 = vld [vmem:[#allocation8 + $0xcc0] sm:$0xff]  ;;  %v838_v52 = vld [vmem:[#allocation8 + $0xc48] sm:$0xff] }
 0x543   :  { %14391 = vmatprep.subr.bf16.mxu1 %v18060_v16  ;;  %v854_v16 = vld [vmem:[#allocation8 + $0xcc8] sm:$0xff]  ;;  %v18218_v54 = vcombine.high %v837_v43, %v853_v50  ;;  %v18217_v12 = vcombine.low %v837_v43, %v853_v50 }
 0x544   :  { %v18220_v57 = vcombine.high %v838_v52, %v854_v16  ;;  %v18219_v17 = vcombine.low %v838_v52, %v854_v16 }
 0x545   :  { %14228 = vmatpush1.bf16.msra.mxu0 %v18057_v58  ;;  %v869_v58 = vld [vmem:[#allocation8 + $0xd40] sm:$0xff] }
 0x546   :  { %14392 = vmatpush1.bf16.msra.mxu1 %v18059_v62  ;;  %14229 = vmatprep.subr.bf16.mxu0 %v18090_v4  ;;  %v885_v62 = vld [vmem:[#allocation8 + $0xdc0] sm:$0xff]  ;;  %v870_v4 = vld [vmem:[#allocation8 + $0xd48] sm:$0xff] }
 0x547   :  { %14393 = vmatprep.subr.bf16.mxu1 %v18092_v9  ;;  %v886_v9 = vld [vmem:[#allocation8 + $0xdc8] sm:$0xff]  ;;  %v18250_v18 = vcombine.high %v869_v58, %v885_v62  ;;  %v18249_v27 = vcombine.low %v869_v58, %v885_v62 }
 0x548   :  { %v18252_v21 = vcombine.high %v870_v4, %v886_v9  ;;  %v18251_v15 = vcombine.low %v870_v4, %v886_v9  ;;  %v1014_v58 = vld [vmem:[#allocation8 + $0x11c8] sm:$0xff]  ;;  %v1029_v9 = vld [vmem:[#allocation8 + $0x1240] sm:$0xff] }
 0x549   :  { %14230 = vmatpush1.bf16.msra.mxu0 %v18089_v59  ;;  %v901_v59 = vld [vmem:[#allocation8 + $0xe40] sm:$0xff] }
 0x54a   :  { %14394 = vmatpush1.bf16.msra.mxu1 %v18091_v22  ;;  %14231 = vmatprep.subr.bf16.mxu0 %v18122_v26  ;;  %v917_v22 = vld [vmem:[#allocation8 + $0xec0] sm:$0xff]  ;;  %v902_v26 = vld [vmem:[#allocation8 + $0xe48] sm:$0xff] }
 0x54b   :  { %14395 = vmatprep.subr.bf16.mxu1 %v18124_v46  ;;  %v918_v46 = vld [vmem:[#allocation8 + $0xec8] sm:$0xff]  ;;  %v18282_v28 = vcombine.high %v901_v59, %v917_v22  ;;  %v18281_v35 = vcombine.low %v901_v59, %v917_v22 }
 0x54c   :  { %v18284_v29 = vcombine.high %v902_v26, %v918_v46  ;;  %v18283_v63 = vcombine.low %v902_v26, %v918_v46 }
 0x54d   :  { %14232 = vmatpush1.bf16.msra.mxu0 %v18121_v30  ;;  %v933_v30 = vld [vmem:[#allocation8 + $0xf40] sm:$0xff] }
 0x54e   :  { %14396 = vmatpush1.bf16.msra.mxu1 %v18123_v31  ;;  %14233 = vmatprep.subr.bf16.mxu0 %v18154_v32  ;;  %v949_v31 = vld [vmem:[#allocation8 + $0xfc0] sm:$0xff]  ;;  %v934_v32 = vld [vmem:[#allocation8 + $0xf48] sm:$0xff] }
 0x54f   :  { %14397 = vmatprep.subr.bf16.mxu1 %v18156_v33  ;;  %v950_v33 = vld [vmem:[#allocation8 + $0xfc8] sm:$0xff]  ;;  %v18314_v37 = vcombine.high %v933_v30, %v949_v31  ;;  %v18313_v43 = vcombine.low %v933_v30, %v949_v31 }
 0x550   :  { %v18316_v38 = vcombine.high %v934_v32, %v950_v33  ;;  %v18315_v50 = vcombine.low %v934_v32, %v950_v33 }
 0x551   :  { %14234 = vmatpush1.bf16.msra.mxu0 %v18153_v39  ;;  %v965_v39 = vld [vmem:[#allocation8 + $0x1040] sm:$0xff] }
 0x552   :  { %14398 = vmatpush1.bf16.msra.mxu1 %v18155_v55  ;;  %14235 = vmatprep.subr.bf16.mxu0 %v18186_v40  ;;  %v981_v55 = vld [vmem:[#allocation8 + $0x10c0] sm:$0xff]  ;;  %v966_v40 = vld [vmem:[#allocation8 + $0x1048] sm:$0xff] }
 0x553   :  { %14399 = vmatprep.subr.bf16.mxu1 %v18188_v42  ;;  %v982_v42 = vld [vmem:[#allocation8 + $0x10c8] sm:$0xff]  ;;  %v18346_v52 = vcombine.high %v965_v39, %v981_v55 }
 0x554   :  { %v18348_v16 = vcombine.high %v966_v40, %v982_v42  ;;  %v18347_v62 = vcombine.low %v966_v40, %v982_v42 }
 0x555   :  { %14236 = vmatpush1.bf16.msra.mxu0 %v18185_v53  ;;  %v997_v53 = vld [vmem:[#allocation8 + $0x1140] sm:$0xff] }
 0x556   :  { %14400 = vmatpush1.bf16.msra.mxu1 %v18187_v44  ;;  %14237 = vmatprep.subr.bf16.mxu0 %v18218_v54  ;;  %v1013_v44 = vld [vmem:[#allocation8 + $0x11c0] sm:$0xff]  ;;  %v18345_v54 = vcombine.low %v965_v39, %v981_v55 }
 0x557   :  { %14401 = vmatprep.subr.bf16.mxu1 %v18220_v57  ;;  %v998_v57 = vld [vmem:[#allocation8 + $0x1148] sm:$0xff]  ;;  %v18378_v4 = vcombine.high %v997_v53, %v1013_v44  ;;  %v18377_v59 = vcombine.low %v997_v53, %v1013_v44 }
 0x558   :  { %v18379_v22 = vcombine.low %v998_v57, %v1014_v58 }
 0x559   :  { %14238 = vmatpush1.bf16.msra.mxu0 %v18217_v12  ;;  %v1045_v12 = vld [vmem:[#allocation8 + $0x12c0] sm:$0xff] }
 0x55a   :  { %14402 = vmatpush1.bf16.msra.mxu1 %v18219_v17  ;;  %14239 = vmatprep.subr.bf16.mxu0 %v18250_v18  ;;  %v18380_v17 = vcombine.high %v998_v57, %v1014_v58  ;;  %v1030_v18 = vld [vmem:[#allocation8 + $0x1248] sm:$0xff]  ;;  %v18410_v26 = vcombine.high %v1029_v9, %v1045_v12  ;;  %v18409_v30 = vcombine.low %v1029_v9, %v1045_v12  ;;  %v1157_v58 = vld [vmem:[#allocation8 + $0x1640] sm:$0xff] }
 0x55b   :  { %14403 = vmatprep.subr.bf16.mxu1 %v18252_v21  ;;  %v1046_v21 = vld [vmem:[#allocation8 + $0x12c8] sm:$0xff] }
 0x55c   :  { %v18412_v46 = vcombine.high %v1030_v18, %v1046_v21  ;;  %v18411_v31 = vcombine.low %v1030_v18, %v1046_v21  ;;  %v1174_v9 = vld [vmem:[#allocation8 + $0x16c8] sm:$0xff] }
 0x55d   :  { %14240 = vmatpush1.bf16.msra.mxu0 %v18249_v27  ;;  %v1061_v27 = vld [vmem:[#allocation8 + $0x1340] sm:$0xff] }
 0x55e   :  { %14404 = vmatpush1.bf16.msra.mxu1 %v18251_v15  ;;  %14241 = vmatprep.subr.bf16.mxu0 %v18282_v28  ;;  %v1077_v15 = vld [vmem:[#allocation8 + $0x13c0] sm:$0xff]  ;;  %v1062_v28 = vld [vmem:[#allocation8 + $0x1348] sm:$0xff] }
 0x55f   :  { %14405 = vmatprep.subr.bf16.mxu1 %v18284_v29  ;;  %v1078_v29 = vld [vmem:[#allocation8 + $0x13c8] sm:$0xff]  ;;  %v18442_v32 = vcombine.high %v1061_v27, %v1077_v15  ;;  %v18441_v39 = vcombine.low %v1061_v27, %v1077_v15 }
 0x560   :  { %v18444_v33 = vcombine.high %v1062_v28, %v1078_v29  ;;  %v18443_v55 = vcombine.low %v1062_v28, %v1078_v29 }
 0x561   :  { %14242 = vmatpush1.bf16.msra.mxu0 %v18281_v35  ;;  %v1093_v35 = vld [vmem:[#allocation8 + $0x1440] sm:$0xff] }
 0x562   :  { %14406 = vmatpush1.bf16.msra.mxu1 %v18283_v63  ;;  %14243 = vmatprep.subr.bf16.mxu0 %v18314_v37  ;;  %v1109_v63 = vld [vmem:[#allocation8 + $0x14c0] sm:$0xff]  ;;  %v1094_v37 = vld [vmem:[#allocation8 + $0x1448] sm:$0xff] }
 0x563   :  { %14407 = vmatprep.subr.bf16.mxu1 %v18316_v38  ;;  %v1110_v38 = vld [vmem:[#allocation8 + $0x14c8] sm:$0xff]  ;;  %v18474_v40 = vcombine.high %v1093_v35, %v1109_v63  ;;  %v18473_v53 = vcombine.low %v1093_v35, %v1109_v63 }
 0x564   :  { %v18476_v42 = vcombine.high %v1094_v37, %v1110_v38  ;;  %v18475_v44 = vcombine.low %v1094_v37, %v1110_v38 }
 0x565   :  { %14244 = vmatpush1.bf16.msra.mxu0 %v18313_v43  ;;  %v1125_v43 = vld [vmem:[#allocation8 + $0x1540] sm:$0xff] }
 0x566   :  { %14408 = vmatpush1.bf16.msra.mxu1 %v18315_v50  ;;  %14254 = vmatprep.subr.bf16.mxu0 %v18346_v52  ;;  %v1141_v50 = vld [vmem:[#allocation8 + $0x15c0] sm:$0xff]  ;;  %v1126_v52 = vld [vmem:[#allocation8 + $0x1548] sm:$0xff] }
 0x567   :  { %14418 = vmatprep.subr.bf16.mxu1 %v18348_v16  ;;  %v1142_v16 = vld [vmem:[#allocation8 + $0x15c8] sm:$0xff]  ;;  %v18505_v12 = vcombine.low %v1125_v43, %v1141_v50 }
 0x568   :  { %14246 = vmatmul.mubr.bf16.vlgmr.msra.gmra.mrb[24].mxu0 %v22896_v7  ;;  %v18508_v57 = vcombine.high %v1126_v52, %v1142_v16 }
 0x569   :  { %14410 = vmatmul.mubr.bf16.vlgmr.msra.gmra.mrb[24].mxu1 %v22896_v7  ;;  %14255 = vmatpush1.bf16.msra.mxu0 %v18345_v54  ;;  %v18506_v54 = vcombine.high %v1125_v43, %v1141_v50 }
 0x56a   :  { %14286 = vmatprep.mubr.bf16.mxu0 %v22900_v14  ;;  %14419 = vmatpush1.bf16.msra.mxu1 %v18347_v62  ;;  %v1173_v62 = vld [vmem:[#allocation8 + $0x16c0] sm:$0xff] }
 0x56b   :  { %14450 = vmatprep.mubr.bf16.mxu1 %v22900_v14  ;;  %14256 = vmatprep.subr.bf16.mxu0 %v18378_v4  ;;  %v1158_v4 = vld [vmem:[#allocation8 + $0x1648] sm:$0xff]  ;;  %v18538_v18 = vcombine.high %v1157_v58, %v1173_v62  ;;  %v18537_v27 = vcombine.low %v1157_v58, %v1173_v62 }
 0x56c   :  { %14420 = vmatprep.subr.bf16.mxu1 %v18380_v17  ;;  %v18507_v17 = vcombine.low %v1126_v52, %v1142_v16  ;;  %v18540_v21 = vcombine.high %v1158_v4, %v1174_v9  ;;  %v18539_v15 = vcombine.low %v1158_v4, %v1174_v9 }
 0x56d   :  { %14257 = vmatpush1.bf16.msra.mxu0 %v18377_v59  ;;  %v1189_v59 = vld [vmem:[#allocation8 + $0x1740] sm:$0xff] }
 0x56e   :  { %14421 = vmatpush1.bf16.msra.mxu1 %v18379_v22  ;;  %14258 = vmatprep.subr.bf16.mxu0 %v18410_v26  ;;  %v1205_v22 = vld [vmem:[#allocation8 + $0x17c0] sm:$0xff]  ;;  %v1190_v26 = vld [vmem:[#allocation8 + $0x1748] sm:$0xff] }
 0x56f   :  { %14422 = vmatprep.subr.bf16.mxu1 %v18412_v46  ;;  %v1206_v46 = vld [vmem:[#allocation8 + $0x17c8] sm:$0xff]  ;;  %v18570_v28 = vcombine.high %v1189_v59, %v1205_v22  ;;  %v18569_v35 = vcombine.low %v1189_v59, %v1205_v22 }
 0x570   :  { %v18572_v29 = vcombine.high %v1190_v26, %v1206_v46  ;;  %v18571_v63 = vcombine.low %v1190_v26, %v1206_v46 }
 0x571   :  { %14259 = vmatpush1.bf16.msra.mxu0 %v18409_v30  ;;  %v1221_v30 = vld [vmem:[#allocation8 + $0x1840] sm:$0xff] }
 0x572   :  { %14423 = vmatpush1.bf16.msra.mxu1 %v18411_v31  ;;  %14260 = vmatprep.subr.bf16.mxu0 %v18442_v32  ;;  %v1237_v31 = vld [vmem:[#allocation8 + $0x18c0] sm:$0xff]  ;;  %v1222_v32 = vld [vmem:[#allocation8 + $0x1848] sm:$0xff] }
 0x573   :  { %14424 = vmatprep.subr.bf16.mxu1 %v18444_v33  ;;  %v1238_v33 = vld [vmem:[#allocation8 + $0x18c8] sm:$0xff]  ;;  %v18602_v37 = vcombine.high %v1221_v30, %v1237_v31  ;;  %v18601_v43 = vcombine.low %v1221_v30, %v1237_v31 }
 0x574   :  { %v18604_v38 = vcombine.high %v1222_v32, %v1238_v33  ;;  %v18603_v50 = vcombine.low %v1222_v32, %v1238_v33 }
 0x575   :  { %14261 = vmatpush1.bf16.msra.mxu0 %v18441_v39  ;;  %v1253_v39 = vld [vmem:[#allocation8 + $0x1940] sm:$0xff] }
 0x576   :  { %14425 = vmatpush1.bf16.msra.mxu1 %v18443_v55  ;;  %14262 = vmatprep.subr.bf16.mxu0 %v18474_v40  ;;  %v1269_v55 = vld [vmem:[#allocation8 + $0x19c0] sm:$0xff]  ;;  %v1254_v40 = vld [vmem:[#allocation8 + $0x1948] sm:$0xff] }
 0x577   :  { %14426 = vmatprep.subr.bf16.mxu1 %v18476_v42  ;;  %v1270_v42 = vld [vmem:[#allocation8 + $0x19c8] sm:$0xff]  ;;  %v18634_v52 = vcombine.high %v1253_v39, %v1269_v55  ;;  %v18633_v58 = vcombine.low %v1253_v39, %v1269_v55 }
 0x578   :  { %v18636_v16 = vcombine.high %v1254_v40, %v1270_v42  ;;  %v18635_v62 = vcombine.low %v1254_v40, %v1270_v42 }
 0x579   :  { %14263 = vmatpush1.bf16.msra.mxu0 %v18473_v53  ;;  %v1285_v53 = vld [vmem:[#allocation8 + $0x1a40] sm:$0xff] }
 0x57a   :  { %14427 = vmatpush1.bf16.msra.mxu1 %v18475_v44  ;;  %14264 = vmatprep.subr.bf16.mxu0 %v18506_v54  ;;  %v1301_v44 = vld [vmem:[#allocation8 + $0x1ac0] sm:$0xff]  ;;  %v1286_v54 = vld [vmem:[#allocation8 + $0x1a48] sm:$0xff] }
 0x57b   :  { %14428 = vmatprep.subr.bf16.mxu1 %v18508_v57  ;;  %v1302_v57 = vld [vmem:[#allocation8 + $0x1ac8] sm:$0xff]  ;;  %v18666_v4 = vcombine.high %v1285_v53, %v1301_v44  ;;  %v18665_v59 = vcombine.low %v1285_v53, %v1301_v44 }
 0x57c   :  { %v18668_v9 = vcombine.high %v1286_v54, %v1302_v57  ;;  %v18667_v22 = vcombine.low %v1286_v54, %v1302_v57 }
 0x57d   :  { %14265 = vmatpush1.bf16.msra.mxu0 %v18505_v12  ;;  %v1317_v12 = vld [vmem:[#allocation8 + $0x1b40] sm:$0xff] }
 0x57e   :  { %14429 = vmatpush1.bf16.msra.mxu1 %v18507_v17  ;;  %14266 = vmatprep.subr.bf16.mxu0 %v18538_v18  ;;  %v1333_v17 = vld [vmem:[#allocation8 + $0x1bc0] sm:$0xff]  ;;  %v1318_v18 = vld [vmem:[#allocation8 + $0x1b48] sm:$0xff] }
 0x57f   :  { %14430 = vmatprep.subr.bf16.mxu1 %v18540_v21  ;;  %v1334_v21 = vld [vmem:[#allocation8 + $0x1bc8] sm:$0xff]  ;;  %v18698_v26 = vcombine.high %v1317_v12, %v1333_v17  ;;  %v18697_v30 = vcombine.low %v1317_v12, %v1333_v17 }
 0x580   :  { %v18700_v46 = vcombine.high %v1318_v18, %v1334_v21  ;;  %v18699_v31 = vcombine.low %v1318_v18, %v1334_v21 }
 0x581   :  { %14267 = vmatpush1.bf16.msra.mxu0 %v18537_v27  ;;  %v1349_v27 = vld [vmem:[#allocation8 + $0x1c40] sm:$0xff] }
 0x582   :  { %14431 = vmatpush1.bf16.msra.mxu1 %v18539_v15  ;;  %14268 = vmatprep.subr.bf16.mxu0 %v18570_v28  ;;  %v1365_v15 = vld [vmem:[#allocation8 + $0x1cc0] sm:$0xff]  ;;  %v1350_v28 = vld [vmem:[#allocation8 + $0x1c48] sm:$0xff] }
 0x583   :  { %14432 = vmatprep.subr.bf16.mxu1 %v18572_v29  ;;  %v1366_v29 = vld [vmem:[#allocation8 + $0x1cc8] sm:$0xff]  ;;  %v18730_v32 = vcombine.high %v1349_v27, %v1365_v15  ;;  %v18729_v39 = vcombine.low %v1349_v27, %v1365_v15 }
 0x584   :  { %v18732_v33 = vcombine.high %v1350_v28, %v1366_v29  ;;  %v18731_v55 = vcombine.low %v1350_v28, %v1366_v29 }
 0x585   :  { %14269 = vmatpush1.bf16.msra.mxu0 %v18569_v35  ;;  %v1381_v35 = vld [vmem:[#allocation8 + $0x1d40] sm:$0xff] }
 0x586   :  { %14433 = vmatpush1.bf16.msra.mxu1 %v18571_v63  ;;  %14270 = vmatprep.subr.bf16.mxu0 %v18602_v37  ;;  %v1397_v63 = vld [vmem:[#allocation8 + $0x1dc0] sm:$0xff]  ;;  %v1382_v37 = vld [vmem:[#allocation8 + $0x1d48] sm:$0xff] }
 0x587   :  { %14434 = vmatprep.subr.bf16.mxu1 %v18604_v38  ;;  %v1398_v38 = vld [vmem:[#allocation8 + $0x1dc8] sm:$0xff]  ;;  %v18762_v40 = vcombine.high %v1381_v35, %v1397_v63  ;;  %v18761_v53 = vcombine.low %v1381_v35, %v1397_v63 }
 0x588   :  { %v18764_v42 = vcombine.high %v1382_v37, %v1398_v38  ;;  %v18763_v44 = vcombine.low %v1382_v37, %v1398_v38  ;;  %v1526_v35 = vld [vmem:[#allocation8 + $0x21c8] sm:$0xff]  ;;  %v1541_v38 = vld [vmem:[#allocation8 + $0x2240] sm:$0xff] }
 0x589   :  { %14271 = vmatpush1.bf16.msra.mxu0 %v18601_v43  ;;  %v1413_v43 = vld [vmem:[#allocation8 + $0x1e40] sm:$0xff] }
 0x58a   :  { %14435 = vmatpush1.bf16.msra.mxu1 %v18603_v50  ;;  %14272 = vmatprep.subr.bf16.mxu0 %v18634_v52  ;;  %v1429_v50 = vld [vmem:[#allocation8 + $0x1ec0] sm:$0xff]  ;;  %v1414_v52 = vld [vmem:[#allocation8 + $0x1e48] sm:$0xff] }
 0x58b   :  { %14436 = vmatprep.subr.bf16.mxu1 %v18636_v16  ;;  %v1430_v16 = vld [vmem:[#allocation8 + $0x1ec8] sm:$0xff]  ;;  %v18794_v54 = vcombine.high %v1413_v43, %v1429_v50  ;;  %v18793_v12 = vcombine.low %v1413_v43, %v1429_v50 }
 0x58c   :  { %v18796_v57 = vcombine.high %v1414_v52, %v1430_v16  ;;  %v18795_v17 = vcombine.low %v1414_v52, %v1430_v16 }
 0x58d   :  { %14273 = vmatpush1.bf16.msra.mxu0 %v18633_v58  ;;  %v1445_v58 = vld [vmem:[#allocation8 + $0x1f40] sm:$0xff] }
 0x58e   :  { %14437 = vmatpush1.bf16.msra.mxu1 %v18635_v62  ;;  %14274 = vmatprep.subr.bf16.mxu0 %v18666_v4  ;;  %v1461_v62 = vld [vmem:[#allocation8 + $0x1fc0] sm:$0xff]  ;;  %v1446_v4 = vld [vmem:[#allocation8 + $0x1f48] sm:$0xff] }
 0x58f   :  { %14438 = vmatprep.subr.bf16.mxu1 %v18668_v9  ;;  %v1462_v9 = vld [vmem:[#allocation8 + $0x1fc8] sm:$0xff]  ;;  %v18826_v18 = vcombine.high %v1445_v58, %v1461_v62  ;;  %v18825_v27 = vcombine.low %v1445_v58, %v1461_v62 }
 0x590   :  { %v18828_v21 = vcombine.high %v1446_v4, %v1462_v9  ;;  %v18827_v15 = vcombine.low %v1446_v4, %v1462_v9 }
 0x591   :  { %14275 = vmatpush1.bf16.msra.mxu0 %v18665_v59  ;;  %v1477_v59 = vld [vmem:[#allocation8 + $0x2040] sm:$0xff] }
 0x592   :  { %14439 = vmatpush1.bf16.msra.mxu1 %v18667_v22  ;;  %14276 = vmatprep.subr.bf16.mxu0 %v18698_v26  ;;  %v1493_v22 = vld [vmem:[#allocation8 + $0x20c0] sm:$0xff]  ;;  %v1478_v26 = vld [vmem:[#allocation8 + $0x2048] sm:$0xff] }
 0x593   :  { %14440 = vmatprep.subr.bf16.mxu1 %v18700_v46  ;;  %v1494_v46 = vld [vmem:[#allocation8 + $0x20c8] sm:$0xff]  ;;  %v18858_v28 = vcombine.high %v1477_v59, %v1493_v22 }
 0x594   :  { %v18860_v29 = vcombine.high %v1478_v26, %v1494_v46  ;;  %v18859_v63 = vcombine.low %v1478_v26, %v1494_v46 }
 0x595   :  { %14277 = vmatpush1.bf16.msra.mxu0 %v18697_v30  ;;  %v1509_v30 = vld [vmem:[#allocation8 + $0x2140] sm:$0xff] }
 0x596   :  { %14441 = vmatpush1.bf16.msra.mxu1 %v18699_v31  ;;  %14278 = vmatprep.subr.bf16.mxu0 %v18730_v32  ;;  %v1525_v31 = vld [vmem:[#allocation8 + $0x21c0] sm:$0xff]  ;;  %v18857_v32 = vcombine.low %v1477_v59, %v1493_v22 }
 0x597   :  { %14442 = vmatprep.subr.bf16.mxu1 %v18732_v33  ;;  %v1510_v33 = vld [vmem:[#allocation8 + $0x2148] sm:$0xff]  ;;  %v18890_v37 = vcombine.high %v1509_v30, %v1525_v31  ;;  %v18889_v43 = vcombine.low %v1509_v30, %v1525_v31 }
 0x598   :  { %v18891_v50 = vcombine.low %v1510_v33, %v1526_v35 }
 0x599   :  { %14279 = vmatpush1.bf16.msra.mxu0 %v18729_v39  ;;  %v1557_v39 = vld [vmem:[#allocation8 + $0x22c0] sm:$0xff] }
 0x59a   :  { %14443 = vmatpush1.bf16.msra.mxu1 %v18731_v55  ;;  %14280 = vmatprep.subr.bf16.mxu0 %v18762_v40  ;;  %v18892_v55 = vcombine.high %v1510_v33, %v1526_v35  ;;  %v1542_v40 = vld [vmem:[#allocation8 + $0x2248] sm:$0xff]  ;;  %v18922_v52 = vcombine.high %v1541_v38, %v1557_v39  ;;  %v18921_v58 = vcombine.low %v1541_v38, %v1557_v39  ;;  %v1669_v35 = vld [vmem:[#allocation8 + $0x2640] sm:$0xff] }
 0x59b   :  { %14444 = vmatprep.subr.bf16.mxu1 %v18764_v42  ;;  %v1558_v42 = vld [vmem:[#allocation8 + $0x22c8] sm:$0xff] }
 0x59c   :  { %v18924_v16 = vcombine.high %v1542_v40, %v1558_v42  ;;  %v18923_v62 = vcombine.low %v1542_v40, %v1558_v42  ;;  %v1686_v38 = vld [vmem:[#allocation8 + $0x26c8] sm:$0xff] }
 0x59d   :  { %14281 = vmatpush1.bf16.msra.mxu0 %v18761_v53  ;;  %v1573_v53 = vld [vmem:[#allocation8 + $0x2340] sm:$0xff] }
 0x59e   :  { %14445 = vmatpush1.bf16.msra.mxu1 %v18763_v44  ;;  %14282 = vmatprep.subr.bf16.mxu0 %v18794_v54  ;;  %v1589_v44 = vld [vmem:[#allocation8 + $0x23c0] sm:$0xff]  ;;  %v1574_v54 = vld [vmem:[#allocation8 + $0x2348] sm:$0xff] }
 0x59f   :  { %14446 = vmatprep.subr.bf16.mxu1 %v18796_v57  ;;  %v1590_v57 = vld [vmem:[#allocation8 + $0x23c8] sm:$0xff]  ;;  %v18954_v4 = vcombine.high %v1573_v53, %v1589_v44  ;;  %v18953_v59 = vcombine.low %v1573_v53, %v1589_v44 }
 0x5a0   :  { %v18956_v9 = vcombine.high %v1574_v54, %v1590_v57  ;;  %v18955_v22 = vcombine.low %v1574_v54, %v1590_v57 }
 0x5a1   :  { %14283 = vmatpush1.bf16.msra.mxu0 %v18793_v12  ;;  %v1605_v12 = vld [vmem:[#allocation8 + $0x2440] sm:$0xff] }
 0x5a2   :  { %14447 = vmatpush1.bf16.msra.mxu1 %v18795_v17  ;;  %14284 = vmatprep.subr.bf16.mxu0 %v18826_v18  ;;  %v1621_v17 = vld [vmem:[#allocation8 + $0x24c0] sm:$0xff]  ;;  %v1606_v18 = vld [vmem:[#allocation8 + $0x2448] sm:$0xff] }
 0x5a3   :  { %14448 = vmatprep.subr.bf16.mxu1 %v18828_v21  ;;  %v1622_v21 = vld [vmem:[#allocation8 + $0x24c8] sm:$0xff]  ;;  %v18986_v26 = vcombine.high %v1605_v12, %v1621_v17  ;;  %v18985_v30 = vcombine.low %v1605_v12, %v1621_v17 }
 0x5a4   :  { %v18988_v46 = vcombine.high %v1606_v18, %v1622_v21  ;;  %v18987_v31 = vcombine.low %v1606_v18, %v1622_v21 }
 0x5a5   :  { %14285 = vmatpush1.bf16.msra.mxu0 %v18825_v27  ;;  %v1637_v27 = vld [vmem:[#allocation8 + $0x2540] sm:$0xff] }
 0x5a6   :  { %14449 = vmatpush1.bf16.msra.mxu1 %v18827_v15  ;;  %14295 = vmatprep.subr.bf16.mxu0 %v18858_v28  ;;  %v1653_v15 = vld [vmem:[#allocation8 + $0x25c0] sm:$0xff]  ;;  %v1638_v28 = vld [vmem:[#allocation8 + $0x2548] sm:$0xff] }
 0x5a7   :  { %14459 = vmatprep.subr.bf16.mxu1 %v18860_v29  ;;  %v1654_v29 = vld [vmem:[#allocation8 + $0x25c8] sm:$0xff]  ;;  %v19017_v39 = vcombine.low %v1637_v27, %v1653_v15 }
 0x5a8   :  { %14287 = vmatmul.mubr.bf16.vlgmr.msra.gmra.mrb[24].mxu0 %v22926_v51  ;;  %v19020_v33 = vcombine.high %v1638_v28, %v1654_v29 }
 0x5a9   :  { %14451 = vmatmul.mubr.bf16.vlgmr.msra.gmra.mrb[24].mxu1 %v22926_v51  ;;  %14296 = vmatpush1.bf16.msra.mxu0 %v18857_v32  ;;  %v19018_v32 = vcombine.high %v1637_v27, %v1653_v15 }
 0x5aa   :  { %14327 = vmatprep.mubr.bf16.mxu0 %v22928_v61  ;;  %14460 = vmatpush1.bf16.msra.mxu1 %v18859_v63  ;;  %v1685_v63 = vld [vmem:[#allocation8 + $0x26c0] sm:$0xff] }
 0x5ab   :  { %14491 = vmatprep.mubr.bf16.mxu1 %v22928_v61  ;;  %14297 = vmatprep.subr.bf16.mxu0 %v18890_v37  ;;  %v1670_v37 = vld [vmem:[#allocation8 + $0x2648] sm:$0xff]  ;;  %v19050_v40 = vcombine.high %v1669_v35, %v1685_v63  ;;  %v19049_v53 = vcombine.low %v1669_v35, %v1685_v63 }
 0x5ac   :  { %14461 = vmatprep.subr.bf16.mxu1 %v18892_v55  ;;  %v19019_v55 = vcombine.low %v1638_v28, %v1654_v29  ;;  %v19052_v42 = vcombine.high %v1670_v37, %v1686_v38  ;;  %v19051_v44 = vcombine.low %v1670_v37, %v1686_v38 }
 0x5ad   :  { %14298 = vmatpush1.bf16.msra.mxu0 %v18889_v43  ;;  %v1701_v43 = vld [vmem:[#allocation8 + $0x2740] sm:$0xff] }
 0x5ae   :  { %14462 = vmatpush1.bf16.msra.mxu1 %v18891_v50  ;;  %14299 = vmatprep.subr.bf16.mxu0 %v18922_v52  ;;  %v1717_v50 = vld [vmem:[#allocation8 + $0x27c0] sm:$0xff]  ;;  %v1702_v52 = vld [vmem:[#allocation8 + $0x2748] sm:$0xff] }
 0x5af   :  { %14463 = vmatprep.subr.bf16.mxu1 %v18924_v16  ;;  %v1718_v16 = vld [vmem:[#allocation8 + $0x27c8] sm:$0xff]  ;;  %v19082_v54 = vcombine.high %v1701_v43, %v1717_v50  ;;  %v19081_v12 = vcombine.low %v1701_v43, %v1717_v50 }
 0x5b0   :  { %v19084_v57 = vcombine.high %v1702_v52, %v1718_v16  ;;  %v19083_v17 = vcombine.low %v1702_v52, %v1718_v16 }
 0x5b1   :  { %14300 = vmatpush1.bf16.msra.mxu0 %v18921_v58  ;;  %v1733_v58 = vld [vmem:[#allocation8 + $0x2840] sm:$0xff] }
 0x5b2   :  { %14464 = vmatpush1.bf16.msra.mxu1 %v18923_v62  ;;  %14301 = vmatprep.subr.bf16.mxu0 %v18954_v4  ;;  %v1749_v62 = vld [vmem:[#allocation8 + $0x28c0] sm:$0xff]  ;;  %v1734_v4 = vld [vmem:[#allocation8 + $0x2848] sm:$0xff] }
 0x5b3   :  { %14465 = vmatprep.subr.bf16.mxu1 %v18956_v9  ;;  %v1750_v9 = vld [vmem:[#allocation8 + $0x28c8] sm:$0xff]  ;;  %v19114_v18 = vcombine.high %v1733_v58, %v1749_v62  ;;  %v19113_v27 = vcombine.low %v1733_v58, %v1749_v62 }
 0x5b4   :  { %v19116_v21 = vcombine.high %v1734_v4, %v1750_v9  ;;  %v19115_v15 = vcombine.low %v1734_v4, %v1750_v9 }
 0x5b5   :  { %14302 = vmatpush1.bf16.msra.mxu0 %v18953_v59  ;;  %v1765_v59 = vld [vmem:[#allocation8 + $0x2940] sm:$0xff] }
 0x5b6   :  { %14466 = vmatpush1.bf16.msra.mxu1 %v18955_v22  ;;  %14303 = vmatprep.subr.bf16.mxu0 %v18986_v26  ;;  %v1781_v22 = vld [vmem:[#allocation8 + $0x29c0] sm:$0xff]  ;;  %v1766_v26 = vld [vmem:[#allocation8 + $0x2948] sm:$0xff] }
 0x5b7   :  { %14467 = vmatprep.subr.bf16.mxu1 %v18988_v46  ;;  %v1782_v46 = vld [vmem:[#allocation8 + $0x29c8] sm:$0xff]  ;;  %v19146_v28 = vcombine.high %v1765_v59, %v1781_v22  ;;  %v19145_v35 = vcombine.low %v1765_v59, %v1781_v22 }
 0x5b8   :  { %v19148_v29 = vcombine.high %v1766_v26, %v1782_v46  ;;  %v19147_v63 = vcombine.low %v1766_v26, %v1782_v46 }
 0x5b9   :  { %14304 = vmatpush1.bf16.msra.mxu0 %v18985_v30  ;;  %v1797_v30 = vld [vmem:[#allocation8 + $0x2a40] sm:$0xff] }
 0x5ba   :  { %14468 = vmatpush1.bf16.msra.mxu1 %v18987_v31  ;;  %14305 = vmatprep.subr.bf16.mxu0 %v19018_v32  ;;  %v1813_v31 = vld [vmem:[#allocation8 + $0x2ac0] sm:$0xff]  ;;  %v1798_v32 = vld [vmem:[#allocation8 + $0x2a48] sm:$0xff] }
 0x5bb   :  { %14469 = vmatprep.subr.bf16.mxu1 %v19020_v33  ;;  %v1814_v33 = vld [vmem:[#allocation8 + $0x2ac8] sm:$0xff]  ;;  %v19178_v37 = vcombine.high %v1797_v30, %v1813_v31  ;;  %v19177_v43 = vcombine.low %v1797_v30, %v1813_v31 }
 0x5bc   :  { %v19180_v38 = vcombine.high %v1798_v32, %v1814_v33  ;;  %v19179_v50 = vcombine.low %v1798_v32, %v1814_v33 }
 0x5bd   :  { %14306 = vmatpush1.bf16.msra.mxu0 %v19017_v39  ;;  %v1829_v39 = vld [vmem:[#allocation8 + $0x2b40] sm:$0xff] }
 0x5be   :  { %14470 = vmatpush1.bf16.msra.mxu1 %v19019_v55  ;;  %14307 = vmatprep.subr.bf16.mxu0 %v19050_v40  ;;  %v1845_v55 = vld [vmem:[#allocation8 + $0x2bc0] sm:$0xff]  ;;  %v1830_v40 = vld [vmem:[#allocation8 + $0x2b48] sm:$0xff] }
 0x5bf   :  { %14471 = vmatprep.subr.bf16.mxu1 %v19052_v42  ;;  %v1846_v42 = vld [vmem:[#allocation8 + $0x2bc8] sm:$0xff]  ;;  %v19210_v52 = vcombine.high %v1829_v39, %v1845_v55  ;;  %v19209_v58 = vcombine.low %v1829_v39, %v1845_v55 }
 0x5c0   :  { %v19212_v16 = vcombine.high %v1830_v40, %v1846_v42  ;;  %v19211_v62 = vcombine.low %v1830_v40, %v1846_v42 }
 0x5c1   :  { %14308 = vmatpush1.bf16.msra.mxu0 %v19049_v53  ;;  %v1861_v53 = vld [vmem:[#allocation8 + $0x2c40] sm:$0xff] }
 0x5c2   :  { %14472 = vmatpush1.bf16.msra.mxu1 %v19051_v44  ;;  %14309 = vmatprep.subr.bf16.mxu0 %v19082_v54  ;;  %v1877_v44 = vld [vmem:[#allocation8 + $0x2cc0] sm:$0xff]  ;;  %v1862_v54 = vld [vmem:[#allocation8 + $0x2c48] sm:$0xff] }
 0x5c3   :  { %14473 = vmatprep.subr.bf16.mxu1 %v19084_v57  ;;  %v1878_v57 = vld [vmem:[#allocation8 + $0x2cc8] sm:$0xff]  ;;  %v19242_v4 = vcombine.high %v1861_v53, %v1877_v44  ;;  %v19241_v59 = vcombine.low %v1861_v53, %v1877_v44 }
 0x5c4   :  { %v19244_v9 = vcombine.high %v1862_v54, %v1878_v57  ;;  %v19243_v22 = vcombine.low %v1862_v54, %v1878_v57 }
 0x5c5   :  { %14310 = vmatpush1.bf16.msra.mxu0 %v19081_v12  ;;  %v1893_v12 = vld [vmem:[#allocation8 + $0x2d40] sm:$0xff] }
 0x5c6   :  { %14474 = vmatpush1.bf16.msra.mxu1 %v19083_v17  ;;  %14311 = vmatprep.subr.bf16.mxu0 %v19114_v18  ;;  %v1909_v17 = vld [vmem:[#allocation8 + $0x2dc0] sm:$0xff]  ;;  %v1894_v18 = vld [vmem:[#allocation8 + $0x2d48] sm:$0xff] }
 0x5c7   :  { %14475 = vmatprep.subr.bf16.mxu1 %v19116_v21  ;;  %v1910_v21 = vld [vmem:[#allocation8 + $0x2dc8] sm:$0xff]  ;;  %v19274_v26 = vcombine.high %v1893_v12, %v1909_v17  ;;  %v19273_v30 = vcombine.low %v1893_v12, %v1909_v17 }
 0x5c8   :  { %v19276_v46 = vcombine.high %v1894_v18, %v1910_v21  ;;  %v19275_v31 = vcombine.low %v1894_v18, %v1910_v21  ;;  %v2038_v12 = vld [vmem:[#allocation8 + $0x31c8] sm:$0xff]  ;;  %v2053_v21 = vld [vmem:[#allocation8 + $0x3240] sm:$0xff] }
 0x5c9   :  { %14312 = vmatpush1.bf16.msra.mxu0 %v19113_v27  ;;  %v1925_v27 = vld [vmem:[#allocation8 + $0x2e40] sm:$0xff] }
 0x5ca   :  { %14476 = vmatpush1.bf16.msra.mxu1 %v19115_v15  ;;  %14313 = vmatprep.subr.bf16.mxu0 %v19146_v28  ;;  %v1941_v15 = vld [vmem:[#allocation8 + $0x2ec0] sm:$0xff]  ;;  %v1926_v28 = vld [vmem:[#allocation8 + $0x2e48] sm:$0xff] }
 0x5cb   :  { %14477 = vmatprep.subr.bf16.mxu1 %v19148_v29  ;;  %v1942_v29 = vld [vmem:[#allocation8 + $0x2ec8] sm:$0xff]  ;;  %v19306_v32 = vcombine.high %v1925_v27, %v1941_v15  ;;  %v19305_v39 = vcombine.low %v1925_v27, %v1941_v15 }
 0x5cc   :  { %v19308_v33 = vcombine.high %v1926_v28, %v1942_v29  ;;  %v19307_v55 = vcombine.low %v1926_v28, %v1942_v29 }
 0x5cd   :  { %14314 = vmatpush1.bf16.msra.mxu0 %v19145_v35  ;;  %v1957_v35 = vld [vmem:[#allocation8 + $0x2f40] sm:$0xff] }
 0x5ce   :  { %14478 = vmatpush1.bf16.msra.mxu1 %v19147_v63  ;;  %14315 = vmatprep.subr.bf16.mxu0 %v19178_v37  ;;  %v1973_v63 = vld [vmem:[#allocation8 + $0x2fc0] sm:$0xff]  ;;  %v1958_v37 = vld [vmem:[#allocation8 + $0x2f48] sm:$0xff] }
 0x5cf   :  { %14479 = vmatprep.subr.bf16.mxu1 %v19180_v38  ;;  %v1974_v38 = vld [vmem:[#allocation8 + $0x2fc8] sm:$0xff]  ;;  %v19338_v40 = vcombine.high %v1957_v35, %v1973_v63  ;;  %v19337_v53 = vcombine.low %v1957_v35, %v1973_v63 }
 0x5d0   :  { %v19340_v42 = vcombine.high %v1958_v37, %v1974_v38  ;;  %v19339_v44 = vcombine.low %v1958_v37, %v1974_v38 }
 0x5d1   :  { %14316 = vmatpush1.bf16.msra.mxu0 %v19177_v43  ;;  %v1989_v43 = vld [vmem:[#allocation8 + $0x3040] sm:$0xff] }
 0x5d2   :  { %14480 = vmatpush1.bf16.msra.mxu1 %v19179_v50  ;;  %14317 = vmatprep.subr.bf16.mxu0 %v19210_v52  ;;  %v2005_v50 = vld [vmem:[#allocation8 + $0x30c0] sm:$0xff]  ;;  %v1990_v52 = vld [vmem:[#allocation8 + $0x3048] sm:$0xff] }
 0x5d3   :  { %14481 = vmatprep.subr.bf16.mxu1 %v19212_v16  ;;  %v2006_v16 = vld [vmem:[#allocation8 + $0x30c8] sm:$0xff]  ;;  %v19370_v54 = vcombine.high %v1989_v43, %v2005_v50 }
 0x5d4   :  { %v19372_v57 = vcombine.high %v1990_v52, %v2006_v16  ;;  %v19371_v17 = vcombine.low %v1990_v52, %v2006_v16 }
 0x5d5   :  { %14318 = vmatpush1.bf16.msra.mxu0 %v19209_v58  ;;  %v2021_v58 = vld [vmem:[#allocation8 + $0x3140] sm:$0xff] }
 0x5d6   :  { %14482 = vmatpush1.bf16.msra.mxu1 %v19211_v62  ;;  %14319 = vmatprep.subr.bf16.mxu0 %v19242_v4  ;;  %v2037_v62 = vld [vmem:[#allocation8 + $0x31c0] sm:$0xff]  ;;  %v19369_v4 = vcombine.low %v1989_v43, %v2005_v50 }
 0x5d7   :  { %14483 = vmatprep.subr.bf16.mxu1 %v19244_v9  ;;  %v2022_v9 = vld [vmem:[#allocation8 + $0x3148] sm:$0xff]  ;;  %v19402_v18 = vcombine.high %v2021_v58, %v2037_v62  ;;  %v19401_v27 = vcombine.low %v2021_v58, %v2037_v62 }
 0x5d8   :  { %v19403_v15 = vcombine.low %v2022_v9, %v2038_v12 }
 0x5d9   :  { %14320 = vmatpush1.bf16.msra.mxu0 %v19241_v59  ;;  %v2069_v59 = vld [vmem:[#allocation8 + $0x32c0] sm:$0xff] }
 0x5da   :  { %14484 = vmatpush1.bf16.msra.mxu1 %v19243_v22  ;;  %14321 = vmatprep.subr.bf16.mxu0 %v19274_v26  ;;  %v19404_v22 = vcombine.high %v2022_v9, %v2038_v12  ;;  %v2054_v26 = vld [vmem:[#allocation8 + $0x3248] sm:$0xff]  ;;  %v19434_v28 = vcombine.high %v2053_v21, %v2069_v59  ;;  %v19433_v35 = vcombine.low %v2053_v21, %v2069_v59  ;;  %v2181_v12 = vld [vmem:[#allocation8 + $0x3640] sm:$0xff] }
 0x5db   :  { %14485 = vmatprep.subr.bf16.mxu1 %v19276_v46  ;;  %v2070_v46 = vld [vmem:[#allocation8 + $0x32c8] sm:$0xff] }
 0x5dc   :  { %v19436_v29 = vcombine.high %v2054_v26, %v2070_v46  ;;  %v19435_v63 = vcombine.low %v2054_v26, %v2070_v46  ;;  %v2198_v21 = vld [vmem:[#allocation8 + $0x36c8] sm:$0xff] }
 0x5dd   :  { %14322 = vmatpush1.bf16.msra.mxu0 %v19273_v30  ;;  %v2085_v30 = vld [vmem:[#allocation8 + $0x3340] sm:$0xff] }
 0x5de   :  { %14486 = vmatpush1.bf16.msra.mxu1 %v19275_v31  ;;  %14323 = vmatprep.subr.bf16.mxu0 %v19306_v32  ;;  %v2101_v31 = vld [vmem:[#allocation8 + $0x33c0] sm:$0xff]  ;;  %v2086_v32 = vld [vmem:[#allocation8 + $0x3348] sm:$0xff] }
 0x5df   :  { %14487 = vmatprep.subr.bf16.mxu1 %v19308_v33  ;;  %v2102_v33 = vld [vmem:[#allocation8 + $0x33c8] sm:$0xff]  ;;  %v19466_v37 = vcombine.high %v2085_v30, %v2101_v31  ;;  %v19465_v43 = vcombine.low %v2085_v30, %v2101_v31 }
 0x5e0   :  { %v19468_v38 = vcombine.high %v2086_v32, %v2102_v33  ;;  %v19467_v50 = vcombine.low %v2086_v32, %v2102_v33  ;;  %v2214_v31 = vld [vmem:[#allocation8 + $0x3748] sm:$0xff] }
 0x5e1   :  { %14324 = vmatpush1.bf16.msra.mxu0 %v19305_v39  ;;  %v2117_v39 = vld [vmem:[#allocation8 + $0x3440] sm:$0xff]  ;;  %v2230_v32 = vld [vmem:[#allocation8 + $0x37c8] sm:$0xff] }
 0x5e2   :  { %14488 = vmatpush1.bf16.msra.mxu1 %v19307_v55  ;;  %14325 = vmatprep.subr.bf16.mxu0 %v19338_v40  ;;  %v2133_v55 = vld [vmem:[#allocation8 + $0x34c0] sm:$0xff]  ;;  %v2118_v40 = vld [vmem:[#allocation8 + $0x3448] sm:$0xff] }
 0x5e3   :  { %14489 = vmatprep.subr.bf16.mxu1 %v19340_v42  ;;  %v2134_v42 = vld [vmem:[#allocation8 + $0x34c8] sm:$0xff]  ;;  %v19498_v52 = vcombine.high %v2117_v39, %v2133_v55  ;;  %v19497_v58 = vcombine.low %v2117_v39, %v2133_v55 }
 0x5e4   :  { %v19500_v16 = vcombine.high %v2118_v40, %v2134_v42  ;;  %v19499_v62 = vcombine.low %v2118_v40, %v2134_v42  ;;  %v19596_v42 = vcombine.high %v2214_v31, %v2230_v32 }
 0x5e5   :  { %14326 = vmatpush1.bf16.msra.mxu0 %v19337_v53  ;;  %v2149_v53 = vld [vmem:[#allocation8 + $0x3540] sm:$0xff] }
 0x5e6   :  { %14490 = vmatpush1.bf16.msra.mxu1 %v19339_v44  ;;  %14336 = vmatprep.subr.bf16.mxu0 %v19370_v54  ;;  %v2165_v44 = vld [vmem:[#allocation8 + $0x35c0] sm:$0xff]  ;;  %v2150_v54 = vld [vmem:[#allocation8 + $0x3548] sm:$0xff] }
 0x5e7   :  { %14500 = vmatprep.subr.bf16.mxu1 %v19372_v57  ;;  %v2166_v57 = vld [vmem:[#allocation8 + $0x35c8] sm:$0xff]  ;;  %v19529_v59 = vcombine.low %v2149_v53, %v2165_v44 }
 0x5e8   :  { %14328 = vmatmul.mubr.bf16.vlgmr.msra.gmra.mrb[24].mxu0 %v22946_v34  ;;  %v19532_v9 = vcombine.high %v2150_v54, %v2166_v57 }
 0x5e9   :  { %14492 = vmatmul.mubr.bf16.vlgmr.msra.gmra.mrb[24].mxu1 %v22946_v34  ;;  %14337 = vmatpush1.bf16.msra.mxu0 %v19369_v4  ;;  %v19530_v4 = vcombine.high %v2149_v53, %v2165_v44  ;;  %v19595_v44 = vcombine.low %v2214_v31, %v2230_v32 }
 0x5ea   :  { %14368 = vmatprep.mubr.bf16.mxu0 %v22948_v41  ;;  %14501 = vmatpush1.bf16.msra.mxu1 %v19371_v17  ;;  %v2197_v17 = vld [vmem:[#allocation8 + $0x36c0] sm:$0xff] }
 0x5eb   :  { %14532 = vmatprep.mubr.bf16.mxu1 %v22948_v41  ;;  %14338 = vmatprep.subr.bf16.mxu0 %v19402_v18  ;;  %v2182_v18 = vld [vmem:[#allocation8 + $0x3648] sm:$0xff]  ;;  %v19562_v26 = vcombine.high %v2181_v12, %v2197_v17 }
 0x5ec   :  { %14502 = vmatprep.subr.bf16.mxu1 %v19404_v22  ;;  %v19531_v22 = vcombine.low %v2150_v54, %v2166_v57  ;;  %v19563_v39 = vcombine.low %v2182_v18, %v2198_v21 }
 0x5ed   :  { %14339 = vmatpush1.bf16.msra.mxu0 %v19401_v27  ;;  %v19564_v27 = vcombine.high %v2182_v18, %v2198_v21 }
 0x5ee   :  { %14503 = vmatpush1.bf16.msra.mxu1 %v19403_v15  ;;  %14340 = vmatprep.subr.bf16.mxu0 %v19434_v28  ;;  %v2213_v15 = vld [vmem:[#allocation8 + $0x3740] sm:$0xff] }
 0x5ef   :  { %14504 = vmatprep.subr.bf16.mxu1 %v19436_v29  ;;  %v2229_v28 = vld [vmem:[#allocation8 + $0x37c0] sm:$0xff] }
 0x5f0   :  { %v19594_v55 = vcombine.high %v2213_v15, %v2229_v28  ;;  %v19593_v53 = vcombine.low %v2213_v15, %v2229_v28 }
 0x5f1   :  { %14341 = vmatpush1.bf16.msra.mxu0 %v19433_v35 }
 0x5f2   :  { %14505 = vmatpush1.bf16.msra.mxu1 %v19435_v63  ;;  %14342 = vmatprep.subr.bf16.mxu0 %v19466_v37  ;;  %v19561_v63 = vcombine.low %v2181_v12, %v2197_v17 }
 0x5f3   :  { %14506 = vmatprep.subr.bf16.mxu1 %v19468_v38 }
 0x5f5   :  { %14343 = vmatpush1.bf16.msra.mxu0 %v19465_v43  ;;  %v2245_v43 = vld [vmem:[#allocation8 + $0x3840] sm:$0xff] }
 0x5f6   :  { %14507 = vmatpush1.bf16.msra.mxu1 %v19467_v50  ;;  %14344 = vmatprep.subr.bf16.mxu0 %v19498_v52  ;;  %v2261_v50 = vld [vmem:[#allocation8 + $0x38c0] sm:$0xff]  ;;  %v2246_v52 = vld [vmem:[#allocation8 + $0x3848] sm:$0xff] }
 0x5f7   :  { %14508 = vmatprep.subr.bf16.mxu1 %v19500_v16  ;;  %v2262_v16 = vld [vmem:[#allocation8 + $0x38c8] sm:$0xff]  ;;  %v19626_v54 = vcombine.high %v2245_v43, %v2261_v50  ;;  %v19625_v12 = vcombine.low %v2245_v43, %v2261_v50  ;;  %v2373_v43 = vld [vmem:[#allocation8 + $0x3c40] sm:$0xff] }
 0x5f8   :  { %v19628_v57 = vcombine.high %v2246_v52, %v2262_v16  ;;  %v19627_v17 = vcombine.low %v2246_v52, %v2262_v16  ;;  %v2389_v50 = vld [vmem:[#allocation8 + $0x3cc0] sm:$0xff]  ;;  %v2374_v52 = vld [vmem:[#allocation8 + $0x3c48] sm:$0xff] }
 0x5f9   :  { %14345 = vmatpush1.bf16.msra.mxu0 %v19497_v58  ;;  %v2277_v58 = vld [vmem:[#allocation8 + $0x3940] sm:$0xff]  ;;  %v2390_v16 = vld [vmem:[#allocation8 + $0x3cc8] sm:$0xff] }
 0x5fa   :  { %14509 = vmatpush1.bf16.msra.mxu1 %v19499_v62  ;;  %14346 = vmatprep.subr.bf16.mxu0 %v19530_v4  ;;  %v2293_v62 = vld [vmem:[#allocation8 + $0x39c0] sm:$0xff]  ;;  %v2278_v4 = vld [vmem:[#allocation8 + $0x3948] sm:$0xff] }
 0x5fb   :  { %v23049_v46 = vpop.f32.mrb[20].mxu0  ;;  %14510 = vmatprep.subr.bf16.mxu1 %v19532_v9  ;;  %v2294_v9 = vld [vmem:[#allocation8 + $0x39c8] sm:$0xff]  ;;  %v19658_v18 = vcombine.high %v2277_v58, %v2293_v62  ;;  %v19657_v15 = vcombine.low %v2277_v58, %v2293_v62  ;;  %v2405_v58 = vld [vmem:[#allocation8 + $0x3d40] sm:$0xff] }
 0x5fc   :  { %v23051_v29 = vpop.f32.mrb[20].mxu1  ;;  %v23053_v30 = vpop.f32.mrb[21].mxu0  ;;  %v19660_v21 = vcombine.high %v2278_v4, %v2294_v9  ;;  %v19659_v28 = vcombine.low %v2278_v4, %v2294_v9  ;;  %v2421_v62 = vld [vmem:[#allocation8 + $0x3dc0] sm:$0xff]  ;;  %v2406_v4 = vld [vmem:[#allocation8 + $0x3d48] sm:$0xff] }
 0x5fd   :  { %v23055_v33 = vpop.f32.mrb[21].mxu1  ;;  %v14046_v35 = vpop.f32.mrb[22].mxu0  ;;  %14347 = vmatpush1.bf16.msra.mxu0 %v19529_v59  ;;  %v2309_v59 = vld [vmem:[#allocation8 + $0x3a40] sm:$0xff]  ;;  %v2422_v9 = vld [vmem:[#allocation8 + $0x3dc8] sm:$0xff] }
 0x5fe   :  { %v14210_v37 = vpop.f32.mrb[22].mxu1  ;;  %14511 = vmatpush1.bf16.msra.mxu1 %v19531_v22  ;;  %v14047_v38 = vpop.f32.mrb[23].mxu0  ;;  %14348 = vmatprep.subr.bf16.mxu0 %v19562_v26  ;;  %v2325_v22 = vld [vmem:[#allocation8 + $0x3ac0] sm:$0xff]  ;;  %v2310_v26 = vld [vmem:[#allocation8 + $0x3a48] sm:$0xff] }
 0x5ff   :  { %v14211_v40 = vpop.f32.mrb[23].mxu1  ;;  %14512 = vmatprep.subr.bf16.mxu1 %v19564_v27  ;;  %v2326_v27 = vld [vmem:[#allocation8 + $0x3ac8] sm:$0xff]  ;;  %v19690_v31 = vcombine.high %v2309_v59, %v2325_v22  ;;  %v2341_v35 = vld [vmem:[#allocation8 + $0x3b40] sm:$0xff] }
 0x600   :  { %v19692_v32 = vcombine.high %v2310_v26, %v2326_v27  ;;  %v2342_v37 = vld [vmem:[#allocation8 + $0x3b48] sm:$0xff] }
 0x601   :  { %14349 = vmatpush1.bf16.msra.mxu0 %v19561_v63  ;;  %v2357_v63 = vld [vmem:[#allocation8 + $0x3bc0] sm:$0xff]  ;;  %v2358_v38 = vld [vmem:[#allocation8 + $0x3bc8] sm:$0xff] }
 0x602   :  { %14513 = vmatpush1.bf16.msra.mxu1 %v19563_v39  ;;  %14350 = vmatprep.subr.bf16.mxu0 %v19594_v55  ;;  %v19689_v39 = vcombine.low %v2309_v59, %v2325_v22  ;;  %v19691_v55 = vcombine.low %v2310_v26, %v2326_v27  ;;  %v19722_v40 = vcombine.high %v2341_v35, %v2357_v63  ;;  %v2437_v59 = vld [vmem:[#allocation8 + $0x3e40] sm:$0xff]  ;;  %v2438_v26 = vld [vmem:[#allocation8 + $0x3e48] sm:$0xff] }
 0x603   :  { %14514 = vmatprep.subr.bf16.mxu1 %v19596_v42  ;;  %v19724_v42 = vcombine.high %v2342_v37, %v2358_v38  ;;  %v2453_v22 = vld [vmem:[#allocation8 + $0x3ec0] sm:$0xff]  ;;  %v2454_v27 = vld [vmem:[#allocation8 + $0x3ec8] sm:$0xff] }
 0x605   :  { %14351 = vmatpush1.bf16.msra.mxu0 %v19593_v53  ;;  %v19721_v53 = vcombine.low %v2341_v35, %v2357_v63  ;;  %v2469_v35 = vld [vmem:[#allocation8 + $0x3f40] sm:$0xff] }
 0x606   :  { %14515 = vmatpush1.bf16.msra.mxu1 %v19595_v44  ;;  %14352 = vmatprep.subr.bf16.mxu0 %v19626_v54  ;;  %v19723_v44 = vcombine.low %v2342_v37, %v2358_v38  ;;  %v19754_v54 = vcombine.high %v2373_v43, %v2389_v50  ;;  %v2485_v63 = vld [vmem:[#allocation8 + $0x3fc0] sm:$0xff]  ;;  %v2470_v37 = vld [vmem:[#allocation8 + $0x3f48] sm:$0xff] }
 0x607   :  { %14516 = vmatprep.subr.bf16.mxu1 %v19628_v57  ;;  %v19756_v57 = vcombine.high %v2374_v52, %v2390_v16  ;;  %v2486_v38 = vld [vmem:[#allocation8 + $0x3fc8] sm:$0xff] }
 0x609   :  { %14353 = vmatpush1.bf16.msra.mxu0 %v19625_v12  ;;  %v19753_v12 = vcombine.low %v2373_v43, %v2389_v50  ;;  %v455_v43 = vld [vmem:[#allocation8 + $0x50] sm:$0xff] }
 0x60a   :  { %14517 = vmatpush1.bf16.msra.mxu1 %v19627_v17  ;;  %14354 = vmatprep.subr.bf16.mxu0 %v19658_v18  ;;  %v19755_v17 = vcombine.low %v2374_v52, %v2390_v16  ;;  %v19786_v18 = vcombine.high %v2405_v58, %v2421_v62  ;;  %v471_v50 = vld [vmem:[#allocation8 + $0xd0] sm:$0xff]  ;;  %v456_v52 = vld [vmem:[#allocation8 + $0x58] sm:$0xff] }
 0x60b   :  { %14518 = vmatprep.subr.bf16.mxu1 %v19660_v21  ;;  %v19788_v21 = vcombine.high %v2406_v4, %v2422_v9  ;;  %v472_v16 = vld [vmem:[#allocation8 + $0xd8] sm:$0xff] }
 0x60d   :  { %14355 = vmatpush1.bf16.msra.mxu0 %v19657_v15  ;;  %v19785_v15 = vcombine.low %v2405_v58, %v2421_v62  ;;  %v487_v58 = vld [vmem:[#allocation8 + $0x150] sm:$0xff] }
 0x60e   :  { %14519 = vmatpush1.bf16.msra.mxu1 %v19659_v28  ;;  %14356 = vmatprep.subr.bf16.mxu0 %v19690_v31  ;;  %v19787_v28 = vcombine.low %v2406_v4, %v2422_v9  ;;  %v19818_v31 = vcombine.high %v2437_v59, %v2453_v22  ;;  %v503_v62 = vld [vmem:[#allocation8 + $0x1d0] sm:$0xff]  ;;  %v17837_v4 = vcombine.low %v455_v43, %v471_v50  ;;  %v488_v9 = vld [vmem:[#allocation8 + $0x158] sm:$0xff] }
 0x60f   :  { %14520 = vmatprep.subr.bf16.mxu1 %v19692_v32  ;;  %v19820_v32 = vcombine.high %v2438_v26, %v2454_v27 }
 0x611   :  { %14357 = vmatpush1.bf16.msra.mxu0 %v19689_v39  ;;  %v19817_v39 = vcombine.low %v2437_v59, %v2453_v22  ;;  %v535_v59 = vld [vmem:[#allocation8 + $0x2d0] sm:$0xff] }
 0x612   :  { %14521 = vmatpush1.bf16.msra.mxu1 %v19691_v55  ;;  %14358 = vmatprep.subr.bf16.mxu0 %v19722_v40  ;;  %v19819_v55 = vcombine.low %v2438_v26, %v2454_v27  ;;  %v19850_v40 = vcombine.high %v2469_v35, %v2485_v63  ;;  %v520_v26 = vld [vmem:[#allocation8 + $0x258] sm:$0xff] }
 0x613   :  { %14522 = vmatprep.subr.bf16.mxu1 %v19724_v42  ;;  %v19852_v42 = vcombine.high %v2470_v37, %v2486_v38  ;;  %v536_v27 = vld [vmem:[#allocation8 + $0x2d8] sm:$0xff] }
 0x615   :  { %14359 = vmatpush1.bf16.msra.mxu0 %v19721_v53  ;;  %v19849_v53 = vcombine.low %v2469_v35, %v2485_v63  ;;  %v551_v35 = vld [vmem:[#allocation8 + $0x350] sm:$0xff] }
 0x616   :  { %14523 = vmatpush1.bf16.msra.mxu1 %v19723_v44  ;;  %14360 = vmatprep.subr.bf16.mxu0 %v19754_v54  ;;  %v19851_v44 = vcombine.low %v2470_v37, %v2486_v38  ;;  %v17838_v54 = vcombine.high %v455_v43, %v471_v50  ;;  %v567_v63 = vld [vmem:[#allocation8 + $0x3d0] sm:$0xff]  ;;  %v552_v37 = vld [vmem:[#allocation8 + $0x358] sm:$0xff] }
 0x617   :  { %14524 = vmatprep.subr.bf16.mxu1 %v19756_v57  ;;  %v17840_v57 = vcombine.high %v456_v52, %v472_v16  ;;  %v568_v38 = vld [vmem:[#allocation8 + $0x3d8] sm:$0xff]  ;;  %v583_v43 = vld [vmem:[#allocation8 + $0x450] sm:$0xff] }
 0x618   :  { %v599_v50 = vld [vmem:[#allocation8 + $0x4d0] sm:$0xff] }
 0x619   :  { %14361 = vmatpush1.bf16.msra.mxu0 %v19753_v12  ;;  %v504_v12 = vld [vmem:[#allocation8 + $0x1d8] sm:$0xff] }
 0x61a   :  { %14525 = vmatpush1.bf16.msra.mxu1 %v19755_v17  ;;  %14362 = vmatprep.subr.bf16.mxu0 %v19786_v18  ;;  %v17839_v17 = vcombine.low %v456_v52, %v472_v16  ;;  %v17870_v18 = vcombine.high %v487_v58, %v503_v62  ;;  %v17872_v22 = vcombine.high %v488_v9, %v504_v12  ;;  %v584_v52 = vld [vmem:[#allocation8 + $0x458] sm:$0xff] }
 0x61b   :  { %14526 = vmatprep.subr.bf16.mxu1 %v19788_v21  ;;  %v519_v21 = vld [vmem:[#allocation8 + $0x250] sm:$0xff]  ;;  %v600_v16 = vld [vmem:[#allocation8 + $0x4d8] sm:$0xff] }
 0x61d   :  { %14363 = vmatpush1.bf16.msra.mxu0 %v19785_v15  ;;  %v17869_v15 = vcombine.low %v487_v58, %v503_v62  ;;  %v615_v58 = vld [vmem:[#allocation8 + $0x550] sm:$0xff] }
 0x61e   :  { %14527 = vmatpush1.bf16.msra.mxu1 %v19787_v28  ;;  %14364 = vmatprep.subr.bf16.mxu0 %v19818_v31  ;;  %v17871_v28 = vcombine.low %v488_v9, %v504_v12  ;;  %v17902_v31 = vcombine.high %v519_v21, %v535_v59  ;;  %v631_v62 = vld [vmem:[#allocation8 + $0x5d0] sm:$0xff]  ;;  %v632_v9 = vld [vmem:[#allocation8 + $0x5d8] sm:$0xff]  ;;  %v17965_v12 = vcombine.low %v583_v43, %v599_v50 }
 0x61f   :  { %14528 = vmatprep.subr.bf16.mxu1 %v19820_v32  ;;  %v17904_v32 = vcombine.high %v520_v26, %v536_v27 }
 0x621   :  { %14365 = vmatpush1.bf16.msra.mxu0 %v19817_v39  ;;  %v17901_v39 = vcombine.low %v519_v21, %v535_v59  ;;  %v647_v59 = vld [vmem:[#allocation8 + $0x650] sm:$0xff] }
 0x622   :  { %14529 = vmatpush1.bf16.msra.mxu1 %v19819_v55  ;;  %14366 = vmatprep.subr.bf16.mxu0 %v19850_v40  ;;  %v17903_v55 = vcombine.low %v520_v26, %v536_v27  ;;  %v17934_v40 = vcombine.high %v551_v35, %v567_v63  ;;  %v648_v26 = vld [vmem:[#allocation8 + $0x658] sm:$0xff] }
 0x623   :  { %14530 = vmatprep.subr.bf16.mxu1 %v19852_v42  ;;  %v17936_v42 = vcombine.high %v552_v37, %v568_v38  ;;  %v664_v27 = vld [vmem:[#allocation8 + $0x6d8] sm:$0xff] }
 0x625   :  { %14367 = vmatpush1.bf16.msra.mxu0 %v19849_v53  ;;  %v17933_v53 = vcombine.low %v551_v35, %v567_v63  ;;  %v679_v35 = vld [vmem:[#allocation8 + $0x750] sm:$0xff] }
 0x626   :  { %14531 = vmatpush1.bf16.msra.mxu1 %v19851_v44  ;;  %14541 = vmatprep.subr.bf16.mxu0 %v17838_v54  ;;  %v17935_v44 = vcombine.low %v552_v37, %v568_v38  ;;  %v17966_v54 = vcombine.high %v583_v43, %v599_v50  ;;  %v695_v63 = vld [vmem:[#allocation8 + $0x7d0] sm:$0xff]  ;;  %v680_v37 = vld [vmem:[#allocation8 + $0x758] sm:$0xff] }
 0x627   :  { %14705 = vmatprep.subr.bf16.mxu1 %v17840_v57  ;;  %v17968_v57 = vcombine.high %v584_v52, %v600_v16  ;;  %v696_v38 = vld [vmem:[#allocation8 + $0x7d8] sm:$0xff]  ;;  %v711_v43 = vld [vmem:[#allocation8 + $0x850] sm:$0xff] }
 0x628   :  { %14369 = vmatmul.mubr.bf16.vlgmr.msra.gmra.mrb[24].mxu0 %v22959_v24  ;;  %v727_v50 = vld [vmem:[#allocation8 + $0x8d0] sm:$0xff] }
 0x629   :  { %14533 = vmatmul.mubr.bf16.vlgmr.msra.gmra.mrb[24].mxu1 %v22959_v24  ;;  %14542 = vmatpush1.bf16.msra.mxu0 %v17837_v4  ;;  %v616_v4 = vld [vmem:[#allocation8 + $0x558] sm:$0xff] }
 0x62a   :  { %14573 = vmatprep.mubr.bf16.mxu0 %v22894_v6  ;;  %14706 = vmatpush1.bf16.msra.mxu1 %v17839_v17  ;;  %v17967_v17 = vcombine.low %v584_v52, %v600_v16  ;;  %v18000_v21 = vcombine.high %v616_v4, %v632_v9  ;;  %v712_v52 = vld [vmem:[#allocation8 + $0x858] sm:$0xff] }
 0x62b   :  { %14737 = vmatprep.mubr.bf16.mxu1 %v22894_v6  ;;  %14543 = vmatprep.subr.bf16.mxu0 %v17870_v18  ;;  %v17998_v18 = vcombine.high %v615_v58, %v631_v62  ;;  %v728_v16 = vld [vmem:[#allocation8 + $0x8d8] sm:$0xff] }
 0x62c   :  { %14707 = vmatprep.subr.bf16.mxu1 %v17872_v22  ;;  %v663_v22 = vld [vmem:[#allocation8 + $0x6d0] sm:$0xff] }
 0x62d   :  { %14544 = vmatpush1.bf16.msra.mxu0 %v17869_v15  ;;  %v17997_v15 = vcombine.low %v615_v58, %v631_v62  ;;  %v743_v58 = vld [vmem:[#allocation8 + $0x950] sm:$0xff] }
 0x62e   :  { %14708 = vmatpush1.bf16.msra.mxu1 %v17871_v28  ;;  %14545 = vmatprep.subr.bf16.mxu0 %v17902_v31  ;;  %v17999_v28 = vcombine.low %v616_v4, %v632_v9  ;;  %v18030_v31 = vcombine.high %v647_v59, %v663_v22  ;;  %v759_v62 = vld [vmem:[#allocation8 + $0x9d0] sm:$0xff]  ;;  %v744_v4 = vld [vmem:[#allocation8 + $0x958] sm:$0xff] }
 0x62f   :  { %14709 = vmatprep.subr.bf16.mxu1 %v17904_v32  ;;  %v18032_v32 = vcombine.high %v648_v26, %v664_v27  ;;  %v760_v9 = vld [vmem:[#allocation8 + $0x9d8] sm:$0xff] }
 0x631   :  { %14546 = vmatpush1.bf16.msra.mxu0 %v17901_v39  ;;  %v18029_v39 = vcombine.low %v647_v59, %v663_v22  ;;  %v775_v59 = vld [vmem:[#allocation8 + $0xa50] sm:$0xff] }
 0x632   :  { %14710 = vmatpush1.bf16.msra.mxu1 %v17903_v55  ;;  %14547 = vmatprep.subr.bf16.mxu0 %v17934_v40  ;;  %v18031_v55 = vcombine.low %v648_v26, %v664_v27  ;;  %v18062_v40 = vcombine.high %v679_v35, %v695_v63  ;;  %v791_v22 = vld [vmem:[#allocation8 + $0xad0] sm:$0xff]  ;;  %v776_v26 = vld [vmem:[#allocation8 + $0xa58] sm:$0xff] }
 0x633   :  { %14711 = vmatprep.subr.bf16.mxu1 %v17936_v42  ;;  %v18064_v42 = vcombine.high %v680_v37, %v696_v38  ;;  %v792_v27 = vld [vmem:[#allocation8 + $0xad8] sm:$0xff] }
 0x635   :  { %14548 = vmatpush1.bf16.msra.mxu0 %v17933_v53  ;;  %v18061_v53 = vcombine.low %v679_v35, %v695_v63  ;;  %v807_v35 = vld [vmem:[#allocation8 + $0xb50] sm:$0xff] }
 0x636   :  { %14712 = vmatpush1.bf16.msra.mxu1 %v17935_v44  ;;  %14549 = vmatprep.subr.bf16.mxu0 %v17966_v54  ;;  %v18063_v44 = vcombine.low %v680_v37, %v696_v38  ;;  %v18094_v54 = vcombine.high %v711_v43, %v727_v50  ;;  %v823_v63 = vld [vmem:[#allocation8 + $0xbd0] sm:$0xff]  ;;  %v808_v37 = vld [vmem:[#allocation8 + $0xb58] sm:$0xff] }
 0x637   :  { %14713 = vmatprep.subr.bf16.mxu1 %v17968_v57  ;;  %v18096_v57 = vcombine.high %v712_v52, %v728_v16  ;;  %v824_v38 = vld [vmem:[#allocation8 + $0xbd8] sm:$0xff] }
 0x639   :  { %14550 = vmatpush1.bf16.msra.mxu0 %v17965_v12  ;;  %v18093_v12 = vcombine.low %v711_v43, %v727_v50  ;;  %v839_v43 = vld [vmem:[#allocation8 + $0xc50] sm:$0xff] }
 0x63a   :  { %14714 = vmatpush1.bf16.msra.mxu1 %v17967_v17  ;;  %14551 = vmatprep.subr.bf16.mxu0 %v17998_v18  ;;  %v18095_v17 = vcombine.low %v712_v52, %v728_v16  ;;  %v18126_v18 = vcombine.high %v743_v58, %v759_v62  ;;  %v855_v50 = vld [vmem:[#allocation8 + $0xcd0] sm:$0xff]  ;;  %v840_v52 = vld [vmem:[#allocation8 + $0xc58] sm:$0xff] }
 0x63b   :  { %14715 = vmatprep.subr.bf16.mxu1 %v18000_v21  ;;  %v18128_v21 = vcombine.high %v744_v4, %v760_v9  ;;  %v856_v16 = vld [vmem:[#allocation8 + $0xcd8] sm:$0xff] }
 0x63d   :  { %14552 = vmatpush1.bf16.msra.mxu0 %v17997_v15  ;;  %v18125_v15 = vcombine.low %v743_v58, %v759_v62  ;;  %v871_v58 = vld [vmem:[#allocation8 + $0xd50] sm:$0xff] }
 0x63e   :  { %14716 = vmatpush1.bf16.msra.mxu1 %v17999_v28  ;;  %14553 = vmatprep.subr.bf16.mxu0 %v18030_v31  ;;  %v18127_v28 = vcombine.low %v744_v4, %v760_v9  ;;  %v18158_v31 = vcombine.high %v775_v59, %v791_v22  ;;  %v887_v62 = vld [vmem:[#allocation8 + $0xdd0] sm:$0xff]  ;;  %v872_v4 = vld [vmem:[#allocation8 + $0xd58] sm:$0xff] }
 0x63f   :  { %14717 = vmatprep.subr.bf16.mxu1 %v18032_v32  ;;  %v18160_v32 = vcombine.high %v776_v26, %v792_v27  ;;  %v888_v9 = vld [vmem:[#allocation8 + $0xdd8] sm:$0xff] }
 0x641   :  { %14554 = vmatpush1.bf16.msra.mxu0 %v18029_v39  ;;  %v18157_v39 = vcombine.low %v775_v59, %v791_v22  ;;  %v903_v59 = vld [vmem:[#allocation8 + $0xe50] sm:$0xff] }
 0x642   :  { %14718 = vmatpush1.bf16.msra.mxu1 %v18031_v55  ;;  %14555 = vmatprep.subr.bf16.mxu0 %v18062_v40  ;;  %v18159_v55 = vcombine.low %v776_v26, %v792_v27  ;;  %v18190_v40 = vcombine.high %v807_v35, %v823_v63  ;;  %v919_v22 = vld [vmem:[#allocation8 + $0xed0] sm:$0xff]  ;;  %v904_v26 = vld [vmem:[#allocation8 + $0xe58] sm:$0xff] }
 0x643   :  { %14719 = vmatprep.subr.bf16.mxu1 %v18064_v42  ;;  %v18192_v42 = vcombine.high %v808_v37, %v824_v38  ;;  %v920_v27 = vld [vmem:[#allocation8 + $0xed8] sm:$0xff] }
 0x645   :  { %14556 = vmatpush1.bf16.msra.mxu0 %v18061_v53  ;;  %v18189_v53 = vcombine.low %v807_v35, %v823_v63  ;;  %v935_v35 = vld [vmem:[#allocation8 + $0xf50] sm:$0xff] }
 0x646   :  { %14720 = vmatpush1.bf16.msra.mxu1 %v18063_v44  ;;  %14557 = vmatprep.subr.bf16.mxu0 %v18094_v54  ;;  %v18191_v44 = vcombine.low %v808_v37, %v824_v38  ;;  %v18222_v54 = vcombine.high %v839_v43, %v855_v50  ;;  %v951_v63 = vld [vmem:[#allocation8 + $0xfd0] sm:$0xff]  ;;  %v936_v37 = vld [vmem:[#allocation8 + $0xf58] sm:$0xff] }
 0x647   :  { %14721 = vmatprep.subr.bf16.mxu1 %v18096_v57  ;;  %v18224_v57 = vcombine.high %v840_v52, %v856_v16  ;;  %v952_v38 = vld [vmem:[#allocation8 + $0xfd8] sm:$0xff] }
 0x649   :  { %14558 = vmatpush1.bf16.msra.mxu0 %v18093_v12  ;;  %v18221_v12 = vcombine.low %v839_v43, %v855_v50  ;;  %v967_v43 = vld [vmem:[#allocation8 + $0x1050] sm:$0xff] }
 0x64a   :  { %14722 = vmatpush1.bf16.msra.mxu1 %v18095_v17  ;;  %14559 = vmatprep.subr.bf16.mxu0 %v18126_v18  ;;  %v18223_v17 = vcombine.low %v840_v52, %v856_v16  ;;  %v18254_v18 = vcombine.high %v871_v58, %v887_v62  ;;  %v983_v50 = vld [vmem:[#allocation8 + $0x10d0] sm:$0xff]  ;;  %v968_v52 = vld [vmem:[#allocation8 + $0x1058] sm:$0xff] }
 0x64b   :  { %14723 = vmatprep.subr.bf16.mxu1 %v18128_v21  ;;  %v18256_v21 = vcombine.high %v872_v4, %v888_v9  ;;  %v984_v16 = vld [vmem:[#allocation8 + $0x10d8] sm:$0xff] }
 0x64d   :  { %14560 = vmatpush1.bf16.msra.mxu0 %v18125_v15  ;;  %v18253_v15 = vcombine.low %v871_v58, %v887_v62  ;;  %v999_v58 = vld [vmem:[#allocation8 + $0x1150] sm:$0xff] }
 0x64e   :  { %14724 = vmatpush1.bf16.msra.mxu1 %v18127_v28  ;;  %14561 = vmatprep.subr.bf16.mxu0 %v18158_v31  ;;  %v18255_v28 = vcombine.low %v872_v4, %v888_v9  ;;  %v18286_v31 = vcombine.high %v903_v59, %v919_v22  ;;  %v1015_v62 = vld [vmem:[#allocation8 + $0x11d0] sm:$0xff]  ;;  %v18349_v4 = vcombine.low %v967_v43, %v983_v50  ;;  %v1000_v9 = vld [vmem:[#allocation8 + $0x1158] sm:$0xff] }
 0x64f   :  { %14725 = vmatprep.subr.bf16.mxu1 %v18160_v32  ;;  %v18288_v32 = vcombine.high %v904_v26, %v920_v27 }
 0x651   :  { %14562 = vmatpush1.bf16.msra.mxu0 %v18157_v39  ;;  %v18285_v39 = vcombine.low %v903_v59, %v919_v22  ;;  %v1047_v59 = vld [vmem:[#allocation8 + $0x12d0] sm:$0xff] }
 0x652   :  { %14726 = vmatpush1.bf16.msra.mxu1 %v18159_v55  ;;  %14563 = vmatprep.subr.bf16.mxu0 %v18190_v40  ;;  %v18287_v55 = vcombine.low %v904_v26, %v920_v27  ;;  %v18318_v40 = vcombine.high %v935_v35, %v951_v63  ;;  %v1032_v26 = vld [vmem:[#allocation8 + $0x1258] sm:$0xff] }
 0x653   :  { %14727 = vmatprep.subr.bf16.mxu1 %v18192_v42  ;;  %v18320_v42 = vcombine.high %v936_v37, %v952_v38  ;;  %v1048_v27 = vld [vmem:[#allocation8 + $0x12d8] sm:$0xff] }
 0x655   :  { %14564 = vmatpush1.bf16.msra.mxu0 %v18189_v53  ;;  %v18317_v53 = vcombine.low %v935_v35, %v951_v63  ;;  %v1063_v35 = vld [vmem:[#allocation8 + $0x1350] sm:$0xff] }
 0x656   :  { %14728 = vmatpush1.bf16.msra.mxu1 %v18191_v44  ;;  %14565 = vmatprep.subr.bf16.mxu0 %v18222_v54  ;;  %v18319_v44 = vcombine.low %v936_v37, %v952_v38  ;;  %v18350_v54 = vcombine.high %v967_v43, %v983_v50  ;;  %v1079_v63 = vld [vmem:[#allocation8 + $0x13d0] sm:$0xff]  ;;  %v1064_v37 = vld [vmem:[#allocation8 + $0x1358] sm:$0xff] }
 0x657   :  { %14729 = vmatprep.subr.bf16.mxu1 %v18224_v57  ;;  %v18352_v57 = vcombine.high %v968_v52, %v984_v16  ;;  %v1080_v38 = vld [vmem:[#allocation8 + $0x13d8] sm:$0xff]  ;;  %v1095_v43 = vld [vmem:[#allocation8 + $0x1450] sm:$0xff] }
 0x658   :  { %v1111_v50 = vld [vmem:[#allocation8 + $0x14d0] sm:$0xff] }
 0x659   :  { %14566 = vmatpush1.bf16.msra.mxu0 %v18221_v12  ;;  %v1016_v12 = vld [vmem:[#allocation8 + $0x11d8] sm:$0xff] }
 0x65a   :  { %14730 = vmatpush1.bf16.msra.mxu1 %v18223_v17  ;;  %14567 = vmatprep.subr.bf16.mxu0 %v18254_v18  ;;  %v18351_v17 = vcombine.low %v968_v52, %v984_v16  ;;  %v18382_v18 = vcombine.high %v999_v58, %v1015_v62  ;;  %v18384_v22 = vcombine.high %v1000_v9, %v1016_v12  ;;  %v1096_v52 = vld [vmem:[#allocation8 + $0x1458] sm:$0xff] }
 0x65b   :  { %14731 = vmatprep.subr.bf16.mxu1 %v18256_v21  ;;  %v1031_v21 = vld [vmem:[#allocation8 + $0x1250] sm:$0xff]  ;;  %v1112_v16 = vld [vmem:[#allocation8 + $0x14d8] sm:$0xff] }
 0x65d   :  { %14568 = vmatpush1.bf16.msra.mxu0 %v18253_v15  ;;  %v18381_v15 = vcombine.low %v999_v58, %v1015_v62  ;;  %v1127_v58 = vld [vmem:[#allocation8 + $0x1550] sm:$0xff] }
 0x65e   :  { %14732 = vmatpush1.bf16.msra.mxu1 %v18255_v28  ;;  %14569 = vmatprep.subr.bf16.mxu0 %v18286_v31  ;;  %v18383_v28 = vcombine.low %v1000_v9, %v1016_v12  ;;  %v18414_v31 = vcombine.high %v1031_v21, %v1047_v59  ;;  %v1143_v62 = vld [vmem:[#allocation8 + $0x15d0] sm:$0xff]  ;;  %v1144_v9 = vld [vmem:[#allocation8 + $0x15d8] sm:$0xff]  ;;  %v18477_v12 = vcombine.low %v1095_v43, %v1111_v50 }
 0x65f   :  { %14733 = vmatprep.subr.bf16.mxu1 %v18288_v32  ;;  %v18416_v32 = vcombine.high %v1032_v26, %v1048_v27 }
 0x661   :  { %14570 = vmatpush1.bf16.msra.mxu0 %v18285_v39  ;;  %v18413_v39 = vcombine.low %v1031_v21, %v1047_v59  ;;  %v1159_v59 = vld [vmem:[#allocation8 + $0x1650] sm:$0xff] }
 0x662   :  { %14734 = vmatpush1.bf16.msra.mxu1 %v18287_v55  ;;  %14571 = vmatprep.subr.bf16.mxu0 %v18318_v40  ;;  %v18415_v55 = vcombine.low %v1032_v26, %v1048_v27  ;;  %v18446_v40 = vcombine.high %v1063_v35, %v1079_v63  ;;  %v1160_v26 = vld [vmem:[#allocation8 + $0x1658] sm:$0xff] }
 0x663   :  { %14735 = vmatprep.subr.bf16.mxu1 %v18320_v42  ;;  %v18448_v42 = vcombine.high %v1064_v37, %v1080_v38  ;;  %v1176_v27 = vld [vmem:[#allocation8 + $0x16d8] sm:$0xff] }
 0x665   :  { %14572 = vmatpush1.bf16.msra.mxu0 %v18317_v53  ;;  %v18445_v53 = vcombine.low %v1063_v35, %v1079_v63  ;;  %v1191_v35 = vld [vmem:[#allocation8 + $0x1750] sm:$0xff] }
 0x666   :  { %14736 = vmatpush1.bf16.msra.mxu1 %v18319_v44  ;;  %14582 = vmatprep.subr.bf16.mxu0 %v18350_v54  ;;  %v18447_v44 = vcombine.low %v1064_v37, %v1080_v38  ;;  %v18478_v54 = vcombine.high %v1095_v43, %v1111_v50  ;;  %v1207_v63 = vld [vmem:[#allocation8 + $0x17d0] sm:$0xff]  ;;  %v1192_v37 = vld [vmem:[#allocation8 + $0x1758] sm:$0xff] }
 0x667   :  { %14746 = vmatprep.subr.bf16.mxu1 %v18352_v57  ;;  %v18480_v57 = vcombine.high %v1096_v52, %v1112_v16  ;;  %v1208_v38 = vld [vmem:[#allocation8 + $0x17d8] sm:$0xff]  ;;  %v1223_v43 = vld [vmem:[#allocation8 + $0x1850] sm:$0xff] }
 0x668   :  { %14574 = vmatmul.mubr.bf16.vlgmr.msra.gmra.mrb[28].mxu0 %v22896_v7  ;;  %v1239_v50 = vld [vmem:[#allocation8 + $0x18d0] sm:$0xff] }
 0x669   :  { %14738 = vmatmul.mubr.bf16.vlgmr.msra.gmra.mrb[28].mxu1 %v22896_v7  ;;  %14583 = vmatpush1.bf16.msra.mxu0 %v18349_v4  ;;  %v1128_v4 = vld [vmem:[#allocation8 + $0x1558] sm:$0xff] }
 0x66a   :  { %14614 = vmatprep.mubr.bf16.mxu0 %v22900_v14  ;;  %14747 = vmatpush1.bf16.msra.mxu1 %v18351_v17  ;;  %v18479_v17 = vcombine.low %v1096_v52, %v1112_v16  ;;  %v18512_v21 = vcombine.high %v1128_v4, %v1144_v9  ;;  %v1224_v52 = vld [vmem:[#allocation8 + $0x1858] sm:$0xff] }
 0x66b   :  { %14778 = vmatprep.mubr.bf16.mxu1 %v22900_v14  ;;  %14584 = vmatprep.subr.bf16.mxu0 %v18382_v18  ;;  %v18510_v18 = vcombine.high %v1127_v58, %v1143_v62  ;;  %v1240_v16 = vld [vmem:[#allocation8 + $0x18d8] sm:$0xff] }
 0x66c   :  { %14748 = vmatprep.subr.bf16.mxu1 %v18384_v22  ;;  %v1175_v22 = vld [vmem:[#allocation8 + $0x16d0] sm:$0xff] }
 0x66d   :  { %14585 = vmatpush1.bf16.msra.mxu0 %v18381_v15  ;;  %v18509_v15 = vcombine.low %v1127_v58, %v1143_v62  ;;  %v1255_v58 = vld [vmem:[#allocation8 + $0x1950] sm:$0xff] }
 0x66e   :  { %14749 = vmatpush1.bf16.msra.mxu1 %v18383_v28  ;;  %14586 = vmatprep.subr.bf16.mxu0 %v18414_v31  ;;  %v18511_v28 = vcombine.low %v1128_v4, %v1144_v9  ;;  %v18542_v31 = vcombine.high %v1159_v59, %v1175_v22  ;;  %v1271_v62 = vld [vmem:[#allocation8 + $0x19d0] sm:$0xff]  ;;  %v1256_v4 = vld [vmem:[#allocation8 + $0x1958] sm:$0xff] }
 0x66f   :  { %14750 = vmatprep.subr.bf16.mxu1 %v18416_v32  ;;  %v18544_v32 = vcombine.high %v1160_v26, %v1176_v27  ;;  %v1272_v9 = vld [vmem:[#allocation8 + $0x19d8] sm:$0xff] }
 0x671   :  { %14587 = vmatpush1.bf16.msra.mxu0 %v18413_v39  ;;  %v18541_v39 = vcombine.low %v1159_v59, %v1175_v22  ;;  %v1287_v59 = vld [vmem:[#allocation8 + $0x1a50] sm:$0xff] }
 0x672   :  { %14751 = vmatpush1.bf16.msra.mxu1 %v18415_v55  ;;  %14588 = vmatprep.subr.bf16.mxu0 %v18446_v40  ;;  %v18543_v55 = vcombine.low %v1160_v26, %v1176_v27  ;;  %v18574_v40 = vcombine.high %v1191_v35, %v1207_v63  ;;  %v1303_v22 = vld [vmem:[#allocation8 + $0x1ad0] sm:$0xff]  ;;  %v1288_v26 = vld [vmem:[#allocation8 + $0x1a58] sm:$0xff] }
 0x673   :  { %14752 = vmatprep.subr.bf16.mxu1 %v18448_v42  ;;  %v18576_v42 = vcombine.high %v1192_v37, %v1208_v38  ;;  %v1304_v27 = vld [vmem:[#allocation8 + $0x1ad8] sm:$0xff] }
 0x675   :  { %14589 = vmatpush1.bf16.msra.mxu0 %v18445_v53  ;;  %v18573_v53 = vcombine.low %v1191_v35, %v1207_v63  ;;  %v1319_v35 = vld [vmem:[#allocation8 + $0x1b50] sm:$0xff] }
 0x676   :  { %14753 = vmatpush1.bf16.msra.mxu1 %v18447_v44  ;;  %14590 = vmatprep.subr.bf16.mxu0 %v18478_v54  ;;  %v18575_v44 = vcombine.low %v1192_v37, %v1208_v38  ;;  %v18606_v54 = vcombine.high %v1223_v43, %v1239_v50  ;;  %v1335_v63 = vld [vmem:[#allocation8 + $0x1bd0] sm:$0xff]  ;;  %v1320_v37 = vld [vmem:[#allocation8 + $0x1b58] sm:$0xff] }
 0x677   :  { %14754 = vmatprep.subr.bf16.mxu1 %v18480_v57  ;;  %v18608_v57 = vcombine.high %v1224_v52, %v1240_v16  ;;  %v1336_v38 = vld [vmem:[#allocation8 + $0x1bd8] sm:$0xff] }
 0x679   :  { %14591 = vmatpush1.bf16.msra.mxu0 %v18477_v12  ;;  %v18605_v12 = vcombine.low %v1223_v43, %v1239_v50  ;;  %v1351_v43 = vld [vmem:[#allocation8 + $0x1c50] sm:$0xff] }
 0x67a   :  { %14755 = vmatpush1.bf16.msra.mxu1 %v18479_v17  ;;  %14592 = vmatprep.subr.bf16.mxu0 %v18510_v18  ;;  %v18607_v17 = vcombine.low %v1224_v52, %v1240_v16  ;;  %v18638_v18 = vcombine.high %v1255_v58, %v1271_v62  ;;  %v1367_v50 = vld [vmem:[#allocation8 + $0x1cd0] sm:$0xff]  ;;  %v1352_v52 = vld [vmem:[#allocation8 + $0x1c58] sm:$0xff] }
 0x67b   :  { %14756 = vmatprep.subr.bf16.mxu1 %v18512_v21  ;;  %v18640_v21 = vcombine.high %v1256_v4, %v1272_v9  ;;  %v1368_v16 = vld [vmem:[#allocation8 + $0x1cd8] sm:$0xff] }
 0x67d   :  { %14593 = vmatpush1.bf16.msra.mxu0 %v18509_v15  ;;  %v18637_v15 = vcombine.low %v1255_v58, %v1271_v62  ;;  %v1383_v58 = vld [vmem:[#allocation8 + $0x1d50] sm:$0xff] }
 0x67e   :  { %14757 = vmatpush1.bf16.msra.mxu1 %v18511_v28  ;;  %14594 = vmatprep.subr.bf16.mxu0 %v18542_v31  ;;  %v18639_v28 = vcombine.low %v1256_v4, %v1272_v9  ;;  %v18670_v31 = vcombine.high %v1287_v59, %v1303_v22  ;;  %v1399_v62 = vld [vmem:[#allocation8 + $0x1dd0] sm:$0xff]  ;;  %v1384_v4 = vld [vmem:[#allocation8 + $0x1d58] sm:$0xff] }
 0x67f   :  { %14758 = vmatprep.subr.bf16.mxu1 %v18544_v32  ;;  %v18672_v32 = vcombine.high %v1288_v26, %v1304_v27  ;;  %v1400_v9 = vld [vmem:[#allocation8 + $0x1dd8] sm:$0xff] }
 0x681   :  { %14595 = vmatpush1.bf16.msra.mxu0 %v18541_v39  ;;  %v18669_v39 = vcombine.low %v1287_v59, %v1303_v22  ;;  %v1415_v59 = vld [vmem:[#allocation8 + $0x1e50] sm:$0xff] }
 0x682   :  { %14759 = vmatpush1.bf16.msra.mxu1 %v18543_v55  ;;  %14596 = vmatprep.subr.bf16.mxu0 %v18574_v40  ;;  %v18671_v55 = vcombine.low %v1288_v26, %v1304_v27  ;;  %v18702_v40 = vcombine.high %v1319_v35, %v1335_v63  ;;  %v1431_v22 = vld [vmem:[#allocation8 + $0x1ed0] sm:$0xff]  ;;  %v1416_v26 = vld [vmem:[#allocation8 + $0x1e58] sm:$0xff] }
 0x683   :  { %14760 = vmatprep.subr.bf16.mxu1 %v18576_v42  ;;  %v18704_v42 = vcombine.high %v1320_v37, %v1336_v38  ;;  %v1432_v27 = vld [vmem:[#allocation8 + $0x1ed8] sm:$0xff] }
 0x685   :  { %14597 = vmatpush1.bf16.msra.mxu0 %v18573_v53  ;;  %v18701_v53 = vcombine.low %v1319_v35, %v1335_v63  ;;  %v1447_v35 = vld [vmem:[#allocation8 + $0x1f50] sm:$0xff] }
 0x686   :  { %14761 = vmatpush1.bf16.msra.mxu1 %v18575_v44  ;;  %14598 = vmatprep.subr.bf16.mxu0 %v18606_v54  ;;  %v18703_v44 = vcombine.low %v1320_v37, %v1336_v38  ;;  %v18734_v54 = vcombine.high %v1351_v43, %v1367_v50  ;;  %v1463_v63 = vld [vmem:[#allocation8 + $0x1fd0] sm:$0xff]  ;;  %v1448_v37 = vld [vmem:[#allocation8 + $0x1f58] sm:$0xff] }
 0x687   :  { %14762 = vmatprep.subr.bf16.mxu1 %v18608_v57  ;;  %v18736_v57 = vcombine.high %v1352_v52, %v1368_v16  ;;  %v1464_v38 = vld [vmem:[#allocation8 + $0x1fd8] sm:$0xff] }
 0x689   :  { %14599 = vmatpush1.bf16.msra.mxu0 %v18605_v12  ;;  %v18733_v12 = vcombine.low %v1351_v43, %v1367_v50  ;;  %v1479_v43 = vld [vmem:[#allocation8 + $0x2050] sm:$0xff] }
 0x68a   :  { %14763 = vmatpush1.bf16.msra.mxu1 %v18607_v17  ;;  %14600 = vmatprep.subr.bf16.mxu0 %v18638_v18  ;;  %v18735_v17 = vcombine.low %v1352_v52, %v1368_v16  ;;  %v18766_v18 = vcombine.high %v1383_v58, %v1399_v62  ;;  %v1495_v50 = vld [vmem:[#allocation8 + $0x20d0] sm:$0xff]  ;;  %v1480_v52 = vld [vmem:[#allocation8 + $0x2058] sm:$0xff] }
 0x68b   :  { %14764 = vmatprep.subr.bf16.mxu1 %v18640_v21  ;;  %v18768_v21 = vcombine.high %v1384_v4, %v1400_v9  ;;  %v1496_v16 = vld [vmem:[#allocation8 + $0x20d8] sm:$0xff] }
 0x68d   :  { %14601 = vmatpush1.bf16.msra.mxu0 %v18637_v15  ;;  %v18765_v15 = vcombine.low %v1383_v58, %v1399_v62  ;;  %v1511_v58 = vld [vmem:[#allocation8 + $0x2150] sm:$0xff] }
 0x68e   :  { %14765 = vmatpush1.bf16.msra.mxu1 %v18639_v28  ;;  %14602 = vmatprep.subr.bf16.mxu0 %v18670_v31  ;;  %v18767_v28 = vcombine.low %v1384_v4, %v1400_v9  ;;  %v18798_v31 = vcombine.high %v1415_v59, %v1431_v22  ;;  %v1527_v62 = vld [vmem:[#allocation8 + $0x21d0] sm:$0xff]  ;;  %v18861_v4 = vcombine.low %v1479_v43, %v1495_v50  ;;  %v1512_v9 = vld [vmem:[#allocation8 + $0x2158] sm:$0xff] }
 0x68f   :  { %14766 = vmatprep.subr.bf16.mxu1 %v18672_v32  ;;  %v18800_v32 = vcombine.high %v1416_v26, %v1432_v27 }
 0x691   :  { %14603 = vmatpush1.bf16.msra.mxu0 %v18669_v39  ;;  %v18797_v39 = vcombine.low %v1415_v59, %v1431_v22  ;;  %v1559_v59 = vld [vmem:[#allocation8 + $0x22d0] sm:$0xff] }
 0x692   :  { %14767 = vmatpush1.bf16.msra.mxu1 %v18671_v55  ;;  %14604 = vmatprep.subr.bf16.mxu0 %v18702_v40  ;;  %v18799_v55 = vcombine.low %v1416_v26, %v1432_v27  ;;  %v18830_v40 = vcombine.high %v1447_v35, %v1463_v63  ;;  %v1544_v26 = vld [vmem:[#allocation8 + $0x2258] sm:$0xff] }
 0x693   :  { %14768 = vmatprep.subr.bf16.mxu1 %v18704_v42  ;;  %v18832_v42 = vcombine.high %v1448_v37, %v1464_v38  ;;  %v1560_v27 = vld [vmem:[#allocation8 + $0x22d8] sm:$0xff] }
 0x695   :  { %14605 = vmatpush1.bf16.msra.mxu0 %v18701_v53  ;;  %v18829_v53 = vcombine.low %v1447_v35, %v1463_v63  ;;  %v1575_v35 = vld [vmem:[#allocation8 + $0x2350] sm:$0xff] }
 0x696   :  { %14769 = vmatpush1.bf16.msra.mxu1 %v18703_v44  ;;  %14606 = vmatprep.subr.bf16.mxu0 %v18734_v54  ;;  %v18831_v44 = vcombine.low %v1448_v37, %v1464_v38  ;;  %v18862_v54 = vcombine.high %v1479_v43, %v1495_v50  ;;  %v1591_v63 = vld [vmem:[#allocation8 + $0x23d0] sm:$0xff]  ;;  %v1576_v37 = vld [vmem:[#allocation8 + $0x2358] sm:$0xff] }
 0x697   :  { %14770 = vmatprep.subr.bf16.mxu1 %v18736_v57  ;;  %v18864_v57 = vcombine.high %v1480_v52, %v1496_v16  ;;  %v1592_v38 = vld [vmem:[#allocation8 + $0x23d8] sm:$0xff]  ;;  %v1607_v43 = vld [vmem:[#allocation8 + $0x2450] sm:$0xff] }
 0x698   :  { %v1623_v50 = vld [vmem:[#allocation8 + $0x24d0] sm:$0xff] }
 0x699   :  { %14607 = vmatpush1.bf16.msra.mxu0 %v18733_v12  ;;  %v1528_v12 = vld [vmem:[#allocation8 + $0x21d8] sm:$0xff] }
 0x69a   :  { %14771 = vmatpush1.bf16.msra.mxu1 %v18735_v17  ;;  %14608 = vmatprep.subr.bf16.mxu0 %v18766_v18  ;;  %v18863_v17 = vcombine.low %v1480_v52, %v1496_v16  ;;  %v18894_v18 = vcombine.high %v1511_v58, %v1527_v62  ;;  %v18896_v22 = vcombine.high %v1512_v9, %v1528_v12  ;;  %v1608_v52 = vld [vmem:[#allocation8 + $0x2458] sm:$0xff] }
 0x69b   :  { %14772 = vmatprep.subr.bf16.mxu1 %v18768_v21  ;;  %v1543_v21 = vld [vmem:[#allocation8 + $0x2250] sm:$0xff]  ;;  %v1624_v16 = vld [vmem:[#allocation8 + $0x24d8] sm:$0xff] }
 0x69d   :  { %14609 = vmatpush1.bf16.msra.mxu0 %v18765_v15  ;;  %v18893_v15 = vcombine.low %v1511_v58, %v1527_v62  ;;  %v1639_v58 = vld [vmem:[#allocation8 + $0x2550] sm:$0xff] }
 0x69e   :  { %14773 = vmatpush1.bf16.msra.mxu1 %v18767_v28  ;;  %14610 = vmatprep.subr.bf16.mxu0 %v18798_v31  ;;  %v18895_v28 = vcombine.low %v1512_v9, %v1528_v12  ;;  %v18926_v31 = vcombine.high %v1543_v21, %v1559_v59  ;;  %v1655_v62 = vld [vmem:[#allocation8 + $0x25d0] sm:$0xff]  ;;  %v1656_v9 = vld [vmem:[#allocation8 + $0x25d8] sm:$0xff]  ;;  %v18989_v12 = vcombine.low %v1607_v43, %v1623_v50 }
 0x69f   :  { %14774 = vmatprep.subr.bf16.mxu1 %v18800_v32  ;;  %v18928_v32 = vcombine.high %v1544_v26, %v1560_v27 }
 0x6a1   :  { %14611 = vmatpush1.bf16.msra.mxu0 %v18797_v39  ;;  %v18925_v39 = vcombine.low %v1543_v21, %v1559_v59  ;;  %v1671_v59 = vld [vmem:[#allocation8 + $0x2650] sm:$0xff] }
 0x6a2   :  { %14775 = vmatpush1.bf16.msra.mxu1 %v18799_v55  ;;  %14612 = vmatprep.subr.bf16.mxu0 %v18830_v40  ;;  %v18927_v55 = vcombine.low %v1544_v26, %v1560_v27  ;;  %v18958_v40 = vcombine.high %v1575_v35, %v1591_v63  ;;  %v1672_v26 = vld [vmem:[#allocation8 + $0x2658] sm:$0xff] }
 0x6a3   :  { %14776 = vmatprep.subr.bf16.mxu1 %v18832_v42  ;;  %v18960_v42 = vcombine.high %v1576_v37, %v1592_v38  ;;  %v1688_v27 = vld [vmem:[#allocation8 + $0x26d8] sm:$0xff] }
 0x6a5   :  { %14613 = vmatpush1.bf16.msra.mxu0 %v18829_v53  ;;  %v18957_v53 = vcombine.low %v1575_v35, %v1591_v63  ;;  %v1703_v35 = vld [vmem:[#allocation8 + $0x2750] sm:$0xff] }
 0x6a6   :  { %14777 = vmatpush1.bf16.msra.mxu1 %v18831_v44  ;;  %14623 = vmatprep.subr.bf16.mxu0 %v18862_v54  ;;  %v18959_v44 = vcombine.low %v1576_v37, %v1592_v38  ;;  %v18990_v54 = vcombine.high %v1607_v43, %v1623_v50  ;;  %v1719_v63 = vld [vmem:[#allocation8 + $0x27d0] sm:$0xff]  ;;  %v1704_v37 = vld [vmem:[#allocation8 + $0x2758] sm:$0xff] }
 0x6a7   :  { %14787 = vmatprep.subr.bf16.mxu1 %v18864_v57  ;;  %v18992_v57 = vcombine.high %v1608_v52, %v1624_v16  ;;  %v1720_v38 = vld [vmem:[#allocation8 + $0x27d8] sm:$0xff]  ;;  %v1735_v43 = vld [vmem:[#allocation8 + $0x2850] sm:$0xff] }
 0x6a8   :  { %14615 = vmatmul.mubr.bf16.vlgmr.msra.gmra.mrb[28].mxu0 %v22926_v51  ;;  %v1751_v50 = vld [vmem:[#allocation8 + $0x28d0] sm:$0xff] }
 0x6a9   :  { %14779 = vmatmul.mubr.bf16.vlgmr.msra.gmra.mrb[28].mxu1 %v22926_v51  ;;  %14624 = vmatpush1.bf16.msra.mxu0 %v18861_v4  ;;  %v1640_v4 = vld [vmem:[#allocation8 + $0x2558] sm:$0xff] }
 0x6aa   :  { %14655 = vmatprep.mubr.bf16.mxu0 %v22928_v61  ;;  %14788 = vmatpush1.bf16.msra.mxu1 %v18863_v17  ;;  %v18991_v17 = vcombine.low %v1608_v52, %v1624_v16  ;;  %v19024_v21 = vcombine.high %v1640_v4, %v1656_v9  ;;  %v1736_v52 = vld [vmem:[#allocation8 + $0x2858] sm:$0xff] }
 0x6ab   :  { %14819 = vmatprep.mubr.bf16.mxu1 %v22928_v61  ;;  %14625 = vmatprep.subr.bf16.mxu0 %v18894_v18  ;;  %v19022_v18 = vcombine.high %v1639_v58, %v1655_v62  ;;  %v1752_v16 = vld [vmem:[#allocation8 + $0x28d8] sm:$0xff] }
 0x6ac   :  { %14789 = vmatprep.subr.bf16.mxu1 %v18896_v22  ;;  %v1687_v22 = vld [vmem:[#allocation8 + $0x26d0] sm:$0xff] }
 0x6ad   :  { %14626 = vmatpush1.bf16.msra.mxu0 %v18893_v15  ;;  %v19021_v15 = vcombine.low %v1639_v58, %v1655_v62  ;;  %v1767_v58 = vld [vmem:[#allocation8 + $0x2950] sm:$0xff] }
 0x6ae   :  { %14790 = vmatpush1.bf16.msra.mxu1 %v18895_v28  ;;  %14627 = vmatprep.subr.bf16.mxu0 %v18926_v31  ;;  %v19023_v28 = vcombine.low %v1640_v4, %v1656_v9  ;;  %v19054_v31 = vcombine.high %v1671_v59, %v1687_v22  ;;  %v1783_v62 = vld [vmem:[#allocation8 + $0x29d0] sm:$0xff]  ;;  %v1768_v4 = vld [vmem:[#allocation8 + $0x2958] sm:$0xff] }
 0x6af   :  { %14791 = vmatprep.subr.bf16.mxu1 %v18928_v32  ;;  %v19056_v32 = vcombine.high %v1672_v26, %v1688_v27  ;;  %v1784_v9 = vld [vmem:[#allocation8 + $0x29d8] sm:$0xff] }
 0x6b1   :  { %14628 = vmatpush1.bf16.msra.mxu0 %v18925_v39  ;;  %v19053_v39 = vcombine.low %v1671_v59, %v1687_v22  ;;  %v1799_v59 = vld [vmem:[#allocation8 + $0x2a50] sm:$0xff] }
 0x6b2   :  { %14792 = vmatpush1.bf16.msra.mxu1 %v18927_v55  ;;  %14629 = vmatprep.subr.bf16.mxu0 %v18958_v40  ;;  %v19055_v55 = vcombine.low %v1672_v26, %v1688_v27  ;;  %v19086_v40 = vcombine.high %v1703_v35, %v1719_v63  ;;  %v1815_v22 = vld [vmem:[#allocation8 + $0x2ad0] sm:$0xff]  ;;  %v1800_v26 = vld [vmem:[#allocation8 + $0x2a58] sm:$0xff] }
 0x6b3   :  { %14793 = vmatprep.subr.bf16.mxu1 %v18960_v42  ;;  %v19088_v42 = vcombine.high %v1704_v37, %v1720_v38  ;;  %v1816_v27 = vld [vmem:[#allocation8 + $0x2ad8] sm:$0xff] }
 0x6b5   :  { %14630 = vmatpush1.bf16.msra.mxu0 %v18957_v53  ;;  %v19085_v53 = vcombine.low %v1703_v35, %v1719_v63  ;;  %v1831_v35 = vld [vmem:[#allocation8 + $0x2b50] sm:$0xff] }
 0x6b6   :  { %14794 = vmatpush1.bf16.msra.mxu1 %v18959_v44  ;;  %14631 = vmatprep.subr.bf16.mxu0 %v18990_v54  ;;  %v19087_v44 = vcombine.low %v1704_v37, %v1720_v38  ;;  %v19118_v54 = vcombine.high %v1735_v43, %v1751_v50  ;;  %v1847_v63 = vld [vmem:[#allocation8 + $0x2bd0] sm:$0xff]  ;;  %v1832_v37 = vld [vmem:[#allocation8 + $0x2b58] sm:$0xff] }
 0x6b7   :  { %14795 = vmatprep.subr.bf16.mxu1 %v18992_v57  ;;  %v19120_v57 = vcombine.high %v1736_v52, %v1752_v16  ;;  %v1848_v38 = vld [vmem:[#allocation8 + $0x2bd8] sm:$0xff] }
 0x6b9   :  { %14632 = vmatpush1.bf16.msra.mxu0 %v18989_v12  ;;  %v19117_v12 = vcombine.low %v1735_v43, %v1751_v50  ;;  %v1863_v43 = vld [vmem:[#allocation8 + $0x2c50] sm:$0xff] }
 0x6ba   :  { %14796 = vmatpush1.bf16.msra.mxu1 %v18991_v17  ;;  %14633 = vmatprep.subr.bf16.mxu0 %v19022_v18  ;;  %v19119_v17 = vcombine.low %v1736_v52, %v1752_v16  ;;  %v19150_v18 = vcombine.high %v1767_v58, %v1783_v62  ;;  %v1879_v50 = vld [vmem:[#allocation8 + $0x2cd0] sm:$0xff]  ;;  %v1864_v52 = vld [vmem:[#allocation8 + $0x2c58] sm:$0xff] }
 0x6bb   :  { %14797 = vmatprep.subr.bf16.mxu1 %v19024_v21  ;;  %v19152_v21 = vcombine.high %v1768_v4, %v1784_v9  ;;  %v1880_v16 = vld [vmem:[#allocation8 + $0x2cd8] sm:$0xff] }
 0x6bd   :  { %14634 = vmatpush1.bf16.msra.mxu0 %v19021_v15  ;;  %v19149_v15 = vcombine.low %v1767_v58, %v1783_v62  ;;  %v1895_v58 = vld [vmem:[#allocation8 + $0x2d50] sm:$0xff] }
 0x6be   :  { %14798 = vmatpush1.bf16.msra.mxu1 %v19023_v28  ;;  %14635 = vmatprep.subr.bf16.mxu0 %v19054_v31  ;;  %v19151_v28 = vcombine.low %v1768_v4, %v1784_v9  ;;  %v19182_v31 = vcombine.high %v1799_v59, %v1815_v22  ;;  %v1911_v62 = vld [vmem:[#allocation8 + $0x2dd0] sm:$0xff]  ;;  %v1896_v4 = vld [vmem:[#allocation8 + $0x2d58] sm:$0xff] }
 0x6bf   :  { %14799 = vmatprep.subr.bf16.mxu1 %v19056_v32  ;;  %v19184_v32 = vcombine.high %v1800_v26, %v1816_v27  ;;  %v1912_v9 = vld [vmem:[#allocation8 + $0x2dd8] sm:$0xff] }
 0x6c1   :  { %14636 = vmatpush1.bf16.msra.mxu0 %v19053_v39  ;;  %v19181_v39 = vcombine.low %v1799_v59, %v1815_v22  ;;  %v1927_v59 = vld [vmem:[#allocation8 + $0x2e50] sm:$0xff] }
 0x6c2   :  { %14800 = vmatpush1.bf16.msra.mxu1 %v19055_v55  ;;  %14637 = vmatprep.subr.bf16.mxu0 %v19086_v40  ;;  %v19183_v55 = vcombine.low %v1800_v26, %v1816_v27  ;;  %v19214_v40 = vcombine.high %v1831_v35, %v1847_v63  ;;  %v1943_v22 = vld [vmem:[#allocation8 + $0x2ed0] sm:$0xff]  ;;  %v1928_v26 = vld [vmem:[#allocation8 + $0x2e58] sm:$0xff] }
 0x6c3   :  { %14801 = vmatprep.subr.bf16.mxu1 %v19088_v42  ;;  %v19216_v42 = vcombine.high %v1832_v37, %v1848_v38  ;;  %v1944_v27 = vld [vmem:[#allocation8 + $0x2ed8] sm:$0xff] }
 0x6c5   :  { %14638 = vmatpush1.bf16.msra.mxu0 %v19085_v53  ;;  %v19213_v53 = vcombine.low %v1831_v35, %v1847_v63  ;;  %v1959_v35 = vld [vmem:[#allocation8 + $0x2f50] sm:$0xff] }
 0x6c6   :  { %14802 = vmatpush1.bf16.msra.mxu1 %v19087_v44  ;;  %14639 = vmatprep.subr.bf16.mxu0 %v19118_v54  ;;  %v19215_v44 = vcombine.low %v1832_v37, %v1848_v38  ;;  %v19246_v54 = vcombine.high %v1863_v43, %v1879_v50  ;;  %v1975_v63 = vld [vmem:[#allocation8 + $0x2fd0] sm:$0xff]  ;;  %v1960_v37 = vld [vmem:[#allocation8 + $0x2f58] sm:$0xff] }
 0x6c7   :  { %14803 = vmatprep.subr.bf16.mxu1 %v19120_v57  ;;  %v19248_v57 = vcombine.high %v1864_v52, %v1880_v16  ;;  %v1976_v38 = vld [vmem:[#allocation8 + $0x2fd8] sm:$0xff] }
 0x6c9   :  { %14640 = vmatpush1.bf16.msra.mxu0 %v19117_v12  ;;  %v19245_v12 = vcombine.low %v1863_v43, %v1879_v50  ;;  %v1991_v43 = vld [vmem:[#allocation8 + $0x3050] sm:$0xff] }
 0x6ca   :  { %14804 = vmatpush1.bf16.msra.mxu1 %v19119_v17  ;;  %14641 = vmatprep.subr.bf16.mxu0 %v19150_v18  ;;  %v19247_v17 = vcombine.low %v1864_v52, %v1880_v16  ;;  %v19278_v18 = vcombine.high %v1895_v58, %v1911_v62  ;;  %v2007_v50 = vld [vmem:[#allocation8 + $0x30d0] sm:$0xff]  ;;  %v1992_v52 = vld [vmem:[#allocation8 + $0x3058] sm:$0xff] }
 0x6cb   :  { %14805 = vmatprep.subr.bf16.mxu1 %v19152_v21  ;;  %v19280_v21 = vcombine.high %v1896_v4, %v1912_v9  ;;  %v2008_v16 = vld [vmem:[#allocation8 + $0x30d8] sm:$0xff] }
 0x6cd   :  { %14642 = vmatpush1.bf16.msra.mxu0 %v19149_v15  ;;  %v19277_v15 = vcombine.low %v1895_v58, %v1911_v62  ;;  %v2023_v58 = vld [vmem:[#allocation8 + $0x3150] sm:$0xff] }
 0x6ce   :  { %14806 = vmatpush1.bf16.msra.mxu1 %v19151_v28  ;;  %14643 = vmatprep.subr.bf16.mxu0 %v19182_v31  ;;  %v19279_v28 = vcombine.low %v1896_v4, %v1912_v9  ;;  %v19310_v31 = vcombine.high %v1927_v59, %v1943_v22  ;;  %v2039_v62 = vld [vmem:[#allocation8 + $0x31d0] sm:$0xff]  ;;  %v19373_v4 = vcombine.low %v1991_v43, %v2007_v50  ;;  %v2024_v9 = vld [vmem:[#allocation8 + $0x3158] sm:$0xff] }
 0x6cf   :  { %14807 = vmatprep.subr.bf16.mxu1 %v19184_v32  ;;  %v19312_v32 = vcombine.high %v1928_v26, %v1944_v27 }
 0x6d1   :  { %14644 = vmatpush1.bf16.msra.mxu0 %v19181_v39  ;;  %v19309_v39 = vcombine.low %v1927_v59, %v1943_v22  ;;  %v2071_v59 = vld [vmem:[#allocation8 + $0x32d0] sm:$0xff] }
 0x6d2   :  { %14808 = vmatpush1.bf16.msra.mxu1 %v19183_v55  ;;  %14645 = vmatprep.subr.bf16.mxu0 %v19214_v40  ;;  %v19311_v55 = vcombine.low %v1928_v26, %v1944_v27  ;;  %v19342_v40 = vcombine.high %v1959_v35, %v1975_v63  ;;  %v2056_v26 = vld [vmem:[#allocation8 + $0x3258] sm:$0xff] }
 0x6d3   :  { %14809 = vmatprep.subr.bf16.mxu1 %v19216_v42  ;;  %v19344_v42 = vcombine.high %v1960_v37, %v1976_v38  ;;  %v2072_v27 = vld [vmem:[#allocation8 + $0x32d8] sm:$0xff] }
 0x6d5   :  { %14646 = vmatpush1.bf16.msra.mxu0 %v19213_v53  ;;  %v19341_v53 = vcombine.low %v1959_v35, %v1975_v63  ;;  %v2087_v35 = vld [vmem:[#allocation8 + $0x3350] sm:$0xff] }
 0x6d6   :  { %14810 = vmatpush1.bf16.msra.mxu1 %v19215_v44  ;;  %14647 = vmatprep.subr.bf16.mxu0 %v19246_v54  ;;  %v19343_v44 = vcombine.low %v1960_v37, %v1976_v38  ;;  %v19374_v54 = vcombine.high %v1991_v43, %v2007_v50  ;;  %v2103_v63 = vld [vmem:[#allocation8 + $0x33d0] sm:$0xff]  ;;  %v2088_v37 = vld [vmem:[#allocation8 + $0x3358] sm:$0xff] }
 0x6d7   :  { %14811 = vmatprep.subr.bf16.mxu1 %v19248_v57  ;;  %v19376_v57 = vcombine.high %v1992_v52, %v2008_v16  ;;  %v2104_v38 = vld [vmem:[#allocation8 + $0x33d8] sm:$0xff]  ;;  %v2119_v43 = vld [vmem:[#allocation8 + $0x3450] sm:$0xff] }
 0x6d8   :  { %v2135_v50 = vld [vmem:[#allocation8 + $0x34d0] sm:$0xff] }
 0x6d9   :  { %14648 = vmatpush1.bf16.msra.mxu0 %v19245_v12  ;;  %v2040_v12 = vld [vmem:[#allocation8 + $0x31d8] sm:$0xff] }
 0x6da   :  { %14812 = vmatpush1.bf16.msra.mxu1 %v19247_v17  ;;  %14649 = vmatprep.subr.bf16.mxu0 %v19278_v18  ;;  %v19375_v17 = vcombine.low %v1992_v52, %v2008_v16  ;;  %v19406_v18 = vcombine.high %v2023_v58, %v2039_v62  ;;  %v19408_v22 = vcombine.high %v2024_v9, %v2040_v12  ;;  %v2120_v52 = vld [vmem:[#allocation8 + $0x3458] sm:$0xff] }
 0x6db   :  { %14813 = vmatprep.subr.bf16.mxu1 %v19280_v21  ;;  %v2055_v21 = vld [vmem:[#allocation8 + $0x3250] sm:$0xff]  ;;  %v2136_v16 = vld [vmem:[#allocation8 + $0x34d8] sm:$0xff] }
 0x6dd   :  { %14650 = vmatpush1.bf16.msra.mxu0 %v19277_v15  ;;  %v19405_v15 = vcombine.low %v2023_v58, %v2039_v62  ;;  %v2151_v58 = vld [vmem:[#allocation8 + $0x3550] sm:$0xff] }
 0x6de   :  { %14814 = vmatpush1.bf16.msra.mxu1 %v19279_v28  ;;  %14651 = vmatprep.subr.bf16.mxu0 %v19310_v31  ;;  %v19407_v28 = vcombine.low %v2024_v9, %v2040_v12  ;;  %v19438_v31 = vcombine.high %v2055_v21, %v2071_v59  ;;  %v2167_v62 = vld [vmem:[#allocation8 + $0x35d0] sm:$0xff]  ;;  %v2168_v9 = vld [vmem:[#allocation8 + $0x35d8] sm:$0xff]  ;;  %v19501_v12 = vcombine.low %v2119_v43, %v2135_v50 }
 0x6df   :  { %14815 = vmatprep.subr.bf16.mxu1 %v19312_v32  ;;  %v19440_v32 = vcombine.high %v2056_v26, %v2072_v27 }
 0x6e1   :  { %14652 = vmatpush1.bf16.msra.mxu0 %v19309_v39  ;;  %v19437_v39 = vcombine.low %v2055_v21, %v2071_v59  ;;  %v2183_v59 = vld [vmem:[#allocation8 + $0x3650] sm:$0xff] }
 0x6e2   :  { %14816 = vmatpush1.bf16.msra.mxu1 %v19311_v55  ;;  %14653 = vmatprep.subr.bf16.mxu0 %v19342_v40  ;;  %v19439_v55 = vcombine.low %v2056_v26, %v2072_v27  ;;  %v19470_v40 = vcombine.high %v2087_v35, %v2103_v63  ;;  %v2184_v26 = vld [vmem:[#allocation8 + $0x3658] sm:$0xff] }
 0x6e3   :  { %14817 = vmatprep.subr.bf16.mxu1 %v19344_v42  ;;  %v19472_v42 = vcombine.high %v2088_v37, %v2104_v38  ;;  %v2200_v27 = vld [vmem:[#allocation8 + $0x36d8] sm:$0xff] }
 0x6e5   :  { %14654 = vmatpush1.bf16.msra.mxu0 %v19341_v53  ;;  %v19469_v53 = vcombine.low %v2087_v35, %v2103_v63  ;;  %v19568_v35 = vcombine.high %v2184_v26, %v2200_v27  ;;  %v2215_v63 = vld [vmem:[#allocation8 + $0x3750] sm:$0xff] }
 0x6e6   :  { %14818 = vmatpush1.bf16.msra.mxu1 %v19343_v44  ;;  %14664 = vmatprep.subr.bf16.mxu0 %v19374_v54  ;;  %v19471_v44 = vcombine.low %v2088_v37, %v2104_v38  ;;  %v19502_v54 = vcombine.high %v2119_v43, %v2135_v50  ;;  %v2231_v37 = vld [vmem:[#allocation8 + $0x37d0] sm:$0xff] }
 0x6e7   :  { %14828 = vmatprep.subr.bf16.mxu1 %v19376_v57  ;;  %v19504_v57 = vcombine.high %v2120_v52, %v2136_v16 }
 0x6e8   :  { %14656 = vmatmul.mubr.bf16.vlgmr.msra.gmra.mrb[28].mxu0 %v22946_v34 }
 0x6e9   :  { %14820 = vmatmul.mubr.bf16.vlgmr.msra.gmra.mrb[28].mxu1 %v22946_v34  ;;  %14665 = vmatpush1.bf16.msra.mxu0 %v19373_v4  ;;  %v2152_v4 = vld [vmem:[#allocation8 + $0x3558] sm:$0xff] }
 0x6ea   :  { %14696 = vmatprep.mubr.bf16.mxu0 %v22948_v41  ;;  %14829 = vmatpush1.bf16.msra.mxu1 %v19375_v17  ;;  %v19503_v17 = vcombine.low %v2120_v52, %v2136_v16  ;;  %v19536_v21 = vcombine.high %v2152_v4, %v2168_v9 }
 0x6eb   :  { %14860 = vmatprep.mubr.bf16.mxu1 %v22948_v41  ;;  %14666 = vmatprep.subr.bf16.mxu0 %v19406_v18  ;;  %v19534_v18 = vcombine.high %v2151_v58, %v2167_v62 }
 0x6ec   :  { %14830 = vmatprep.subr.bf16.mxu1 %v19408_v22  ;;  %v2199_v22 = vld [vmem:[#allocation8 + $0x36d0] sm:$0xff] }
 0x6ed   :  { %14667 = vmatpush1.bf16.msra.mxu0 %v19405_v15  ;;  %v19533_v15 = vcombine.low %v2151_v58, %v2167_v62  ;;  %v19565_v50 = vcombine.low %v2183_v59, %v2199_v22  ;;  %v2247_v58 = vld [vmem:[#allocation8 + $0x3850] sm:$0xff] }
 0x6ee   :  { %14831 = vmatpush1.bf16.msra.mxu1 %v19407_v28  ;;  %14668 = vmatprep.subr.bf16.mxu0 %v19438_v31  ;;  %v19535_v28 = vcombine.low %v2152_v4, %v2168_v9  ;;  %v19566_v31 = vcombine.high %v2183_v59, %v2199_v22  ;;  %v2263_v62 = vld [vmem:[#allocation8 + $0x38d0] sm:$0xff]  ;;  %v2248_v4 = vld [vmem:[#allocation8 + $0x3858] sm:$0xff] }
 0x6ef   :  { %14832 = vmatprep.subr.bf16.mxu1 %v19440_v32  ;;  %v2264_v9 = vld [vmem:[#allocation8 + $0x38d8] sm:$0xff]  ;;  %v2279_v59 = vld [vmem:[#allocation8 + $0x3950] sm:$0xff] }
 0x6f0   :  { %v2295_v22 = vld [vmem:[#allocation8 + $0x39d0] sm:$0xff] }
 0x6f1   :  { %14669 = vmatpush1.bf16.msra.mxu0 %v19437_v39 }
 0x6f2   :  { %14833 = vmatpush1.bf16.msra.mxu1 %v19439_v55  ;;  %14670 = vmatprep.subr.bf16.mxu0 %v19470_v40  ;;  %v2216_v55 = vld [vmem:[#allocation8 + $0x3758] sm:$0xff] }
 0x6f3   :  { %14834 = vmatprep.subr.bf16.mxu1 %v19472_v42  ;;  %v2232_v40 = vld [vmem:[#allocation8 + $0x37d8] sm:$0xff] }
 0x6f5   :  { %14671 = vmatpush1.bf16.msra.mxu0 %v19469_v53  ;;  %v19567_v53 = vcombine.low %v2184_v26, %v2200_v27  ;;  %v2296_v26 = vld [vmem:[#allocation8 + $0x39d8] sm:$0xff]  ;;  %v19629_v27 = vcombine.low %v2247_v58, %v2263_v62 }
 0x6f6   :  { %14835 = vmatpush1.bf16.msra.mxu1 %v19471_v44  ;;  %14672 = vmatprep.subr.bf16.mxu0 %v19502_v54  ;;  %v19598_v44 = vcombine.high %v2215_v63, %v2231_v37 }
 0x6f7   :  { %14836 = vmatprep.subr.bf16.mxu1 %v19504_v57  ;;  %v19600_v57 = vcombine.high %v2216_v55, %v2232_v40 }
 0x6f9   :  { %14673 = vmatpush1.bf16.msra.mxu0 %v19501_v12  ;;  %v19597_v12 = vcombine.low %v2215_v63, %v2231_v37  ;;  %v2327_v63 = vld [vmem:[#allocation8 + $0x3ad0] sm:$0xff]  ;;  %v2312_v37 = vld [vmem:[#allocation8 + $0x3a58] sm:$0xff] }
 0x6fa   :  { %14837 = vmatpush1.bf16.msra.mxu1 %v19503_v17  ;;  %14674 = vmatprep.subr.bf16.mxu0 %v19534_v18  ;;  %v19599_v17 = vcombine.low %v2216_v55, %v2232_v40  ;;  %v19630_v18 = vcombine.high %v2247_v58, %v2263_v62  ;;  %v19661_v55 = vcombine.low %v2279_v59, %v2295_v22 }
 0x6fb   :  { %v23073_v32 = vpop.f32.mrb[24].mxu0  ;;  %14838 = vmatprep.subr.bf16.mxu1 %v19536_v21  ;;  %v19632_v21 = vcombine.high %v2248_v4, %v2264_v9 }
 0x6fc   :  { %v23075_v38 = vpop.f32.mrb[24].mxu1  ;;  %v23077_v39 = vpop.f32.mrb[25].mxu0 }
 0x6fd   :  { %v23079_v42 = vpop.f32.mrb[25].mxu1  ;;  %v14374_v43 = vpop.f32.mrb[26].mxu0  ;;  %14675 = vmatpush1.bf16.msra.mxu0 %v19533_v15  ;;  %v2280_v15 = vld [vmem:[#allocation8 + $0x3958] sm:$0xff] }
 0x6fe   :  { %v14538_v52 = vpop.f32.mrb[26].mxu1  ;;  %14839 = vmatpush1.bf16.msra.mxu1 %v19535_v28  ;;  %v14375_v16 = vpop.f32.mrb[27].mxu0  ;;  %14676 = vmatprep.subr.bf16.mxu0 %v19566_v31  ;;  %v19631_v28 = vcombine.low %v2248_v4, %v2264_v9  ;;  %v19662_v31 = vcombine.high %v2279_v59, %v2295_v22  ;;  %v2311_v43 = vld [vmem:[#allocation8 + $0x3a50] sm:$0xff]  ;;  %v19663_v40 = vcombine.low %v2280_v15, %v2296_v26 }
 0x6ff   :  { %v14539_v54 = vpop.f32.mrb[27].mxu1  ;;  %14840 = vmatprep.subr.bf16.mxu1 %v19568_v35  ;;  %v19664_v35 = vcombine.high %v2280_v15, %v2296_v26  ;;  %v19694_v52 = vcombine.high %v2311_v43, %v2327_v63  ;;  %v19693_v58 = vcombine.low %v2311_v43, %v2327_v63 }
 0x700   :  { %v2344_v54 = vld [vmem:[#allocation8 + $0x3b58] sm:$0xff] }
 0x701   :  { %14677 = vmatpush1.bf16.msra.mxu0 %v19565_v50  ;;  %v2328_v50 = vld [vmem:[#allocation8 + $0x3ad8] sm:$0xff] }
 0x702   :  { %14841 = vmatpush1.bf16.msra.mxu1 %v19567_v53  ;;  %14678 = vmatprep.subr.bf16.mxu0 %v19598_v44  ;;  %v19696_v16 = vcombine.high %v2312_v37, %v2328_v50  ;;  %v2343_v53 = vld [vmem:[#allocation8 + $0x3b50] sm:$0xff]  ;;  %v19695_v62 = vcombine.low %v2312_v37, %v2328_v50 }
 0x703   :  { %14842 = vmatprep.subr.bf16.mxu1 %v19600_v57  ;;  %v2359_v44 = vld [vmem:[#allocation8 + $0x3bd0] sm:$0xff]  ;;  %v2360_v57 = vld [vmem:[#allocation8 + $0x3bd8] sm:$0xff] }
 0x704   :  { %v19726_v4 = vcombine.high %v2343_v53, %v2359_v44  ;;  %v19728_v9 = vcombine.high %v2344_v54, %v2360_v57  ;;  %v19725_v59 = vcombine.low %v2343_v53, %v2359_v44  ;;  %v19727_v22 = vcombine.low %v2344_v54, %v2360_v57 }
 0x705   :  { %14679 = vmatpush1.bf16.msra.mxu0 %v19597_v12  ;;  %v2375_v12 = vld [vmem:[#allocation8 + $0x3c50] sm:$0xff] }
 0x706   :  { %14843 = vmatpush1.bf16.msra.mxu1 %v19599_v17  ;;  %14680 = vmatprep.subr.bf16.mxu0 %v19630_v18  ;;  %v2391_v17 = vld [vmem:[#allocation8 + $0x3cd0] sm:$0xff]  ;;  %v2376_v18 = vld [vmem:[#allocation8 + $0x3c58] sm:$0xff] }
 0x707   :  { %14844 = vmatprep.subr.bf16.mxu1 %v19632_v21  ;;  %v2392_v21 = vld [vmem:[#allocation8 + $0x3cd8] sm:$0xff]  ;;  %v19758_v15 = vcombine.high %v2375_v12, %v2391_v17  ;;  %v19757_v43 = vcombine.low %v2375_v12, %v2391_v17 }
 0x708   :  { %v19760_v26 = vcombine.high %v2376_v18, %v2392_v21  ;;  %v19759_v63 = vcombine.low %v2376_v18, %v2392_v21 }
 0x709   :  { %14681 = vmatpush1.bf16.msra.mxu0 %v19629_v27  ;;  %v2407_v27 = vld [vmem:[#allocation8 + $0x3d50] sm:$0xff] }
 0x70a   :  { %14845 = vmatpush1.bf16.msra.mxu1 %v19631_v28  ;;  %14682 = vmatprep.subr.bf16.mxu0 %v19662_v31  ;;  %v2423_v28 = vld [vmem:[#allocation8 + $0x3dd0] sm:$0xff]  ;;  %v2408_v31 = vld [vmem:[#allocation8 + $0x3d58] sm:$0xff] }
 0x70b   :  { %14846 = vmatprep.subr.bf16.mxu1 %v19664_v35  ;;  %v2424_v35 = vld [vmem:[#allocation8 + $0x3dd8] sm:$0xff]  ;;  %v19790_v37 = vcombine.high %v2407_v27, %v2423_v28  ;;  %v19789_v53 = vcombine.low %v2407_v27, %v2423_v28 }
 0x70c   :  { %v19792_v50 = vcombine.high %v2408_v31, %v2424_v35  ;;  %v19791_v44 = vcombine.low %v2408_v31, %v2424_v35 }
 0x70d   :  { %14683 = vmatpush1.bf16.msra.mxu0 %v19661_v55  ;;  %v2439_v55 = vld [vmem:[#allocation8 + $0x3e50] sm:$0xff] }
 0x70e   :  { %14847 = vmatpush1.bf16.msra.mxu1 %v19663_v40  ;;  %14684 = vmatprep.subr.bf16.mxu0 %v19694_v52  ;;  %v2455_v40 = vld [vmem:[#allocation8 + $0x3ed0] sm:$0xff]  ;;  %v2440_v52 = vld [vmem:[#allocation8 + $0x3e58] sm:$0xff] }
 0x70f   :  { %14848 = vmatprep.subr.bf16.mxu1 %v19696_v16  ;;  %v2456_v16 = vld [vmem:[#allocation8 + $0x3ed8] sm:$0xff]  ;;  %v19822_v54 = vcombine.high %v2439_v55, %v2455_v40  ;;  %v19821_v12 = vcombine.low %v2439_v55, %v2455_v40  ;;  %v506_v55 = vld [vmem:[#allocation8 + $0x1e8] sm:$0xff] }
 0x710   :  { %v19824_v57 = vcombine.high %v2440_v52, %v2456_v16  ;;  %v19823_v17 = vcombine.low %v2440_v52, %v2456_v16  ;;  %v521_v16 = vld [vmem:[#allocation8 + $0x260] sm:$0xff] }
 0x711   :  { %14685 = vmatpush1.bf16.msra.mxu0 %v19693_v58  ;;  %v2471_v58 = vld [vmem:[#allocation8 + $0x3f50] sm:$0xff] }
 0x712   :  { %14849 = vmatpush1.bf16.msra.mxu1 %v19695_v62  ;;  %14686 = vmatprep.subr.bf16.mxu0 %v19726_v4  ;;  %v2487_v62 = vld [vmem:[#allocation8 + $0x3fd0] sm:$0xff]  ;;  %v2472_v4 = vld [vmem:[#allocation8 + $0x3f58] sm:$0xff] }
 0x713   :  { %14850 = vmatprep.subr.bf16.mxu1 %v19728_v9  ;;  %v2488_v9 = vld [vmem:[#allocation8 + $0x3fd8] sm:$0xff]  ;;  %v19854_v18 = vcombine.high %v2471_v58, %v2487_v62  ;;  %v19853_v27 = vcombine.low %v2471_v58, %v2487_v62 }
 0x714   :  { %v19856_v21 = vcombine.high %v2472_v4, %v2488_v9  ;;  %v19855_v28 = vcombine.low %v2472_v4, %v2488_v9 }
 0x715   :  { %14687 = vmatpush1.bf16.msra.mxu0 %v19725_v59  ;;  %v457_v59 = vld [vmem:[#allocation8 + $0x60] sm:$0xff] }
 0x716   :  { %14851 = vmatpush1.bf16.msra.mxu1 %v19727_v22  ;;  %14688 = vmatprep.subr.bf16.mxu0 %v19758_v15  ;;  %v473_v22 = vld [vmem:[#allocation8 + $0xe0] sm:$0xff]  ;;  %v458_v15 = vld [vmem:[#allocation8 + $0x68] sm:$0xff] }
 0x717   :  { %14852 = vmatprep.subr.bf16.mxu1 %v19760_v26  ;;  %v474_v26 = vld [vmem:[#allocation8 + $0xe8] sm:$0xff]  ;;  %v17842_v31 = vcombine.high %v457_v59, %v473_v22 }
 0x718   :  { %v17844_v35 = vcombine.high %v458_v15, %v474_v26  ;;  %v17843_v40 = vcombine.low %v458_v15, %v474_v26 }
 0x719   :  { %14689 = vmatpush1.bf16.msra.mxu0 %v19757_v43  ;;  %v489_v43 = vld [vmem:[#allocation8 + $0x160] sm:$0xff] }
 0x71a   :  { %14853 = vmatpush1.bf16.msra.mxu1 %v19759_v63  ;;  %14690 = vmatprep.subr.bf16.mxu0 %v19790_v37  ;;  %v505_v63 = vld [vmem:[#allocation8 + $0x1e0] sm:$0xff]  ;;  %v17841_v37 = vcombine.low %v457_v59, %v473_v22 }
 0x71b   :  { %14854 = vmatprep.subr.bf16.mxu1 %v19792_v50  ;;  %v490_v50 = vld [vmem:[#allocation8 + $0x168] sm:$0xff]  ;;  %v17874_v52 = vcombine.high %v489_v43, %v505_v63  ;;  %v17873_v58 = vcombine.low %v489_v43, %v505_v63 }
 0x71c   :  { %v17875_v62 = vcombine.low %v490_v50, %v506_v55 }
 0x71d   :  { %14691 = vmatpush1.bf16.msra.mxu0 %v19789_v53  ;;  %v537_v53 = vld [vmem:[#allocation8 + $0x2e0] sm:$0xff] }
 0x71e   :  { %14855 = vmatpush1.bf16.msra.mxu1 %v19791_v44  ;;  %14692 = vmatprep.subr.bf16.mxu0 %v19822_v54  ;;  %v17876_v44 = vcombine.high %v490_v50, %v506_v55  ;;  %v522_v54 = vld [vmem:[#allocation8 + $0x268] sm:$0xff]  ;;  %v17906_v4 = vcombine.high %v521_v16, %v537_v53  ;;  %v17905_v59 = vcombine.low %v521_v16, %v537_v53  ;;  %v617_v55 = vld [vmem:[#allocation8 + $0x560] sm:$0xff] }
 0x71f   :  { %14856 = vmatprep.subr.bf16.mxu1 %v19824_v57  ;;  %v538_v57 = vld [vmem:[#allocation8 + $0x2e8] sm:$0xff] }
 0x720   :  { %v17908_v9 = vcombine.high %v522_v54, %v538_v57  ;;  %v17907_v22 = vcombine.low %v522_v54, %v538_v57  ;;  %v634_v16 = vld [vmem:[#allocation8 + $0x5e8] sm:$0xff] }
 0x721   :  { %14693 = vmatpush1.bf16.msra.mxu0 %v19821_v12  ;;  %v553_v12 = vld [vmem:[#allocation8 + $0x360] sm:$0xff] }
 0x722   :  { %14857 = vmatpush1.bf16.msra.mxu1 %v19823_v17  ;;  %14694 = vmatprep.subr.bf16.mxu0 %v19854_v18  ;;  %v569_v17 = vld [vmem:[#allocation8 + $0x3e0] sm:$0xff]  ;;  %v554_v18 = vld [vmem:[#allocation8 + $0x368] sm:$0xff] }
 0x723   :  { %14858 = vmatprep.subr.bf16.mxu1 %v19856_v21  ;;  %v570_v21 = vld [vmem:[#allocation8 + $0x3e8] sm:$0xff]  ;;  %v17938_v15 = vcombine.high %v553_v12, %v569_v17  ;;  %v17937_v43 = vcombine.low %v553_v12, %v569_v17 }
 0x724   :  { %v17940_v26 = vcombine.high %v554_v18, %v570_v21  ;;  %v17939_v63 = vcombine.low %v554_v18, %v570_v21 }
 0x725   :  { %14695 = vmatpush1.bf16.msra.mxu0 %v19853_v27  ;;  %v585_v27 = vld [vmem:[#allocation8 + $0x460] sm:$0xff] }
 0x726   :  { %14859 = vmatpush1.bf16.msra.mxu1 %v19855_v28  ;;  %14869 = vmatprep.subr.bf16.mxu0 %v17842_v31  ;;  %v601_v28 = vld [vmem:[#allocation8 + $0x4e0] sm:$0xff]  ;;  %v586_v31 = vld [vmem:[#allocation8 + $0x468] sm:$0xff] }
 0x727   :  { %15033 = vmatprep.subr.bf16.mxu1 %v17844_v35  ;;  %v602_v35 = vld [vmem:[#allocation8 + $0x4e8] sm:$0xff]  ;;  %v17969_v53 = vcombine.low %v585_v27, %v601_v28 }
 0x728   :  { %14697 = vmatmul.mubr.bf16.vlgmr.msra.gmra.mrb[28].mxu0 %v22959_v24  ;;  %v17972_v50 = vcombine.high %v586_v31, %v602_v35 }
 0x729   :  { %14861 = vmatmul.mubr.bf16.vlgmr.msra.gmra.mrb[28].mxu1 %v22959_v24  ;;  %14870 = vmatpush1.bf16.msra.mxu0 %v17841_v37  ;;  %v17970_v37 = vcombine.high %v585_v27, %v601_v28 }
 0x72a   :  { %14901 = vmatprep.mubr.bf16.mxu0 %v22894_v6  ;;  %15034 = vmatpush1.bf16.msra.mxu1 %v17843_v40  ;;  %v633_v40 = vld [vmem:[#allocation8 + $0x5e0] sm:$0xff] }
 0x72b   :  { %15065 = vmatprep.mubr.bf16.mxu1 %v22894_v6  ;;  %14871 = vmatprep.subr.bf16.mxu0 %v17874_v52  ;;  %v618_v52 = vld [vmem:[#allocation8 + $0x568] sm:$0xff]  ;;  %v18002_v54 = vcombine.high %v617_v55, %v633_v40  ;;  %v18001_v12 = vcombine.low %v617_v55, %v633_v40 }
 0x72c   :  { %15035 = vmatprep.subr.bf16.mxu1 %v17876_v44  ;;  %v17971_v44 = vcombine.low %v586_v31, %v602_v35  ;;  %v18004_v57 = vcombine.high %v618_v52, %v634_v16  ;;  %v18003_v17 = vcombine.low %v618_v52, %v634_v16 }
 0x72d   :  { %14872 = vmatpush1.bf16.msra.mxu0 %v17873_v58  ;;  %v649_v58 = vld [vmem:[#allocation8 + $0x660] sm:$0xff] }
 0x72e   :  { %15036 = vmatpush1.bf16.msra.mxu1 %v17875_v62  ;;  %14873 = vmatprep.subr.bf16.mxu0 %v17906_v4  ;;  %v665_v62 = vld [vmem:[#allocation8 + $0x6e0] sm:$0xff]  ;;  %v650_v4 = vld [vmem:[#allocation8 + $0x668] sm:$0xff] }
 0x72f   :  { %15037 = vmatprep.subr.bf16.mxu1 %v17908_v9  ;;  %v666_v9 = vld [vmem:[#allocation8 + $0x6e8] sm:$0xff]  ;;  %v18034_v18 = vcombine.high %v649_v58, %v665_v62  ;;  %v18033_v27 = vcombine.low %v649_v58, %v665_v62 }
 0x730   :  { %v18036_v21 = vcombine.high %v650_v4, %v666_v9  ;;  %v18035_v28 = vcombine.low %v650_v4, %v666_v9 }
 0x731   :  { %14874 = vmatpush1.bf16.msra.mxu0 %v17905_v59  ;;  %v681_v59 = vld [vmem:[#allocation8 + $0x760] sm:$0xff] }
 0x732   :  { %15038 = vmatpush1.bf16.msra.mxu1 %v17907_v22  ;;  %14875 = vmatprep.subr.bf16.mxu0 %v17938_v15  ;;  %v697_v22 = vld [vmem:[#allocation8 + $0x7e0] sm:$0xff]  ;;  %v682_v15 = vld [vmem:[#allocation8 + $0x768] sm:$0xff] }
 0x733   :  { %15039 = vmatprep.subr.bf16.mxu1 %v17940_v26  ;;  %v698_v26 = vld [vmem:[#allocation8 + $0x7e8] sm:$0xff]  ;;  %v18066_v31 = vcombine.high %v681_v59, %v697_v22  ;;  %v18065_v55 = vcombine.low %v681_v59, %v697_v22 }
 0x734   :  { %v18068_v35 = vcombine.high %v682_v15, %v698_v26  ;;  %v18067_v40 = vcombine.low %v682_v15, %v698_v26 }
 0x735   :  { %14876 = vmatpush1.bf16.msra.mxu0 %v17937_v43  ;;  %v713_v43 = vld [vmem:[#allocation8 + $0x860] sm:$0xff] }
 0x736   :  { %15040 = vmatpush1.bf16.msra.mxu1 %v17939_v63  ;;  %14877 = vmatprep.subr.bf16.mxu0 %v17970_v37  ;;  %v729_v63 = vld [vmem:[#allocation8 + $0x8e0] sm:$0xff]  ;;  %v714_v37 = vld [vmem:[#allocation8 + $0x868] sm:$0xff] }
 0x737   :  { %15041 = vmatprep.subr.bf16.mxu1 %v17972_v50  ;;  %v730_v50 = vld [vmem:[#allocation8 + $0x8e8] sm:$0xff]  ;;  %v18098_v52 = vcombine.high %v713_v43, %v729_v63  ;;  %v18097_v58 = vcombine.low %v713_v43, %v729_v63 }
 0x738   :  { %v18100_v16 = vcombine.high %v714_v37, %v730_v50  ;;  %v18099_v62 = vcombine.low %v714_v37, %v730_v50 }
 0x739   :  { %14878 = vmatpush1.bf16.msra.mxu0 %v17969_v53  ;;  %v745_v53 = vld [vmem:[#allocation8 + $0x960] sm:$0xff] }
 0x73a   :  { %15042 = vmatpush1.bf16.msra.mxu1 %v17971_v44  ;;  %14879 = vmatprep.subr.bf16.mxu0 %v18002_v54  ;;  %v761_v44 = vld [vmem:[#allocation8 + $0x9e0] sm:$0xff]  ;;  %v746_v54 = vld [vmem:[#allocation8 + $0x968] sm:$0xff] }
 0x73b   :  { %15043 = vmatprep.subr.bf16.mxu1 %v18004_v57  ;;  %v762_v57 = vld [vmem:[#allocation8 + $0x9e8] sm:$0xff]  ;;  %v18130_v4 = vcombine.high %v745_v53, %v761_v44  ;;  %v18129_v59 = vcombine.low %v745_v53, %v761_v44 }
 0x73c   :  { %v18132_v9 = vcombine.high %v746_v54, %v762_v57  ;;  %v18131_v22 = vcombine.low %v746_v54, %v762_v57 }
 0x73d   :  { %14880 = vmatpush1.bf16.msra.mxu0 %v18001_v12  ;;  %v777_v12 = vld [vmem:[#allocation8 + $0xa60] sm:$0xff] }
 0x73e   :  { %15044 = vmatpush1.bf16.msra.mxu1 %v18003_v17  ;;  %14881 = vmatprep.subr.bf16.mxu0 %v18034_v18  ;;  %v793_v17 = vld [vmem:[#allocation8 + $0xae0] sm:$0xff]  ;;  %v778_v18 = vld [vmem:[#allocation8 + $0xa68] sm:$0xff] }
 0x73f   :  { %15045 = vmatprep.subr.bf16.mxu1 %v18036_v21  ;;  %v794_v21 = vld [vmem:[#allocation8 + $0xae8] sm:$0xff]  ;;  %v18162_v15 = vcombine.high %v777_v12, %v793_v17  ;;  %v18161_v43 = vcombine.low %v777_v12, %v793_v17 }
 0x740   :  { %v18164_v26 = vcombine.high %v778_v18, %v794_v21  ;;  %v18163_v63 = vcombine.low %v778_v18, %v794_v21 }
 0x741   :  { %14882 = vmatpush1.bf16.msra.mxu0 %v18033_v27  ;;  %v809_v27 = vld [vmem:[#allocation8 + $0xb60] sm:$0xff] }
 0x742   :  { %15046 = vmatpush1.bf16.msra.mxu1 %v18035_v28  ;;  %14883 = vmatprep.subr.bf16.mxu0 %v18066_v31  ;;  %v825_v28 = vld [vmem:[#allocation8 + $0xbe0] sm:$0xff]  ;;  %v810_v31 = vld [vmem:[#allocation8 + $0xb68] sm:$0xff] }
 0x743   :  { %15047 = vmatprep.subr.bf16.mxu1 %v18068_v35  ;;  %v826_v35 = vld [vmem:[#allocation8 + $0xbe8] sm:$0xff]  ;;  %v18194_v37 = vcombine.high %v809_v27, %v825_v28  ;;  %v18193_v53 = vcombine.low %v809_v27, %v825_v28 }
 0x744   :  { %v18196_v50 = vcombine.high %v810_v31, %v826_v35  ;;  %v18195_v44 = vcombine.low %v810_v31, %v826_v35 }
 0x745   :  { %14884 = vmatpush1.bf16.msra.mxu0 %v18065_v55  ;;  %v841_v55 = vld [vmem:[#allocation8 + $0xc60] sm:$0xff] }
 0x746   :  { %15048 = vmatpush1.bf16.msra.mxu1 %v18067_v40  ;;  %14885 = vmatprep.subr.bf16.mxu0 %v18098_v52  ;;  %v857_v40 = vld [vmem:[#allocation8 + $0xce0] sm:$0xff]  ;;  %v842_v52 = vld [vmem:[#allocation8 + $0xc68] sm:$0xff] }
 0x747   :  { %15049 = vmatprep.subr.bf16.mxu1 %v18100_v16  ;;  %v858_v16 = vld [vmem:[#allocation8 + $0xce8] sm:$0xff]  ;;  %v18226_v54 = vcombine.high %v841_v55, %v857_v40  ;;  %v18225_v12 = vcombine.low %v841_v55, %v857_v40 }
 0x748   :  { %v18228_v57 = vcombine.high %v842_v52, %v858_v16  ;;  %v18227_v17 = vcombine.low %v842_v52, %v858_v16 }
 0x749   :  { %14886 = vmatpush1.bf16.msra.mxu0 %v18097_v58  ;;  %v873_v58 = vld [vmem:[#allocation8 + $0xd60] sm:$0xff] }
 0x74a   :  { %15050 = vmatpush1.bf16.msra.mxu1 %v18099_v62  ;;  %14887 = vmatprep.subr.bf16.mxu0 %v18130_v4  ;;  %v889_v62 = vld [vmem:[#allocation8 + $0xde0] sm:$0xff]  ;;  %v874_v4 = vld [vmem:[#allocation8 + $0xd68] sm:$0xff] }
 0x74b   :  { %15051 = vmatprep.subr.bf16.mxu1 %v18132_v9  ;;  %v890_v9 = vld [vmem:[#allocation8 + $0xde8] sm:$0xff]  ;;  %v18258_v18 = vcombine.high %v873_v58, %v889_v62  ;;  %v18257_v27 = vcombine.low %v873_v58, %v889_v62 }
 0x74c   :  { %v18260_v21 = vcombine.high %v874_v4, %v890_v9  ;;  %v18259_v28 = vcombine.low %v874_v4, %v890_v9 }
 0x74d   :  { %14888 = vmatpush1.bf16.msra.mxu0 %v18129_v59  ;;  %v905_v59 = vld [vmem:[#allocation8 + $0xe60] sm:$0xff] }
 0x74e   :  { %15052 = vmatpush1.bf16.msra.mxu1 %v18131_v22  ;;  %14889 = vmatprep.subr.bf16.mxu0 %v18162_v15  ;;  %v921_v22 = vld [vmem:[#allocation8 + $0xee0] sm:$0xff]  ;;  %v906_v15 = vld [vmem:[#allocation8 + $0xe68] sm:$0xff] }
 0x74f   :  { %15053 = vmatprep.subr.bf16.mxu1 %v18164_v26  ;;  %v922_v26 = vld [vmem:[#allocation8 + $0xee8] sm:$0xff]  ;;  %v18290_v31 = vcombine.high %v905_v59, %v921_v22  ;;  %v18289_v55 = vcombine.low %v905_v59, %v921_v22 }
 0x750   :  { %v18292_v35 = vcombine.high %v906_v15, %v922_v26  ;;  %v18291_v40 = vcombine.low %v906_v15, %v922_v26  ;;  %v1018_v59 = vld [vmem:[#allocation8 + $0x11e8] sm:$0xff]  ;;  %v1033_v26 = vld [vmem:[#allocation8 + $0x1260] sm:$0xff] }
 0x751   :  { %14890 = vmatpush1.bf16.msra.mxu0 %v18161_v43  ;;  %v937_v43 = vld [vmem:[#allocation8 + $0xf60] sm:$0xff] }
 0x752   :  { %15054 = vmatpush1.bf16.msra.mxu1 %v18163_v63  ;;  %14891 = vmatprep.subr.bf16.mxu0 %v18194_v37  ;;  %v953_v63 = vld [vmem:[#allocation8 + $0xfe0] sm:$0xff]  ;;  %v938_v37 = vld [vmem:[#allocation8 + $0xf68] sm:$0xff] }
 0x753   :  { %15055 = vmatprep.subr.bf16.mxu1 %v18196_v50  ;;  %v954_v50 = vld [vmem:[#allocation8 + $0xfe8] sm:$0xff]  ;;  %v18322_v52 = vcombine.high %v937_v43, %v953_v63  ;;  %v18321_v58 = vcombine.low %v937_v43, %v953_v63 }
 0x754   :  { %v18324_v16 = vcombine.high %v938_v37, %v954_v50  ;;  %v18323_v62 = vcombine.low %v938_v37, %v954_v50 }
 0x755   :  { %14892 = vmatpush1.bf16.msra.mxu0 %v18193_v53  ;;  %v969_v53 = vld [vmem:[#allocation8 + $0x1060] sm:$0xff] }
 0x756   :  { %15056 = vmatpush1.bf16.msra.mxu1 %v18195_v44  ;;  %14893 = vmatprep.subr.bf16.mxu0 %v18226_v54  ;;  %v985_v44 = vld [vmem:[#allocation8 + $0x10e0] sm:$0xff]  ;;  %v970_v54 = vld [vmem:[#allocation8 + $0x1068] sm:$0xff] }
 0x757   :  { %15057 = vmatprep.subr.bf16.mxu1 %v18228_v57  ;;  %v986_v57 = vld [vmem:[#allocation8 + $0x10e8] sm:$0xff]  ;;  %v18354_v4 = vcombine.high %v969_v53, %v985_v44 }
 0x758   :  { %v18356_v9 = vcombine.high %v970_v54, %v986_v57  ;;  %v18355_v22 = vcombine.low %v970_v54, %v986_v57 }
 0x759   :  { %14894 = vmatpush1.bf16.msra.mxu0 %v18225_v12  ;;  %v1001_v12 = vld [vmem:[#allocation8 + $0x1160] sm:$0xff] }
 0x75a   :  { %15058 = vmatpush1.bf16.msra.mxu1 %v18227_v17  ;;  %14895 = vmatprep.subr.bf16.mxu0 %v18258_v18  ;;  %v1017_v17 = vld [vmem:[#allocation8 + $0x11e0] sm:$0xff]  ;;  %v18353_v18 = vcombine.low %v969_v53, %v985_v44 }
 0x75b   :  { %15059 = vmatprep.subr.bf16.mxu1 %v18260_v21  ;;  %v1002_v21 = vld [vmem:[#allocation8 + $0x1168] sm:$0xff]  ;;  %v18386_v15 = vcombine.high %v1001_v12, %v1017_v17  ;;  %v18385_v43 = vcombine.low %v1001_v12, %v1017_v17 }
 0x75c   :  { %v18387_v63 = vcombine.low %v1002_v21, %v1018_v59 }
 0x75d   :  { %14896 = vmatpush1.bf16.msra.mxu0 %v18257_v27  ;;  %v1049_v27 = vld [vmem:[#allocation8 + $0x12e0] sm:$0xff] }
 0x75e   :  { %15060 = vmatpush1.bf16.msra.mxu1 %v18259_v28  ;;  %14897 = vmatprep.subr.bf16.mxu0 %v18290_v31  ;;  %v18388_v28 = vcombine.high %v1002_v21, %v1018_v59  ;;  %v1034_v31 = vld [vmem:[#allocation8 + $0x1268] sm:$0xff]  ;;  %v18418_v37 = vcombine.high %v1033_v26, %v1049_v27  ;;  %v18417_v53 = vcombine.low %v1033_v26, %v1049_v27  ;;  %v1129_v59 = vld [vmem:[#allocation8 + $0x1560] sm:$0xff] }
 0x75f   :  { %15061 = vmatprep.subr.bf16.mxu1 %v18292_v35  ;;  %v1050_v35 = vld [vmem:[#allocation8 + $0x12e8] sm:$0xff] }
 0x760   :  { %v18420_v50 = vcombine.high %v1034_v31, %v1050_v35  ;;  %v18419_v44 = vcombine.low %v1034_v31, %v1050_v35  ;;  %v1146_v26 = vld [vmem:[#allocation8 + $0x15e8] sm:$0xff] }
 0x761   :  { %14898 = vmatpush1.bf16.msra.mxu0 %v18289_v55  ;;  %v1065_v55 = vld [vmem:[#allocation8 + $0x1360] sm:$0xff] }
 0x762   :  { %15062 = vmatpush1.bf16.msra.mxu1 %v18291_v40  ;;  %14899 = vmatprep.subr.bf16.mxu0 %v18322_v52  ;;  %v1081_v40 = vld [vmem:[#allocation8 + $0x13e0] sm:$0xff]  ;;  %v1066_v52 = vld [vmem:[#allocation8 + $0x1368] sm:$0xff] }
 0x763   :  { %15063 = vmatprep.subr.bf16.mxu1 %v18324_v16  ;;  %v1082_v16 = vld [vmem:[#allocation8 + $0x13e8] sm:$0xff]  ;;  %v18450_v54 = vcombine.high %v1065_v55, %v1081_v40  ;;  %v18449_v12 = vcombine.low %v1065_v55, %v1081_v40 }
 0x764   :  { %v18452_v57 = vcombine.high %v1066_v52, %v1082_v16  ;;  %v18451_v17 = vcombine.low %v1066_v52, %v1082_v16 }
 0x765   :  { %14900 = vmatpush1.bf16.msra.mxu0 %v18321_v58  ;;  %v1097_v58 = vld [vmem:[#allocation8 + $0x1460] sm:$0xff] }
 0x766   :  { %15064 = vmatpush1.bf16.msra.mxu1 %v18323_v62  ;;  %14910 = vmatprep.subr.bf16.mxu0 %v18354_v4  ;;  %v1113_v62 = vld [vmem:[#allocation8 + $0x14e0] sm:$0xff]  ;;  %v1098_v4 = vld [vmem:[#allocation8 + $0x1468] sm:$0xff] }
 0x767   :  { %15074 = vmatprep.subr.bf16.mxu1 %v18356_v9  ;;  %v1114_v9 = vld [vmem:[#allocation8 + $0x14e8] sm:$0xff]  ;;  %v18481_v27 = vcombine.low %v1097_v58, %v1113_v62 }
 0x768   :  { %14902 = vmatmul.mubr.bf16.vlgmr.msra.gmra.mrb[32].mxu0 %v22896_v7  ;;  %v18484_v21 = vcombine.high %v1098_v4, %v1114_v9 }
 0x769   :  { %15066 = vmatmul.mubr.bf16.vlgmr.msra.gmra.mrb[32].mxu1 %v22896_v7  ;;  %14911 = vmatpush1.bf16.msra.mxu0 %v18353_v18  ;;  %v18482_v18 = vcombine.high %v1097_v58, %v1113_v62 }
 0x76a   :  { %14942 = vmatprep.mubr.bf16.mxu0 %v22900_v14  ;;  %15075 = vmatpush1.bf16.msra.mxu1 %v18355_v22  ;;  %v1145_v22 = vld [vmem:[#allocation8 + $0x15e0] sm:$0xff] }
 0x76b   :  { %15106 = vmatprep.mubr.bf16.mxu1 %v22900_v14  ;;  %14912 = vmatprep.subr.bf16.mxu0 %v18386_v15  ;;  %v1130_v15 = vld [vmem:[#allocation8 + $0x1568] sm:$0xff]  ;;  %v18514_v31 = vcombine.high %v1129_v59, %v1145_v22  ;;  %v18513_v55 = vcombine.low %v1129_v59, %v1145_v22 }
 0x76c   :  { %15076 = vmatprep.subr.bf16.mxu1 %v18388_v28  ;;  %v18483_v28 = vcombine.low %v1098_v4, %v1114_v9  ;;  %v18516_v35 = vcombine.high %v1130_v15, %v1146_v26  ;;  %v18515_v40 = vcombine.low %v1130_v15, %v1146_v26 }
 0x76d   :  { %14913 = vmatpush1.bf16.msra.mxu0 %v18385_v43  ;;  %v1161_v43 = vld [vmem:[#allocation8 + $0x1660] sm:$0xff] }
 0x76e   :  { %15077 = vmatpush1.bf16.msra.mxu1 %v18387_v63  ;;  %14914 = vmatprep.subr.bf16.mxu0 %v18418_v37  ;;  %v1177_v63 = vld [vmem:[#allocation8 + $0x16e0] sm:$0xff]  ;;  %v1162_v37 = vld [vmem:[#allocation8 + $0x1668] sm:$0xff] }
 0x76f   :  { %15078 = vmatprep.subr.bf16.mxu1 %v18420_v50  ;;  %v1178_v50 = vld [vmem:[#allocation8 + $0x16e8] sm:$0xff]  ;;  %v18546_v52 = vcombine.high %v1161_v43, %v1177_v63  ;;  %v18545_v58 = vcombine.low %v1161_v43, %v1177_v63 }
 0x770   :  { %v18548_v16 = vcombine.high %v1162_v37, %v1178_v50  ;;  %v18547_v62 = vcombine.low %v1162_v37, %v1178_v50 }
 0x771   :  { %14915 = vmatpush1.bf16.msra.mxu0 %v18417_v53  ;;  %v1193_v53 = vld [vmem:[#allocation8 + $0x1760] sm:$0xff] }
 0x772   :  { %15079 = vmatpush1.bf16.msra.mxu1 %v18419_v44  ;;  %14916 = vmatprep.subr.bf16.mxu0 %v18450_v54  ;;  %v1209_v44 = vld [vmem:[#allocation8 + $0x17e0] sm:$0xff]  ;;  %v1194_v54 = vld [vmem:[#allocation8 + $0x1768] sm:$0xff] }
 0x773   :  { %15080 = vmatprep.subr.bf16.mxu1 %v18452_v57  ;;  %v1210_v57 = vld [vmem:[#allocation8 + $0x17e8] sm:$0xff]  ;;  %v18578_v4 = vcombine.high %v1193_v53, %v1209_v44  ;;  %v18577_v59 = vcombine.low %v1193_v53, %v1209_v44 }
 0x774   :  { %v18580_v9 = vcombine.high %v1194_v54, %v1210_v57  ;;  %v18579_v22 = vcombine.low %v1194_v54, %v1210_v57 }
 0x775   :  { %14917 = vmatpush1.bf16.msra.mxu0 %v18449_v12  ;;  %v1225_v12 = vld [vmem:[#allocation8 + $0x1860] sm:$0xff] }
 0x776   :  { %15081 = vmatpush1.bf16.msra.mxu1 %v18451_v17  ;;  %14918 = vmatprep.subr.bf16.mxu0 %v18482_v18  ;;  %v1241_v17 = vld [vmem:[#allocation8 + $0x18e0] sm:$0xff]  ;;  %v1226_v18 = vld [vmem:[#allocation8 + $0x1868] sm:$0xff] }
 0x777   :  { %15082 = vmatprep.subr.bf16.mxu1 %v18484_v21  ;;  %v1242_v21 = vld [vmem:[#allocation8 + $0x18e8] sm:$0xff]  ;;  %v18610_v15 = vcombine.high %v1225_v12, %v1241_v17  ;;  %v18609_v43 = vcombine.low %v1225_v12, %v1241_v17 }
 0x778   :  { %v18612_v26 = vcombine.high %v1226_v18, %v1242_v21  ;;  %v18611_v63 = vcombine.low %v1226_v18, %v1242_v21 }
 0x779   :  { %14919 = vmatpush1.bf16.msra.mxu0 %v18481_v27  ;;  %v1257_v27 = vld [vmem:[#allocation8 + $0x1960] sm:$0xff] }
 0x77a   :  { %15083 = vmatpush1.bf16.msra.mxu1 %v18483_v28  ;;  %14920 = vmatprep.subr.bf16.mxu0 %v18514_v31  ;;  %v1273_v28 = vld [vmem:[#allocation8 + $0x19e0] sm:$0xff]  ;;  %v1258_v31 = vld [vmem:[#allocation8 + $0x1968] sm:$0xff] }
 0x77b   :  { %15084 = vmatprep.subr.bf16.mxu1 %v18516_v35  ;;  %v1274_v35 = vld [vmem:[#allocation8 + $0x19e8] sm:$0xff]  ;;  %v18642_v37 = vcombine.high %v1257_v27, %v1273_v28  ;;  %v18641_v53 = vcombine.low %v1257_v27, %v1273_v28 }
 0x77c   :  { %v18644_v50 = vcombine.high %v1258_v31, %v1274_v35  ;;  %v18643_v44 = vcombine.low %v1258_v31, %v1274_v35 }
 0x77d   :  { %14921 = vmatpush1.bf16.msra.mxu0 %v18513_v55  ;;  %v1289_v55 = vld [vmem:[#allocation8 + $0x1a60] sm:$0xff] }
 0x77e   :  { %15085 = vmatpush1.bf16.msra.mxu1 %v18515_v40  ;;  %14922 = vmatprep.subr.bf16.mxu0 %v18546_v52  ;;  %v1305_v40 = vld [vmem:[#allocation8 + $0x1ae0] sm:$0xff]  ;;  %v1290_v52 = vld [vmem:[#allocation8 + $0x1a68] sm:$0xff] }
 0x77f   :  { %15086 = vmatprep.subr.bf16.mxu1 %v18548_v16  ;;  %v1306_v16 = vld [vmem:[#allocation8 + $0x1ae8] sm:$0xff]  ;;  %v18674_v54 = vcombine.high %v1289_v55, %v1305_v40  ;;  %v18673_v12 = vcombine.low %v1289_v55, %v1305_v40 }
 0x780   :  { %v18676_v57 = vcombine.high %v1290_v52, %v1306_v16  ;;  %v18675_v17 = vcombine.low %v1290_v52, %v1306_v16 }
 0x781   :  { %14923 = vmatpush1.bf16.msra.mxu0 %v18545_v58  ;;  %v1321_v58 = vld [vmem:[#allocation8 + $0x1b60] sm:$0xff] }
 0x782   :  { %15087 = vmatpush1.bf16.msra.mxu1 %v18547_v62  ;;  %14924 = vmatprep.subr.bf16.mxu0 %v18578_v4  ;;  %v1337_v62 = vld [vmem:[#allocation8 + $0x1be0] sm:$0xff]  ;;  %v1322_v4 = vld [vmem:[#allocation8 + $0x1b68] sm:$0xff] }
 0x783   :  { %15088 = vmatprep.subr.bf16.mxu1 %v18580_v9  ;;  %v1338_v9 = vld [vmem:[#allocation8 + $0x1be8] sm:$0xff]  ;;  %v18706_v18 = vcombine.high %v1321_v58, %v1337_v62  ;;  %v18705_v27 = vcombine.low %v1321_v58, %v1337_v62 }
 0x784   :  { %v18708_v21 = vcombine.high %v1322_v4, %v1338_v9  ;;  %v18707_v28 = vcombine.low %v1322_v4, %v1338_v9 }
 0x785   :  { %14925 = vmatpush1.bf16.msra.mxu0 %v18577_v59  ;;  %v1353_v59 = vld [vmem:[#allocation8 + $0x1c60] sm:$0xff] }
 0x786   :  { %15089 = vmatpush1.bf16.msra.mxu1 %v18579_v22  ;;  %14926 = vmatprep.subr.bf16.mxu0 %v18610_v15  ;;  %v1369_v22 = vld [vmem:[#allocation8 + $0x1ce0] sm:$0xff]  ;;  %v1354_v15 = vld [vmem:[#allocation8 + $0x1c68] sm:$0xff] }
 0x787   :  { %15090 = vmatprep.subr.bf16.mxu1 %v18612_v26  ;;  %v1370_v26 = vld [vmem:[#allocation8 + $0x1ce8] sm:$0xff]  ;;  %v18738_v31 = vcombine.high %v1353_v59, %v1369_v22  ;;  %v18737_v55 = vcombine.low %v1353_v59, %v1369_v22 }
 0x788   :  { %v18740_v35 = vcombine.high %v1354_v15, %v1370_v26  ;;  %v18739_v40 = vcombine.low %v1354_v15, %v1370_v26 }
 0x789   :  { %14927 = vmatpush1.bf16.msra.mxu0 %v18609_v43  ;;  %v1385_v43 = vld [vmem:[#allocation8 + $0x1d60] sm:$0xff] }
 0x78a   :  { %15091 = vmatpush1.bf16.msra.mxu1 %v18611_v63  ;;  %14928 = vmatprep.subr.bf16.mxu0 %v18642_v37  ;;  %v1401_v63 = vld [vmem:[#allocation8 + $0x1de0] sm:$0xff]  ;;  %v1386_v37 = vld [vmem:[#allocation8 + $0x1d68] sm:$0xff] }
 0x78b   :  { %15092 = vmatprep.subr.bf16.mxu1 %v18644_v50  ;;  %v1402_v50 = vld [vmem:[#allocation8 + $0x1de8] sm:$0xff]  ;;  %v18770_v52 = vcombine.high %v1385_v43, %v1401_v63  ;;  %v18769_v58 = vcombine.low %v1385_v43, %v1401_v63 }
 0x78c   :  { %v18772_v16 = vcombine.high %v1386_v37, %v1402_v50  ;;  %v18771_v62 = vcombine.low %v1386_v37, %v1402_v50 }
 0x78d   :  { %14929 = vmatpush1.bf16.msra.mxu0 %v18641_v53  ;;  %v1417_v53 = vld [vmem:[#allocation8 + $0x1e60] sm:$0xff] }
 0x78e   :  { %15093 = vmatpush1.bf16.msra.mxu1 %v18643_v44  ;;  %14930 = vmatprep.subr.bf16.mxu0 %v18674_v54  ;;  %v1433_v44 = vld [vmem:[#allocation8 + $0x1ee0] sm:$0xff]  ;;  %v1418_v54 = vld [vmem:[#allocation8 + $0x1e68] sm:$0xff] }
 0x78f   :  { %15094 = vmatprep.subr.bf16.mxu1 %v18676_v57  ;;  %v1434_v57 = vld [vmem:[#allocation8 + $0x1ee8] sm:$0xff]  ;;  %v18802_v4 = vcombine.high %v1417_v53, %v1433_v44  ;;  %v18801_v59 = vcombine.low %v1417_v53, %v1433_v44 }
 0x790   :  { %v18804_v9 = vcombine.high %v1418_v54, %v1434_v57  ;;  %v18803_v22 = vcombine.low %v1418_v54, %v1434_v57  ;;  %v1530_v53 = vld [vmem:[#allocation8 + $0x21e8] sm:$0xff]  ;;  %v1545_v57 = vld [vmem:[#allocation8 + $0x2260] sm:$0xff] }
 0x791   :  { %14931 = vmatpush1.bf16.msra.mxu0 %v18673_v12  ;;  %v1449_v12 = vld [vmem:[#allocation8 + $0x1f60] sm:$0xff] }
 0x792   :  { %15095 = vmatpush1.bf16.msra.mxu1 %v18675_v17  ;;  %14932 = vmatprep.subr.bf16.mxu0 %v18706_v18  ;;  %v1465_v17 = vld [vmem:[#allocation8 + $0x1fe0] sm:$0xff]  ;;  %v1450_v18 = vld [vmem:[#allocation8 + $0x1f68] sm:$0xff] }
 0x793   :  { %15096 = vmatprep.subr.bf16.mxu1 %v18708_v21  ;;  %v1466_v21 = vld [vmem:[#allocation8 + $0x1fe8] sm:$0xff]  ;;  %v18834_v15 = vcombine.high %v1449_v12, %v1465_v17  ;;  %v18833_v43 = vcombine.low %v1449_v12, %v1465_v17 }
 0x794   :  { %v18836_v26 = vcombine.high %v1450_v18, %v1466_v21  ;;  %v18835_v63 = vcombine.low %v1450_v18, %v1466_v21 }
 0x795   :  { %14933 = vmatpush1.bf16.msra.mxu0 %v18705_v27  ;;  %v1481_v27 = vld [vmem:[#allocation8 + $0x2060] sm:$0xff] }
 0x796   :  { %15097 = vmatpush1.bf16.msra.mxu1 %v18707_v28  ;;  %14934 = vmatprep.subr.bf16.mxu0 %v18738_v31  ;;  %v1497_v28 = vld [vmem:[#allocation8 + $0x20e0] sm:$0xff]  ;;  %v1482_v31 = vld [vmem:[#allocation8 + $0x2068] sm:$0xff] }
 0x797   :  { %15098 = vmatprep.subr.bf16.mxu1 %v18740_v35  ;;  %v1498_v35 = vld [vmem:[#allocation8 + $0x20e8] sm:$0xff]  ;;  %v18866_v37 = vcombine.high %v1481_v27, %v1497_v28 }
 0x798   :  { %v18868_v50 = vcombine.high %v1482_v31, %v1498_v35  ;;  %v18867_v44 = vcombine.low %v1482_v31, %v1498_v35 }
 0x799   :  { %14935 = vmatpush1.bf16.msra.mxu0 %v18737_v55  ;;  %v1513_v55 = vld [vmem:[#allocation8 + $0x2160] sm:$0xff] }
 0x79a   :  { %15099 = vmatpush1.bf16.msra.mxu1 %v18739_v40  ;;  %14936 = vmatprep.subr.bf16.mxu0 %v18770_v52  ;;  %v1529_v40 = vld [vmem:[#allocation8 + $0x21e0] sm:$0xff]  ;;  %v18865_v52 = vcombine.low %v1481_v27, %v1497_v28 }
 0x79b   :  { %15100 = vmatprep.subr.bf16.mxu1 %v18772_v16  ;;  %v1514_v16 = vld [vmem:[#allocation8 + $0x2168] sm:$0xff]  ;;  %v18898_v54 = vcombine.high %v1513_v55, %v1529_v40  ;;  %v18897_v12 = vcombine.low %v1513_v55, %v1529_v40 }
 0x79c   :  { %v18899_v17 = vcombine.low %v1514_v16, %v1530_v53 }
 0x79d   :  { %14937 = vmatpush1.bf16.msra.mxu0 %v18769_v58  ;;  %v1561_v58 = vld [vmem:[#allocation8 + $0x22e0] sm:$0xff] }
 0x79e   :  { %15101 = vmatpush1.bf16.msra.mxu1 %v18771_v62  ;;  %14938 = vmatprep.subr.bf16.mxu0 %v18802_v4  ;;  %v18900_v62 = vcombine.high %v1514_v16, %v1530_v53  ;;  %v1546_v4 = vld [vmem:[#allocation8 + $0x2268] sm:$0xff]  ;;  %v18930_v18 = vcombine.high %v1545_v57, %v1561_v58  ;;  %v18929_v27 = vcombine.low %v1545_v57, %v1561_v58  ;;  %v1641_v53 = vld [vmem:[#allocation8 + $0x2560] sm:$0xff] }
 0x79f   :  { %15102 = vmatprep.subr.bf16.mxu1 %v18804_v9  ;;  %v1562_v9 = vld [vmem:[#allocation8 + $0x22e8] sm:$0xff] }
 0x7a0   :  { %v18932_v21 = vcombine.high %v1546_v4, %v1562_v9  ;;  %v18931_v28 = vcombine.low %v1546_v4, %v1562_v9  ;;  %v1658_v57 = vld [vmem:[#allocation8 + $0x25e8] sm:$0xff] }
 0x7a1   :  { %14939 = vmatpush1.bf16.msra.mxu0 %v18801_v59  ;;  %v1577_v59 = vld [vmem:[#allocation8 + $0x2360] sm:$0xff] }
 0x7a2   :  { %15103 = vmatpush1.bf16.msra.mxu1 %v18803_v22  ;;  %14940 = vmatprep.subr.bf16.mxu0 %v18834_v15  ;;  %v1593_v22 = vld [vmem:[#allocation8 + $0x23e0] sm:$0xff]  ;;  %v1578_v15 = vld [vmem:[#allocation8 + $0x2368] sm:$0xff] }
 0x7a3   :  { %15104 = vmatprep.subr.bf16.mxu1 %v18836_v26  ;;  %v1594_v26 = vld [vmem:[#allocation8 + $0x23e8] sm:$0xff]  ;;  %v18962_v31 = vcombine.high %v1577_v59, %v1593_v22  ;;  %v18961_v55 = vcombine.low %v1577_v59, %v1593_v22 }
 0x7a4   :  { %v18964_v35 = vcombine.high %v1578_v15, %v1594_v26  ;;  %v18963_v40 = vcombine.low %v1578_v15, %v1594_v26 }
 0x7a5   :  { %14941 = vmatpush1.bf16.msra.mxu0 %v18833_v43  ;;  %v1609_v43 = vld [vmem:[#allocation8 + $0x2460] sm:$0xff] }
 0x7a6   :  { %15105 = vmatpush1.bf16.msra.mxu1 %v18835_v63  ;;  %14951 = vmatprep.subr.bf16.mxu0 %v18866_v37  ;;  %v1625_v63 = vld [vmem:[#allocation8 + $0x24e0] sm:$0xff]  ;;  %v1610_v37 = vld [vmem:[#allocation8 + $0x2468] sm:$0xff] }
 0x7a7   :  { %15115 = vmatprep.subr.bf16.mxu1 %v18868_v50  ;;  %v1626_v50 = vld [vmem:[#allocation8 + $0x24e8] sm:$0xff]  ;;  %v18993_v58 = vcombine.low %v1609_v43, %v1625_v63 }
 0x7a8   :  { %14943 = vmatmul.mubr.bf16.vlgmr.msra.gmra.mrb[32].mxu0 %v22926_v51  ;;  %v18996_v16 = vcombine.high %v1610_v37, %v1626_v50 }
 0x7a9   :  { %15107 = vmatmul.mubr.bf16.vlgmr.msra.gmra.mrb[32].mxu1 %v22926_v51  ;;  %14952 = vmatpush1.bf16.msra.mxu0 %v18865_v52  ;;  %v18994_v52 = vcombine.high %v1609_v43, %v1625_v63 }
 0x7aa   :  { %14983 = vmatprep.mubr.bf16.mxu0 %v22928_v61  ;;  %15116 = vmatpush1.bf16.msra.mxu1 %v18867_v44  ;;  %v1657_v44 = vld [vmem:[#allocation8 + $0x25e0] sm:$0xff] }
 0x7ab   :  { %15147 = vmatprep.mubr.bf16.mxu1 %v22928_v61  ;;  %14953 = vmatprep.subr.bf16.mxu0 %v18898_v54  ;;  %v1642_v54 = vld [vmem:[#allocation8 + $0x2568] sm:$0xff]  ;;  %v19026_v4 = vcombine.high %v1641_v53, %v1657_v44  ;;  %v19025_v59 = vcombine.low %v1641_v53, %v1657_v44 }
 0x7ac   :  { %15117 = vmatprep.subr.bf16.mxu1 %v18900_v62  ;;  %v18995_v62 = vcombine.low %v1610_v37, %v1626_v50  ;;  %v19028_v9 = vcombine.high %v1642_v54, %v1658_v57  ;;  %v19027_v22 = vcombine.low %v1642_v54, %v1658_v57 }
 0x7ad   :  { %14954 = vmatpush1.bf16.msra.mxu0 %v18897_v12  ;;  %v1673_v12 = vld [vmem:[#allocation8 + $0x2660] sm:$0xff] }
 0x7ae   :  { %15118 = vmatpush1.bf16.msra.mxu1 %v18899_v17  ;;  %14955 = vmatprep.subr.bf16.mxu0 %v18930_v18  ;;  %v1689_v17 = vld [vmem:[#allocation8 + $0x26e0] sm:$0xff]  ;;  %v1674_v18 = vld [vmem:[#allocation8 + $0x2668] sm:$0xff] }
 0x7af   :  { %15119 = vmatprep.subr.bf16.mxu1 %v18932_v21  ;;  %v1690_v21 = vld [vmem:[#allocation8 + $0x26e8] sm:$0xff]  ;;  %v19058_v15 = vcombine.high %v1673_v12, %v1689_v17  ;;  %v19057_v43 = vcombine.low %v1673_v12, %v1689_v17 }
 0x7b0   :  { %v19060_v26 = vcombine.high %v1674_v18, %v1690_v21  ;;  %v19059_v63 = vcombine.low %v1674_v18, %v1690_v21 }
 0x7b1   :  { %14956 = vmatpush1.bf16.msra.mxu0 %v18929_v27  ;;  %v1705_v27 = vld [vmem:[#allocation8 + $0x2760] sm:$0xff] }
 0x7b2   :  { %15120 = vmatpush1.bf16.msra.mxu1 %v18931_v28  ;;  %14957 = vmatprep.subr.bf16.mxu0 %v18962_v31  ;;  %v1721_v28 = vld [vmem:[#allocation8 + $0x27e0] sm:$0xff]  ;;  %v1706_v31 = vld [vmem:[#allocation8 + $0x2768] sm:$0xff] }
 0x7b3   :  { %15121 = vmatprep.subr.bf16.mxu1 %v18964_v35  ;;  %v1722_v35 = vld [vmem:[#allocation8 + $0x27e8] sm:$0xff]  ;;  %v19090_v37 = vcombine.high %v1705_v27, %v1721_v28  ;;  %v19089_v53 = vcombine.low %v1705_v27, %v1721_v28 }
 0x7b4   :  { %v19092_v50 = vcombine.high %v1706_v31, %v1722_v35  ;;  %v19091_v44 = vcombine.low %v1706_v31, %v1722_v35 }
 0x7b5   :  { %14958 = vmatpush1.bf16.msra.mxu0 %v18961_v55  ;;  %v1737_v55 = vld [vmem:[#allocation8 + $0x2860] sm:$0xff] }
 0x7b6   :  { %15122 = vmatpush1.bf16.msra.mxu1 %v18963_v40  ;;  %14959 = vmatprep.subr.bf16.mxu0 %v18994_v52  ;;  %v1753_v40 = vld [vmem:[#allocation8 + $0x28e0] sm:$0xff]  ;;  %v1738_v52 = vld [vmem:[#allocation8 + $0x2868] sm:$0xff] }
 0x7b7   :  { %15123 = vmatprep.subr.bf16.mxu1 %v18996_v16  ;;  %v1754_v16 = vld [vmem:[#allocation8 + $0x28e8] sm:$0xff]  ;;  %v19122_v54 = vcombine.high %v1737_v55, %v1753_v40  ;;  %v19121_v12 = vcombine.low %v1737_v55, %v1753_v40 }
 0x7b8   :  { %v19124_v57 = vcombine.high %v1738_v52, %v1754_v16  ;;  %v19123_v17 = vcombine.low %v1738_v52, %v1754_v16 }
 0x7b9   :  { %14960 = vmatpush1.bf16.msra.mxu0 %v18993_v58  ;;  %v1769_v58 = vld [vmem:[#allocation8 + $0x2960] sm:$0xff] }
 0x7ba   :  { %15124 = vmatpush1.bf16.msra.mxu1 %v18995_v62  ;;  %14961 = vmatprep.subr.bf16.mxu0 %v19026_v4  ;;  %v1785_v62 = vld [vmem:[#allocation8 + $0x29e0] sm:$0xff]  ;;  %v1770_v4 = vld [vmem:[#allocation8 + $0x2968] sm:$0xff] }
 0x7bb   :  { %15125 = vmatprep.subr.bf16.mxu1 %v19028_v9  ;;  %v1786_v9 = vld [vmem:[#allocation8 + $0x29e8] sm:$0xff]  ;;  %v19154_v18 = vcombine.high %v1769_v58, %v1785_v62  ;;  %v19153_v27 = vcombine.low %v1769_v58, %v1785_v62 }
 0x7bc   :  { %v19156_v21 = vcombine.high %v1770_v4, %v1786_v9  ;;  %v19155_v28 = vcombine.low %v1770_v4, %v1786_v9 }
 0x7bd   :  { %14962 = vmatpush1.bf16.msra.mxu0 %v19025_v59  ;;  %v1801_v59 = vld [vmem:[#allocation8 + $0x2a60] sm:$0xff] }
 0x7be   :  { %15126 = vmatpush1.bf16.msra.mxu1 %v19027_v22  ;;  %14963 = vmatprep.subr.bf16.mxu0 %v19058_v15  ;;  %v1817_v22 = vld [vmem:[#allocation8 + $0x2ae0] sm:$0xff]  ;;  %v1802_v15 = vld [vmem:[#allocation8 + $0x2a68] sm:$0xff] }
 0x7bf   :  { %15127 = vmatprep.subr.bf16.mxu1 %v19060_v26  ;;  %v1818_v26 = vld [vmem:[#allocation8 + $0x2ae8] sm:$0xff]  ;;  %v19186_v31 = vcombine.high %v1801_v59, %v1817_v22  ;;  %v19185_v55 = vcombine.low %v1801_v59, %v1817_v22 }
 0x7c0   :  { %v19188_v35 = vcombine.high %v1802_v15, %v1818_v26  ;;  %v19187_v40 = vcombine.low %v1802_v15, %v1818_v26 }
 0x7c1   :  { %14964 = vmatpush1.bf16.msra.mxu0 %v19057_v43  ;;  %v1833_v43 = vld [vmem:[#allocation8 + $0x2b60] sm:$0xff] }
 0x7c2   :  { %15128 = vmatpush1.bf16.msra.mxu1 %v19059_v63  ;;  %14965 = vmatprep.subr.bf16.mxu0 %v19090_v37  ;;  %v1849_v63 = vld [vmem:[#allocation8 + $0x2be0] sm:$0xff]  ;;  %v1834_v37 = vld [vmem:[#allocation8 + $0x2b68] sm:$0xff] }
 0x7c3   :  { %15129 = vmatprep.subr.bf16.mxu1 %v19092_v50  ;;  %v1850_v50 = vld [vmem:[#allocation8 + $0x2be8] sm:$0xff]  ;;  %v19218_v52 = vcombine.high %v1833_v43, %v1849_v63  ;;  %v19217_v58 = vcombine.low %v1833_v43, %v1849_v63 }
 0x7c4   :  { %v19220_v16 = vcombine.high %v1834_v37, %v1850_v50  ;;  %v19219_v62 = vcombine.low %v1834_v37, %v1850_v50 }
 0x7c5   :  { %14966 = vmatpush1.bf16.msra.mxu0 %v19089_v53  ;;  %v1865_v53 = vld [vmem:[#allocation8 + $0x2c60] sm:$0xff] }
 0x7c6   :  { %15130 = vmatpush1.bf16.msra.mxu1 %v19091_v44  ;;  %14967 = vmatprep.subr.bf16.mxu0 %v19122_v54  ;;  %v1881_v44 = vld [vmem:[#allocation8 + $0x2ce0] sm:$0xff]  ;;  %v1866_v54 = vld [vmem:[#allocation8 + $0x2c68] sm:$0xff] }
 0x7c7   :  { %15131 = vmatprep.subr.bf16.mxu1 %v19124_v57  ;;  %v1882_v57 = vld [vmem:[#allocation8 + $0x2ce8] sm:$0xff]  ;;  %v19250_v4 = vcombine.high %v1865_v53, %v1881_v44  ;;  %v19249_v59 = vcombine.low %v1865_v53, %v1881_v44 }
 0x7c8   :  { %v19252_v9 = vcombine.high %v1866_v54, %v1882_v57  ;;  %v19251_v22 = vcombine.low %v1866_v54, %v1882_v57 }
 0x7c9   :  { %14968 = vmatpush1.bf16.msra.mxu0 %v19121_v12  ;;  %v1897_v12 = vld [vmem:[#allocation8 + $0x2d60] sm:$0xff] }
 0x7ca   :  { %15132 = vmatpush1.bf16.msra.mxu1 %v19123_v17  ;;  %14969 = vmatprep.subr.bf16.mxu0 %v19154_v18  ;;  %v1913_v17 = vld [vmem:[#allocation8 + $0x2de0] sm:$0xff]  ;;  %v1898_v18 = vld [vmem:[#allocation8 + $0x2d68] sm:$0xff] }
 0x7cb   :  { %15133 = vmatprep.subr.bf16.mxu1 %v19156_v21  ;;  %v1914_v21 = vld [vmem:[#allocation8 + $0x2de8] sm:$0xff]  ;;  %v19282_v15 = vcombine.high %v1897_v12, %v1913_v17  ;;  %v19281_v43 = vcombine.low %v1897_v12, %v1913_v17 }
 0x7cc   :  { %v19284_v26 = vcombine.high %v1898_v18, %v1914_v21  ;;  %v19283_v63 = vcombine.low %v1898_v18, %v1914_v21 }
 0x7cd   :  { %14970 = vmatpush1.bf16.msra.mxu0 %v19153_v27  ;;  %v1929_v27 = vld [vmem:[#allocation8 + $0x2e60] sm:$0xff] }
 0x7ce   :  { %15134 = vmatpush1.bf16.msra.mxu1 %v19155_v28  ;;  %14971 = vmatprep.subr.bf16.mxu0 %v19186_v31  ;;  %v1945_v28 = vld [vmem:[#allocation8 + $0x2ee0] sm:$0xff]  ;;  %v1930_v31 = vld [vmem:[#allocation8 + $0x2e68] sm:$0xff] }
 0x7cf   :  { %15135 = vmatprep.subr.bf16.mxu1 %v19188_v35  ;;  %v1946_v35 = vld [vmem:[#allocation8 + $0x2ee8] sm:$0xff]  ;;  %v19314_v37 = vcombine.high %v1929_v27, %v1945_v28  ;;  %v19313_v53 = vcombine.low %v1929_v27, %v1945_v28 }
 0x7d0   :  { %v19316_v50 = vcombine.high %v1930_v31, %v1946_v35  ;;  %v19315_v44 = vcombine.low %v1930_v31, %v1946_v35  ;;  %v2042_v27 = vld [vmem:[#allocation8 + $0x31e8] sm:$0xff]  ;;  %v2057_v35 = vld [vmem:[#allocation8 + $0x3260] sm:$0xff] }
 0x7d1   :  { %14972 = vmatpush1.bf16.msra.mxu0 %v19185_v55  ;;  %v1961_v55 = vld [vmem:[#allocation8 + $0x2f60] sm:$0xff] }
 0x7d2   :  { %15136 = vmatpush1.bf16.msra.mxu1 %v19187_v40  ;;  %14973 = vmatprep.subr.bf16.mxu0 %v19218_v52  ;;  %v1977_v40 = vld [vmem:[#allocation8 + $0x2fe0] sm:$0xff]  ;;  %v1962_v52 = vld [vmem:[#allocation8 + $0x2f68] sm:$0xff] }
 0x7d3   :  { %15137 = vmatprep.subr.bf16.mxu1 %v19220_v16  ;;  %v1978_v16 = vld [vmem:[#allocation8 + $0x2fe8] sm:$0xff]  ;;  %v19346_v54 = vcombine.high %v1961_v55, %v1977_v40  ;;  %v19345_v12 = vcombine.low %v1961_v55, %v1977_v40 }
 0x7d4   :  { %v19348_v57 = vcombine.high %v1962_v52, %v1978_v16  ;;  %v19347_v17 = vcombine.low %v1962_v52, %v1978_v16 }
 0x7d5   :  { %14974 = vmatpush1.bf16.msra.mxu0 %v19217_v58  ;;  %v1993_v58 = vld [vmem:[#allocation8 + $0x3060] sm:$0xff] }
 0x7d6   :  { %15138 = vmatpush1.bf16.msra.mxu1 %v19219_v62  ;;  %14975 = vmatprep.subr.bf16.mxu0 %v19250_v4  ;;  %v2009_v62 = vld [vmem:[#allocation8 + $0x30e0] sm:$0xff]  ;;  %v1994_v4 = vld [vmem:[#allocation8 + $0x3068] sm:$0xff] }
 0x7d7   :  { %15139 = vmatprep.subr.bf16.mxu1 %v19252_v9  ;;  %v2010_v9 = vld [vmem:[#allocation8 + $0x30e8] sm:$0xff]  ;;  %v19378_v18 = vcombine.high %v1993_v58, %v2009_v62 }
 0x7d8   :  { %v19380_v21 = vcombine.high %v1994_v4, %v2010_v9  ;;  %v19379_v28 = vcombine.low %v1994_v4, %v2010_v9 }
 0x7d9   :  { %14976 = vmatpush1.bf16.msra.mxu0 %v19249_v59  ;;  %v2025_v59 = vld [vmem:[#allocation8 + $0x3160] sm:$0xff] }
 0x7da   :  { %15140 = vmatpush1.bf16.msra.mxu1 %v19251_v22  ;;  %14977 = vmatprep.subr.bf16.mxu0 %v19282_v15  ;;  %v2041_v22 = vld [vmem:[#allocation8 + $0x31e0] sm:$0xff]  ;;  %v19377_v15 = vcombine.low %v1993_v58, %v2009_v62 }
 0x7db   :  { %15141 = vmatprep.subr.bf16.mxu1 %v19284_v26  ;;  %v2026_v26 = vld [vmem:[#allocation8 + $0x3168] sm:$0xff]  ;;  %v19410_v31 = vcombine.high %v2025_v59, %v2041_v22  ;;  %v19409_v55 = vcombine.low %v2025_v59, %v2041_v22 }
 0x7dc   :  { %v19411_v40 = vcombine.low %v2026_v26, %v2042_v27 }
 0x7dd   :  { %14978 = vmatpush1.bf16.msra.mxu0 %v19281_v43  ;;  %v2073_v43 = vld [vmem:[#allocation8 + $0x32e0] sm:$0xff] }
 0x7de   :  { %15142 = vmatpush1.bf16.msra.mxu1 %v19283_v63  ;;  %14979 = vmatprep.subr.bf16.mxu0 %v19314_v37  ;;  %v19412_v63 = vcombine.high %v2026_v26, %v2042_v27  ;;  %v2058_v37 = vld [vmem:[#allocation8 + $0x3268] sm:$0xff]  ;;  %v19442_v52 = vcombine.high %v2057_v35, %v2073_v43  ;;  %v19441_v58 = vcombine.low %v2057_v35, %v2073_v43  ;;  %v2153_v27 = vld [vmem:[#allocation8 + $0x3560] sm:$0xff] }
 0x7df   :  { %15143 = vmatprep.subr.bf16.mxu1 %v19316_v50  ;;  %v2074_v50 = vld [vmem:[#allocation8 + $0x32e8] sm:$0xff] }
 0x7e0   :  { %v19444_v16 = vcombine.high %v2058_v37, %v2074_v50  ;;  %v19443_v62 = vcombine.low %v2058_v37, %v2074_v50  ;;  %v2170_v35 = vld [vmem:[#allocation8 + $0x35e8] sm:$0xff] }
 0x7e1   :  { %14980 = vmatpush1.bf16.msra.mxu0 %v19313_v53  ;;  %v2089_v53 = vld [vmem:[#allocation8 + $0x3360] sm:$0xff] }
 0x7e2   :  { %15144 = vmatpush1.bf16.msra.mxu1 %v19315_v44  ;;  %14981 = vmatprep.subr.bf16.mxu0 %v19346_v54  ;;  %v2105_v44 = vld [vmem:[#allocation8 + $0x33e0] sm:$0xff]  ;;  %v2090_v54 = vld [vmem:[#allocation8 + $0x3368] sm:$0xff] }
 0x7e3   :  { %15145 = vmatprep.subr.bf16.mxu1 %v19348_v57  ;;  %v2106_v57 = vld [vmem:[#allocation8 + $0x33e8] sm:$0xff]  ;;  %v19474_v4 = vcombine.high %v2089_v53, %v2105_v44  ;;  %v19473_v59 = vcombine.low %v2089_v53, %v2105_v44 }
 0x7e4   :  { %v19476_v9 = vcombine.high %v2090_v54, %v2106_v57  ;;  %v19475_v22 = vcombine.low %v2090_v54, %v2106_v57 }
 0x7e5   :  { %14982 = vmatpush1.bf16.msra.mxu0 %v19345_v12  ;;  %v2121_v12 = vld [vmem:[#allocation8 + $0x3460] sm:$0xff] }
 0x7e6   :  { %15146 = vmatpush1.bf16.msra.mxu1 %v19347_v17  ;;  %14992 = vmatprep.subr.bf16.mxu0 %v19378_v18  ;;  %v2137_v17 = vld [vmem:[#allocation8 + $0x34e0] sm:$0xff]  ;;  %v2122_v18 = vld [vmem:[#allocation8 + $0x3468] sm:$0xff] }
 0x7e7   :  { %15156 = vmatprep.subr.bf16.mxu1 %v19380_v21  ;;  %v2138_v21 = vld [vmem:[#allocation8 + $0x34e8] sm:$0xff]  ;;  %v19505_v43 = vcombine.low %v2121_v12, %v2137_v17 }
 0x7e8   :  { %14984 = vmatmul.mubr.bf16.vlgmr.msra.gmra.mrb[32].mxu0 %v22946_v34  ;;  %v19508_v26 = vcombine.high %v2122_v18, %v2138_v21 }
 0x7e9   :  { %15148 = vmatmul.mubr.bf16.vlgmr.msra.gmra.mrb[32].mxu1 %v22946_v34  ;;  %14993 = vmatpush1.bf16.msra.mxu0 %v19377_v15  ;;  %v19506_v15 = vcombine.high %v2121_v12, %v2137_v17  ;;  %v2218_v17 = vld [vmem:[#allocation8 + $0x3768] sm:$0xff] }
 0x7ea   :  { %15024 = vmatprep.mubr.bf16.mxu0 %v22948_v41  ;;  %15157 = vmatpush1.bf16.msra.mxu1 %v19379_v28  ;;  %v2169_v28 = vld [vmem:[#allocation8 + $0x35e0] sm:$0xff] }
 0x7eb   :  { %15188 = vmatprep.mubr.bf16.mxu1 %v22948_v41  ;;  %14994 = vmatprep.subr.bf16.mxu0 %v19410_v31  ;;  %v2154_v31 = vld [vmem:[#allocation8 + $0x3568] sm:$0xff]  ;;  %v19538_v37 = vcombine.high %v2153_v27, %v2169_v28  ;;  %v19537_v53 = vcombine.low %v2153_v27, %v2169_v28 }
 0x7ec   :  { %15158 = vmatprep.subr.bf16.mxu1 %v19412_v63  ;;  %v19507_v63 = vcombine.low %v2122_v18, %v2138_v21  ;;  %v19540_v50 = vcombine.high %v2154_v31, %v2170_v35  ;;  %v19539_v44 = vcombine.low %v2154_v31, %v2170_v35  ;;  %v2234_v18 = vld [vmem:[#allocation8 + $0x37e8] sm:$0xff] }
 0x7ed   :  { %14995 = vmatpush1.bf16.msra.mxu0 %v19409_v55  ;;  %v2185_v55 = vld [vmem:[#allocation8 + $0x3660] sm:$0xff]  ;;  %v19604_v35 = vcombine.high %v2218_v17, %v2234_v18 }
 0x7ee   :  { %15159 = vmatpush1.bf16.msra.mxu1 %v19411_v40  ;;  %14996 = vmatprep.subr.bf16.mxu0 %v19442_v52  ;;  %v2201_v40 = vld [vmem:[#allocation8 + $0x36e0] sm:$0xff]  ;;  %v2186_v52 = vld [vmem:[#allocation8 + $0x3668] sm:$0xff] }
 0x7ef   :  { %15160 = vmatprep.subr.bf16.mxu1 %v19444_v16  ;;  %v2202_v16 = vld [vmem:[#allocation8 + $0x36e8] sm:$0xff]  ;;  %v19570_v54 = vcombine.high %v2185_v55, %v2201_v40 }
 0x7f0   :  { %v19571_v27 = vcombine.low %v2186_v52, %v2202_v16 }
 0x7f1   :  { %14997 = vmatpush1.bf16.msra.mxu0 %v19441_v58  ;;  %v19572_v58 = vcombine.high %v2186_v52, %v2202_v16  ;;  %v2298_v52 = vld [vmem:[#allocation8 + $0x39e8] sm:$0xff] }
 0x7f2   :  { %15161 = vmatpush1.bf16.msra.mxu1 %v19443_v62  ;;  %14998 = vmatprep.subr.bf16.mxu0 %v19474_v4  ;;  %v2217_v62 = vld [vmem:[#allocation8 + $0x3760] sm:$0xff] }
 0x7f3   :  { %15162 = vmatprep.subr.bf16.mxu1 %v19476_v9  ;;  %v2233_v4 = vld [vmem:[#allocation8 + $0x37e0] sm:$0xff] }
 0x7f4   :  { %v19602_v28 = vcombine.high %v2217_v62, %v2233_v4 }
 0x7f5   :  { %14999 = vmatpush1.bf16.msra.mxu0 %v19473_v59 }
 0x7f6   :  { %15163 = vmatpush1.bf16.msra.mxu1 %v19475_v22  ;;  %15000 = vmatprep.subr.bf16.mxu0 %v19506_v15  ;;  %v19569_v22 = vcombine.low %v2185_v55, %v2201_v40  ;;  %v2281_v40 = vld [vmem:[#allocation8 + $0x3960] sm:$0xff] }
 0x7f7   :  { %15164 = vmatprep.subr.bf16.mxu1 %v19508_v26 }
 0x7f9   :  { %15001 = vmatpush1.bf16.msra.mxu0 %v19505_v43  ;;  %v2249_v43 = vld [vmem:[#allocation8 + $0x3860] sm:$0xff] }
 0x7fa   :  { %15165 = vmatpush1.bf16.msra.mxu1 %v19507_v63  ;;  %15002 = vmatprep.subr.bf16.mxu0 %v19538_v37  ;;  %v2265_v63 = vld [vmem:[#allocation8 + $0x38e0] sm:$0xff]  ;;  %v2250_v37 = vld [vmem:[#allocation8 + $0x3868] sm:$0xff] }
 0x7fb   :  { %v23097_v57 = vpop.f32.mrb[28].mxu0  ;;  %15166 = vmatprep.subr.bf16.mxu1 %v19540_v50  ;;  %v2266_v50 = vld [vmem:[#allocation8 + $0x38e8] sm:$0xff]  ;;  %v19633_v16 = vcombine.low %v2249_v43, %v2265_v63 }
 0x7fc   :  { %v23099_v9 = vpop.f32.mrb[28].mxu1  ;;  %v23101_v12 = vpop.f32.mrb[29].mxu0  ;;  %v19636_v55 = vcombine.high %v2250_v37, %v2266_v50 }
 0x7fd   :  { %24059 = vst [vmem:[#allocation24_spill] sm:$0xff] %v23099_v9  ;;  %v23103_v21 = vpop.f32.mrb[29].mxu1  ;;  %v14702_v59 = vpop.f32.mrb[30].mxu0  ;;  %15003 = vmatpush1.bf16.msra.mxu0 %v19537_v53  ;;  %v19601_v9 = vcombine.low %v2217_v62, %v2233_v4  ;;  %v19634_v53 = vcombine.high %v2249_v43, %v2265_v63  ;;  %v2329_v62 = vld [vmem:[#allocation8 + $0x3ae0] sm:$0xff]  ;;  %v2314_v4 = vld [vmem:[#allocation8 + $0x3a68] sm:$0xff] }
 0x7fe   :  { %v14866_v15 = vpop.f32.mrb[30].mxu1  ;;  %15167 = vmatpush1.bf16.msra.mxu1 %v19539_v44  ;;  %v14703_v26 = vpop.f32.mrb[31].mxu0  ;;  %15004 = vmatprep.subr.bf16.mxu0 %v19570_v54  ;;  %v19603_v59 = vcombine.low %v2218_v17, %v2234_v18  ;;  %v2297_v44 = vld [vmem:[#allocation8 + $0x39e0] sm:$0xff]  ;;  %v2282_v54 = vld [vmem:[#allocation8 + $0x3968] sm:$0xff] }
 0x7ff   :  { %v14867_v31 = vpop.f32.mrb[31].mxu1  ;;  %15168 = vmatprep.subr.bf16.mxu1 %v19572_v58  ;;  %v19635_v58 = vcombine.low %v2250_v37, %v2266_v50  ;;  %v19666_v15 = vcombine.high %v2281_v40, %v2297_v44  ;;  %v19668_v26 = vcombine.high %v2282_v54, %v2298_v52  ;;  %v19665_v17 = vcombine.low %v2281_v40, %v2297_v44  ;;  %v2346_v43 = vld [vmem:[#allocation8 + $0x3b68] sm:$0xff]  ;;  %v2393_v40 = vld [vmem:[#allocation8 + $0x3ce0] sm:$0xff] }
 0x800   :  { %v19667_v18 = vcombine.low %v2282_v54, %v2298_v52  ;;  %v2362_v63 = vld [vmem:[#allocation8 + $0x3be8] sm:$0xff] }
 0x801   :  { %15005 = vmatpush1.bf16.msra.mxu0 %v19569_v22  ;;  %v2313_v22 = vld [vmem:[#allocation8 + $0x3a60] sm:$0xff]  ;;  %v2378_v44 = vld [vmem:[#allocation8 + $0x3c68] sm:$0xff]  ;;  %v19731_v52 = vcombine.low %v2346_v43, %v2362_v63 }
 0x802   :  { %15169 = vmatpush1.bf16.msra.mxu1 %v19571_v27  ;;  %15006 = vmatprep.subr.bf16.mxu0 %v19602_v28  ;;  %v2330_v27 = vld [vmem:[#allocation8 + $0x3ae8] sm:$0xff]  ;;  %v19698_v28 = vcombine.high %v2313_v22, %v2329_v62  ;;  %v19697_v37 = vcombine.low %v2313_v22, %v2329_v62  ;;  %v2425_v22 = vld [vmem:[#allocation8 + $0x3de0] sm:$0xff] }
 0x803   :  { %15170 = vmatprep.subr.bf16.mxu1 %v19604_v35  ;;  %v19700_v31 = vcombine.high %v2314_v4, %v2330_v27  ;;  %v2361_v35 = vld [vmem:[#allocation8 + $0x3be0] sm:$0xff]  ;;  %v19699_v50 = vcombine.low %v2314_v4, %v2330_v27  ;;  %v2410_v62 = vld [vmem:[#allocation8 + $0x3d68] sm:$0xff] }
 0x805   :  { %15007 = vmatpush1.bf16.msra.mxu0 %v19601_v9  ;;  %v2345_v9 = vld [vmem:[#allocation8 + $0x3b60] sm:$0xff] }
 0x806   :  { %15171 = vmatpush1.bf16.msra.mxu1 %v19603_v59  ;;  %15008 = vmatprep.subr.bf16.mxu0 %v19634_v53  ;;  %v19730_v59 = vcombine.high %v2345_v9, %v2361_v35  ;;  %v19732_v53 = vcombine.high %v2346_v43, %v2362_v63  ;;  %v19729_v54 = vcombine.low %v2345_v9, %v2361_v35  ;;  %v2457_v9 = vld [vmem:[#allocation8 + $0x3ee0] sm:$0xff]  ;;  %v2442_v35 = vld [vmem:[#allocation8 + $0x3e68] sm:$0xff] }
 0x807   :  { %15172 = vmatprep.subr.bf16.mxu1 %v19636_v55  ;;  %v2377_v55 = vld [vmem:[#allocation8 + $0x3c60] sm:$0xff] }
 0x808   :  { %v19761_v4 = vcombine.low %v2377_v55, %v2393_v40 }
 0x809   :  { %15009 = vmatpush1.bf16.msra.mxu0 %v19633_v16  ;;  %v2394_v16 = vld [vmem:[#allocation8 + $0x3ce8] sm:$0xff] }
 0x80a   :  { %15173 = vmatpush1.bf16.msra.mxu1 %v19635_v58  ;;  %15010 = vmatprep.subr.bf16.mxu0 %v19666_v15  ;;  %v19762_v58 = vcombine.high %v2377_v55, %v2393_v40  ;;  %v19764_v15 = vcombine.high %v2378_v44, %v2394_v16  ;;  %v19763_v27 = vcombine.low %v2378_v44, %v2394_v16  ;;  %v2489_v55 = vld [vmem:[#allocation8 + $0x3fe0] sm:$0xff]  ;;  %v2474_v40 = vld [vmem:[#allocation8 + $0x3f68] sm:$0xff] }
 0x80b   :  { %15174 = vmatprep.subr.bf16.mxu1 %v19668_v26  ;;  %v2409_v26 = vld [vmem:[#allocation8 + $0x3d60] sm:$0xff] }
 0x80c   :  { %v19793_v43 = vcombine.low %v2409_v26, %v2425_v22 }
 0x80d   :  { %15011 = vmatpush1.bf16.msra.mxu0 %v19665_v17  ;;  %v2426_v17 = vld [vmem:[#allocation8 + $0x3de8] sm:$0xff] }
 0x80e   :  { %15175 = vmatpush1.bf16.msra.mxu1 %v19667_v18  ;;  %15012 = vmatprep.subr.bf16.mxu0 %v19698_v28  ;;  %v19794_v18 = vcombine.high %v2409_v26, %v2425_v22  ;;  %v19796_v28 = vcombine.high %v2410_v62, %v2426_v17  ;;  %v19795_v63 = vcombine.low %v2410_v62, %v2426_v17  ;;  %v475_v26 = vld [vmem:[#allocation8 + $0xf0] sm:$0xff]  ;;  %v460_v22 = vld [vmem:[#allocation8 + $0x78] sm:$0xff] }
 0x80f   :  { %15176 = vmatprep.subr.bf16.mxu1 %v19700_v31  ;;  %v2441_v31 = vld [vmem:[#allocation8 + $0x3e60] sm:$0xff] }
 0x810   :  { %v19825_v44 = vcombine.low %v2441_v31, %v2457_v9 }
 0x811   :  { %15013 = vmatpush1.bf16.msra.mxu0 %v19697_v37  ;;  %v2458_v37 = vld [vmem:[#allocation8 + $0x3ee8] sm:$0xff] }
 0x812   :  { %15177 = vmatpush1.bf16.msra.mxu1 %v19699_v50  ;;  %15014 = vmatprep.subr.bf16.mxu0 %v19730_v59  ;;  %v19826_v50 = vcombine.high %v2441_v31, %v2457_v9  ;;  %v19828_v59 = vcombine.high %v2442_v35, %v2458_v37  ;;  %v19827_v16 = vcombine.low %v2442_v35, %v2458_v37  ;;  %v507_v31 = vld [vmem:[#allocation8 + $0x1f0] sm:$0xff]  ;;  %v492_v35 = vld [vmem:[#allocation8 + $0x178] sm:$0xff] }
 0x813   :  { %15178 = vmatprep.subr.bf16.mxu1 %v19732_v53  ;;  %v2473_v53 = vld [vmem:[#allocation8 + $0x3f60] sm:$0xff]  ;;  %v508_v37 = vld [vmem:[#allocation8 + $0x1f8] sm:$0xff] }
 0x814   :  { %v19857_v62 = vcombine.low %v2473_v53, %v2489_v55 }
 0x815   :  { %15015 = vmatpush1.bf16.msra.mxu0 %v19729_v54  ;;  %v2490_v54 = vld [vmem:[#allocation8 + $0x3fe8] sm:$0xff] }
 0x816   :  { %15179 = vmatpush1.bf16.msra.mxu1 %v19731_v52  ;;  %15016 = vmatprep.subr.bf16.mxu0 %v19762_v58  ;;  %v19858_v52 = vcombine.high %v2473_v53, %v2489_v55  ;;  %v19860_v58 = vcombine.high %v2474_v40, %v2490_v54  ;;  %v19859_v17 = vcombine.low %v2474_v40, %v2490_v54  ;;  %v524_v55 = vld [vmem:[#allocation8 + $0x278] sm:$0xff] }
 0x817   :  { %15180 = vmatprep.subr.bf16.mxu1 %v19764_v15  ;;  %v459_v15 = vld [vmem:[#allocation8 + $0x70] sm:$0xff]  ;;  %v17880_v53 = vcombine.high %v492_v35, %v508_v37  ;;  %v540_v40 = vld [vmem:[#allocation8 + $0x2f8] sm:$0xff] }
 0x818   :  { %v17845_v9 = vcombine.low %v459_v15, %v475_v26 }
 0x819   :  { %15017 = vmatpush1.bf16.msra.mxu0 %v19761_v4  ;;  %v476_v4 = vld [vmem:[#allocation8 + $0xf8] sm:$0xff] }
 0x81a   :  { %15181 = vmatpush1.bf16.msra.mxu1 %v19763_v27  ;;  %15018 = vmatprep.subr.bf16.mxu0 %v19794_v18  ;;  %v17846_v27 = vcombine.high %v459_v15, %v475_v26  ;;  %v17848_v18 = vcombine.high %v460_v22, %v476_v4  ;;  %v571_v15 = vld [vmem:[#allocation8 + $0x3f0] sm:$0xff]  ;;  %v556_v26 = vld [vmem:[#allocation8 + $0x378] sm:$0xff] }
 0x81b   :  { %15182 = vmatprep.subr.bf16.mxu1 %v19796_v28  ;;  %v491_v28 = vld [vmem:[#allocation8 + $0x170] sm:$0xff] }
 0x81c   :  { %v17877_v54 = vcombine.low %v491_v28, %v507_v31 }
 0x81d   :  { %15019 = vmatpush1.bf16.msra.mxu0 %v19793_v43  ;;  %v17847_v43 = vcombine.low %v460_v22, %v476_v4  ;;  %v572_v22 = vld [vmem:[#allocation8 + $0x3f8] sm:$0xff] }
 0x81e   :  { %15183 = vmatpush1.bf16.msra.mxu1 %v19795_v63  ;;  %15020 = vmatprep.subr.bf16.mxu0 %v19826_v50  ;;  %v17878_v63 = vcombine.high %v491_v28, %v507_v31  ;;  %v523_v50 = vld [vmem:[#allocation8 + $0x270] sm:$0xff]  ;;  %v588_v31 = vld [vmem:[#allocation8 + $0x478] sm:$0xff] }
 0x81f   :  { %15184 = vmatprep.subr.bf16.mxu1 %v19828_v59  ;;  %v539_v59 = vld [vmem:[#allocation8 + $0x2f0] sm:$0xff] }
 0x820   :  { %v17909_v4 = vcombine.low %v523_v50, %v539_v59  ;;  %v603_v28 = vld [vmem:[#allocation8 + $0x4f0] sm:$0xff] }
 0x821   :  { %15021 = vmatpush1.bf16.msra.mxu0 %v19825_v44  ;;  %v17879_v44 = vcombine.low %v492_v35, %v508_v37  ;;  %v17943_v35 = vcombine.low %v556_v26, %v572_v22 }
 0x822   :  { %15185 = vmatpush1.bf16.msra.mxu1 %v19827_v16  ;;  %15022 = vmatprep.subr.bf16.mxu0 %v19858_v52  ;;  %v17910_v16 = vcombine.high %v523_v50, %v539_v59  ;;  %v17912_v52 = vcombine.high %v524_v55, %v540_v40  ;;  %v635_v50 = vld [vmem:[#allocation8 + $0x5f0] sm:$0xff]  ;;  %v620_v59 = vld [vmem:[#allocation8 + $0x578] sm:$0xff] }
 0x823   :  { %15186 = vmatprep.subr.bf16.mxu1 %v19860_v58  ;;  %v555_v58 = vld [vmem:[#allocation8 + $0x370] sm:$0xff] }
 0x825   :  { %15023 = vmatpush1.bf16.msra.mxu0 %v19857_v62  ;;  %v17911_v62 = vcombine.low %v524_v55, %v540_v40 }
 0x826   :  { %15187 = vmatpush1.bf16.msra.mxu1 %v19859_v17  ;;  %15197 = vmatprep.subr.bf16.mxu0 %v17846_v27  ;;  %v17942_v17 = vcombine.high %v555_v58, %v571_v15  ;;  %v17944_v27 = vcombine.high %v556_v26, %v572_v22 }
 0x827   :  { %15361 = vmatprep.subr.bf16.mxu1 %v17848_v18  ;;  %v587_v18 = vld [vmem:[#allocation8 + $0x470] sm:$0xff] }
 0x828   :  { %15025 = vmatmul.mubr.bf16.vlgmr.msra.gmra.mrb[32].mxu0 %v22959_v24  ;;  %v17974_v37 = vcombine.high %v587_v18, %v603_v28  ;;  %v17973_v55 = vcombine.low %v587_v18, %v603_v28  ;;  %v684_v18 = vld [vmem:[#allocation8 + $0x778] sm:$0xff] }
 0x829   :  { %15189 = vmatmul.mubr.bf16.vlgmr.msra.gmra.mrb[32].mxu1 %v22959_v24  ;;  %15198 = vmatpush1.bf16.msra.mxu0 %v17845_v9  ;;  %v604_v9 = vld [vmem:[#allocation8 + $0x4f8] sm:$0xff] }
 0x82a   :  { %15229 = vmatprep.mubr.bf16.mxu0 %v22894_v6  ;;  %15362 = vmatpush1.bf16.msra.mxu1 %v17847_v43  ;;  %v17976_v43 = vcombine.high %v588_v31, %v604_v9  ;;  %v17975_v40 = vcombine.low %v588_v31, %v604_v9  ;;  %v700_v28 = vld [vmem:[#allocation8 + $0x7f8] sm:$0xff] }
 0x82b   :  { %15393 = vmatprep.mubr.bf16.mxu1 %v22894_v6  ;;  %15199 = vmatprep.subr.bf16.mxu0 %v17878_v63  ;;  %v17941_v6 = vcombine.low %v555_v58, %v571_v15  ;;  %v619_v63 = vld [vmem:[#allocation8 + $0x570] sm:$0xff]  ;;  %v652_v58 = vld [vmem:[#allocation8 + $0x678] sm:$0xff] }
 0x82c   :  { %15363 = vmatprep.subr.bf16.mxu1 %v17880_v53  ;;  %v636_v53 = vld [vmem:[#allocation8 + $0x5f8] sm:$0xff]  ;;  %v18005_v26 = vcombine.low %v619_v63, %v635_v50 }
 0x82d   :  { %15200 = vmatpush1.bf16.msra.mxu0 %v17877_v54  ;;  %v18006_v54 = vcombine.high %v619_v63, %v635_v50  ;;  %v668_v15 = vld [vmem:[#allocation8 + $0x6f8] sm:$0xff]  ;;  %v18007_v22 = vcombine.low %v620_v59, %v636_v53 }
 0x82e   :  { %15364 = vmatpush1.bf16.msra.mxu1 %v17879_v44  ;;  %15201 = vmatprep.subr.bf16.mxu0 %v17910_v16  ;;  %v18008_v44 = vcombine.high %v620_v59, %v636_v53  ;;  %v651_v16 = vld [vmem:[#allocation8 + $0x670] sm:$0xff]  ;;  %v18039_v9 = vcombine.low %v652_v58, %v668_v15  ;;  %v716_v63 = vld [vmem:[#allocation8 + $0x878] sm:$0xff]  ;;  %v18071_v53 = vcombine.low %v684_v18, %v700_v28 }
 0x82f   :  { %15365 = vmatprep.subr.bf16.mxu1 %v17912_v52  ;;  %v667_v52 = vld [vmem:[#allocation8 + $0x6f0] sm:$0xff]  ;;  %v732_v50 = vld [vmem:[#allocation8 + $0x8f8] sm:$0xff] }
 0x830   :  { %v18037_v31 = vcombine.low %v651_v16, %v667_v52 }
 0x831   :  { %15202 = vmatpush1.bf16.msra.mxu0 %v17909_v4  ;;  %v18038_v4 = vcombine.high %v651_v16, %v667_v52  ;;  %v748_v16 = vld [vmem:[#allocation8 + $0x978] sm:$0xff] }
 0x832   :  { %15366 = vmatpush1.bf16.msra.mxu1 %v17911_v62  ;;  %15203 = vmatprep.subr.bf16.mxu0 %v17942_v17  ;;  %v18040_v62 = vcombine.high %v652_v58, %v668_v15  ;;  %v683_v17 = vld [vmem:[#allocation8 + $0x770] sm:$0xff]  ;;  %v764_v52 = vld [vmem:[#allocation8 + $0x9f8] sm:$0xff]  ;;  %v18103_v15 = vcombine.low %v716_v63, %v732_v50 }
 0x833   :  { %15367 = vmatprep.subr.bf16.mxu1 %v17944_v27  ;;  %v699_v27 = vld [vmem:[#allocation8 + $0x7f0] sm:$0xff] }
 0x834   :  { %v18069_v59 = vcombine.low %v683_v17, %v699_v27 }
 0x835   :  { %15204 = vmatpush1.bf16.msra.mxu0 %v17941_v6  ;;  %v18070_v6 = vcombine.high %v683_v17, %v699_v27  ;;  %v780_v17 = vld [vmem:[#allocation8 + $0xa78] sm:$0xff] }
 0x836   :  { %15368 = vmatpush1.bf16.msra.mxu1 %v17943_v35  ;;  %15205 = vmatprep.subr.bf16.mxu0 %v17974_v37  ;;  %v18072_v35 = vcombine.high %v684_v18, %v700_v28  ;;  %v715_v37 = vld [vmem:[#allocation8 + $0x870] sm:$0xff]  ;;  %v796_v27 = vld [vmem:[#allocation8 + $0xaf8] sm:$0xff]  ;;  %v18135_v28 = vcombine.low %v748_v16, %v764_v52 }
 0x837   :  { %15369 = vmatprep.subr.bf16.mxu1 %v17976_v43  ;;  %v731_v43 = vld [vmem:[#allocation8 + $0x8f0] sm:$0xff] }
 0x838   :  { %v18101_v58 = vcombine.low %v715_v37, %v731_v43 }
 0x839   :  { %15206 = vmatpush1.bf16.msra.mxu0 %v17973_v55  ;;  %v18102_v55 = vcombine.high %v715_v37, %v731_v43  ;;  %v812_v37 = vld [vmem:[#allocation8 + $0xb78] sm:$0xff] }
 0x83a   :  { %15370 = vmatpush1.bf16.msra.mxu1 %v17975_v40  ;;  %15207 = vmatprep.subr.bf16.mxu0 %v18006_v54  ;;  %v18104_v40 = vcombine.high %v716_v63, %v732_v50  ;;  %v747_v54 = vld [vmem:[#allocation8 + $0x970] sm:$0xff]  ;;  %v828_v43 = vld [vmem:[#allocation8 + $0xbf8] sm:$0xff]  ;;  %v18167_v50 = vcombine.low %v780_v17, %v796_v27 }
 0x83b   :  { %15371 = vmatprep.subr.bf16.mxu1 %v18008_v44  ;;  %v763_v44 = vld [vmem:[#allocation8 + $0x9f0] sm:$0xff] }
 0x83c   :  { %v18133_v18 = vcombine.low %v747_v54, %v763_v44 }
 0x83d   :  { %15208 = vmatpush1.bf16.msra.mxu0 %v18005_v26  ;;  %v18134_v26 = vcombine.high %v747_v54, %v763_v44  ;;  %v844_v54 = vld [vmem:[#allocation8 + $0xc78] sm:$0xff] }
 0x83e   :  { %15372 = vmatpush1.bf16.msra.mxu1 %v18007_v22  ;;  %15209 = vmatprep.subr.bf16.mxu0 %v18038_v4  ;;  %v18136_v22 = vcombine.high %v748_v16, %v764_v52  ;;  %v779_v4 = vld [vmem:[#allocation8 + $0xa70] sm:$0xff]  ;;  %v860_v44 = vld [vmem:[#allocation8 + $0xcf8] sm:$0xff]  ;;  %v18199_v52 = vcombine.low %v812_v37, %v828_v43 }
 0x83f   :  { %15373 = vmatprep.subr.bf16.mxu1 %v18040_v62  ;;  %v795_v62 = vld [vmem:[#allocation8 + $0xaf0] sm:$0xff] }
 0x840   :  { %v18165_v63 = vcombine.low %v779_v4, %v795_v62 }
 0x841   :  { %15210 = vmatpush1.bf16.msra.mxu0 %v18037_v31  ;;  %v18166_v31 = vcombine.high %v779_v4, %v795_v62  ;;  %v876_v4 = vld [vmem:[#allocation8 + $0xd78] sm:$0xff] }
 0x842   :  { %15374 = vmatpush1.bf16.msra.mxu1 %v18039_v9  ;;  %15211 = vmatprep.subr.bf16.mxu0 %v18070_v6  ;;  %v18168_v9 = vcombine.high %v780_v17, %v796_v27  ;;  %v811_v6 = vld [vmem:[#allocation8 + $0xb70] sm:$0xff]  ;;  %v892_v62 = vld [vmem:[#allocation8 + $0xdf8] sm:$0xff]  ;;  %v18231_v27 = vcombine.low %v844_v54, %v860_v44 }
 0x843   :  { %15375 = vmatprep.subr.bf16.mxu1 %v18072_v35  ;;  %v827_v35 = vld [vmem:[#allocation8 + $0xbf0] sm:$0xff] }
 0x844   :  { %v18197_v16 = vcombine.low %v811_v6, %v827_v35 }
 0x845   :  { %15212 = vmatpush1.bf16.msra.mxu0 %v18069_v59  ;;  %v18198_v59 = vcombine.high %v811_v6, %v827_v35  ;;  %v908_v6 = vld [vmem:[#allocation8 + $0xe78] sm:$0xff] }
 0x846   :  { %15376 = vmatpush1.bf16.msra.mxu1 %v18071_v53  ;;  %15213 = vmatprep.subr.bf16.mxu0 %v18102_v55  ;;  %v18200_v53 = vcombine.high %v812_v37, %v828_v43  ;;  %v843_v55 = vld [vmem:[#allocation8 + $0xc70] sm:$0xff]  ;;  %v924_v35 = vld [vmem:[#allocation8 + $0xef8] sm:$0xff]  ;;  %v18263_v43 = vcombine.low %v876_v4, %v892_v62 }
 0x847   :  { %15377 = vmatprep.subr.bf16.mxu1 %v18104_v40  ;;  %v859_v40 = vld [vmem:[#allocation8 + $0xcf0] sm:$0xff] }
 0x848   :  { %v18229_v17 = vcombine.low %v843_v55, %v859_v40 }
 0x849   :  { %15214 = vmatpush1.bf16.msra.mxu0 %v18101_v58  ;;  %v18230_v58 = vcombine.high %v843_v55, %v859_v40  ;;  %v940_v55 = vld [vmem:[#allocation8 + $0xf78] sm:$0xff] }
 0x84a   :  { %15378 = vmatpush1.bf16.msra.mxu1 %v18103_v15  ;;  %15215 = vmatprep.subr.bf16.mxu0 %v18134_v26  ;;  %v18232_v15 = vcombine.high %v844_v54, %v860_v44  ;;  %v875_v26 = vld [vmem:[#allocation8 + $0xd70] sm:$0xff]  ;;  %v956_v40 = vld [vmem:[#allocation8 + $0xff8] sm:$0xff]  ;;  %v18295_v44 = vcombine.low %v908_v6, %v924_v35 }
 0x84b   :  { %15379 = vmatprep.subr.bf16.mxu1 %v18136_v22  ;;  %v891_v22 = vld [vmem:[#allocation8 + $0xdf0] sm:$0xff] }
 0x84c   :  { %v18261_v37 = vcombine.low %v875_v26, %v891_v22 }
 0x84d   :  { %15216 = vmatpush1.bf16.msra.mxu0 %v18133_v18  ;;  %v18262_v18 = vcombine.high %v875_v26, %v891_v22  ;;  %v972_v26 = vld [vmem:[#allocation8 + $0x1078] sm:$0xff] }
 0x84e   :  { %15380 = vmatpush1.bf16.msra.mxu1 %v18135_v28  ;;  %15217 = vmatprep.subr.bf16.mxu0 %v18166_v31  ;;  %v18264_v28 = vcombine.high %v876_v4, %v892_v62  ;;  %v907_v31 = vld [vmem:[#allocation8 + $0xe70] sm:$0xff]  ;;  %v988_v22 = vld [vmem:[#allocation8 + $0x10f8] sm:$0xff]  ;;  %v18327_v62 = vcombine.low %v940_v55, %v956_v40 }
 0x84f   :  { %15381 = vmatprep.subr.bf16.mxu1 %v18168_v9  ;;  %v923_v9 = vld [vmem:[#allocation8 + $0xef0] sm:$0xff] }
 0x850   :  { %v18293_v54 = vcombine.low %v907_v31, %v923_v9 }
 0x851   :  { %15218 = vmatpush1.bf16.msra.mxu0 %v18165_v63  ;;  %v18294_v63 = vcombine.high %v907_v31, %v923_v9  ;;  %v1004_v9 = vld [vmem:[#allocation8 + $0x1178] sm:$0xff] }
 0x852   :  { %15382 = vmatpush1.bf16.msra.mxu1 %v18167_v50  ;;  %15219 = vmatprep.subr.bf16.mxu0 %v18198_v59  ;;  %v18296_v50 = vcombine.high %v908_v6, %v924_v35  ;;  %v939_v59 = vld [vmem:[#allocation8 + $0xf70] sm:$0xff]  ;;  %v1020_v6 = vld [vmem:[#allocation8 + $0x11f8] sm:$0xff]  ;;  %v18359_v35 = vcombine.low %v972_v26, %v988_v22 }
 0x853   :  { %15383 = vmatprep.subr.bf16.mxu1 %v18200_v53  ;;  %v955_v53 = vld [vmem:[#allocation8 + $0xff0] sm:$0xff] }
 0x854   :  { %v18325_v4 = vcombine.low %v939_v59, %v955_v53 }
 0x855   :  { %15220 = vmatpush1.bf16.msra.mxu0 %v18197_v16  ;;  %v18326_v16 = vcombine.high %v939_v59, %v955_v53  ;;  %v1036_v59 = vld [vmem:[#allocation8 + $0x1278] sm:$0xff] }
 0x856   :  { %15384 = vmatpush1.bf16.msra.mxu1 %v18199_v52  ;;  %15221 = vmatprep.subr.bf16.mxu0 %v18230_v58  ;;  %v18328_v52 = vcombine.high %v940_v55, %v956_v40  ;;  %v971_v58 = vld [vmem:[#allocation8 + $0x1070] sm:$0xff]  ;;  %v1052_v53 = vld [vmem:[#allocation8 + $0x12f8] sm:$0xff]  ;;  %v18391_v40 = vcombine.low %v1004_v9, %v1020_v6 }
 0x857   :  { %15385 = vmatprep.subr.bf16.mxu1 %v18232_v15  ;;  %v987_v15 = vld [vmem:[#allocation8 + $0x10f0] sm:$0xff] }
 0x858   :  { %v18357_v31 = vcombine.low %v971_v58, %v987_v15 }
 0x859   :  { %15222 = vmatpush1.bf16.msra.mxu0 %v18229_v17  ;;  %v18358_v17 = vcombine.high %v971_v58, %v987_v15  ;;  %v1068_v58 = vld [vmem:[#allocation8 + $0x1378] sm:$0xff] }
 0x85a   :  { %15386 = vmatpush1.bf16.msra.mxu1 %v18231_v27  ;;  %15223 = vmatprep.subr.bf16.mxu0 %v18262_v18  ;;  %v18360_v27 = vcombine.high %v972_v26, %v988_v22  ;;  %v1003_v18 = vld [vmem:[#allocation8 + $0x1170] sm:$0xff]  ;;  %v1084_v15 = vld [vmem:[#allocation8 + $0x13f8] sm:$0xff] }
 0x85b   :  { %15387 = vmatprep.subr.bf16.mxu1 %v18264_v28  ;;  %v1019_v28 = vld [vmem:[#allocation8 + $0x11f0] sm:$0xff] }
 0x85c   :  { %v18389_v55 = vcombine.low %v1003_v18, %v1019_v28 }
 0x85d   :  { %15224 = vmatpush1.bf16.msra.mxu0 %v18261_v37  ;;  %v18390_v37 = vcombine.high %v1003_v18, %v1019_v28  ;;  %v1116_v18 = vld [vmem:[#allocation8 + $0x14f8] sm:$0xff]  ;;  %v18455_v28 = vcombine.low %v1068_v58, %v1084_v15 }
 0x85e   :  { %15388 = vmatpush1.bf16.msra.mxu1 %v18263_v43  ;;  %15225 = vmatprep.subr.bf16.mxu0 %v18294_v63  ;;  %v1035_v43 = vld [vmem:[#allocation8 + $0x1270] sm:$0xff] }
 0x85f   :  { %15389 = vmatprep.subr.bf16.mxu1 %v18296_v50  ;;  %v1051_v63 = vld [vmem:[#allocation8 + $0x12f0] sm:$0xff]  ;;  %v18392_v50 = vcombine.high %v1004_v9, %v1020_v6 }
 0x860   :  { %v18421_v26 = vcombine.low %v1035_v43, %v1051_v63  ;;  %v1131_v6 = vld [vmem:[#allocation8 + $0x1570] sm:$0xff] }
 0x861   :  { %15226 = vmatpush1.bf16.msra.mxu0 %v18293_v54  ;;  %v18422_v54 = vcombine.high %v1035_v43, %v1051_v63  ;;  %v1148_v43 = vld [vmem:[#allocation8 + $0x15f8] sm:$0xff] }
 0x862   :  { %15390 = vmatpush1.bf16.msra.mxu1 %v18295_v44  ;;  %15227 = vmatprep.subr.bf16.mxu0 %v18326_v16  ;;  %v18424_v44 = vcombine.high %v1036_v59, %v1052_v53  ;;  %v1067_v16 = vld [vmem:[#allocation8 + $0x1370] sm:$0xff] }
 0x863   :  { %15391 = vmatprep.subr.bf16.mxu1 %v18328_v52  ;;  %v1083_v52 = vld [vmem:[#allocation8 + $0x13f0] sm:$0xff] }
 0x864   :  { %v18454_v22 = vcombine.high %v1067_v16, %v1083_v52 }
 0x865   :  { %15228 = vmatpush1.bf16.msra.mxu0 %v18325_v4  ;;  %v18456_v4 = vcombine.high %v1068_v58, %v1084_v15 }
 0x866   :  { %15392 = vmatpush1.bf16.msra.mxu1 %v18327_v62  ;;  %15238 = vmatprep.subr.bf16.mxu0 %v18358_v17  ;;  %v1099_v62 = vld [vmem:[#allocation8 + $0x1470] sm:$0xff] }
 0x867   :  { %15402 = vmatprep.subr.bf16.mxu1 %v18360_v27  ;;  %v1115_v17 = vld [vmem:[#allocation8 + $0x14f0] sm:$0xff]  ;;  %v1100_v27 = vld [vmem:[#allocation8 + $0x1478] sm:$0xff] }
 0x868   :  { %15230 = vmatmul.mubr.bf16.vlgmr.msra.gmra.mrb[36].mxu0 %v22896_v7  ;;  %v18488_v9 = vcombine.high %v1100_v27, %v1116_v18  ;;  %v18485_v63 = vcombine.low %v1099_v62, %v1115_v17 }
 0x869   :  { %15394 = vmatmul.mubr.bf16.vlgmr.msra.gmra.mrb[36].mxu1 %v22896_v7  ;;  %15239 = vmatpush1.bf16.msra.mxu0 %v18357_v31  ;;  %v18423_v7 = vcombine.low %v1036_v59, %v1052_v53  ;;  %v18486_v31 = vcombine.high %v1099_v62, %v1115_v17 }
 0x86a   :  { %15270 = vmatprep.mubr.bf16.mxu0 %v22900_v14  ;;  %15403 = vmatpush1.bf16.msra.mxu1 %v18359_v35  ;;  %v1147_v35 = vld [vmem:[#allocation8 + $0x15f0] sm:$0xff] }
 0x86b   :  { %15434 = vmatprep.mubr.bf16.mxu1 %v22900_v14  ;;  %15240 = vmatprep.subr.bf16.mxu0 %v18390_v37  ;;  %v18453_v14 = vcombine.low %v1067_v16, %v1083_v52  ;;  %v1132_v37 = vld [vmem:[#allocation8 + $0x1578] sm:$0xff]  ;;  %v18518_v59 = vcombine.high %v1131_v6, %v1147_v35  ;;  %v18517_v16 = vcombine.low %v1131_v6, %v1147_v35 }
 0x86c   :  { %15404 = vmatprep.subr.bf16.mxu1 %v18392_v50  ;;  %v18487_v50 = vcombine.low %v1100_v27, %v1116_v18  ;;  %v18520_v53 = vcombine.high %v1132_v37, %v1148_v43  ;;  %v18519_v52 = vcombine.low %v1132_v37, %v1148_v43 }
 0x86d   :  { %15241 = vmatpush1.bf16.msra.mxu0 %v18389_v55  ;;  %v1163_v55 = vld [vmem:[#allocation8 + $0x1670] sm:$0xff] }
 0x86e   :  { %15405 = vmatpush1.bf16.msra.mxu1 %v18391_v40  ;;  %15242 = vmatprep.subr.bf16.mxu0 %v18422_v54  ;;  %v1179_v40 = vld [vmem:[#allocation8 + $0x16f0] sm:$0xff]  ;;  %v1164_v54 = vld [vmem:[#allocation8 + $0x1678] sm:$0xff] }
 0x86f   :  { %15406 = vmatprep.subr.bf16.mxu1 %v18424_v44  ;;  %v1180_v44 = vld [vmem:[#allocation8 + $0x16f8] sm:$0xff]  ;;  %v18550_v58 = vcombine.high %v1163_v55, %v1179_v40  ;;  %v18549_v62 = vcombine.low %v1163_v55, %v1179_v40 }
 0x870   :  { %v18552_v15 = vcombine.high %v1164_v54, %v1180_v44  ;;  %v18551_v17 = vcombine.low %v1164_v54, %v1180_v44 }
 0x871   :  { %15243 = vmatpush1.bf16.msra.mxu0 %v18421_v26  ;;  %v1195_v26 = vld [vmem:[#allocation8 + $0x1770] sm:$0xff] }
 0x872   :  { %15407 = vmatpush1.bf16.msra.mxu1 %v18423_v7  ;;  %15244 = vmatprep.subr.bf16.mxu0 %v18454_v22  ;;  %v1211_v7 = vld [vmem:[#allocation8 + $0x17f0] sm:$0xff]  ;;  %v1196_v22 = vld [vmem:[#allocation8 + $0x1778] sm:$0xff] }
 0x873   :  { %15408 = vmatprep.subr.bf16.mxu1 %v18456_v4  ;;  %v1212_v4 = vld [vmem:[#allocation8 + $0x17f8] sm:$0xff]  ;;  %v18582_v27 = vcombine.high %v1195_v26, %v1211_v7  ;;  %v18581_v6 = vcombine.low %v1195_v26, %v1211_v7 }
 0x874   :  { %v18584_v18 = vcombine.high %v1196_v22, %v1212_v4  ;;  %v18583_v35 = vcombine.low %v1196_v22, %v1212_v4 }
 0x875   :  { %15245 = vmatpush1.bf16.msra.mxu0 %v18453_v14  ;;  %v1227_v14 = vld [vmem:[#allocation8 + $0x1870] sm:$0xff] }
 0x876   :  { %15409 = vmatpush1.bf16.msra.mxu1 %v18455_v28  ;;  %15246 = vmatprep.subr.bf16.mxu0 %v18486_v31  ;;  %v1243_v28 = vld [vmem:[#allocation8 + $0x18f0] sm:$0xff]  ;;  %v1228_v31 = vld [vmem:[#allocation8 + $0x1878] sm:$0xff] }
 0x877   :  { %15410 = vmatprep.subr.bf16.mxu1 %v18488_v9  ;;  %v1244_v9 = vld [vmem:[#allocation8 + $0x18f8] sm:$0xff]  ;;  %v18614_v37 = vcombine.high %v1227_v14, %v1243_v28  ;;  %v18613_v55 = vcombine.low %v1227_v14, %v1243_v28 }
 0x878   :  { %v18616_v43 = vcombine.high %v1228_v31, %v1244_v9  ;;  %v18615_v40 = vcombine.low %v1228_v31, %v1244_v9 }
 0x879   :  { %15247 = vmatpush1.bf16.msra.mxu0 %v18485_v63  ;;  %v1259_v63 = vld [vmem:[#allocation8 + $0x1970] sm:$0xff] }
 0x87a   :  { %15411 = vmatpush1.bf16.msra.mxu1 %v18487_v50  ;;  %15248 = vmatprep.subr.bf16.mxu0 %v18518_v59  ;;  %v1275_v50 = vld [vmem:[#allocation8 + $0x19f0] sm:$0xff]  ;;  %v1260_v59 = vld [vmem:[#allocation8 + $0x1978] sm:$0xff] }
 0x87b   :  { %15412 = vmatprep.subr.bf16.mxu1 %v18520_v53  ;;  %v1276_v53 = vld [vmem:[#allocation8 + $0x19f8] sm:$0xff]  ;;  %v18646_v54 = vcombine.high %v1259_v63, %v1275_v50  ;;  %v18645_v26 = vcombine.low %v1259_v63, %v1275_v50 }
 0x87c   :  { %v18648_v44 = vcombine.high %v1260_v59, %v1276_v53  ;;  %v18647_v7 = vcombine.low %v1260_v59, %v1276_v53 }
 0x87d   :  { %15249 = vmatpush1.bf16.msra.mxu0 %v18517_v16  ;;  %v1291_v16 = vld [vmem:[#allocation8 + $0x1a70] sm:$0xff] }
 0x87e   :  { %15413 = vmatpush1.bf16.msra.mxu1 %v18519_v52  ;;  %15250 = vmatprep.subr.bf16.mxu0 %v18550_v58  ;;  %v1307_v52 = vld [vmem:[#allocation8 + $0x1af0] sm:$0xff]  ;;  %v1292_v58 = vld [vmem:[#allocation8 + $0x1a78] sm:$0xff] }
 0x87f   :  { %15414 = vmatprep.subr.bf16.mxu1 %v18552_v15  ;;  %v1308_v15 = vld [vmem:[#allocation8 + $0x1af8] sm:$0xff]  ;;  %v18678_v22 = vcombine.high %v1291_v16, %v1307_v52  ;;  %v18677_v14 = vcombine.low %v1291_v16, %v1307_v52 }
 0x880   :  { %v18680_v4 = vcombine.high %v1292_v58, %v1308_v15  ;;  %v18679_v28 = vcombine.low %v1292_v58, %v1308_v15 }
 0x881   :  { %15251 = vmatpush1.bf16.msra.mxu0 %v18549_v62  ;;  %v1323_v62 = vld [vmem:[#allocation8 + $0x1b70] sm:$0xff] }
 0x882   :  { %15415 = vmatpush1.bf16.msra.mxu1 %v18551_v17  ;;  %15252 = vmatprep.subr.bf16.mxu0 %v18582_v27  ;;  %v1339_v17 = vld [vmem:[#allocation8 + $0x1bf0] sm:$0xff]  ;;  %v1324_v27 = vld [vmem:[#allocation8 + $0x1b78] sm:$0xff] }
 0x883   :  { %15416 = vmatprep.subr.bf16.mxu1 %v18584_v18  ;;  %v1340_v18 = vld [vmem:[#allocation8 + $0x1bf8] sm:$0xff]  ;;  %v18710_v31 = vcombine.high %v1323_v62, %v1339_v17  ;;  %v18709_v63 = vcombine.low %v1323_v62, %v1339_v17 }
 0x884   :  { %v18712_v9 = vcombine.high %v1324_v27, %v1340_v18  ;;  %v18711_v50 = vcombine.low %v1324_v27, %v1340_v18 }
 0x885   :  { %15253 = vmatpush1.bf16.msra.mxu0 %v18581_v6  ;;  %v1355_v6 = vld [vmem:[#allocation8 + $0x1c70] sm:$0xff] }
 0x886   :  { %15417 = vmatpush1.bf16.msra.mxu1 %v18583_v35  ;;  %15254 = vmatprep.subr.bf16.mxu0 %v18614_v37  ;;  %v1371_v35 = vld [vmem:[#allocation8 + $0x1cf0] sm:$0xff]  ;;  %v1356_v37 = vld [vmem:[#allocation8 + $0x1c78] sm:$0xff] }
 0x887   :  { %15418 = vmatprep.subr.bf16.mxu1 %v18616_v43  ;;  %v1372_v43 = vld [vmem:[#allocation8 + $0x1cf8] sm:$0xff]  ;;  %v18742_v59 = vcombine.high %v1355_v6, %v1371_v35  ;;  %v18741_v16 = vcombine.low %v1355_v6, %v1371_v35 }
 0x888   :  { %v18744_v53 = vcombine.high %v1356_v37, %v1372_v43  ;;  %v18743_v52 = vcombine.low %v1356_v37, %v1372_v43 }
 0x889   :  { %15255 = vmatpush1.bf16.msra.mxu0 %v18613_v55  ;;  %v1387_v55 = vld [vmem:[#allocation8 + $0x1d70] sm:$0xff] }
 0x88a   :  { %15419 = vmatpush1.bf16.msra.mxu1 %v18615_v40  ;;  %15256 = vmatprep.subr.bf16.mxu0 %v18646_v54  ;;  %v1403_v40 = vld [vmem:[#allocation8 + $0x1df0] sm:$0xff]  ;;  %v1388_v54 = vld [vmem:[#allocation8 + $0x1d78] sm:$0xff] }
 0x88b   :  { %15420 = vmatprep.subr.bf16.mxu1 %v18648_v44  ;;  %v1404_v44 = vld [vmem:[#allocation8 + $0x1df8] sm:$0xff]  ;;  %v18774_v58 = vcombine.high %v1387_v55, %v1403_v40  ;;  %v18773_v62 = vcombine.low %v1387_v55, %v1403_v40 }
 0x88c   :  { %v18776_v15 = vcombine.high %v1388_v54, %v1404_v44  ;;  %v18775_v17 = vcombine.low %v1388_v54, %v1404_v44 }
 0x88d   :  { %15257 = vmatpush1.bf16.msra.mxu0 %v18645_v26  ;;  %v1419_v26 = vld [vmem:[#allocation8 + $0x1e70] sm:$0xff] }
 0x88e   :  { %15421 = vmatpush1.bf16.msra.mxu1 %v18647_v7  ;;  %15258 = vmatprep.subr.bf16.mxu0 %v18678_v22  ;;  %v1435_v7 = vld [vmem:[#allocation8 + $0x1ef0] sm:$0xff]  ;;  %v1420_v22 = vld [vmem:[#allocation8 + $0x1e78] sm:$0xff] }
 0x88f   :  { %15422 = vmatprep.subr.bf16.mxu1 %v18680_v4  ;;  %v1436_v4 = vld [vmem:[#allocation8 + $0x1ef8] sm:$0xff]  ;;  %v18806_v27 = vcombine.high %v1419_v26, %v1435_v7  ;;  %v18805_v6 = vcombine.low %v1419_v26, %v1435_v7 }
 0x890   :  { %v18808_v18 = vcombine.high %v1420_v22, %v1436_v4  ;;  %v18807_v35 = vcombine.low %v1420_v22, %v1436_v4  ;;  %v1532_v26 = vld [vmem:[#allocation8 + $0x21f8] sm:$0xff]  ;;  %v1547_v4 = vld [vmem:[#allocation8 + $0x2270] sm:$0xff] }
 0x891   :  { %15259 = vmatpush1.bf16.msra.mxu0 %v18677_v14  ;;  %v1451_v14 = vld [vmem:[#allocation8 + $0x1f70] sm:$0xff] }
 0x892   :  { %15423 = vmatpush1.bf16.msra.mxu1 %v18679_v28  ;;  %15260 = vmatprep.subr.bf16.mxu0 %v18710_v31  ;;  %v1467_v28 = vld [vmem:[#allocation8 + $0x1ff0] sm:$0xff]  ;;  %v1452_v31 = vld [vmem:[#allocation8 + $0x1f78] sm:$0xff] }
 0x893   :  { %15424 = vmatprep.subr.bf16.mxu1 %v18712_v9  ;;  %v1468_v9 = vld [vmem:[#allocation8 + $0x1ff8] sm:$0xff]  ;;  %v18838_v37 = vcombine.high %v1451_v14, %v1467_v28  ;;  %v18837_v55 = vcombine.low %v1451_v14, %v1467_v28 }
 0x894   :  { %v18840_v43 = vcombine.high %v1452_v31, %v1468_v9  ;;  %v18839_v40 = vcombine.low %v1452_v31, %v1468_v9 }
 0x895   :  { %15261 = vmatpush1.bf16.msra.mxu0 %v18709_v63  ;;  %v1483_v63 = vld [vmem:[#allocation8 + $0x2070] sm:$0xff] }
 0x896   :  { %15425 = vmatpush1.bf16.msra.mxu1 %v18711_v50  ;;  %15262 = vmatprep.subr.bf16.mxu0 %v18742_v59  ;;  %v1499_v50 = vld [vmem:[#allocation8 + $0x20f0] sm:$0xff]  ;;  %v1484_v59 = vld [vmem:[#allocation8 + $0x2078] sm:$0xff] }
 0x897   :  { %15426 = vmatprep.subr.bf16.mxu1 %v18744_v53  ;;  %v1500_v53 = vld [vmem:[#allocation8 + $0x20f8] sm:$0xff]  ;;  %v18870_v54 = vcombine.high %v1483_v63, %v1499_v50 }
 0x898   :  { %v18872_v44 = vcombine.high %v1484_v59, %v1500_v53  ;;  %v18871_v7 = vcombine.low %v1484_v59, %v1500_v53  ;;  %v1611_v53 = vld [vmem:[#allocation8 + $0x2470] sm:$0xff] }
 0x899   :  { %15263 = vmatpush1.bf16.msra.mxu0 %v18741_v16  ;;  %v1515_v16 = vld [vmem:[#allocation8 + $0x2170] sm:$0xff] }
 0x89a   :  { %15427 = vmatpush1.bf16.msra.mxu1 %v18743_v52  ;;  %15264 = vmatprep.subr.bf16.mxu0 %v18774_v58  ;;  %v1531_v52 = vld [vmem:[#allocation8 + $0x21f0] sm:$0xff]  ;;  %v18869_v58 = vcombine.low %v1483_v63, %v1499_v50 }
 0x89b   :  { %15428 = vmatprep.subr.bf16.mxu1 %v18776_v15  ;;  %v1516_v15 = vld [vmem:[#allocation8 + $0x2178] sm:$0xff]  ;;  %v18902_v22 = vcombine.high %v1515_v16, %v1531_v52  ;;  %v18901_v14 = vcombine.low %v1515_v16, %v1531_v52 }
 0x89c   :  { %v18903_v28 = vcombine.low %v1516_v15, %v1532_v26 }
 0x89d   :  { %15265 = vmatpush1.bf16.msra.mxu0 %v18773_v62  ;;  %v1563_v62 = vld [vmem:[#allocation8 + $0x22f0] sm:$0xff] }
 0x89e   :  { %15429 = vmatpush1.bf16.msra.mxu1 %v18775_v17  ;;  %15266 = vmatprep.subr.bf16.mxu0 %v18806_v27  ;;  %v18904_v17 = vcombine.high %v1516_v15, %v1532_v26  ;;  %v1548_v27 = vld [vmem:[#allocation8 + $0x2278] sm:$0xff]  ;;  %v18934_v31 = vcombine.high %v1547_v4, %v1563_v62  ;;  %v18933_v63 = vcombine.low %v1547_v4, %v1563_v62  ;;  %v1659_v15 = vld [vmem:[#allocation8 + $0x25f0] sm:$0xff] }
 0x89f   :  { %15430 = vmatprep.subr.bf16.mxu1 %v18808_v18  ;;  %v1564_v18 = vld [vmem:[#allocation8 + $0x22f8] sm:$0xff] }
 0x8a0   :  { %v18936_v9 = vcombine.high %v1548_v27, %v1564_v18  ;;  %v1644_v26 = vld [vmem:[#allocation8 + $0x2578] sm:$0xff] }
 0x8a1   :  { %15267 = vmatpush1.bf16.msra.mxu0 %v18805_v6  ;;  %v1579_v6 = vld [vmem:[#allocation8 + $0x2370] sm:$0xff] }
 0x8a2   :  { %15431 = vmatpush1.bf16.msra.mxu1 %v18807_v35  ;;  %15268 = vmatprep.subr.bf16.mxu0 %v18838_v37  ;;  %v1595_v35 = vld [vmem:[#allocation8 + $0x23f0] sm:$0xff]  ;;  %v1580_v37 = vld [vmem:[#allocation8 + $0x2378] sm:$0xff] }
 0x8a3   :  { %15432 = vmatprep.subr.bf16.mxu1 %v18840_v43  ;;  %v1596_v43 = vld [vmem:[#allocation8 + $0x23f8] sm:$0xff]  ;;  %v18966_v50 = vcombine.high %v1579_v6, %v1595_v35 }
 0x8a4   :  { %v18968_v59 = vcombine.high %v1580_v37, %v1596_v43 }
 0x8a5   :  { %15269 = vmatpush1.bf16.msra.mxu0 %v18837_v55  ;;  %v1627_v55 = vld [vmem:[#allocation8 + $0x24f0] sm:$0xff] }
 0x8a6   :  { %15433 = vmatpush1.bf16.msra.mxu1 %v18839_v40  ;;  %15279 = vmatprep.subr.bf16.mxu0 %v18870_v54  ;;  %v1612_v40 = vld [vmem:[#allocation8 + $0x2478] sm:$0xff]  ;;  %v18998_v16 = vcombine.high %v1611_v53, %v1627_v55 }
 0x8a7   :  { %15443 = vmatprep.subr.bf16.mxu1 %v18872_v44  ;;  %v1628_v54 = vld [vmem:[#allocation8 + $0x24f8] sm:$0xff]  ;;  %v18967_v44 = vcombine.low %v1580_v37, %v1596_v43  ;;  %v1707_v37 = vld [vmem:[#allocation8 + $0x2770] sm:$0xff] }
 0x8a8   :  { %15271 = vmatmul.mubr.bf16.vlgmr.msra.gmra.mrb[36].mxu0 %v22926_v51  ;;  %v19000_v52 = vcombine.high %v1612_v40, %v1628_v54  ;;  %v18999_v4 = vcombine.low %v1612_v40, %v1628_v54  ;;  %v1723_v43 = vld [vmem:[#allocation8 + $0x27f0] sm:$0xff] }
 0x8a9   :  { %15435 = vmatmul.mubr.bf16.vlgmr.msra.gmra.mrb[36].mxu1 %v22926_v51  ;;  %15280 = vmatpush1.bf16.msra.mxu0 %v18869_v58  ;;  %v18935_v51 = vcombine.low %v1548_v27, %v1564_v18  ;;  %v1643_v58 = vld [vmem:[#allocation8 + $0x2570] sm:$0xff] }
 0x8aa   :  { %15311 = vmatprep.mubr.bf16.mxu0 %v22928_v61  ;;  %15444 = vmatpush1.bf16.msra.mxu1 %v18871_v7  ;;  %v1660_v7 = vld [vmem:[#allocation8 + $0x25f8] sm:$0xff]  ;;  %v19030_v62 = vcombine.high %v1643_v58, %v1659_v15  ;;  %v1675_v27 = vld [vmem:[#allocation8 + $0x2670] sm:$0xff] }
 0x8ab   :  { %15475 = vmatprep.mubr.bf16.mxu1 %v22928_v61  ;;  %15281 = vmatprep.subr.bf16.mxu0 %v18902_v22  ;;  %v18965_v61 = vcombine.low %v1579_v6, %v1595_v35  ;;  %v18997_v22 = vcombine.low %v1611_v53, %v1627_v55  ;;  %v1691_v18 = vld [vmem:[#allocation8 + $0x26f0] sm:$0xff]  ;;  %v19094_v53 = vcombine.high %v1707_v37, %v1723_v43 }
 0x8ac   :  { %15445 = vmatprep.subr.bf16.mxu1 %v18904_v17  ;;  %v19032_v17 = vcombine.high %v1644_v26, %v1660_v7  ;;  %v19062_v6 = vcombine.high %v1675_v27, %v1691_v18  ;;  %v1739_v40 = vld [vmem:[#allocation8 + $0x2870] sm:$0xff] }
 0x8ad   :  { %15282 = vmatpush1.bf16.msra.mxu0 %v18901_v14  ;;  %v1676_v14 = vld [vmem:[#allocation8 + $0x2678] sm:$0xff]  ;;  %v1755_v54 = vld [vmem:[#allocation8 + $0x28f0] sm:$0xff] }
 0x8ae   :  { %15446 = vmatpush1.bf16.msra.mxu1 %v18903_v28  ;;  %15283 = vmatprep.subr.bf16.mxu0 %v18934_v31  ;;  %v1692_v28 = vld [vmem:[#allocation8 + $0x26f8] sm:$0xff]  ;;  %v19029_v31 = vcombine.low %v1643_v58, %v1659_v15  ;;  %v19126_v58 = vcombine.high %v1739_v40, %v1755_v54 }
 0x8af   :  { %15447 = vmatprep.subr.bf16.mxu1 %v18936_v9  ;;  %v19031_v9 = vcombine.low %v1644_v26, %v1660_v7  ;;  %v19064_v35 = vcombine.high %v1676_v14, %v1692_v28  ;;  %v1771_v26 = vld [vmem:[#allocation8 + $0x2970] sm:$0xff] }
 0x8b0   :  { %v1787_v7 = vld [vmem:[#allocation8 + $0x29f0] sm:$0xff] }
 0x8b1   :  { %15284 = vmatpush1.bf16.msra.mxu0 %v18933_v63  ;;  %v1708_v63 = vld [vmem:[#allocation8 + $0x2778] sm:$0xff] }
 0x8b2   :  { %15448 = vmatpush1.bf16.msra.mxu1 %v18935_v51  ;;  %15285 = vmatprep.subr.bf16.mxu0 %v18966_v50  ;;  %v1724_v51 = vld [vmem:[#allocation8 + $0x27f8] sm:$0xff]  ;;  %v19061_v50 = vcombine.low %v1675_v27, %v1691_v18  ;;  %v19158_v27 = vcombine.high %v1771_v26, %v1787_v7 }
 0x8b3   :  { %15449 = vmatprep.subr.bf16.mxu1 %v18968_v59  ;;  %v19063_v59 = vcombine.low %v1676_v14, %v1692_v28  ;;  %v19096_v55 = vcombine.high %v1708_v63, %v1724_v51  ;;  %v1803_v14 = vld [vmem:[#allocation8 + $0x2a70] sm:$0xff] }
 0x8b4   :  { %v1819_v28 = vld [vmem:[#allocation8 + $0x2af0] sm:$0xff] }
 0x8b5   :  { %15286 = vmatpush1.bf16.msra.mxu0 %v18965_v61  ;;  %v1740_v61 = vld [vmem:[#allocation8 + $0x2878] sm:$0xff] }
 0x8b6   :  { %15450 = vmatpush1.bf16.msra.mxu1 %v18967_v44  ;;  %15287 = vmatprep.subr.bf16.mxu0 %v18998_v16  ;;  %v1756_v44 = vld [vmem:[#allocation8 + $0x28f8] sm:$0xff]  ;;  %v19093_v16 = vcombine.low %v1707_v37, %v1723_v43  ;;  %v19190_v37 = vcombine.high %v1803_v14, %v1819_v28 }
 0x8b7   :  { %15451 = vmatprep.subr.bf16.mxu1 %v19000_v52  ;;  %v19095_v52 = vcombine.low %v1708_v63, %v1724_v51  ;;  %v19128_v15 = vcombine.high %v1740_v61, %v1756_v44  ;;  %v1835_v63 = vld [vmem:[#allocation8 + $0x2b70] sm:$0xff] }
 0x8b8   :  { %v1851_v51 = vld [vmem:[#allocation8 + $0x2bf0] sm:$0xff] }
 0x8b9   :  { %15288 = vmatpush1.bf16.msra.mxu0 %v18997_v22  ;;  %v1772_v22 = vld [vmem:[#allocation8 + $0x2978] sm:$0xff] }
 0x8ba   :  { %15452 = vmatpush1.bf16.msra.mxu1 %v18999_v4  ;;  %15289 = vmatprep.subr.bf16.mxu0 %v19030_v62  ;;  %v1788_v4 = vld [vmem:[#allocation8 + $0x29f8] sm:$0xff]  ;;  %v19125_v62 = vcombine.low %v1739_v40, %v1755_v54  ;;  %v19222_v40 = vcombine.high %v1835_v63, %v1851_v51 }
 0x8bb   :  { %15453 = vmatprep.subr.bf16.mxu1 %v19032_v17  ;;  %v19127_v17 = vcombine.low %v1740_v61, %v1756_v44  ;;  %v19160_v18 = vcombine.high %v1772_v22, %v1788_v4  ;;  %v1867_v61 = vld [vmem:[#allocation8 + $0x2c70] sm:$0xff] }
 0x8bc   :  { %v1883_v44 = vld [vmem:[#allocation8 + $0x2cf0] sm:$0xff] }
 0x8bd   :  { %15290 = vmatpush1.bf16.msra.mxu0 %v19029_v31  ;;  %v1804_v31 = vld [vmem:[#allocation8 + $0x2a78] sm:$0xff] }
 0x8be   :  { %15454 = vmatpush1.bf16.msra.mxu1 %v19031_v9  ;;  %15291 = vmatprep.subr.bf16.mxu0 %v19062_v6  ;;  %v1820_v9 = vld [vmem:[#allocation8 + $0x2af8] sm:$0xff]  ;;  %v19157_v6 = vcombine.low %v1771_v26, %v1787_v7  ;;  %v19254_v26 = vcombine.high %v1867_v61, %v1883_v44 }
 0x8bf   :  { %15455 = vmatprep.subr.bf16.mxu1 %v19064_v35  ;;  %v19159_v35 = vcombine.low %v1772_v22, %v1788_v4  ;;  %v19192_v43 = vcombine.high %v1804_v31, %v1820_v9  ;;  %v1899_v22 = vld [vmem:[#allocation8 + $0x2d70] sm:$0xff] }
 0x8c0   :  { %v1915_v4 = vld [vmem:[#allocation8 + $0x2df0] sm:$0xff] }
 0x8c1   :  { %15292 = vmatpush1.bf16.msra.mxu0 %v19061_v50  ;;  %v1836_v50 = vld [vmem:[#allocation8 + $0x2b78] sm:$0xff] }
 0x8c2   :  { %15456 = vmatpush1.bf16.msra.mxu1 %v19063_v59  ;;  %15293 = vmatprep.subr.bf16.mxu0 %v19094_v53  ;;  %v1852_v59 = vld [vmem:[#allocation8 + $0x2bf8] sm:$0xff]  ;;  %v19189_v53 = vcombine.low %v1803_v14, %v1819_v28  ;;  %v19286_v14 = vcombine.high %v1899_v22, %v1915_v4 }
 0x8c3   :  { %15457 = vmatprep.subr.bf16.mxu1 %v19096_v55  ;;  %v19191_v55 = vcombine.low %v1804_v31, %v1820_v9  ;;  %v19224_v54 = vcombine.high %v1836_v50, %v1852_v59  ;;  %v1931_v31 = vld [vmem:[#allocation8 + $0x2e70] sm:$0xff] }
 0x8c4   :  { %v1947_v9 = vld [vmem:[#allocation8 + $0x2ef0] sm:$0xff] }
 0x8c5   :  { %15294 = vmatpush1.bf16.msra.mxu0 %v19093_v16  ;;  %v1868_v16 = vld [vmem:[#allocation8 + $0x2c78] sm:$0xff] }
 0x8c6   :  { %15458 = vmatpush1.bf16.msra.mxu1 %v19095_v52  ;;  %15295 = vmatprep.subr.bf16.mxu0 %v19126_v58  ;;  %v1884_v52 = vld [vmem:[#allocation8 + $0x2cf8] sm:$0xff]  ;;  %v19221_v58 = vcombine.low %v1835_v63, %v1851_v51  ;;  %v19318_v63 = vcombine.high %v1931_v31, %v1947_v9 }
 0x8c7   :  { %15459 = vmatprep.subr.bf16.mxu1 %v19128_v15  ;;  %v19223_v15 = vcombine.low %v1836_v50, %v1852_v59  ;;  %v19256_v7 = vcombine.high %v1868_v16, %v1884_v52  ;;  %v1963_v50 = vld [vmem:[#allocation8 + $0x2f70] sm:$0xff] }
 0x8c8   :  { %v1979_v59 = vld [vmem:[#allocation8 + $0x2ff0] sm:$0xff] }
 0x8c9   :  { %15296 = vmatpush1.bf16.msra.mxu0 %v19125_v62  ;;  %v1900_v62 = vld [vmem:[#allocation8 + $0x2d78] sm:$0xff] }
 0x8ca   :  { %15460 = vmatpush1.bf16.msra.mxu1 %v19127_v17  ;;  %15297 = vmatprep.subr.bf16.mxu0 %v19158_v27  ;;  %v1916_v17 = vld [vmem:[#allocation8 + $0x2df8] sm:$0xff]  ;;  %v19253_v27 = vcombine.low %v1867_v61, %v1883_v44  ;;  %v19350_v61 = vcombine.high %v1963_v50, %v1979_v59 }
 0x8cb   :  { %15461 = vmatprep.subr.bf16.mxu1 %v19160_v18  ;;  %v19255_v18 = vcombine.low %v1868_v16, %v1884_v52  ;;  %v19288_v28 = vcombine.high %v1900_v62, %v1916_v17  ;;  %v1995_v16 = vld [vmem:[#allocation8 + $0x3070] sm:$0xff] }
 0x8cc   :  { %v2011_v52 = vld [vmem:[#allocation8 + $0x30f0] sm:$0xff] }
 0x8cd   :  { %15298 = vmatpush1.bf16.msra.mxu0 %v19157_v6  ;;  %v1932_v6 = vld [vmem:[#allocation8 + $0x2e78] sm:$0xff] }
 0x8ce   :  { %15462 = vmatpush1.bf16.msra.mxu1 %v19159_v35  ;;  %15299 = vmatprep.subr.bf16.mxu0 %v19190_v37  ;;  %v1948_v35 = vld [vmem:[#allocation8 + $0x2ef8] sm:$0xff]  ;;  %v19285_v37 = vcombine.low %v1899_v22, %v1915_v4  ;;  %v19382_v22 = vcombine.high %v1995_v16, %v2011_v52 }
 0x8cf   :  { %15463 = vmatprep.subr.bf16.mxu1 %v19192_v43  ;;  %v19287_v43 = vcombine.low %v1900_v62, %v1916_v17  ;;  %v19320_v51 = vcombine.high %v1932_v6, %v1948_v35  ;;  %v2027_v62 = vld [vmem:[#allocation8 + $0x3170] sm:$0xff] }
 0x8d0   :  { %v2043_v17 = vld [vmem:[#allocation8 + $0x31f0] sm:$0xff] }
 0x8d1   :  { %15300 = vmatpush1.bf16.msra.mxu0 %v19189_v53  ;;  %v1964_v53 = vld [vmem:[#allocation8 + $0x2f78] sm:$0xff] }
 0x8d2   :  { %15464 = vmatpush1.bf16.msra.mxu1 %v19191_v55  ;;  %15301 = vmatprep.subr.bf16.mxu0 %v19222_v40  ;;  %v1980_v55 = vld [vmem:[#allocation8 + $0x2ff8] sm:$0xff]  ;;  %v19317_v40 = vcombine.low %v1931_v31, %v1947_v9  ;;  %v19414_v31 = vcombine.high %v2027_v62, %v2043_v17  ;;  %v2059_v9 = vld [vmem:[#allocation8 + $0x3270] sm:$0xff] }
 0x8d3   :  { %15465 = vmatprep.subr.bf16.mxu1 %v19224_v54  ;;  %v19319_v54 = vcombine.low %v1932_v6, %v1948_v35  ;;  %v19352_v44 = vcombine.high %v1964_v53, %v1980_v55  ;;  %v2075_v6 = vld [vmem:[#allocation8 + $0x32f0] sm:$0xff] }
 0x8d5   :  { %15302 = vmatpush1.bf16.msra.mxu0 %v19221_v58  ;;  %v1996_v58 = vld [vmem:[#allocation8 + $0x3078] sm:$0xff] }
 0x8d6   :  { %15466 = vmatpush1.bf16.msra.mxu1 %v19223_v15  ;;  %15303 = vmatprep.subr.bf16.mxu0 %v19254_v26  ;;  %v2012_v15 = vld [vmem:[#allocation8 + $0x30f8] sm:$0xff]  ;;  %v19349_v26 = vcombine.low %v1963_v50, %v1979_v59  ;;  %v19446_v50 = vcombine.high %v2059_v9, %v2075_v6 }
 0x8d7   :  { %15467 = vmatprep.subr.bf16.mxu1 %v19256_v7  ;;  %v19351_v7 = vcombine.low %v1964_v53, %v1980_v55  ;;  %v19384_v4 = vcombine.high %v1996_v58, %v2012_v15  ;;  %v2091_v53 = vld [vmem:[#allocation8 + $0x3370] sm:$0xff] }
 0x8d8   :  { %v2107_v55 = vld [vmem:[#allocation8 + $0x33f0] sm:$0xff] }
 0x8d9   :  { %15304 = vmatpush1.bf16.msra.mxu0 %v19253_v27  ;;  %v19381_v27 = vcombine.low %v1995_v16, %v2011_v52  ;;  %v2123_v52 = vld [vmem:[#allocation8 + $0x3470] sm:$0xff] }
 0x8da   :  { %15468 = vmatpush1.bf16.msra.mxu1 %v19255_v18  ;;  %15305 = vmatprep.subr.bf16.mxu0 %v19286_v14  ;;  %v2028_v18 = vld [vmem:[#allocation8 + $0x3178] sm:$0xff] }
 0x8db   :  { %15469 = vmatprep.subr.bf16.mxu1 %v19288_v28  ;;  %v2044_v14 = vld [vmem:[#allocation8 + $0x31f8] sm:$0xff]  ;;  %v19383_v28 = vcombine.low %v1996_v58, %v2012_v15  ;;  %v2139_v58 = vld [vmem:[#allocation8 + $0x34f0] sm:$0xff] }
 0x8dc   :  { %v19416_v35 = vcombine.high %v2028_v18, %v2044_v14  ;;  %v2124_v15 = vld [vmem:[#allocation8 + $0x3478] sm:$0xff] }
 0x8dd   :  { %15306 = vmatpush1.bf16.msra.mxu0 %v19285_v37  ;;  %v2060_v37 = vld [vmem:[#allocation8 + $0x3278] sm:$0xff] }
 0x8de   :  { %15470 = vmatpush1.bf16.msra.mxu1 %v19287_v43  ;;  %15307 = vmatprep.subr.bf16.mxu0 %v19318_v63  ;;  %v2076_v43 = vld [vmem:[#allocation8 + $0x32f8] sm:$0xff]  ;;  %v19413_v63 = vcombine.low %v2027_v62, %v2043_v17  ;;  %v2155_v62 = vld [vmem:[#allocation8 + $0x3570] sm:$0xff] }
 0x8df   :  { %15471 = vmatprep.subr.bf16.mxu1 %v19320_v51  ;;  %v19415_v51 = vcombine.low %v2028_v18, %v2044_v14  ;;  %v19448_v59 = vcombine.high %v2060_v37, %v2076_v43  ;;  %v2171_v17 = vld [vmem:[#allocation8 + $0x35f0] sm:$0xff]  ;;  %v2172_v18 = vld [vmem:[#allocation8 + $0x35f8] sm:$0xff]  ;;  %v19509_v14 = vcombine.low %v2123_v52, %v2139_v58 }
 0x8e1   :  { %15308 = vmatpush1.bf16.msra.mxu0 %v19317_v40  ;;  %v2092_v40 = vld [vmem:[#allocation8 + $0x3378] sm:$0xff] }
 0x8e2   :  { %15472 = vmatpush1.bf16.msra.mxu1 %v19319_v54  ;;  %15309 = vmatprep.subr.bf16.mxu0 %v19350_v61  ;;  %v2108_v54 = vld [vmem:[#allocation8 + $0x33f8] sm:$0xff]  ;;  %v19445_v61 = vcombine.low %v2059_v9, %v2075_v6  ;;  %v2187_v6 = vld [vmem:[#allocation8 + $0x3670] sm:$0xff] }
 0x8e3   :  { %15473 = vmatprep.subr.bf16.mxu1 %v19352_v44  ;;  %v19478_v44 = vcombine.high %v2091_v53, %v2107_v55  ;;  %v19480_v16 = vcombine.high %v2092_v40, %v2108_v54 }
 0x8e5   :  { %15310 = vmatpush1.bf16.msra.mxu0 %v19349_v26  ;;  %v2140_v26 = vld [vmem:[#allocation8 + $0x34f8] sm:$0xff] }
 0x8e6   :  { %15474 = vmatpush1.bf16.msra.mxu1 %v19351_v7  ;;  %15320 = vmatprep.subr.bf16.mxu0 %v19382_v22  ;;  %v19479_v7 = vcombine.low %v2092_v40, %v2108_v54  ;;  %v19510_v22 = vcombine.high %v2123_v52, %v2139_v58  ;;  %v2235_v40 = vld [vmem:[#allocation8 + $0x37f0] sm:$0xff] }
 0x8e7   :  { %15484 = vmatprep.subr.bf16.mxu1 %v19384_v4  ;;  %v19512_v4 = vcombine.high %v2124_v15, %v2140_v26 }
 0x8e8   :  { %15312 = vmatmul.mubr.bf16.vlgmr.msra.gmra.mrb[36].mxu0 %v22946_v34 }
 0x8e9   :  { %15476 = vmatmul.mubr.bf16.vlgmr.msra.gmra.mrb[36].mxu1 %v22946_v34  ;;  %15321 = vmatpush1.bf16.msra.mxu0 %v19381_v27  ;;  %v19447_v34 = vcombine.low %v2060_v37, %v2076_v43  ;;  %v2156_v27 = vld [vmem:[#allocation8 + $0x3578] sm:$0xff] }
 0x8ea   :  { %15352 = vmatprep.mubr.bf16.mxu0 %v22948_v41  ;;  %15485 = vmatpush1.bf16.msra.mxu1 %v19383_v28  ;;  %v19511_v28 = vcombine.low %v2124_v15, %v2140_v26  ;;  %v19544_v9 = vcombine.high %v2156_v27, %v2172_v18  ;;  %v2188_v37 = vld [vmem:[#allocation8 + $0x3678] sm:$0xff] }
 0x8eb   :  { %15516 = vmatprep.mubr.bf16.mxu1 %v22948_v41  ;;  %15322 = vmatprep.subr.bf16.mxu0 %v19414_v31  ;;  %v19477_v41 = vcombine.low %v2091_v53, %v2107_v55  ;;  %v19542_v31 = vcombine.high %v2155_v62, %v2171_v17  ;;  %v2204_v43 = vld [vmem:[#allocation8 + $0x36f8] sm:$0xff]  ;;  %v2219_v55 = vld [vmem:[#allocation8 + $0x3770] sm:$0xff] }
 0x8ec   :  { %15486 = vmatprep.subr.bf16.mxu1 %v19416_v35  ;;  %v2203_v35 = vld [vmem:[#allocation8 + $0x36f0] sm:$0xff]  ;;  %v19576_v53 = vcombine.high %v2188_v37, %v2204_v43 }
 0x8ed   :  { %15323 = vmatpush1.bf16.msra.mxu0 %v19413_v63  ;;  %v19541_v63 = vcombine.low %v2155_v62, %v2171_v17  ;;  %v19573_v58 = vcombine.low %v2187_v6, %v2203_v35  ;;  %v2251_v62 = vld [vmem:[#allocation8 + $0x3870] sm:$0xff] }
 0x8ee   :  { %15487 = vmatpush1.bf16.msra.mxu1 %v19415_v51  ;;  %15324 = vmatprep.subr.bf16.mxu0 %v19446_v50  ;;  %v19543_v51 = vcombine.low %v2156_v27, %v2172_v18  ;;  %v19574_v50 = vcombine.high %v2187_v6, %v2203_v35  ;;  %v2267_v17 = vld [vmem:[#allocation8 + $0x38f0] sm:$0xff]  ;;  %v2252_v27 = vld [vmem:[#allocation8 + $0x3878] sm:$0xff] }
 0x8ef   :  { %15488 = vmatprep.subr.bf16.mxu1 %v19448_v59  ;;  %v2268_v18 = vld [vmem:[#allocation8 + $0x38f8] sm:$0xff]  ;;  %v2283_v6 = vld [vmem:[#allocation8 + $0x3970] sm:$0xff] }
 0x8f0   :  { %v2299_v35 = vld [vmem:[#allocation8 + $0x39f0] sm:$0xff] }
 0x8f1   :  { %15325 = vmatpush1.bf16.msra.mxu0 %v19445_v61 }
 0x8f2   :  { %15489 = vmatpush1.bf16.msra.mxu1 %v19447_v34  ;;  %15326 = vmatprep.subr.bf16.mxu0 %v19478_v44  ;;  %v2220_v34 = vld [vmem:[#allocation8 + $0x3778] sm:$0xff] }
 0x8f3   :  { %15490 = vmatprep.subr.bf16.mxu1 %v19480_v16  ;;  %v2236_v44 = vld [vmem:[#allocation8 + $0x37f8] sm:$0xff] }
 0x8f5   :  { %15327 = vmatpush1.bf16.msra.mxu0 %v19477_v41  ;;  %v19575_v41 = vcombine.low %v2188_v37, %v2204_v43  ;;  %v2300_v37 = vld [vmem:[#allocation8 + $0x39f8] sm:$0xff]  ;;  %v19637_v43 = vcombine.low %v2251_v62, %v2267_v17 }
 0x8f6   :  { %15491 = vmatpush1.bf16.msra.mxu1 %v19479_v7  ;;  %15328 = vmatprep.subr.bf16.mxu0 %v19510_v22  ;;  %v19606_v7 = vcombine.high %v2219_v55, %v2235_v40 }
 0x8f7   :  { %15492 = vmatprep.subr.bf16.mxu1 %v19512_v4  ;;  %v19608_v4 = vcombine.high %v2220_v34, %v2236_v44 }
 0x8f9   :  { %15329 = vmatpush1.bf16.msra.mxu0 %v19509_v14  ;;  %v19605_v14 = vcombine.low %v2219_v55, %v2235_v40  ;;  %v2331_v55 = vld [vmem:[#allocation8 + $0x3af0] sm:$0xff]  ;;  %v2316_v40 = vld [vmem:[#allocation8 + $0x3a78] sm:$0xff] }
 0x8fa   :  { %15493 = vmatpush1.bf16.msra.mxu1 %v19511_v28  ;;  %15330 = vmatprep.subr.bf16.mxu0 %v19542_v31  ;;  %v19607_v28 = vcombine.low %v2220_v34, %v2236_v44  ;;  %v19638_v31 = vcombine.high %v2251_v62, %v2267_v17  ;;  %v19669_v34 = vcombine.low %v2283_v6, %v2299_v35 }
 0x8fb   :  { %v23121_v59 = vpop.f32.mrb[32].mxu0  ;;  %15494 = vmatprep.subr.bf16.mxu1 %v19544_v9  ;;  %v19640_v9 = vcombine.high %v2252_v27, %v2268_v18 }
 0x8fc   :  { %v23123_v54 = vpop.f32.mrb[32].mxu1  ;;  %v23125_v61 = vpop.f32.mrb[33].mxu0 }
 0x8fd   :  { %v23127_v16 = vpop.f32.mrb[33].mxu1  ;;  %v15030_v52 = vpop.f32.mrb[34].mxu0  ;;  %15331 = vmatpush1.bf16.msra.mxu0 %v19541_v63  ;;  %v2284_v63 = vld [vmem:[#allocation8 + $0x3978] sm:$0xff] }
 0x8fe   :  { %v15194_v15 = vpop.f32.mrb[34].mxu1  ;;  %15495 = vmatpush1.bf16.msra.mxu1 %v19543_v51  ;;  %v15031_v26 = vpop.f32.mrb[35].mxu0  ;;  %15332 = vmatprep.subr.bf16.mxu0 %v19574_v50  ;;  %v19639_v51 = vcombine.low %v2252_v27, %v2268_v18  ;;  %v19670_v50 = vcombine.high %v2283_v6, %v2299_v35  ;;  %v2315_v52 = vld [vmem:[#allocation8 + $0x3a70] sm:$0xff]  ;;  %v19671_v44 = vcombine.low %v2284_v63, %v2300_v37 }
 0x8ff   :  { %v15195_v22 = vpop.f32.mrb[35].mxu1  ;;  %15496 = vmatprep.subr.bf16.mxu1 %v19576_v53  ;;  %v19672_v53 = vcombine.high %v2284_v63, %v2300_v37  ;;  %v19702_v15 = vcombine.high %v2315_v52, %v2331_v55  ;;  %v19701_v62 = vcombine.low %v2315_v52, %v2331_v55 }
 0x900   :  { %v2348_v22 = vld [vmem:[#allocation8 + $0x3b78] sm:$0xff] }
 0x901   :  { %15333 = vmatpush1.bf16.msra.mxu0 %v19573_v58  ;;  %v2332_v58 = vld [vmem:[#allocation8 + $0x3af8] sm:$0xff] }
 0x902   :  { %15497 = vmatpush1.bf16.msra.mxu1 %v19575_v41  ;;  %15334 = vmatprep.subr.bf16.mxu0 %v19606_v7  ;;  %v19704_v26 = vcombine.high %v2316_v40, %v2332_v58  ;;  %v2347_v41 = vld [vmem:[#allocation8 + $0x3b70] sm:$0xff]  ;;  %v19703_v17 = vcombine.low %v2316_v40, %v2332_v58 }
 0x903   :  { %15498 = vmatprep.subr.bf16.mxu1 %v19608_v4  ;;  %v2363_v7 = vld [vmem:[#allocation8 + $0x3bf0] sm:$0xff]  ;;  %v2364_v4 = vld [vmem:[#allocation8 + $0x3bf8] sm:$0xff] }
 0x904   :  { %v19734_v27 = vcombine.high %v2347_v41, %v2363_v7  ;;  %v19736_v18 = vcombine.high %v2348_v22, %v2364_v4  ;;  %v19733_v6 = vcombine.low %v2347_v41, %v2363_v7  ;;  %v19735_v35 = vcombine.low %v2348_v22, %v2364_v4 }
 0x905   :  { %15335 = vmatpush1.bf16.msra.mxu0 %v19605_v14  ;;  %v2379_v14 = vld [vmem:[#allocation8 + $0x3c70] sm:$0xff] }
 0x906   :  { %15499 = vmatpush1.bf16.msra.mxu1 %v19607_v28  ;;  %15336 = vmatprep.subr.bf16.mxu0 %v19638_v31  ;;  %v2395_v28 = vld [vmem:[#allocation8 + $0x3cf0] sm:$0xff]  ;;  %v2380_v31 = vld [vmem:[#allocation8 + $0x3c78] sm:$0xff] }
 0x907   :  { %15500 = vmatprep.subr.bf16.mxu1 %v19640_v9  ;;  %v2396_v9 = vld [vmem:[#allocation8 + $0x3cf8] sm:$0xff]  ;;  %v19766_v63 = vcombine.high %v2379_v14, %v2395_v28  ;;  %v19765_v52 = vcombine.low %v2379_v14, %v2395_v28  ;;  %v23129_v14 = vld [vmem:[#allocation10] sm:$0xff] }
 0x908   :  { %v19768_v37 = vcombine.high %v2380_v31, %v2396_v9  ;;  %v19767_v55 = vcombine.low %v2380_v31, %v2396_v9 }
 0x909   :  { %15337 = vmatpush1.bf16.msra.mxu0 %v19637_v43  ;;  %v2411_v43 = vld [vmem:[#allocation8 + $0x3d70] sm:$0xff] }
 0x90a   :  { %15501 = vmatpush1.bf16.msra.mxu1 %v19639_v51  ;;  %15338 = vmatprep.subr.bf16.mxu0 %v19670_v50  ;;  %v2427_v51 = vld [vmem:[#allocation8 + $0x3df0] sm:$0xff]  ;;  %v2412_v50 = vld [vmem:[#allocation8 + $0x3d78] sm:$0xff] }
 0x90b   :  { %15502 = vmatprep.subr.bf16.mxu1 %v19672_v53  ;;  %v2428_v53 = vld [vmem:[#allocation8 + $0x3df8] sm:$0xff]  ;;  %v19798_v40 = vcombine.high %v2411_v43, %v2427_v51  ;;  %v19797_v41 = vcombine.low %v2411_v43, %v2427_v51  ;;  %v20898_v51 = vld [vmem:[%s24053_s5 + $0x40] sm:$0xff]  }
 0x90c   :  { %v19800_v58 = vcombine.high %v2412_v50, %v2428_v53  ;;  %v19799_v7 = vcombine.low %v2412_v50, %v2428_v53  ;;  %v20914_v53 = vld [vmem:[%s24053_s5 + $0xc0] sm:$0xff]  }
 0x90d   :  { %15339 = vmatpush1.bf16.msra.mxu0 %v19669_v34  ;;  %v2443_v34 = vld [vmem:[#allocation8 + $0x3e70] sm:$0xff] }
 0x90e   :  { %15503 = vmatpush1.bf16.msra.mxu1 %v19671_v44  ;;  %15340 = vmatprep.subr.bf16.mxu0 %v19702_v15  ;;  %v2459_v44 = vld [vmem:[#allocation8 + $0x3ef0] sm:$0xff]  ;;  %v2444_v15 = vld [vmem:[#allocation8 + $0x3e78] sm:$0xff] }
 0x90f   :  { %15504 = vmatprep.subr.bf16.mxu1 %v19704_v26  ;;  %v2460_v26 = vld [vmem:[#allocation8 + $0x3ef8] sm:$0xff]  ;;  %v19830_v22 = vcombine.high %v2443_v34, %v2459_v44  ;;  %v19829_v28 = vcombine.low %v2443_v34, %v2459_v44 }
 0x910   :  { %v19832_v4 = vcombine.high %v2444_v15, %v2460_v26  ;;  %v19831_v31 = vcombine.low %v2444_v15, %v2460_v26  ;;  %v20915_v34 = vld [vmem:[%s24053_s5 + $0xc8] sm:$0xff]   ;;  %v20916_v26 = vld [vmem:[%s24053_s5 + $0xd0] sm:$0xff]  }
 0x911   :  { %15341 = vmatpush1.bf16.msra.mxu0 %v19701_v62  ;;  %v2475_v62 = vld [vmem:[#allocation8 + $0x3f70] sm:$0xff]  ;;  %v20891_v44 = vld [vmem:[%s24053_s5 + $0x8] sm:$0xff]  }
 0x912   :  { %15505 = vmatpush1.bf16.msra.mxu1 %v19703_v17  ;;  %15342 = vmatprep.subr.bf16.mxu0 %v19734_v27  ;;  %v2491_v17 = vld [vmem:[#allocation8 + $0x3ff0] sm:$0xff]  ;;  %v2476_v27 = vld [vmem:[#allocation8 + $0x3f78] sm:$0xff] }
 0x913   :  { %15506 = vmatprep.subr.bf16.mxu1 %v19736_v18  ;;  %v2492_v18 = vld [vmem:[#allocation8 + $0x3ff8] sm:$0xff]  ;;  %v19862_v9 = vcombine.high %v2475_v62, %v2491_v17 }
 0x914   :  { %v19863_v43 = vcombine.low %v2476_v27, %v2492_v18  ;;  %v20907_v15 = vld [vmem:[%s24053_s5 + $0x88] sm:$0xff]  }
 0x915   :  { %15343 = vmatpush1.bf16.msra.mxu0 %v19733_v6  ;;  %v19864_v6 = vcombine.high %v2476_v27, %v2492_v18  ;;  %v20902_v27 = vld [vmem:[%s24053_s5 + $0x60] sm:$0xff]  }
 0x916   :  { %15507 = vmatpush1.bf16.msra.mxu1 %v19735_v35  ;;  %15344 = vmatprep.subr.bf16.mxu0 %v19766_v63  ;;  %v2508_v35 = vrot.slane %v23129_v14, %v22881_v47  ;;  %v2516_v63 = vrot.slane %v23129_v14, %v22884_v48  ;;  %v20918_v18 = vld [vmem:[%s24053_s5 + $0xe0] sm:$0xff]  }
 0x917   :  { %15508 = vmatprep.subr.bf16.mxu1 %v19768_v37  ;;  %v19861_v37 = vcombine.low %v2475_v62, %v2491_v17  ;;  %v20893_v62 = vld [vmem:[%s24053_s5 + $0x18] sm:$0xff]  }
 0x918   :  { %v22219_v50 = vadd.f32 %v22981_v23, %v2508_v35  ;;  %v20899_v23 = vld [vmem:[%s24053_s5 + $0x48] sm:$0xff]   ;;  %v20909_v17 = vld [vmem:[%s24053_s5 + $0x98] sm:$0xff]  }
 0x919   :  { %15345 = vmatpush1.bf16.msra.mxu0 %v19765_v52  ;;  %v22221_v52 = vadd.f32 %v22983_v25, %v2516_v63  ;;  %v20895_v35 = vld [vmem:[%s24053_s5 + $0x28] sm:$0xff]  }
 0x91a   :  { %15509 = vmatpush1.bf16.msra.mxu1 %v19767_v55  ;;  %15346 = vmatprep.subr.bf16.mxu0 %v19798_v40  ;;  %v19868_v55 = vld [vmem:[%s24053_s5] sm:$0xff]   ;;  %v20911_v63 = vld [vmem:[%s24053_s5 + $0xa8] sm:$0xff]  }
 0x91b   :  { %15510 = vmatprep.subr.bf16.mxu1 %v19800_v58  ;;  %v20906_v40 = vld [vmem:[%s24053_s5 + $0x80] sm:$0xff]   ;;  %v15526_v58 = vmax.f32 %v22219_v50, 0.0  ;;  %v15528_v25 = vmax.f32 %v22221_v52, 0.0  ;;  %v20896_v50 = vld [vmem:[%s24053_s5 + $0x30] sm:$0xff]  }
 0x91c   :  { %v20912_v52 = vld [vmem:[%s24053_s5 + $0xb0] sm:$0xff]  }
 0x91d   :  { %15347 = vmatpush1.bf16.msra.mxu0 %v19797_v41  ;;  %v20892_v41 = vld [vmem:[%s24053_s5 + $0x10] sm:$0xff]  }
 0x91e   :  { %15511 = vmatpush1.bf16.msra.mxu1 %v19799_v7  ;;  %15348 = vmatprep.subr.bf16.mxu0 %v19830_v22  ;;  %v20908_v7 = vld [vmem:[%s24053_s5 + $0x90] sm:$0xff]   ;;  %v20901_v22 = vld [vmem:[%s24053_s5 + $0x58] sm:$0xff]  }
 0x91f   :  { %15512 = vmatprep.subr.bf16.mxu1 %v19832_v4  ;;  %v20917_v4 = vld [vmem:[%s24053_s5 + $0xd8] sm:$0xff]  }
 0x921   :  { %15349 = vmatpush1.bf16.msra.mxu0 %v19829_v28  ;;  %v20894_v28 = vld [vmem:[%s24053_s5 + $0x20] sm:$0xff]  }
 0x922   :  { %15513 = vmatpush1.bf16.msra.mxu1 %v19831_v31  ;;  %15350 = vmatprep.subr.bf16.mxu0 %v19862_v9  ;;  %v20910_v31 = vld [vmem:[%s24053_s5 + $0xa0] sm:$0xff]   ;;  %v20903_v9 = vld [vmem:[%s24053_s5 + $0x68] sm:$0xff]  }
 0x923   :  { %15514 = vmatprep.subr.bf16.mxu1 %v19864_v6  ;;  %v20919_v6 = vld [vmem:[%s24053_s5 + $0xe8] sm:$0xff]  }
 0x925   :  { %15351 = vmatpush1.bf16.msra.mxu0 %v19861_v37  ;;  %v20904_v37 = vld [vmem:[%s24053_s5 + $0x70] sm:$0xff]  }
 0x926   :  { %15515 = vmatpush1.bf16.msra.mxu1 %v19863_v43  ;;  %21707 = vmatprep.subr.bf16.mxu0 %v20898_v51  ;;  %v20920_v43 = vld [vmem:[%s24053_s5 + $0xf0] sm:$0xff]   ;;  %v2504_v51 = vrot.slane %v23129_v14, %v22876_v45 }
 0x927   :  { %21739 = vmatprep.subr.bf16.mxu1 %v20914_v53  ;;  %v2512_v53 = vrot.slane %v23129_v14, %v22915_v2 }
 0x928   :  { %15353 = vmatmul.mubr.bf16.vlgmr.msra.gmra.mrb[36].mxu0 %v22959_v24 }
 0x929   :  { %15517 = vmatmul.mubr.bf16.vlgmr.msra.gmra.mrb[36].mxu1 %v22959_v24  ;;  %21709 = vmatpush3.bf16.msra.mxu0 %v19868_v55  ;;  %v20900_v24 = vld [vmem:[%s24053_s5 + $0x50] sm:$0xff]   ;;  %v20905_v55 = vld [vmem:[%s24053_s5 + $0x78] sm:$0xff]  }
 0x92a   :  { %16645 = vmatprep.mubr.f32.mxu0 %v15526_v58  ;;  %21741 = vmatpush3.bf16.msra.mxu1 %v20906_v40  ;;  %v2524_v40 = vrot.slane %v23129_v14, %v22918_v13  ;;  %v20921_v58 = vld [vmem:[%s24053_s5 + $0xf8] sm:$0xff]  }
 0x92b   :  { %16715 = vmatprep.mubr.f32.mxu1 %v15528_v25  ;;  %21711 = vmatprep.subr.bf16.mxu0 %v20899_v23  ;;  %v2532_v23 = vrot.slane %v23129_v14, %v22938_v60  ;;  %v22218_v25 = vadd.f32 %v22977_v19, %v2504_v51  ;;  %v20946_v19 = vld [vmem:[%s24053_s5 + $0x1c0] sm:$0xff]  }
 0x92c   :  { %21743 = vmatprep.subr.bf16.mxu1 %v20915_v34  ;;  %v20897_v34 = vld [vmem:[%s24053_s5 + $0x38] sm:$0xff]   ;;  %v20934_v51 = vld [vmem:[%s24053_s5 + $0x160] sm:$0xff]  }
 0x92d   :  { %21713 = vmatpush3.bf16.msra.mxu0 %v20891_v44  ;;  %v22220_v44 = vadd.f32 %v22979_v20, %v2512_v53  ;;  %v20922_v20 = vld [vmem:[%s24053_s5 + $0x100] sm:$0xff]  }
 0x92e   :  { %21745 = vmatpush3.bf16.msra.mxu1 %v20907_v15  ;;  %21715 = vmatprep.subr.bf16.mxu0 %v20900_v24  ;;  %v20913_v15 = vld [vmem:[%s24053_s5 + $0xb8] sm:$0xff]   ;;  %v20930_v24 = vld [vmem:[%s24053_s5 + $0x140] sm:$0xff]  }
 0x92f   :  { %21747 = vmatprep.subr.bf16.mxu1 %v20916_v26  ;;  %v22223_v26 = vadd.f32 %v23005_v8, %v2524_v40  ;;  %v20938_v8 = vld [vmem:[%s24053_s5 + $0x180] sm:$0xff]   ;;  %v20951_v40 = vld [vmem:[%s24053_s5 + $0x1e8] sm:$0xff]  }
 0x930   :  { %v20926_v53 = vld [vmem:[%s24053_s5 + $0x120] sm:$0xff]  }
 0x931   :  { %21717 = vmatpush3.bf16.msra.mxu0 %v20892_v41  ;;  %v22225_v41 = vadd.f32 %v23007_v11, %v2532_v23  ;;  %v20931_v11 = vld [vmem:[%s24053_s5 + $0x148] sm:$0xff]  }
 0x932   :  { %21749 = vmatpush3.bf16.msra.mxu1 %v20908_v7  ;;  %21719 = vmatprep.subr.bf16.mxu0 %v20901_v22  ;;  %v15525_v7 = vmax.f32 %v22218_v25, 0.0  ;;  %v15527_v22 = vmax.f32 %v22220_v44, 0.0  ;;  %v20943_v23 = vld [vmem:[%s24053_s5 + $0x1a8] sm:$0xff]   ;;  %v20936_v25 = vld [vmem:[%s24053_s5 + $0x170] sm:$0xff]   ;;  %v23325_v44 = vld [vmem:[#allocation10 + $0x8] sm:$0xff] }
 0x933   :  { %21751 = vmatprep.subr.bf16.mxu1 %v20917_v4  ;;  %v15530_v4 = vmax.f32 %v22223_v26, 0.0  ;;  %v2528_v26 = vrot.slane %v23129_v14, %v22955_v36 }
 0x935   :  { %21721 = vmatpush3.bf16.msra.mxu0 %v20893_v62  ;;  %v15532_v62 = vmax.f32 %v22225_v41, 0.0  ;;  %v20937_v41 = vld [vmem:[%s24053_s5 + $0x178] sm:$0xff]  }
 0x936   :  { %21753 = vmatpush3.bf16.msra.mxu1 %v20909_v17  ;;  %21723 = vmatprep.subr.bf16.mxu0 %v20902_v27  ;;  %v20947_v17 = vld [vmem:[%s24053_s5 + $0x1c8] sm:$0xff]  }
 0x937   :  { %21755 = vmatprep.subr.bf16.mxu1 %v20918_v18  ;;  %v20923_v27 = vld [vmem:[%s24053_s5 + $0x108] sm:$0xff]  }
 0x938   :  { %v20939_v18 = vld [vmem:[%s24053_s5 + $0x188] sm:$0xff]  }
 0x939   :  { %21725 = vmatpush3.bf16.msra.mxu0 %v20894_v28  ;;  %v20932_v28 = vld [vmem:[%s24053_s5 + $0x150] sm:$0xff]  }
 0x93a   :  { %21757 = vmatpush3.bf16.msra.mxu1 %v20910_v31  ;;  %21727 = vmatprep.subr.bf16.mxu0 %v20903_v9  ;;  %v20948_v31 = vld [vmem:[%s24053_s5 + $0x1d0] sm:$0xff]  }
 0x93b   :  { %21759 = vmatprep.subr.bf16.mxu1 %v20919_v6  ;;  %v20924_v9 = vld [vmem:[%s24053_s5 + $0x110] sm:$0xff]  }
 0x93c   :  { %v20940_v6 = vld [vmem:[%s24053_s5 + $0x190] sm:$0xff]  }
 0x93d   :  { %21729 = vmatpush3.bf16.msra.mxu0 %v20895_v35  ;;  %v20933_v35 = vld [vmem:[%s24053_s5 + $0x158] sm:$0xff]  }
 0x93e   :  { %21761 = vmatpush3.bf16.msra.mxu1 %v20911_v63  ;;  %21731 = vmatprep.subr.bf16.mxu0 %v20904_v37  ;;  %v20949_v63 = vld [vmem:[%s24053_s5 + $0x1d8] sm:$0xff]  }
 0x93f   :  { %21763 = vmatprep.subr.bf16.mxu1 %v20920_v43  ;;  %v20925_v37 = vld [vmem:[%s24053_s5 + $0x118] sm:$0xff]  }
 0x940   :  { %v20941_v43 = vld [vmem:[%s24053_s5 + $0x198] sm:$0xff]  }
 0x941   :  { %21733 = vmatpush3.bf16.msra.mxu0 %v20896_v50  ;;  %v20950_v50 = vld [vmem:[%s24053_s5 + $0x1e0] sm:$0xff]  }
 0x942   :  { %21765 = vmatpush3.bf16.msra.mxu1 %v20912_v52  ;;  %21735 = vmatprep.subr.bf16.mxu0 %v20905_v55  ;;  %v20942_v52 = vld [vmem:[%s24053_s5 + $0x1a0] sm:$0xff]   ;;  %v20935_v55 = vld [vmem:[%s24053_s5 + $0x168] sm:$0xff]  }
 0x943   :  { %21767 = vmatprep.subr.bf16.mxu1 %v20921_v58  ;;  %v20927_v58 = vld [vmem:[%s24053_s5 + $0x128] sm:$0xff]  }
 0x945   :  { %21737 = vmatpush3.bf16.msra.mxu0 %v20897_v34  ;;  %v20952_v34 = vld [vmem:[%s24053_s5 + $0x1f0] sm:$0xff]  }
 0x946   :  { %21769 = vmatpush3.bf16.msra.mxu1 %v20913_v15  ;;  %21771 = vmatprep.subr.bf16.mxu0 %v20930_v24  ;;  %v2520_v15 = vrot.slane %v23129_v14, %v22935_v49  ;;  %v20928_v24 = vld [vmem:[%s24053_s5 + $0x130] sm:$0xff]  }
 0x947   :  { %21803 = vmatprep.subr.bf16.mxu1 %v20946_v19  ;;  %v20944_v19 = vld [vmem:[%s24053_s5 + $0x1b0] sm:$0xff]  }
 0x948   :  { %16646 = vmatmul.mubr.f32.vlgmr.msra.gmra.mrb[40].mxu0 %v15525_v7  ;;  %v2540_v7 = vrot.slane %v23325_v44, %v22881_v47  ;;  %v22222_v14 = vadd.f32 %v23001_v0, %v2520_v15  ;;  %v20978_v0 = vld [vmem:[%s24053_s5 + $0x2c0] sm:$0xff]   ;;  %v20967_v15 = vld [vmem:[%s24053_s5 + $0x268] sm:$0xff]  }
 0x949   :  { %16716 = vmatmul.mubr.f32.vlgmr.msra.gmra.mrb[40].mxu1 %v15527_v22  ;;  %21773 = vmatpush3.bf16.msra.mxu0 %v20922_v20  ;;  %v20953_v20 = vld [vmem:[%s24053_s5 + $0x1f8] sm:$0xff]   ;;  %v2548_v22 = vrot.slane %v23325_v44, %v22884_v48 }
 0x94a   :  { %16785 = vmatprep.mubr.f32.mxu0 %v15530_v4  ;;  %21805 = vmatpush3.bf16.msra.mxu1 %v20938_v8  ;;  %v20929_v8 = vld [vmem:[%s24053_s5 + $0x138] sm:$0xff]   ;;  %v22224_v4 = vadd.f32 %v23003_v5, %v2528_v26  ;;  %v20954_v5 = vld [vmem:[%s24053_s5 + $0x200] sm:$0xff]   ;;  %v20959_v26 = vld [vmem:[%s24053_s5 + $0x228] sm:$0xff]  }
 0x94b   :  { %16855 = vmatprep.mubr.f32.mxu1 %v15532_v62  ;;  %21775 = vmatprep.subr.bf16.mxu0 %v20931_v11  ;;  %v20945_v11 = vld [vmem:[%s24053_s5 + $0x1b8] sm:$0xff]   ;;  %v20962_v62 = vld [vmem:[%s24053_s5 + $0x240] sm:$0xff]  }
 0x94c   :  { %21807 = vmatprep.subr.bf16.mxu1 %v20947_v17  ;;  %v22227_v17 = vadd.f32 %v23029_v3, %v2540_v7  ;;  %v20970_v3 = vld [vmem:[%s24053_s5 + $0x280] sm:$0xff]   ;;  %v20984_v7 = vld [vmem:[%s24053_s5 + $0x2f0] sm:$0xff]  }
 0x94d   :  { %21777 = vmatpush3.bf16.msra.mxu0 %v20923_v27  ;;  %v22229_v27 = vadd.f32 %v23031_v10, %v2548_v22  ;;  %v20963_v10 = vld [vmem:[%s24053_s5 + $0x248] sm:$0xff]   ;;  %v20960_v22 = vld [vmem:[%s24053_s5 + $0x230] sm:$0xff]  }
 0x94e   :  { %21809 = vmatpush3.bf16.msra.mxu1 %v20939_v18  ;;  %21779 = vmatprep.subr.bf16.mxu0 %v20932_v28  ;;  %v15529_v18 = vmax.f32 %v22222_v14, 0.0  ;;  %v15531_v28 = vmax.f32 %v22224_v4, 0.0  ;;  %v2544_v14 = vrot.slane %v23325_v44, %v22915_v2  ;;  %v20969_v4 = vld [vmem:[%s24053_s5 + $0x278] sm:$0xff]  }
 0x94f   :  { %21811 = vmatprep.subr.bf16.mxu1 %v20948_v31  ;;  %v15534_v31 = vmax.f32 %v22227_v17, 0.0  ;;  %v2564_v17 = vrot.slane %v23325_v44, %v22938_v60 }
 0x951   :  { %21781 = vmatpush3.bf16.msra.mxu0 %v20924_v9  ;;  %v15536_v9 = vmax.f32 %v22229_v27, 0.0  ;;  %v20961_v27 = vld [vmem:[%s24053_s5 + $0x238] sm:$0xff]  }
 0x952   :  { %21813 = vmatpush3.bf16.msra.mxu1 %v20940_v6  ;;  %21783 = vmatprep.subr.bf16.mxu0 %v20933_v35  ;;  %v20979_v6 = vld [vmem:[%s24053_s5 + $0x2c8] sm:$0xff]  }
 0x953   :  { %21815 = vmatprep.subr.bf16.mxu1 %v20949_v63  ;;  %v20955_v35 = vld [vmem:[%s24053_s5 + $0x208] sm:$0xff]  }
 0x954   :  { %v20971_v63 = vld [vmem:[%s24053_s5 + $0x288] sm:$0xff]  }
 0x955   :  { %21785 = vmatpush3.bf16.msra.mxu0 %v20925_v37  ;;  %v20964_v37 = vld [vmem:[%s24053_s5 + $0x250] sm:$0xff]  }
 0x956   :  { %21817 = vmatpush3.bf16.msra.mxu1 %v20941_v43  ;;  %21787 = vmatprep.subr.bf16.mxu0 %v20934_v51  ;;  %v20980_v43 = vld [vmem:[%s24053_s5 + $0x2d0] sm:$0xff]  }
 0x957   :  { %21819 = vmatprep.subr.bf16.mxu1 %v20950_v50  ;;  %v20956_v51 = vld [vmem:[%s24053_s5 + $0x210] sm:$0xff]  }
 0x958   :  { %v20972_v50 = vld [vmem:[%s24053_s5 + $0x290] sm:$0xff]  }
 0x959   :  { %21789 = vmatpush3.bf16.msra.mxu0 %v20926_v53  ;;  %v20965_v53 = vld [vmem:[%s24053_s5 + $0x258] sm:$0xff]  }
 0x95a   :  { %21821 = vmatpush3.bf16.msra.mxu1 %v20942_v52  ;;  %21791 = vmatprep.subr.bf16.mxu0 %v20935_v55  ;;  %v20981_v52 = vld [vmem:[%s24053_s5 + $0x2d8] sm:$0xff]  }
 0x95b   :  { %21823 = vmatprep.subr.bf16.mxu1 %v20951_v40  ;;  %v20957_v55 = vld [vmem:[%s24053_s5 + $0x218] sm:$0xff]  }
 0x95c   :  { %v20973_v40 = vld [vmem:[%s24053_s5 + $0x298] sm:$0xff]  }
 0x95d   :  { %21793 = vmatpush3.bf16.msra.mxu0 %v20927_v58  ;;  %v20966_v58 = vld [vmem:[%s24053_s5 + $0x260] sm:$0xff]  }
 0x95e   :  { %21825 = vmatpush3.bf16.msra.mxu1 %v20943_v23  ;;  %21795 = vmatprep.subr.bf16.mxu0 %v20936_v25  ;;  %v20982_v23 = vld [vmem:[%s24053_s5 + $0x2e0] sm:$0xff]  }
 0x95f   :  { %21827 = vmatprep.subr.bf16.mxu1 %v20952_v34  ;;  %v20958_v25 = vld [vmem:[%s24053_s5 + $0x220] sm:$0xff]  }
 0x960   :  { %v20974_v34 = vld [vmem:[%s24053_s5 + $0x2a0] sm:$0xff]  }
 0x961   :  { %21797 = vmatpush3.bf16.msra.mxu0 %v20928_v24  ;;  %v20983_v24 = vld [vmem:[%s24053_s5 + $0x2e8] sm:$0xff]  }
 0x962   :  { %21829 = vmatpush3.bf16.msra.mxu1 %v20944_v19  ;;  %21799 = vmatprep.subr.bf16.mxu0 %v20937_v41  ;;  %v20975_v19 = vld [vmem:[%s24053_s5 + $0x2a8] sm:$0xff]   ;;  %v20968_v41 = vld [vmem:[%s24053_s5 + $0x270] sm:$0xff]  }
 0x963   :  { %21831 = vmatprep.subr.bf16.mxu1 %v20953_v20  ;;  %v2536_v20 = vrot.slane %v23325_v44, %v22876_v45 }
 0x965   :  { %21801 = vmatpush3.bf16.msra.mxu0 %v20929_v8  ;;  %v20976_v8 = vld [vmem:[%s24053_s5 + $0x2b0] sm:$0xff]  }
 0x966   :  { %21833 = vmatpush3.bf16.msra.mxu1 %v20945_v11  ;;  %21835 = vmatprep.subr.bf16.mxu0 %v20962_v62  ;;  %v2556_v11 = vrot.slane %v23325_v44, %v22918_v13  ;;  %v20985_v62 = vld [vmem:[%s24053_s5 + $0x2f8] sm:$0xff]  }
 0x967   :  { %21867 = vmatprep.subr.bf16.mxu1 %v20978_v0  ;;  %v22226_v0 = vadd.f32 %v23025_v56, %v2536_v20  ;;  %v21010_v56 = vld [vmem:[%s24053_s5 + $0x3c0] sm:$0xff]   ;;  %v21000_v20 = vld [vmem:[%s24053_s5 + $0x370] sm:$0xff]  }
 0x968   :  { %16786 = vmatmul.mubr.f32.vlgmr.msra.gmra.mrb[42].mxu0 %v15529_v18  ;;  %v22228_v18 = vadd.f32 %v23027_v1, %v2544_v14  ;;  %v20986_v1 = vld [vmem:[%s24053_s5 + $0x300] sm:$0xff]  }
 0x969   :  { %16856 = vmatmul.mubr.f32.vlgmr.msra.gmra.mrb[42].mxu1 %v15531_v28  ;;  %21837 = vmatpush3.bf16.msra.mxu0 %v20954_v5  ;;  %v20977_v5 = vld [vmem:[%s24053_s5 + $0x2b8] sm:$0xff]   ;;  %v20994_v28 = vld [vmem:[%s24053_s5 + $0x340] sm:$0xff]  }
 0x96a   :  { %16925 = vmatprep.mubr.f32.mxu0 %v15534_v31  ;;  %21869 = vmatpush3.bf16.msra.mxu1 %v20970_v3  ;;  %v22231_v3 = vadd.f32 %v23053_v30, %v2556_v11  ;;  %v22233_v31 = vadd.f32 %v23055_v33, %v2564_v17  ;;  %v21002_v30 = vld [vmem:[%s24053_s5 + $0x380] sm:$0xff]   ;;  %v20995_v33 = vld [vmem:[%s24053_s5 + $0x348] sm:$0xff]   ;;  %v2560_v11 = vrot.slane %v23325_v44, %v22955_v36  ;;  %v21001_v17 = vld [vmem:[%s24053_s5 + $0x378] sm:$0xff]  }
 0x96b   :  { %16995 = vmatprep.mubr.f32.mxu1 %v15536_v9  ;;  %21839 = vmatprep.subr.bf16.mxu0 %v20963_v10  ;;  %v15533_v10 = vmax.f32 %v22226_v0, 0.0  ;;  %v15535_v9 = vmax.f32 %v22228_v18, 0.0  ;;  %v23543_v14 = vld [vmem:[#allocation10 + $0x10] sm:$0xff] }
 0x96c   :  { %21871 = vmatprep.subr.bf16.mxu1 %v20979_v6  ;;  %v15538_v6 = vmax.f32 %v22231_v3, 0.0  ;;  %v2572_v0 = vrot.slane %v23543_v14, %v22881_v47  ;;  %v2580_v18 = vrot.slane %v23543_v14, %v22884_v48  ;;  %v21009_v3 = vld [vmem:[%s24053_s5 + $0x3b8] sm:$0xff]  }
 0x96d   :  { %21841 = vmatpush3.bf16.msra.mxu0 %v20955_v35  ;;  %v15540_v35 = vmax.f32 %v22233_v31, 0.0 }
 0x96e   :  { %21873 = vmatpush3.bf16.msra.mxu1 %v20971_v63  ;;  %21843 = vmatprep.subr.bf16.mxu0 %v20964_v37  ;;  %v21011_v63 = vld [vmem:[%s24053_s5 + $0x3c8] sm:$0xff]   ;;  %v22235_v31 = vadd.f32 %v23077_v39, %v2572_v0  ;;  %v21034_v39 = vld [vmem:[%s24053_s5 + $0x480] sm:$0xff]   ;;  %v2596_v0 = vrot.slane %v23543_v14, %v22938_v60 }
 0x96f   :  { %21875 = vmatprep.subr.bf16.mxu1 %v20980_v43  ;;  %v20987_v37 = vld [vmem:[%s24053_s5 + $0x308] sm:$0xff]  }
 0x970   :  { %v21003_v43 = vld [vmem:[%s24053_s5 + $0x388] sm:$0xff]  }
 0x971   :  { %21845 = vmatpush3.bf16.msra.mxu0 %v20956_v51  ;;  %v20996_v51 = vld [vmem:[%s24053_s5 + $0x350] sm:$0xff]  }
 0x972   :  { %21877 = vmatpush3.bf16.msra.mxu1 %v20972_v50  ;;  %21847 = vmatprep.subr.bf16.mxu0 %v20965_v53  ;;  %v21012_v50 = vld [vmem:[%s24053_s5 + $0x3d0] sm:$0xff]  }
 0x973   :  { %21879 = vmatprep.subr.bf16.mxu1 %v20981_v52  ;;  %v20988_v53 = vld [vmem:[%s24053_s5 + $0x310] sm:$0xff]  }
 0x974   :  { %v21004_v52 = vld [vmem:[%s24053_s5 + $0x390] sm:$0xff]  }
 0x975   :  { %21849 = vmatpush3.bf16.msra.mxu0 %v20957_v55  ;;  %v20997_v55 = vld [vmem:[%s24053_s5 + $0x358] sm:$0xff]  }
 0x976   :  { %21881 = vmatpush3.bf16.msra.mxu1 %v20973_v40  ;;  %21851 = vmatprep.subr.bf16.mxu0 %v20966_v58  ;;  %v21013_v40 = vld [vmem:[%s24053_s5 + $0x3d8] sm:$0xff]  }
 0x977   :  { %21883 = vmatprep.subr.bf16.mxu1 %v20982_v23  ;;  %v20989_v58 = vld [vmem:[%s24053_s5 + $0x318] sm:$0xff]  }
 0x978   :  { %v21005_v23 = vld [vmem:[%s24053_s5 + $0x398] sm:$0xff]  }
 0x979   :  { %21853 = vmatpush3.bf16.msra.mxu0 %v20958_v25  ;;  %v20998_v25 = vld [vmem:[%s24053_s5 + $0x360] sm:$0xff]  }
 0x97a   :  { %21885 = vmatpush3.bf16.msra.mxu1 %v20974_v34  ;;  %21855 = vmatprep.subr.bf16.mxu0 %v20967_v15  ;;  %v21014_v34 = vld [vmem:[%s24053_s5 + $0x3e0] sm:$0xff]  }
 0x97b   :  { %21887 = vmatprep.subr.bf16.mxu1 %v20983_v24  ;;  %v20990_v15 = vld [vmem:[%s24053_s5 + $0x320] sm:$0xff]  }
 0x97c   :  { %v21006_v24 = vld [vmem:[%s24053_s5 + $0x3a0] sm:$0xff]  }
 0x97d   :  { %21857 = vmatpush3.bf16.msra.mxu0 %v20959_v26  ;;  %v20999_v26 = vld [vmem:[%s24053_s5 + $0x368] sm:$0xff]  }
 0x97e   :  { %21889 = vmatpush3.bf16.msra.mxu1 %v20975_v19  ;;  %21859 = vmatprep.subr.bf16.mxu0 %v20968_v41  ;;  %v21015_v19 = vld [vmem:[%s24053_s5 + $0x3e8] sm:$0xff]  }
 0x97f   :  { %21891 = vmatprep.subr.bf16.mxu1 %v20984_v7  ;;  %v20991_v41 = vld [vmem:[%s24053_s5 + $0x328] sm:$0xff]  }
 0x980   :  { %v21007_v7 = vld [vmem:[%s24053_s5 + $0x3a8] sm:$0xff]  }
 0x981   :  { %21861 = vmatpush3.bf16.msra.mxu0 %v20960_v22  ;;  %v21016_v22 = vld [vmem:[%s24053_s5 + $0x3f0] sm:$0xff]  }
 0x982   :  { %21893 = vmatpush3.bf16.msra.mxu1 %v20976_v8  ;;  %21863 = vmatprep.subr.bf16.mxu0 %v20969_v4  ;;  %v2552_v8 = vrot.slane %v23325_v44, %v22935_v49  ;;  %v20992_v4 = vld [vmem:[%s24053_s5 + $0x330] sm:$0xff]  }
 0x983   :  { %21895 = vmatprep.subr.bf16.mxu1 %v20985_v62  ;;  %v21008_v62 = vld [vmem:[%s24053_s5 + $0x3b0] sm:$0xff]  }
 0x984   :  { %v22230_v44 = vadd.f32 %v23049_v46, %v2552_v8  ;;  %v21042_v46 = vld [vmem:[%s24053_s5 + $0x4c0] sm:$0xff]   ;;  %v2576_v8 = vrot.slane %v23543_v14, %v22915_v2 }
 0x985   :  { %21865 = vmatpush3.bf16.msra.mxu0 %v20961_v27  ;;  %v21017_v27 = vld [vmem:[%s24053_s5 + $0x3f8] sm:$0xff]  }
 0x986   :  { %21897 = vmatpush3.bf16.msra.mxu1 %v20977_v5  ;;  %21899 = vmatprep.subr.bf16.mxu0 %v20994_v28  ;;  %v20993_v5 = vld [vmem:[%s24053_s5 + $0x338] sm:$0xff]   ;;  %v22232_v28 = vadd.f32 %v23051_v29, %v2560_v11  ;;  %v21018_v29 = vld [vmem:[%s24053_s5 + $0x400] sm:$0xff]  }
 0x987   :  { %21931 = vmatprep.subr.bf16.mxu1 %v21010_v56  ;;  %v21026_v56 = vld [vmem:[%s24053_s5 + $0x440] sm:$0xff]   ;;  %v21033_v11 = vld [vmem:[%s24053_s5 + $0x478] sm:$0xff]  }
 0x988   :  { %16926 = vmatmul.mubr.f32.vlgmr.msra.gmra.mrb[44].mxu0 %v15533_v10  ;;  %v22237_v10 = vadd.f32 %v23079_v42, %v2580_v18  ;;  %v21027_v42 = vld [vmem:[%s24053_s5 + $0x448] sm:$0xff]   ;;  %v21025_v18 = vld [vmem:[%s24053_s5 + $0x438] sm:$0xff]  }
 0x989   :  { %16996 = vmatmul.mubr.f32.vlgmr.msra.gmra.mrb[44].mxu1 %v15535_v9  ;;  %21901 = vmatpush3.bf16.msra.mxu0 %v20986_v1  ;;  %v15537_v1 = vmax.f32 %v22230_v44, 0.0  ;;  %v15539_v9 = vmax.f32 %v22232_v28, 0.0  ;;  %v22236_v44 = vadd.f32 %v23075_v38, %v2576_v8  ;;  %v21058_v28 = vld [vmem:[%s24053_s5 + $0x540] sm:$0xff]  }
 0x98a   :  { %17065 = vmatprep.mubr.f32.mxu0 %v15538_v6  ;;  %21933 = vmatpush3.bf16.msra.mxu1 %v21002_v30  ;;  %v15542_v30 = vmax.f32 %v22235_v31, 0.0  ;;  %v15544_v6 = vmax.f32 %v22237_v10, 0.0  ;;  %v21050_v38 = vld [vmem:[%s24053_s5 + $0x500] sm:$0xff]  }
 0x98b   :  { %17135 = vmatprep.mubr.f32.mxu1 %v15540_v35  ;;  %21903 = vmatprep.subr.bf16.mxu0 %v20995_v33  ;;  %v21043_v33 = vld [vmem:[%s24053_s5 + $0x4c8] sm:$0xff]  }
 0x98c   :  { %21935 = vmatprep.subr.bf16.mxu1 %v21011_v63  ;;  %v21019_v35 = vld [vmem:[%s24053_s5 + $0x408] sm:$0xff]  }
 0x98d   :  { %21905 = vmatpush3.bf16.msra.mxu0 %v20987_v37  ;;  %v21035_v63 = vld [vmem:[%s24053_s5 + $0x488] sm:$0xff]   ;;  %v21028_v37 = vld [vmem:[%s24053_s5 + $0x450] sm:$0xff]  }
 0x98e   :  { %21937 = vmatpush3.bf16.msra.mxu1 %v21003_v43  ;;  %21907 = vmatprep.subr.bf16.mxu0 %v20996_v51  ;;  %v21044_v43 = vld [vmem:[%s24053_s5 + $0x4d0] sm:$0xff]  }
 0x98f   :  { %21939 = vmatprep.subr.bf16.mxu1 %v21012_v50  ;;  %v21020_v51 = vld [vmem:[%s24053_s5 + $0x410] sm:$0xff]  }
 0x990   :  { %v21036_v50 = vld [vmem:[%s24053_s5 + $0x490] sm:$0xff]  }
 0x991   :  { %21909 = vmatpush3.bf16.msra.mxu0 %v20988_v53  ;;  %v21029_v53 = vld [vmem:[%s24053_s5 + $0x458] sm:$0xff]  }
 0x992   :  { %21941 = vmatpush3.bf16.msra.mxu1 %v21004_v52  ;;  %21911 = vmatprep.subr.bf16.mxu0 %v20997_v55  ;;  %v21045_v52 = vld [vmem:[%s24053_s5 + $0x4d8] sm:$0xff]  }
 0x993   :  { %21943 = vmatprep.subr.bf16.mxu1 %v21013_v40  ;;  %v21021_v55 = vld [vmem:[%s24053_s5 + $0x418] sm:$0xff]  }
 0x994   :  { %v21037_v40 = vld [vmem:[%s24053_s5 + $0x498] sm:$0xff]  }
 0x995   :  { %21913 = vmatpush3.bf16.msra.mxu0 %v20989_v58  ;;  %v21030_v58 = vld [vmem:[%s24053_s5 + $0x460] sm:$0xff]  }
 0x996   :  { %21945 = vmatpush3.bf16.msra.mxu1 %v21005_v23  ;;  %21915 = vmatprep.subr.bf16.mxu0 %v20998_v25  ;;  %v21046_v23 = vld [vmem:[%s24053_s5 + $0x4e0] sm:$0xff]  }
 0x997   :  { %21947 = vmatprep.subr.bf16.mxu1 %v21014_v34  ;;  %v21022_v25 = vld [vmem:[%s24053_s5 + $0x420] sm:$0xff]  }
 0x998   :  { %v21038_v34 = vld [vmem:[%s24053_s5 + $0x4a0] sm:$0xff]  }
 0x999   :  { %21917 = vmatpush3.bf16.msra.mxu0 %v20990_v15  ;;  %v21031_v15 = vld [vmem:[%s24053_s5 + $0x468] sm:$0xff]  }
 0x99a   :  { %21949 = vmatpush3.bf16.msra.mxu1 %v21006_v24  ;;  %21919 = vmatprep.subr.bf16.mxu0 %v20999_v26  ;;  %v21047_v24 = vld [vmem:[%s24053_s5 + $0x4e8] sm:$0xff]  }
 0x99b   :  { %21951 = vmatprep.subr.bf16.mxu1 %v21015_v19  ;;  %v21023_v26 = vld [vmem:[%s24053_s5 + $0x428] sm:$0xff]  }
 0x99c   :  { %v21039_v19 = vld [vmem:[%s24053_s5 + $0x4a8] sm:$0xff]  }
 0x99d   :  { %21921 = vmatpush3.bf16.msra.mxu0 %v20991_v41  ;;  %v21032_v41 = vld [vmem:[%s24053_s5 + $0x470] sm:$0xff]  }
 0x99e   :  { %21953 = vmatpush3.bf16.msra.mxu1 %v21007_v7  ;;  %21923 = vmatprep.subr.bf16.mxu0 %v21000_v20  ;;  %v21048_v7 = vld [vmem:[%s24053_s5 + $0x4f0] sm:$0xff]   ;;  %v2568_v20 = vrot.slane %v23543_v14, %v22876_v45 }
 0x99f   :  { %21955 = vmatprep.subr.bf16.mxu1 %v21016_v22  ;;  %v21024_v22 = vld [vmem:[%s24053_s5 + $0x430] sm:$0xff]  }
 0x9a1   :  { %21925 = vmatpush3.bf16.msra.mxu0 %v20992_v4  ;;  %v21040_v4 = vld [vmem:[%s24053_s5 + $0x4b0] sm:$0xff]  }
 0x9a2   :  { %21957 = vmatpush3.bf16.msra.mxu1 %v21008_v62  ;;  %21927 = vmatprep.subr.bf16.mxu0 %v21001_v17  ;;  %v2588_v62 = vrot.slane %v23543_v14, %v22918_v13  ;;  %v21049_v17 = vld [vmem:[%s24053_s5 + $0x4f8] sm:$0xff]  }
 0x9a3   :  { %21959 = vmatprep.subr.bf16.mxu1 %v21017_v27  ;;  %v22234_v27 = vadd.f32 %v23073_v32, %v2568_v20  ;;  %v21074_v32 = vld [vmem:[%s24053_s5 + $0x5c0] sm:$0xff]  }
 0x9a5   :  { %21929 = vmatpush3.bf16.msra.mxu0 %v20993_v5  ;;  %v21041_v5 = vld [vmem:[%s24053_s5 + $0x4b8] sm:$0xff]   ;;  %v15541_v31 = vmax.f32 %v22234_v27, 0.0 }
 0x9a6   :  { %21961 = vmatpush3.bf16.msra.mxu1 %v21009_v3  ;;  %21963 = vmatprep.subr.bf16.mxu0 %v21026_v56  ;;  %v22239_v3 = vadd.f32 %v23101_v12, %v2588_v62  ;;  %v22241_v56 = vadd.f32 %v23103_v21, %v2596_v0  ;;  %v21066_v12 = vld [vmem:[%s24053_s5 + $0x580] sm:$0xff]   ;;  %v21059_v21 = vld [vmem:[%s24053_s5 + $0x548] sm:$0xff]  }
 0x9a7   :  { %21995 = vmatprep.subr.bf16.mxu1 %v21042_v46  ;;  %v15543_v46 = vmax.f32 %v22236_v44, 0.0 }
 0x9a8   :  { %17066 = vmatmul.mubr.f32.vlgmr.msra.gmra.mrb[46].mxu0 %v15537_v1  ;;  %v15546_v10 = vmax.f32 %v22239_v3, 0.0  ;;  %v15548_v1 = vmax.f32 %v22241_v56, 0.0  ;;  %v21107_v3 = vld [vmem:[%s24053_s5 + $0x6c8] sm:$0xff]  }
 0x9a9   :  { %17136 = vmatmul.mubr.f32.vlgmr.msra.gmra.mrb[46].mxu1 %v15539_v9  ;;  %21965 = vmatpush3.bf16.msra.mxu0 %v21018_v29  ;;  %v21075_v29 = vld [vmem:[%s24053_s5 + $0x5c8] sm:$0xff]  }
 0x9aa   :  { %17205 = vmatprep.mubr.f32.mxu0 %v15542_v30  ;;  %21997 = vmatpush3.bf16.msra.mxu1 %v21034_v39  ;;  %v21051_v9 = vld [vmem:[%s24053_s5 + $0x508] sm:$0xff]   ;;  %v21060_v30 = vld [vmem:[%s24053_s5 + $0x550] sm:$0xff]  }
 0x9ab   :  { %17275 = vmatprep.mubr.f32.mxu1 %v15544_v6  ;;  %21967 = vmatprep.subr.bf16.mxu0 %v21027_v42  ;;  %v21067_v39 = vld [vmem:[%s24053_s5 + $0x588] sm:$0xff]   ;;  %v21076_v42 = vld [vmem:[%s24053_s5 + $0x5d0] sm:$0xff]  }
 0x9ac   :  { %21999 = vmatprep.subr.bf16.mxu1 %v21043_v33  ;;  %v21052_v6 = vld [vmem:[%s24053_s5 + $0x510] sm:$0xff]   ;;  %v21099_v56 = vld [vmem:[%s24053_s5 + $0x688] sm:$0xff]  }
 0x9ad   :  { %21969 = vmatpush3.bf16.msra.mxu0 %v21019_v35  ;;  %v21068_v33 = vld [vmem:[%s24053_s5 + $0x590] sm:$0xff]   ;;  %v21061_v35 = vld [vmem:[%s24053_s5 + $0x558] sm:$0xff]  }
 0x9ae   :  { %22001 = vmatpush3.bf16.msra.mxu1 %v21035_v63  ;;  %21971 = vmatprep.subr.bf16.mxu0 %v21028_v37  ;;  %v21077_v63 = vld [vmem:[%s24053_s5 + $0x5d8] sm:$0xff]  }
 0x9af   :  { %22003 = vmatprep.subr.bf16.mxu1 %v21044_v43  ;;  %v21053_v37 = vld [vmem:[%s24053_s5 + $0x518] sm:$0xff]  }
 0x9b0   :  { %v21069_v43 = vld [vmem:[%s24053_s5 + $0x598] sm:$0xff]  }
 0x9b1   :  { %21973 = vmatpush3.bf16.msra.mxu0 %v21020_v51  ;;  %v21062_v51 = vld [vmem:[%s24053_s5 + $0x560] sm:$0xff]  }
 0x9b2   :  { %22005 = vmatpush3.bf16.msra.mxu1 %v21036_v50  ;;  %21975 = vmatprep.subr.bf16.mxu0 %v21029_v53  ;;  %v21078_v50 = vld [vmem:[%s24053_s5 + $0x5e0] sm:$0xff]  }
 0x9b3   :  { %22007 = vmatprep.subr.bf16.mxu1 %v21045_v52  ;;  %v21054_v53 = vld [vmem:[%s24053_s5 + $0x520] sm:$0xff]  }
 0x9b4   :  { %v21070_v52 = vld [vmem:[%s24053_s5 + $0x5a0] sm:$0xff]  }
 0x9b5   :  { %21977 = vmatpush3.bf16.msra.mxu0 %v21021_v55  ;;  %v21063_v55 = vld [vmem:[%s24053_s5 + $0x568] sm:$0xff]  }
 0x9b6   :  { %22009 = vmatpush3.bf16.msra.mxu1 %v21037_v40  ;;  %21979 = vmatprep.subr.bf16.mxu0 %v21030_v58  ;;  %v21079_v40 = vld [vmem:[%s24053_s5 + $0x5e8] sm:$0xff]  }
 0x9b7   :  { %22011 = vmatprep.subr.bf16.mxu1 %v21046_v23  ;;  %v21055_v58 = vld [vmem:[%s24053_s5 + $0x528] sm:$0xff]  }
 0x9b8   :  { %v21071_v23 = vld [vmem:[%s24053_s5 + $0x5a8] sm:$0xff]  }
 0x9b9   :  { %21981 = vmatpush3.bf16.msra.mxu0 %v21022_v25  ;;  %v21064_v25 = vld [vmem:[%s24053_s5 + $0x570] sm:$0xff]  }
 0x9ba   :  { %22013 = vmatpush3.bf16.msra.mxu1 %v21038_v34  ;;  %21983 = vmatprep.subr.bf16.mxu0 %v21031_v15  ;;  %v21080_v34 = vld [vmem:[%s24053_s5 + $0x5f0] sm:$0xff]   ;;  %v23761_v15 = vld [vmem:[#allocation10 + $0x18] sm:$0xff] }
 0x9bb   :  { %22015 = vmatprep.subr.bf16.mxu1 %v21047_v24  ;;  %v2584_v24 = vrot.slane %v23543_v14, %v22935_v49  ;;  %v2604_v20 = vrot.slane %v23761_v15, %v22881_v47  ;;  %v2612_v8 = vrot.slane %v23761_v15, %v22884_v48  ;;  %v21073_v47 = vld [vmem:[%s24053_s5 + $0x5b8] sm:$0xff]   ;;  %v21090_v48 = vld [vmem:[%s24053_s5 + $0x640] sm:$0xff]  }
 0x9bd   :  { %21985 = vmatpush3.bf16.msra.mxu0 %v21023_v26  ;;  %v21056_v26 = vld [vmem:[%s24053_s5 + $0x530] sm:$0xff]   ;;  %v22245_v0 = vadd.f32 %v23127_v16, %v2612_v8  ;;  %v21091_v16 = vld [vmem:[%s24053_s5 + $0x648] sm:$0xff]  }
 0x9be   :  { %22017 = vmatpush3.bf16.msra.mxu1 %v21039_v19  ;;  %21987 = vmatprep.subr.bf16.mxu0 %v21032_v41  ;;  %v2592_v19 = vrot.slane %v23543_v14, %v22955_v36  ;;  %v21072_v41 = vld [vmem:[%s24053_s5 + $0x5b0] sm:$0xff]   ;;  %v22238_v14 = vadd.f32 %v23097_v57, %v2584_v24  ;;  %v21106_v57 = vld [vmem:[%s24053_s5 + $0x6c0] sm:$0xff]  }
 0x9bf   :  { %22019 = vmatprep.subr.bf16.mxu1 %v21048_v7  ;;  %v21065_v7 = vld [vmem:[%s24053_s5 + $0x578] sm:$0xff]  }
 0x9c0   :  { %v15545_v27 = vmax.f32 %v22238_v14, 0.0  ;;  %v21138_v14 = vld [vmem:[%s24053_s5 + $0x7c0] sm:$0xff]  }
 0x9c1   :  { %21989 = vmatpush3.bf16.msra.mxu0 %v21024_v22  ;;  %v21081_v22 = vld [vmem:[%s24053_s5 + $0x5f8] sm:$0xff]  }
 0x9c2   :  { %22021 = vmatpush3.bf16.msra.mxu1 %v21040_v4  ;;  %21991 = vmatprep.subr.bf16.mxu0 %v21033_v11  ;;  %v21057_v4 = vld [vmem:[%s24053_s5 + $0x538] sm:$0xff]   ;;  %v24060_v11 = vld [vmem:[#allocation24_spill] sm:$0xff] }
 0x9c3   :  { %22023 = vmatprep.subr.bf16.mxu1 %v21049_v17  ;;  %v22240_v62 = vadd.f32 %v24060_v11, %v2592_v19  ;;  %v22243_v17 = vadd.f32 %v23125_v61, %v2604_v20  ;;  %v21098_v61 = vld [vmem:[%s24053_s5 + $0x680] sm:$0xff]   ;;  %v2620_v19 = vrot.slane %v23761_v15, %v22918_v13  ;;  %v21105_v13 = vld [vmem:[%s24053_s5 + $0x6b8] sm:$0xff]  }
 0x9c5   :  { %21993 = vmatpush3.bf16.msra.mxu0 %v21025_v18  ;;  %v21082_v18 = vld [vmem:[%s24053_s5 + $0x600] sm:$0xff]   ;;  %v15547_v44 = vmax.f32 %v22240_v62, 0.0 }
 0x9c6   :  { %22025 = vmatpush3.bf16.msra.mxu1 %v21041_v5  ;;  %22027 = vmatprep.subr.bf16.mxu0 %v21058_v28  ;;  %v15550_v5 = vmax.f32 %v22243_v17, 0.0  ;;  %v15552_v28 = vmax.f32 %v22245_v0, 0.0  ;;  %v21123_v17 = vld [vmem:[%s24053_s5 + $0x748] sm:$0xff]  }
 0x9c7   :  { %22059 = vmatprep.subr.bf16.mxu1 %v21074_v32  ;;  %v21083_v32 = vld [vmem:[%s24053_s5 + $0x608] sm:$0xff]  }
 0x9c8   :  { %17206 = vmatmul.mubr.f32.vlgmr.msra.gmra.mrb[48].mxu0 %v15541_v31  ;;  %v21092_v31 = vld [vmem:[%s24053_s5 + $0x650] sm:$0xff]   ;;  %v21139_v0 = vld [vmem:[%s24053_s5 + $0x7c8] sm:$0xff]  }
 0x9c9   :  { %17276 = vmatmul.mubr.f32.vlgmr.msra.gmra.mrb[48].mxu1 %v15543_v46  ;;  %22029 = vmatpush3.bf16.msra.mxu0 %v21050_v38  ;;  %v21108_v38 = vld [vmem:[%s24053_s5 + $0x6d0] sm:$0xff]  }
 0x9ca   :  { %17345 = vmatprep.mubr.f32.mxu0 %v15546_v10  ;;  %22061 = vmatpush3.bf16.msra.mxu1 %v21066_v12  ;;  %v21084_v46 = vld [vmem:[%s24053_s5 + $0x610] sm:$0xff]   ;;  %v21093_v10 = vld [vmem:[%s24053_s5 + $0x658] sm:$0xff]  }
 0x9cb   :  { %17415 = vmatprep.mubr.f32.mxu1 %v15548_v1  ;;  %22031 = vmatprep.subr.bf16.mxu0 %v21059_v21  ;;  %v21100_v12 = vld [vmem:[%s24053_s5 + $0x690] sm:$0xff]   ;;  %v21109_v21 = vld [vmem:[%s24053_s5 + $0x6d8] sm:$0xff]  }
 0x9cc   :  { %22063 = vmatprep.subr.bf16.mxu1 %v21075_v29  ;;  %v21085_v1 = vld [vmem:[%s24053_s5 + $0x618] sm:$0xff]  }
 0x9cd   :  { %22033 = vmatpush3.bf16.msra.mxu0 %v21051_v9  ;;  %v21101_v29 = vld [vmem:[%s24053_s5 + $0x698] sm:$0xff]   ;;  %v21094_v9 = vld [vmem:[%s24053_s5 + $0x660] sm:$0xff]  }
 0x9ce   :  { %22065 = vmatpush3.bf16.msra.mxu1 %v21067_v39  ;;  %22035 = vmatprep.subr.bf16.mxu0 %v21060_v30  ;;  %v21110_v39 = vld [vmem:[%s24053_s5 + $0x6e0] sm:$0xff]  }
 0x9cf   :  { %22067 = vmatprep.subr.bf16.mxu1 %v21076_v42  ;;  %v21086_v30 = vld [vmem:[%s24053_s5 + $0x620] sm:$0xff]  }
 0x9d0   :  { %v21102_v42 = vld [vmem:[%s24053_s5 + $0x6a0] sm:$0xff]  }
 0x9d1   :  { %22037 = vmatpush3.bf16.msra.mxu0 %v21052_v6  ;;  %v21095_v6 = vld [vmem:[%s24053_s5 + $0x668] sm:$0xff]  }
 0x9d2   :  { %22069 = vmatpush3.bf16.msra.mxu1 %v21068_v33  ;;  %22039 = vmatprep.subr.bf16.mxu0 %v21061_v35  ;;  %v21111_v33 = vld [vmem:[%s24053_s5 + $0x6e8] sm:$0xff]  }
 0x9d3   :  { %22071 = vmatprep.subr.bf16.mxu1 %v21077_v63  ;;  %v21087_v35 = vld [vmem:[%s24053_s5 + $0x628] sm:$0xff]  }
 0x9d5   :  { %22041 = vmatpush3.bf16.msra.mxu0 %v21053_v37  ;;  %v21103_v37 = vld [vmem:[%s24053_s5 + $0x6a8] sm:$0xff]  }
 0x9d6   :  { %22073 = vmatpush3.bf16.msra.mxu1 %v21069_v43  ;;  %22043 = vmatprep.subr.bf16.mxu0 %v21062_v51  ;;  %v21096_v43 = vld [vmem:[%s24053_s5 + $0x670] sm:$0xff]  }
 0x9d7   :  { %22075 = vmatprep.subr.bf16.mxu1 %v21078_v50 }
 0x9d9   :  { %22045 = vmatpush3.bf16.msra.mxu0 %v21054_v53  ;;  %v21112_v53 = vld [vmem:[%s24053_s5 + $0x6f0] sm:$0xff]  }
 0x9da   :  { %22077 = vmatpush3.bf16.msra.mxu1 %v21070_v52  ;;  %22047 = vmatprep.subr.bf16.mxu0 %v21063_v55 }
 0x9db   :  { %22079 = vmatprep.subr.bf16.mxu1 %v21079_v40  ;;  %v2600_v40 = vrot.slane %v23761_v15, %v22876_v45  ;;  %v21097_v45 = vld [vmem:[%s24053_s5 + $0x678] sm:$0xff]  }
 0x9dd   :  { %22049 = vmatpush3.bf16.msra.mxu0 %v21055_v58  ;;  %v22242_v20 = vadd.f32 %v23121_v59, %v2600_v40  ;;  %v21145_v40 = vld [vmem:[%s24053_s5 + $0x7f8] sm:$0xff]  }
 0x9de   :  { %22081 = vmatpush3.bf16.msra.mxu1 %v21071_v23  ;;  %22051 = vmatprep.subr.bf16.mxu0 %v21064_v25  ;;  %v21088_v25 = vld [vmem:[%s24053_s5 + $0x630] sm:$0xff]  }
 0x9df   :  { %22083 = vmatprep.subr.bf16.mxu1 %v21080_v34  ;;  %v2608_v34 = vrot.slane %v23761_v15, %v22915_v2  ;;  %v2628_v2 = vrot.slane %v23761_v15, %v22938_v60  ;;  %v21122_v60 = vld [vmem:[%s24053_s5 + $0x740] sm:$0xff]   ;;  %v15549_v11 = vmax.f32 %v22242_v20, 0.0 }
 0x9e1   :  { %22053 = vmatpush3.bf16.msra.mxu0 %v21056_v26  ;;  %v21104_v26 = vld [vmem:[%s24053_s5 + $0x6b0] sm:$0xff]   ;;  %v22244_v8 = vadd.f32 %v23123_v54, %v2608_v34  ;;  %v21114_v54 = vld [vmem:[%s24053_s5 + $0x700] sm:$0xff]  }
 0x9e2   :  { %22085 = vmatpush3.bf16.msra.mxu1 %v21072_v41  ;;  %22055 = vmatprep.subr.bf16.mxu0 %v21065_v7  ;;  %v21113_v41 = vld [vmem:[%s24053_s5 + $0x6f8] sm:$0xff]   ;;  %v19866_v7 = vld [vmem:[#allocation13] ss:$0 sm:$0xff] }
 0x9e3   :  { %22087 = vmatprep.subr.bf16.mxu1 %v21081_v22  ;;  %v21089_v22 = vld [vmem:[%s24053_s5 + $0x638] sm:$0xff]   ;;  %17718 = vrot.lane.b32.xlu0 %v19866_v7, %s22707_s24  ;;  %v15551_v62 = vmax.f32 %v22244_v8, 0.0 }
 0x9e5   :  { %22057 = vmatpush3.bf16.msra.mxu0 %v21057_v4 }
 0x9e6   :  { %22089 = vmatpush3.bf16.msra.mxu1 %v21073_v47  ;;  %22091 = vmatprep.subr.bf16.mxu0 %v21090_v48  ;;  %v21130_v47 = vld [vmem:[%s24053_s5 + $0x780] sm:$0xff]  }
 0x9e7   :  { %22123 = vmatprep.subr.bf16.mxu1 %v21106_v57 }
 0x9e8   :  { %17346 = vmatmul.mubr.f32.vlgmr.msra.gmra.mrb[50].mxu0 %v15545_v27  ;;  %v21115_v27 = vld [vmem:[%s24053_s5 + $0x708] sm:$0xff]  }
 0x9e9   :  { %17416 = vmatmul.mubr.f32.vlgmr.msra.gmra.mrb[50].mxu1 %v15547_v44  ;;  %22093 = vmatpush3.bf16.msra.mxu0 %v21082_v18  ;;  %v21131_v18 = vld [vmem:[%s24053_s5 + $0x788] sm:$0xff]   ;;  %v21124_v44 = vld [vmem:[%s24053_s5 + $0x750] sm:$0xff]  }
 0x9ea   :  { %17485 = vmatprep.mubr.f32.mxu0 %v15550_v5  ;;  %22125 = vmatpush3.bf16.msra.mxu1 %v21098_v61  ;;  %v21140_v61 = vld [vmem:[%s24053_s5 + $0x7d0] sm:$0xff]  }
 0x9eb   :  { %17555 = vmatprep.mubr.f32.mxu1 %v15552_v28  ;;  %22095 = vmatprep.subr.bf16.mxu0 %v21091_v16  ;;  %v21116_v5 = vld [vmem:[%s24053_s5 + $0x710] sm:$0xff]   ;;  %v21125_v28 = vld [vmem:[%s24053_s5 + $0x758] sm:$0xff]  }
 0x9ec   :  { %22127 = vmatprep.subr.bf16.mxu1 %v21107_v3  ;;  %v21132_v16 = vld [vmem:[%s24053_s5 + $0x790] sm:$0xff]   ;;  %v21141_v3 = vld [vmem:[%s24053_s5 + $0x7d8] sm:$0xff]  }
 0x9ed   :  { %22097 = vmatpush3.bf16.msra.mxu0 %v21083_v32  ;;  %v21117_v32 = vld [vmem:[%s24053_s5 + $0x718] sm:$0xff]  }
 0x9ee   :  { %22129 = vmatpush3.bf16.msra.mxu1 %v21099_v56  ;;  %22099 = vmatprep.subr.bf16.mxu0 %v21092_v31  ;;  %v21133_v56 = vld [vmem:[%s24053_s5 + $0x798] sm:$0xff]   ;;  %v21126_v31 = vld [vmem:[%s24053_s5 + $0x760] sm:$0xff]  }
 0x9ef   :  { %22131 = vmatprep.subr.bf16.mxu1 %v21108_v38  ;;  %v21142_v38 = vld [vmem:[%s24053_s5 + $0x7e0] sm:$0xff]  }
 0x9f1   :  { %22101 = vmatpush3.bf16.msra.mxu0 %v21084_v46  ;;  %v21118_v46 = vld [vmem:[%s24053_s5 + $0x720] sm:$0xff]  }
 0x9f2   :  { %22133 = vmatpush3.bf16.msra.mxu1 %v21100_v12  ;;  %22103 = vmatprep.subr.bf16.mxu0 %v21093_v10  ;;  %v21134_v12 = vld [vmem:[%s24053_s5 + $0x7a0] sm:$0xff]   ;;  %v21127_v10 = vld [vmem:[%s24053_s5 + $0x768] sm:$0xff]  }
 0x9f3   :  { %22135 = vmatprep.subr.bf16.mxu1 %v21109_v21  ;;  %v21143_v21 = vld [vmem:[%s24053_s5 + $0x7e8] sm:$0xff]  }
 0x9f5   :  { %22105 = vmatpush3.bf16.msra.mxu0 %v21085_v1  ;;  %v21119_v1 = vld [vmem:[%s24053_s5 + $0x728] sm:$0xff]  }
 0x9f6   :  { %22137 = vmatpush3.bf16.msra.mxu1 %v21101_v29  ;;  %22107 = vmatprep.subr.bf16.mxu0 %v21094_v9  ;;  %v21135_v9 = vld [vmem:[%s24053_s5 + $0x7a8] sm:$0xff]  }
 0x9f7   :  { %22139 = vmatprep.subr.bf16.mxu1 %v21110_v39  ;;  %v21128_v39 = vld [vmem:[%s24053_s5 + $0x770] sm:$0xff]  }
 0x9f9   :  { %22109 = vmatpush3.bf16.msra.mxu0 %v21086_v30 }
 0x9fa   :  { %22141 = vmatpush3.bf16.msra.mxu1 %v21102_v42  ;;  %22111 = vmatprep.subr.bf16.mxu0 %v21095_v6  ;;  %v21144_v6 = vld [vmem:[%s24053_s5 + $0x7f0] sm:$0xff]  }
 0x9fb   :  { %v23862_v63 = vpop.f32.mrb[36].mxu0  ;;  %22143 = vmatprep.subr.bf16.mxu1 %v21111_v33 }
 0x9fc   :  { %v23870_v51 = vpop.f32.mrb[36].mxu1  ;;  %v15356_v50 = vpop.f32.mrb[37].mxu0 }
 0x9fd   :  { %v15520_v52 = vpop.f32.mrb[37].mxu1  ;;  %v15358_v55 = vpop.f32.mrb[38].mxu0  ;;  %22113 = vmatpush3.bf16.msra.mxu0 %v21087_v35  ;;  %v22247_v59 = vadd.f32 %v15356_v50, %v2620_v19  ;;  %v21120_v50 = vld [vmem:[%s24053_s5 + $0x730] sm:$0xff]  }
 0x9fe   :  { %v15522_v58 = vpop.f32.mrb[38].mxu1  ;;  %22145 = vmatpush3.bf16.msra.mxu1 %v21103_v37  ;;  %v15359_v23 = vpop.f32.mrb[39].mxu0  ;;  %22115 = vmatprep.subr.bf16.mxu0 %v21096_v43  ;;  %v22249_v4 = vadd.f32 %v15520_v52, %v2628_v2  ;;  %v2616_v37 = vrot.slane %v23761_v15, %v22935_v49  ;;  %v21136_v52 = vld [vmem:[%s24053_s5 + $0x7b0] sm:$0xff]   ;;  %v21129_v55 = vld [vmem:[%s24053_s5 + $0x778] sm:$0xff]  }
 0x9ff   :  { %v15523_v24 = vpop.f32.mrb[39].mxu1  ;;  %22147 = vmatprep.subr.bf16.mxu1 %v21112_v53  ;;  %v15554_v48 = vmax.f32 %v22247_v59, 0.0  ;;  %v2624_v53 = vrot.slane %v23761_v15, %v22955_v36  ;;  %v21121_v36 = vld [vmem:[%s24053_s5 + $0x738] sm:$0xff]  }
 0xa00   :  { %v15556_v57 = vmax.f32 %v22249_v4, 0.0  ;;  %v22246_v58 = vadd.f32 %v23862_v63, %v2616_v37  ;;  %v21137_v23 = vld [vmem:[%s24053_s5 + $0x7b8] sm:$0xff]   ;;  %s22717_s5 = smov 96  }
 0xa01   :  { %22117 = vmatpush3.bf16.msra.mxu0 %v21088_v25  ;;  %v22248_v15 = vadd.f32 %v23870_v51, %v2624_v53 }
 0xa02   :  { %22149 = vmatpush3.bf16.msra.mxu1 %v21104_v26  ;;  %22119 = vmatprep.subr.bf16.mxu0 %v21097_v45  ;;  %v15553_v25 = vmax.f32 %v22246_v58, 0.0 }
 0xa03   :  { %22151 = vmatprep.subr.bf16.mxu1 %v21113_v41  ;;  %v15555_v34 = vmax.f32 %v22248_v15, 0.0 }
 0xa05   :  { %22121 = vmatpush3.bf16.msra.mxu0 %v21089_v22 }
 0xa06   :  { %22153 = vmatpush3.bf16.msra.mxu1 %v21105_v13  ;;  %22155 = vmatprep.subr.bf16.mxu0 %v21122_v60 }
 0xa07   :  { %22187 = vmatprep.subr.bf16.mxu1 %v21138_v14 }
 0xa08   :  { %17486 = vmatmul.mubr.f32.vlgmr.msra.gmra.mrb[52].mxu0 %v15549_v11 }
 0xa09   :  { %17556 = vmatmul.mubr.f32.vlgmr.msra.gmra.mrb[52].mxu1 %v15551_v62  ;;  %22157 = vmatpush3.bf16.msra.mxu0 %v21114_v54 }
 0xa0a   :  { %17625 = vmatprep.mubr.f32.mxu0 %v15554_v48  ;;  %22189 = vmatpush3.bf16.msra.mxu1 %v21130_v47 }
 0xa0b   :  { %17695 = vmatprep.mubr.f32.mxu1 %v15556_v57  ;;  %22159 = vmatprep.subr.bf16.mxu0 %v21123_v17 }
 0xa0c   :  { %22191 = vmatprep.subr.bf16.mxu1 %v21139_v0 }
 0xa0d   :  { %22161 = vmatpush3.bf16.msra.mxu0 %v21115_v27 }
 0xa0e   :  { %22193 = vmatpush3.bf16.msra.mxu1 %v21131_v18  ;;  %22163 = vmatprep.subr.bf16.mxu0 %v21124_v44 }
 0xa0f   :  { %22195 = vmatprep.subr.bf16.mxu1 %v21140_v61 }
 0xa11   :  { %22165 = vmatpush3.bf16.msra.mxu0 %v21116_v5 }
 0xa12   :  { %22197 = vmatpush3.bf16.msra.mxu1 %v21132_v16  ;;  %22167 = vmatprep.subr.bf16.mxu0 %v21125_v28 }
 0xa13   :  { %22199 = vmatprep.subr.bf16.mxu1 %v21141_v3 }
 0xa15   :  { %22169 = vmatpush3.bf16.msra.mxu0 %v21117_v32 }
 0xa16   :  { %22201 = vmatpush3.bf16.msra.mxu1 %v21133_v56  ;;  %22171 = vmatprep.subr.bf16.mxu0 %v21126_v31 }
 0xa17   :  { %22203 = vmatprep.subr.bf16.mxu1 %v21142_v38 }
 0xa19   :  { %22173 = vmatpush3.bf16.msra.mxu0 %v21118_v46 }
 0xa1a   :  { %22205 = vmatpush3.bf16.msra.mxu1 %v21134_v12  ;;  %22175 = vmatprep.subr.bf16.mxu0 %v21127_v10 }
 0xa1b   :  { %v21178_v29 = vpop.f32.mrb[40].mxu0  ;;  %22207 = vmatprep.subr.bf16.mxu1 %v21143_v21 }
 0xa1c   :  { %v21213_v30 = vpop.f32.mrb[40].mxu1  ;;  %v21179_v42 = vpop.f32.mrb[41].mxu0 }
 0xa1d   :  { %v21180_v33 = vadd.f32 %v21179_v42, %v21178_v29  ;;  %v21214_v35 = vpop.f32.mrb[41].mxu1  ;;  %22177 = vmatpush3.bf16.msra.mxu0 %v21119_v1 }
 0xa1e   :  { %v21215_v43 = vadd.f32 %v21214_v35, %v21213_v30  ;;  %22209 = vmatpush3.bf16.msra.mxu1 %v21135_v9  ;;  %22179 = vmatprep.subr.bf16.mxu0 %v21128_v39 }
 0xa1f   :  { %22211 = vmatprep.subr.bf16.mxu1 %v21144_v6 }
 0xa20   :  { %v16718_v49 = vadd.f32 %v21215_v43, %v21180_v33 }
 0xa21   :  { %22181 = vmatpush3.bf16.msra.mxu0 %v21120_v50 }
 0xa22   :  { %22213 = vmatpush3.bf16.msra.mxu1 %v21136_v52  ;;  %22183 = vmatprep.subr.bf16.mxu0 %v21129_v55 }
 0xa23   :  { %22215 = vmatprep.subr.bf16.mxu1 %v21145_v40 }
 0xa25   :  { %22185 = vmatpush3.bf16.msra.mxu0 %v21121_v36 }
 0xa26   :  { %22217 = vmatpush3.bf16.msra.mxu1 %v21137_v23 }
 0xa28   :  { %17626 = vmatmul.mubr.f32.vlgmr.msra.gmra.mrb[54].mxu0 %v15553_v25 }
 0xa29   :  { %17696 = vmatmul.mubr.f32.vlgmr.msra.gmra.mrb[54].mxu1 %v15555_v34 }
 0xa3b   :  { %v21248_v63 = vpop.f32.mrb[42].mxu0 }
 0xa3c   :  { %v21283_v24 = vpop.f32.mrb[42].mxu1  ;;  %v21249_v26 = vpop.f32.mrb[43].mxu0 }
 0xa3d   :  { %v21250_v45 = vadd.f32 %v21249_v26, %v21248_v63  ;;  %v21284_v19 = vpop.f32.mrb[43].mxu1 }
 0xa3e   :  { %v21285_v41 = vadd.f32 %v21284_v19, %v21283_v24 }
 0xa3f   :  { %v16788_v2 = vadd.f32 %v21250_v45, %v16718_v49  ;;  %v19865_v49 = vld [vmem:[#allocation11] ss:$0 sm:$0xff] }
 0xa41   :  { %v16858_v7 = vadd.f32 %v21285_v41, %v16788_v2 }
 0xa55   :  { %v17719_v55 = vpop.permute.xlu0 %17718 }
 0xa5b   :  { %v21318_v51 = vpop.f32.mrb[44].mxu0 }
 0xa5c   :  { %v21353_v20 = vpop.f32.mrb[44].mxu1  ;;  %v21319_v22 = vpop.f32.mrb[45].mxu0 }
 0xa5d   :  { %v21320_v8 = vadd.f32 %v21319_v22, %v21318_v51  ;;  %v21354_v13 = vpop.f32.mrb[45].mxu1 }
 0xa5e   :  { %v21355_v60 = vadd.f32 %v21354_v13, %v21353_v20 }
 0xa5f   :  { %v16928_v59 = vadd.f32 %v21320_v8, %v16858_v7 }
 0xa61   :  { %v16998_v14 = vadd.f32 %v21355_v60, %v16928_v59 }
 0xa7b   :  { %v21388_v4 = vpop.f32.mrb[46].mxu0 }
 0xa7c   :  { %v21423_v11 = vpop.f32.mrb[46].mxu1  ;;  %v21389_v54 = vpop.f32.mrb[47].mxu0 }
 0xa7d   :  { %v21390_v62 = vadd.f32 %v21389_v54, %v21388_v4  ;;  %v21424_v47 = vpop.f32.mrb[47].mxu1 }
 0xa7e   :  { %v21425_v48 = vadd.f32 %v21424_v47, %v21423_v11 }
 0xa7f   :  { %v17068_v17 = vadd.f32 %v21390_v62, %v16998_v14 }
 0xa81   :  { %v17138_v57 = vadd.f32 %v21425_v48, %v17068_v17 }
 0xa9b   :  { %v21458_v0 = vpop.f32.mrb[48].mxu0 }
 0xa9c   :  { %v21493_v27 = vpop.f32.mrb[48].mxu1  ;;  %v21459_v18 = vpop.f32.mrb[49].mxu0 }
 0xa9d   :  { %v21460_v44 = vadd.f32 %v21459_v18, %v21458_v0  ;;  %v21494_v61 = vpop.f32.mrb[49].mxu1 }
 0xa9e   :  { %v21495_v5 = vadd.f32 %v21494_v61, %v21493_v27 }
 0xa9f   :  { %v17208_v16 = vadd.f32 %v21460_v44, %v17138_v57 }
 0xaa1   :  { %v17278_v28 = vadd.f32 %v21495_v5, %v17208_v16 }
 0xabb   :  { %v21528_v3 = vpop.f32.mrb[50].mxu0 }
 0xabc   :  { %v21563_v32 = vpop.f32.mrb[50].mxu1  ;;  %v21529_v56 = vpop.f32.mrb[51].mxu0 }
 0xabd   :  { %v21530_v31 = vadd.f32 %v21529_v56, %v21528_v3  ;;  %v21564_v38 = vpop.f32.mrb[51].mxu1 }
 0xabe   :  { %v21565_v46 = vadd.f32 %v21564_v38, %v21563_v32 }
 0xabf   :  { %v17348_v12 = vadd.f32 %v21530_v31, %v17278_v28 }
 0xac1   :  { %v17418_v10 = vadd.f32 %v21565_v46, %v17348_v12 }
 0xadb   :  { %v21598_v21 = vpop.f32.mrb[52].mxu0 }
 0xadc   :  { %v21633_v1 = vpop.f32.mrb[52].mxu1  ;;  %v21599_v29 = vpop.f32.mrb[53].mxu0 }
 0xadd   :  { %v21600_v9 = vadd.f32 %v21599_v29, %v21598_v21  ;;  %v21634_v39 = vpop.f32.mrb[53].mxu1 }
 0xade   :  { %v21635_v30 = vadd.f32 %v21634_v39, %v21633_v1 }
 0xadf   :  { %v17488_v42 = vadd.f32 %v21600_v9, %v17418_v10 }
 0xae1   :  { %v17558_v6 = vadd.f32 %v21635_v30, %v17488_v42 }
 0xafb   :  { %v21668_v33 = vpop.f32.mrb[54].mxu0 }
 0xafc   :  { %v21703_v35 = vpop.f32.mrb[54].mxu1  ;;  %v21669_v37 = vpop.f32.mrb[55].mxu0 }
 0xafd   :  { %v21670_v43 = vadd.f32 %v21669_v37, %v21668_v33  ;;  %v21704_v50 = vpop.f32.mrb[55].mxu1 }
 0xafe   :  { %v21705_v53 = vadd.f32 %v21704_v50, %v21703_v35 }
 0xaff   :  { %v17628_v52 = vadd.f32 %v21670_v43, %v17558_v6 }
 0xb01   :  { %v17698_v40 = vadd.f32 %v21705_v53, %v17628_v52 }
 0xb03   :  { %v17708_v58 = vadd.f32 %v19865_v49, %v17698_v40  ;;  %v17721_v36 = vadd.f32 %v17719_v55, %v17698_v40 }
 0xb05   :  { %22466 = vtanh.f32 %v17708_v58  ;;  %v17728_v15 = vsel %vm17727_vm2, %v17721_v36, -inf }
 0xb06   :  { %17729 = vmax.xlane.f32.xlu0 %v17728_v15 }
 0xb0f   :  { %v22467_v23 = vpop.eup %22466 }
 0xb10   :  { %17711 = vst.msk [vmem:[#allocation15] sm:$0xff] %vm17710_vm3, %v22467_v23 }
 0xb1c   :  { %17723 = vrot.lane.b32.xlu0 %v17721_v36, %s22717_s5 }
 0xb93   :  { %v17730_v25 = vpop.xlane.xlu0 %17729 }
 0xb94   :  { %v17731_v34 = vsub.f32 %v17721_v36, %v17730_v25 }
 0xb96   :  { %v17732_v63 = vmul.f32 1.442695, %v17731_v34 }
 0xb97   :  { %v17724_v24 = vpop.permute.xlu0 %17723 }
 0xb98   :  { %22468 = vpow2.f32 %v17732_v63  ;;  %17726 = vst.msk [vmem:[#allocation14] sm:$0xff] %vm236_vm1, %v17724_v24 }
 0xba2   :  { %v22469_v26 = vpop.eup %22468 }
 0xba3   :  { %17735 = vrot.lane.b32.xlu1 %v22469_v26, %s22717_s5 }
 0xc15   :  { %v17736_v45 = vpop.permute.xlu1 %17735 }
 0xc16   :  { %v17738_v19 = vsel %vm236_vm1, %v17736_v45, 0.0 }
 0xc17   :  { %17739 = vadd.xlane.f32.xlu1 %v17738_v19 }
 0xca4   :  { %v17740_v41 = vpop.xlane.xlu1 %17739 }
 0xca5   :  { %22470 = vrcp.f32 %v17740_v41 }
 0xca6   :  { %22638 = shalt.err (!%p22635_p4)
}
 0xca7   :  { %s22639_s15 = scalar_lea.hbm %s24057_s9, 128 }
 0xca8   :  { %p22640_p5 = scmp.ne.s32.totalorder %s24057_s9, %s22639_s15  ;;  %p22643_p6 = scmp.lt.u32.totalorder %s22639_s15, %s24057_s9 }
 0xcaa   :  { %p22645_p7 = pnand %p22643_p6, %p22640_p5 }
 0xcac   :  { %22648 = shalt.err (!%p22645_p7)
}
 0xcad   :  { %17767 = dma.vmem_to_hbm [thread:$0]  %s17765_s30, 128, %s24057_s9, [#allocation16]  }
 0xcae   :  { %s22649_s17 = scalar_lea.vmem %s17755_s12, 128  ;;  %p22654_p9 = scmp.lt.s32.totalorder %s17755_s12, %s17755_s12 }
 0xcaf   :  { %p22650_p8 = scmp.ne.s32.totalorder %s17755_s12, %s22649_s17  ;;  %p22655_p10 = scmp.lt.s32.totalorder %s22649_s17, %s22649_s17 }
 0xcb1   :  { %p22656_p11 = por %p22655_p10, %p22654_p9 }
 0xcb3   :  { %p22657_p12 = pnand %p22656_p11, %p22650_p8 }
 0xcb5   :  { %22660 = shalt.err (!%p22657_p12)
}
 0xcb6   :  { %s22661_s18 = scalar_lea.hbm %s24056_s8, 128 }
 0xcb7   :  { %p22662_p13 = scmp.ne.s32.totalorder %s24056_s8, %s22661_s18  ;;  %p22665_p0 = scmp.lt.u32.totalorder %s22661_s18, %s24056_s8 }
 0xcb9   :  { %p22667_p1 = pnand %p22665_p0, %p22662_p13 }
 0xcbb   :  { %22670 = shalt.err (!%p22667_p1)
}
 0xcbc   :  { %17757 = dma.vmem_to_hbm [thread:$0]  %s17755_s12, 128, %s24056_s8, [#allocation4]   ;;  %v22471_v2 = vpop.eup %22470 }
 0xcbd   :  { %v17742_v7 = vmul.f32 %v22471_v2, %v22469_v26  ;;  %s22720_s21 = smov [#allocation17]  }
 0xcbe   :  { %s17774_s25 = sshll.u32 %s22720_s21, 4  ;;  %s17775_s25 = int_to_ptr.vmem [resolvable:$true] %s17774_s25 }
 0xcbf   :  { %17744 = vrot.lane.b32.xlu1 %v17742_v7, %s22717_s5  ;;  %s22671_s24 = scalar_lea.vmem %s17775_s25, 128  ;;  %p22676_p3 = scmp.lt.s32.totalorder %s17775_s25, %s17775_s25 }
 0xcc0   :  { %p22672_p2 = scmp.ne.s32.totalorder %s17775_s25, %s22671_s24  ;;  %p22677_p4 = scmp.lt.s32.totalorder %s22671_s24, %s22671_s24 }
 0xcc2   :  { %p22678_p5 = por %p22677_p4, %p22676_p3 }
 0xcc4   :  { %p22679_p6 = pnand %p22678_p5, %p22672_p2 }
 0xd31   :  { %v17745_v51 = vpop.permute.xlu1 %17744 }
 0xd32   :  { %17747 = vst.msk [vmem:[#allocation17] sm:$0xff] %vm236_vm1, %v17745_v51 }
 0xd33   :  { %22682 = shalt.err (!%p22679_p6)
}
 0xd34   :  { %s22683_s8 = scalar_lea.hbm %s24058_s10, 128 }
 0xd35   :  { %p22684_p7 = scmp.ne.s32.totalorder %s24058_s10, %s22683_s8  ;;  %p22687_p8 = scmp.lt.u32.totalorder %s22683_s8, %s24058_s10 }
 0xd37   :  { %p22689_p9 = pnand %p22687_p8, %p22684_p7 }
 0xd39   :  { %22692 = shalt.err (!%p22689_p9)
}
 0xd3a   :  { %17777 = dma.vmem_to_hbm [thread:$0]  %s17775_s25, 128, %s24058_s10, [#allocation16]  }
 0xd3b   :  { %22701 = dma.done.wait [#allocation4], 128  }
 0xd3c   :  { %22702 = vsyncadd [#allocation4], 4294967168 }
 0xd3d   :  { %22703 = dma.done.wait [#allocation16], 256  }
 0xd3e   :  { %22704 = vsyncadd [#allocation16], 4294967040 }
 0xd3f   :  { %17787 = vsyncpa [#allocation3], 1 }
 0xd40   :  { %17788 = vsyncpa [#allocation6], 1 }
 0xd41   :  { %17789 = vsyncpa [#allocation9], 1 }
 0xd42   :  { %17790 = vsyncpa [#allocation12], 1 }
 0xd43   :  { %17791 = vsyncpa [#allocation4], 1 }
 0xd44   :  { %17792 = vsyncpa [#allocation16], 1 }

</bundles_post_ra>
